<compile_context>
chip_gen: v7x
topology: tpu7x:2x2x1
jax: 0.10.0
libtpu: 0.0.40
codegen_flags: <defaults>
</compile_context>

<pallas_src>
from types import SimpleNamespace

import jax
import jax.numpy as jnp
from jax.experimental import pallas as pl
from jax.experimental.pallas import tpu as pltpu


# ----------------------------------------------------------------------------
# Fused forward kernel (one batch TILE per grid step)
#   x_ref   : (BT, T, Cin0)
#   w1_ref  : (K1, Cin0, C1)        FE block 1 FIR taps
#   w2_ref  : (K2, C1, C2)          FE block 2 FIR taps
#   wih_ref : (C2, 4H)  whh_ref: (H, 4H)  b_ref: (1, 4H)   [gate order i,f,g,o]
#   wc1_ref : (H, Hd)   bc1_ref: (1, Hd)
#   wc2_ref : (Hd, O)   bc2_ref: (1, O)
#   o_ref   : (BT, O)
#   zx_sc   : VMEM (T2, BT, 4H) time-major scratch for the hoisted LSTM input proj
# ----------------------------------------------------------------------------
def _instance_norm_time(x, eps=1e-5):
    # InstanceNorm1d over time (per channel, per sample), affine=False, eval mode.
    # x: (BT, T, C); normalize along axis=1.
    mean = jnp.mean(x, axis=1, keepdims=True)
    var = jnp.mean(jnp.square(x - mean), axis=1, keepdims=True)
    return (x - mean) * jax.lax.rsqrt(var + eps)


def m20_fused_kernel(x_ref, w1_ref, w2_ref, wih_ref, whh_ref, b_ref,
                     wc1_ref, bc1_ref, wc2_ref, bc2_ref, o_ref, zx_sc):
    K1, Cin0, C1 = w1_ref.shape
    K2, _, C2 = w2_ref.shape
    BT, T, _ = x_ref.shape
    T1 = T - K1 + 1
    T2 = T1 - K2 + 1
    H = whh_ref.shape[0]

    x = x_ref[...]                                        # (BT, T, Cin0)

    # ---- FE block 1: valid FIR cross-correlation + InstanceNorm ----
    acc1 = jnp.zeros((BT, T1, C1), jnp.float32)
    for k in range(K1):                                   # static unroll over taps
        xk = x[:, k:k + T1, :]                            # (BT, T1, Cin0)
        if Cin0 == 1:
            # rank-1 contraction -> VPU broadcast MAC, keeps MXU off the path
            acc1 = acc1 + xk * w1_ref[k]                  # (BT,T1,1) * (1,C1)
        else:
            acc1 = acc1 + jnp.einsum('btc,cd->btd', xk, w1_ref[k],
                                     preferred_element_type=jnp.float32)
    x1 = _instance_norm_time(acc1)                        # (BT, T1, C1)

    # ---- FE block 2: valid FIR cross-correlation + InstanceNorm ----
    acc2 = jnp.zeros((BT, T2, C2), jnp.float32)
    for k in range(K2):                                   # static unroll, MXU dots
        acc2 = acc2 + jnp.einsum('btc,cd->btd', x1[:, k:k + T2, :], w2_ref[k],
                                 preferred_element_type=jnp.float32)
    x2 = _instance_norm_time(acc2)                        # (BT, T2, C2)

    # ---- Seq2M: single-layer LSTM, last hidden state is the embedding ----
    # Hoisted input projection: one MXU matmul for all (batch, time), then a
    # single transpose to time-major so the per-step fetch is a leading-axis
    # slice of the scratch (no per-step relayout).
    zx = jnp.einsum('btc,cg->btg', x2, wih_ref[...],
                    preferred_element_type=jnp.float32) + b_ref[...]   # (BT,T2,4H)
    zx_sc[...] = jnp.swapaxes(zx, 0, 1)                   # (T2, BT, 4H)

    whh = whh_ref[...]                                    # (H, 4H), kept in vregs

    def step(t, carry):
        h, c = carry                                      # (BT, H), (BT, H)
        z = zx_sc[t] + jnp.dot(h, whh, preferred_element_type=jnp.float32)
        i = jax.nn.sigmoid(z[:, 0:H])
        f = jax.nn.sigmoid(z[:, H:2 * H])
        g = jnp.tanh(z[:, 2 * H:3 * H])
        o = jax.nn.sigmoid(z[:, 3 * H:4 * H])
        c_new = f * c + i * g
        h_new = o * jnp.tanh(c_new)
        return (h_new, c_new)

    h0 = jnp.zeros((BT, H), jnp.float32)
    c0 = jnp.zeros((BT, H), jnp.float32)
    h_last, _ = jax.lax.fori_loop(0, T2, step, (h0, c0))

    # ---- Classifier head: Linear -> ReLU -> (Dropout=identity) -> Linear ----
    hd = jnp.maximum(
        jnp.dot(h_last, wc1_ref[...], preferred_element_type=jnp.float32)
        + bc1_ref[...], 0.0)
    o_ref[...] = (jnp.dot(hd, wc2_ref[...], preferred_element_type=jnp.float32)
                  + bc2_ref[...])                         # (BT, O)


def m20_fused(x_bwc, w1, w2, wih, whh, b, wc1, bc1, wc2, bc2, *, batch_tile=64):
    """x_bwc: (B, T, Cin0) feature-last audio.  Returns (B, n_output) logits."""
    B, T, Cin0 = x_bwc.shape
    K1, _, C1 = w1.shape
    K2, _, C2 = w2.shape
    T1 = T - K1 + 1
    T2 = T1 - K2 + 1
    H = whh.shape[0]
    Hd = wc1.shape[1]
    O = wc2.shape[1]

    # One tile if the batch is small; otherwise 8-aligned tiles + zero padding.
    if B <= batch_tile:
        BT, Bp = B, B
    else:
        BT = batch_tile
        Bp = ((B + BT - 1) // BT) * BT
    if Bp != B:
        x_bwc = jnp.pad(x_bwc, ((0, Bp - B), (0, 0), (0, 0)))
    nb = Bp // BT

    out = pl.pallas_call(
        m20_fused_kernel,
        out_shape=jax.ShapeDtypeStruct((Bp, O), jnp.float32),
        grid=(nb,),
        in_specs=[
            pl.BlockSpec((BT, T, Cin0), lambda bi: (bi, 0, 0)),
            pl.BlockSpec((K1, Cin0, C1), lambda bi: (0, 0, 0)),
            pl.BlockSpec((K2, C1, C2), lambda bi: (0, 0, 0)),
            pl.BlockSpec((C2, 4 * H), lambda bi: (0, 0)),
            pl.BlockSpec((H, 4 * H), lambda bi: (0, 0)),
            pl.BlockSpec((1, 4 * H), lambda bi: (0, 0)),
            pl.BlockSpec((H, Hd), lambda bi: (0, 0)),
            pl.BlockSpec((1, Hd), lambda bi: (0, 0)),
            pl.BlockSpec((Hd, O), lambda bi: (0, 0)),
            pl.BlockSpec((1, O), lambda bi: (0, 0)),
        ],
        out_specs=pl.BlockSpec((BT, O), lambda bi: (bi, 0)),
        scratch_shapes=[pltpu.VMEM((T2, BT, 4 * H), jnp.float32)],
        compiler_params=pltpu.CompilerParams(
            dimension_semantics=("parallel",)),   # batch tiles shard across TCs
    )(x_bwc, w1, w2, wih, whh, b, wc1, bc1, wc2, bc2)
    return out[:B]


# ----------------------------------------------------------------------------
# Parameter construction (deterministic) and full forward pass
# ----------------------------------------------------------------------------
def hann(K):
    k = jnp.arange(K, dtype=jnp.float32)
    return 0.5 - 0.5 * jnp.cos(2.0 * jnp.pi * k / (K - 1))


def make_params(cfg, key):
    keys = jax.random.split(key, 8)
    params = {}

    # FeBlocks: windowed FIR kernels (K, Cin, Cout), kernel = coeffs * Hann(K)
    fe_ws = []
    cin = cfg.n_input
    for i in range(cfg.fe.n_block):
        K = cfg.fe.kernel_size[i]
        cout = cfg.fe.n_channel[i]
        w = 0.1 * jax.random.normal(keys[i], (K, cin, cout), jnp.float32)
        w = w * hann(K)[:, None, None]
        fe_ws.append(w)
        cin = cout
    params["fe_w"] = fe_ws

    # Seq2MBlocks: LSTM weights, gate order (i, f, g, o)
    C = cin
    H = cfg.seq.n_channel
    sc = 1.0 / jnp.sqrt(jnp.float32(H))
    params["wih"] = sc * jax.random.normal(keys[4], (C, 4 * H), jnp.float32)
    params["whh"] = sc * jax.random.normal(keys[5], (H, 4 * H), jnp.float32)
    params["b"] = jnp.zeros((1, 4 * H), jnp.float32)

    # Classifier
    F = H
    Hd = cfg.cls.n_hidden_dim
    O = cfg.n_output
    params["w1"] = (1.0 / jnp.sqrt(jnp.float32(F))) * jax.random.normal(
        keys[6], (F, Hd), jnp.float32)
    params["b1"] = jnp.zeros((1, Hd), jnp.float32)
    params["w2"] = (1.0 / jnp.sqrt(jnp.float32(Hd))) * jax.random.normal(
        keys[7], (Hd, O), jnp.float32)
    params["b2"] = jnp.zeros((1, O), jnp.float32)
    return params


@jax.jit
def m20_forward(x_ncw, fe_w0, fe_w1, wih, whh, b, w1, b1, w2, b2):
    # x_ncw: (B, n_input, T) -- PyTorch Conv1d layout.  For n_input == 1 this
    # transpose is a free relayout of a ~1 KB tensor.
    x = jnp.transpose(x_ncw, (0, 2, 1)).astype(jnp.float32)   # -> (B, T, Cin)
    return m20_fused(x, fe_w0, fe_w1, wih, whh, b, w1, b1, w2, b2)


if __name__ == "__main__":
    cfg = SimpleNamespace(
        n_input=1,
        n_output=4,
        fe=SimpleNamespace(n_block=2, n_channel=(8, 16), kernel_size=(17, 9),
                           stride=(1, 1), window_k=2, filter_type="firwin",
                           learnable_bands=False, learnable_windows=False,
                           shared_window=False, window_func="hann",
                           conv_mode="conv", norm_type="InstanceNorm"),
        seq=SimpleNamespace(n_block=1, n_channel=32, use_context=False,
                            bidirectional=False, out_seq_length=1),
        cls=SimpleNamespace(n_block=1, n_hidden_dim=32, dropout=0.0),
    )

    key = jax.random.PRNGKey(0)
    pkey, xkey = jax.random.split(key)
    params = make_params(cfg, pkey)

    B, T = 2, 128
    x = jax.random.normal(xkey, (B, cfg.n_input, T), jnp.float32)   # NCW input

    out = m20_forward(x, params["fe_w"][0], params["fe_w"][1],
                      params["wih"], params["whh"], params["b"],
                      params["w1"], params["b1"], params["w2"], params["b2"])
    out = jax.block_until_ready(out)
    assert out.shape == (B, cfg.n_output) and bool(jnp.all(jnp.isfinite(out)))
    print("KERNEL_OK")
</pallas_src>

<mosaic_0001>
module attributes {stable_mosaic.version = 11 : i64} {
  func.func @m20_fused_kernel(%arg0: i32, %arg1: memref<2x128x1xf32, #tpu.memory_space<vmem>>, %arg2: memref<17x1x8xf32, #tpu.memory_space<vmem>>, %arg3: memref<9x8x16xf32, #tpu.memory_space<vmem>>, %arg4: memref<16x128xf32, #tpu.memory_space<vmem>>, %arg5: memref<32x128xf32, #tpu.memory_space<vmem>>, %arg6: memref<1x128xf32, #tpu.memory_space<vmem>>, %arg7: memref<32x32xf32, #tpu.memory_space<vmem>>, %arg8: memref<1x32xf32, #tpu.memory_space<vmem>>, %arg9: memref<32x4xf32, #tpu.memory_space<vmem>>, %arg10: memref<1x4xf32, #tpu.memory_space<vmem>>, %arg11: memref<2x4xf32, #tpu.memory_space<vmem>>, %arg12: memref<104x2x128xf32, #tpu.memory_space<vmem>>) attributes {dimension_semantics = [#tpu.dimension_semantics<parallel>], iteration_bounds = array<i64: 1>, scalar_prefetch = 0 : i64, scratch_operands = 1 : i64, tpu.core_type = #tpu.core_type<tc>, window_params = [{transform_indices = @transform_0, window_bounds = array<i64: 2, 128, 1>}, {pipeline_mode = #tpu.pipeline_mode<synchronous>, transform_indices = @transform_1, window_bounds = array<i64: 17, 1, 8>}, {pipeline_mode = #tpu.pipeline_mode<synchronous>, transform_indices = @transform_2, window_bounds = array<i64: 9, 8, 16>}, {pipeline_mode = #tpu.pipeline_mode<synchronous>, transform_indices = @transform_3, window_bounds = array<i64: 16, 128>}, {pipeline_mode = #tpu.pipeline_mode<synchronous>, transform_indices = @transform_4, window_bounds = array<i64: 32, 128>}, {pipeline_mode = #tpu.pipeline_mode<synchronous>, transform_indices = @transform_5, window_bounds = array<i64: 1, 128>}, {pipeline_mode = #tpu.pipeline_mode<synchronous>, transform_indices = @transform_6, window_bounds = array<i64: 32, 32>}, {pipeline_mode = #tpu.pipeline_mode<synchronous>, transform_indices = @transform_7, window_bounds = array<i64: 1, 32>}, {pipeline_mode = #tpu.pipeline_mode<synchronous>, transform_indices = @transform_8, window_bounds = array<i64: 32, 4>}, {pipeline_mode = #tpu.pipeline_mode<synchronous>, transform_indices = @transform_9, window_bounds = array<i64: 1, 4>}, {transform_indices = @transform_10, window_bounds = array<i64: 2, 4>}]} {
    %c0 = arith.constant 0 : index
    %c0_0 = arith.constant 0 : index
    %c0_1 = arith.constant 0 : index
    %0 = vector.load %arg1[%c0, %c0_0, %c0_1] : memref<2x128x1xf32, #tpu.memory_space<vmem>>, vector<2x128x1xf32>
    %cst = arith.constant 0.000000e+00 : f32
    %1 = vector.broadcast %cst : f32 to vector<2x112x8xf32>
    %2 = vector.extract_strided_slice %0 {offsets = [0, 0, 0], sizes = [2, 112, 1], strides = [1, 1, 1]} : vector<2x128x1xf32> to vector<2x112x1xf32>
    %c0_2 = arith.constant 0 : index
    %c0_3 = arith.constant 0 : index
    %c0_4 = arith.constant 0 : index
    %3 = vector.load %arg2[%c0_2, %c0_3, %c0_4] : memref<17x1x8xf32, #tpu.memory_space<vmem>>, vector<1x1x8xf32>
    %4 = vector.shape_cast %3 : vector<1x1x8xf32> to vector<1x8xf32>
    %5 = vector.shape_cast %4 : vector<1x8xf32> to vector<1x1x8xf32>
    %6 = vector.broadcast %2 : vector<2x112x1xf32> to vector<2x112x8xf32>
    %7 = vector.broadcast %5 : vector<1x1x8xf32> to vector<2x112x8xf32>
    %8 = arith.mulf %6, %7 : vector<2x112x8xf32>
    %9 = arith.addf %1, %8 : vector<2x112x8xf32>
    %10 = vector.extract_strided_slice %0 {offsets = [0, 1, 0], sizes = [2, 112, 1], strides = [1, 1, 1]} : vector<2x128x1xf32> to vector<2x112x1xf32>
    %c1 = arith.constant 1 : index
    %c0_5 = arith.constant 0 : index
    %c0_6 = arith.constant 0 : index
    %11 = vector.load %arg2[%c1, %c0_5, %c0_6] : memref<17x1x8xf32, #tpu.memory_space<vmem>>, vector<1x1x8xf32>
    %12 = vector.shape_cast %11 : vector<1x1x8xf32> to vector<1x8xf32>
    %13 = vector.shape_cast %12 : vector<1x8xf32> to vector<1x1x8xf32>
    %14 = vector.broadcast %10 : vector<2x112x1xf32> to vector<2x112x8xf32>
    %15 = vector.broadcast %13 : vector<1x1x8xf32> to vector<2x112x8xf32>
    %16 = arith.mulf %14, %15 : vector<2x112x8xf32>
    %17 = arith.addf %9, %16 : vector<2x112x8xf32>
    %18 = vector.extract_strided_slice %0 {offsets = [0, 2, 0], sizes = [2, 112, 1], strides = [1, 1, 1]} : vector<2x128x1xf32> to vector<2x112x1xf32>
    %c2 = arith.constant 2 : index
    %c0_7 = arith.constant 0 : index
    %c0_8 = arith.constant 0 : index
    %19 = vector.load %arg2[%c2, %c0_7, %c0_8] : memref<17x1x8xf32, #tpu.memory_space<vmem>>, vector<1x1x8xf32>
    %20 = vector.shape_cast %19 : vector<1x1x8xf32> to vector<1x8xf32>
    %21 = vector.shape_cast %20 : vector<1x8xf32> to vector<1x1x8xf32>
    %22 = vector.broadcast %18 : vector<2x112x1xf32> to vector<2x112x8xf32>
    %23 = vector.broadcast %21 : vector<1x1x8xf32> to vector<2x112x8xf32>
    %24 = arith.mulf %22, %23 : vector<2x112x8xf32>
    %25 = arith.addf %17, %24 : vector<2x112x8xf32>
    %26 = vector.extract_strided_slice %0 {offsets = [0, 3, 0], sizes = [2, 112, 1], strides = [1, 1, 1]} : vector<2x128x1xf32> to vector<2x112x1xf32>
    %c3 = arith.constant 3 : index
    %c0_9 = arith.constant 0 : index
    %c0_10 = arith.constant 0 : index
    %27 = vector.load %arg2[%c3, %c0_9, %c0_10] : memref<17x1x8xf32, #tpu.memory_space<vmem>>, vector<1x1x8xf32>
    %28 = vector.shape_cast %27 : vector<1x1x8xf32> to vector<1x8xf32>
    %29 = vector.shape_cast %28 : vector<1x8xf32> to vector<1x1x8xf32>
    %30 = vector.broadcast %26 : vector<2x112x1xf32> to vector<2x112x8xf32>
    %31 = vector.broadcast %29 : vector<1x1x8xf32> to vector<2x112x8xf32>
    %32 = arith.mulf %30, %31 : vector<2x112x8xf32>
    %33 = arith.addf %25, %32 : vector<2x112x8xf32>
    %34 = vector.extract_strided_slice %0 {offsets = [0, 4, 0], sizes = [2, 112, 1], strides = [1, 1, 1]} : vector<2x128x1xf32> to vector<2x112x1xf32>
    %c4 = arith.constant 4 : index
    %c0_11 = arith.constant 0 : index
    %c0_12 = arith.constant 0 : index
    %35 = vector.load %arg2[%c4, %c0_11, %c0_12] : memref<17x1x8xf32, #tpu.memory_space<vmem>>, vector<1x1x8xf32>
    %36 = vector.shape_cast %35 : vector<1x1x8xf32> to vector<1x8xf32>
    %37 = vector.shape_cast %36 : vector<1x8xf32> to vector<1x1x8xf32>
    %38 = vector.broadcast %34 : vector<2x112x1xf32> to vector<2x112x8xf32>
    %39 = vector.broadcast %37 : vector<1x1x8xf32> to vector<2x112x8xf32>
    %40 = arith.mulf %38, %39 : vector<2x112x8xf32>
    %41 = arith.addf %33, %40 : vector<2x112x8xf32>
    %42 = vector.extract_strided_slice %0 {offsets = [0, 5, 0], sizes = [2, 112, 1], strides = [1, 1, 1]} : vector<2x128x1xf32> to vector<2x112x1xf32>
    %c5 = arith.constant 5 : index
    %c0_13 = arith.constant 0 : index
    %c0_14 = arith.constant 0 : index
    %43 = vector.load %arg2[%c5, %c0_13, %c0_14] : memref<17x1x8xf32, #tpu.memory_space<vmem>>, vector<1x1x8xf32>
    %44 = vector.shape_cast %43 : vector<1x1x8xf32> to vector<1x8xf32>
    %45 = vector.shape_cast %44 : vector<1x8xf32> to vector<1x1x8xf32>
    %46 = vector.broadcast %42 : vector<2x112x1xf32> to vector<2x112x8xf32>
    %47 = vector.broadcast %45 : vector<1x1x8xf32> to vector<2x112x8xf32>
    %48 = arith.mulf %46, %47 : vector<2x112x8xf32>
    %49 = arith.addf %41, %48 : vector<2x112x8xf32>
    %50 = vector.extract_strided_slice %0 {offsets = [0, 6, 0], sizes = [2, 112, 1], strides = [1, 1, 1]} : vector<2x128x1xf32> to vector<2x112x1xf32>
    %c6 = arith.constant 6 : index
    %c0_15 = arith.constant 0 : index
    %c0_16 = arith.constant 0 : index
    %51 = vector.load %arg2[%c6, %c0_15, %c0_16] : memref<17x1x8xf32, #tpu.memory_space<vmem>>, vector<1x1x8xf32>
    %52 = vector.shape_cast %51 : vector<1x1x8xf32> to vector<1x8xf32>
    %53 = vector.shape_cast %52 : vector<1x8xf32> to vector<1x1x8xf32>
    %54 = vector.broadcast %50 : vector<2x112x1xf32> to vector<2x112x8xf32>
    %55 = vector.broadcast %53 : vector<1x1x8xf32> to vector<2x112x8xf32>
    %56 = arith.mulf %54, %55 : vector<2x112x8xf32>
    %57 = arith.addf %49, %56 : vector<2x112x8xf32>
    %58 = vector.extract_strided_slice %0 {offsets = [0, 7, 0], sizes = [2, 112, 1], strides = [1, 1, 1]} : vector<2x128x1xf32> to vector<2x112x1xf32>
    %c7 = arith.constant 7 : index
    %c0_17 = arith.constant 0 : index
    %c0_18 = arith.constant 0 : index
    %59 = vector.load %arg2[%c7, %c0_17, %c0_18] : memref<17x1x8xf32, #tpu.memory_space<vmem>>, vector<1x1x8xf32>
    %60 = vector.shape_cast %59 : vector<1x1x8xf32> to vector<1x8xf32>
    %61 = vector.shape_cast %60 : vector<1x8xf32> to vector<1x1x8xf32>
    %62 = vector.broadcast %58 : vector<2x112x1xf32> to vector<2x112x8xf32>
    %63 = vector.broadcast %61 : vector<1x1x8xf32> to vector<2x112x8xf32>
    %64 = arith.mulf %62, %63 : vector<2x112x8xf32>
    %65 = arith.addf %57, %64 : vector<2x112x8xf32>
    %66 = vector.extract_strided_slice %0 {offsets = [0, 8, 0], sizes = [2, 112, 1], strides = [1, 1, 1]} : vector<2x128x1xf32> to vector<2x112x1xf32>
    %c8 = arith.constant 8 : index
    %c0_19 = arith.constant 0 : index
    %c0_20 = arith.constant 0 : index
    %67 = vector.load %arg2[%c8, %c0_19, %c0_20] : memref<17x1x8xf32, #tpu.memory_space<vmem>>, vector<1x1x8xf32>
    %68 = vector.shape_cast %67 : vector<1x1x8xf32> to vector<1x8xf32>
    %69 = vector.shape_cast %68 : vector<1x8xf32> to vector<1x1x8xf32>
    %70 = vector.broadcast %66 : vector<2x112x1xf32> to vector<2x112x8xf32>
    %71 = vector.broadcast %69 : vector<1x1x8xf32> to vector<2x112x8xf32>
    %72 = arith.mulf %70, %71 : vector<2x112x8xf32>
    %73 = arith.addf %65, %72 : vector<2x112x8xf32>
    %74 = vector.extract_strided_slice %0 {offsets = [0, 9, 0], sizes = [2, 112, 1], strides = [1, 1, 1]} : vector<2x128x1xf32> to vector<2x112x1xf32>
    %c9 = arith.constant 9 : index
    %c0_21 = arith.constant 0 : index
    %c0_22 = arith.constant 0 : index
    %75 = vector.load %arg2[%c9, %c0_21, %c0_22] : memref<17x1x8xf32, #tpu.memory_space<vmem>>, vector<1x1x8xf32>
    %76 = vector.shape_cast %75 : vector<1x1x8xf32> to vector<1x8xf32>
    %77 = vector.shape_cast %76 : vector<1x8xf32> to vector<1x1x8xf32>
    %78 = vector.broadcast %74 : vector<2x112x1xf32> to vector<2x112x8xf32>
    %79 = vector.broadcast %77 : vector<1x1x8xf32> to vector<2x112x8xf32>
    %80 = arith.mulf %78, %79 : vector<2x112x8xf32>
    %81 = arith.addf %73, %80 : vector<2x112x8xf32>
    %82 = vector.extract_strided_slice %0 {offsets = [0, 10, 0], sizes = [2, 112, 1], strides = [1, 1, 1]} : vector<2x128x1xf32> to vector<2x112x1xf32>
    %c10 = arith.constant 10 : index
    %c0_23 = arith.constant 0 : index
    %c0_24 = arith.constant 0 : index
    %83 = vector.load %arg2[%c10, %c0_23, %c0_24] : memref<17x1x8xf32, #tpu.memory_space<vmem>>, vector<1x1x8xf32>
    %84 = vector.shape_cast %83 : vector<1x1x8xf32> to vector<1x8xf32>
    %85 = vector.shape_cast %84 : vector<1x8xf32> to vector<1x1x8xf32>
    %86 = vector.broadcast %82 : vector<2x112x1xf32> to vector<2x112x8xf32>
    %87 = vector.broadcast %85 : vector<1x1x8xf32> to vector<2x112x8xf32>
    %88 = arith.mulf %86, %87 : vector<2x112x8xf32>
    %89 = arith.addf %81, %88 : vector<2x112x8xf32>
    %90 = vector.extract_strided_slice %0 {offsets = [0, 11, 0], sizes = [2, 112, 1], strides = [1, 1, 1]} : vector<2x128x1xf32> to vector<2x112x1xf32>
    %c11 = arith.constant 11 : index
    %c0_25 = arith.constant 0 : index
    %c0_26 = arith.constant 0 : index
    %91 = vector.load %arg2[%c11, %c0_25, %c0_26] : memref<17x1x8xf32, #tpu.memory_space<vmem>>, vector<1x1x8xf32>
    %92 = vector.shape_cast %91 : vector<1x1x8xf32> to vector<1x8xf32>
    %93 = vector.shape_cast %92 : vector<1x8xf32> to vector<1x1x8xf32>
    %94 = vector.broadcast %90 : vector<2x112x1xf32> to vector<2x112x8xf32>
    %95 = vector.broadcast %93 : vector<1x1x8xf32> to vector<2x112x8xf32>
    %96 = arith.mulf %94, %95 : vector<2x112x8xf32>
    %97 = arith.addf %89, %96 : vector<2x112x8xf32>
    %98 = vector.extract_strided_slice %0 {offsets = [0, 12, 0], sizes = [2, 112, 1], strides = [1, 1, 1]} : vector<2x128x1xf32> to vector<2x112x1xf32>
    %c12 = arith.constant 12 : index
    %c0_27 = arith.constant 0 : index
    %c0_28 = arith.constant 0 : index
    %99 = vector.load %arg2[%c12, %c0_27, %c0_28] : memref<17x1x8xf32, #tpu.memory_space<vmem>>, vector<1x1x8xf32>
    %100 = vector.shape_cast %99 : vector<1x1x8xf32> to vector<1x8xf32>
    %101 = vector.shape_cast %100 : vector<1x8xf32> to vector<1x1x8xf32>
    %102 = vector.broadcast %98 : vector<2x112x1xf32> to vector<2x112x8xf32>
    %103 = vector.broadcast %101 : vector<1x1x8xf32> to vector<2x112x8xf32>
    %104 = arith.mulf %102, %103 : vector<2x112x8xf32>
    %105 = arith.addf %97, %104 : vector<2x112x8xf32>
    %106 = vector.extract_strided_slice %0 {offsets = [0, 13, 0], sizes = [2, 112, 1], strides = [1, 1, 1]} : vector<2x128x1xf32> to vector<2x112x1xf32>
    %c13 = arith.constant 13 : index
    %c0_29 = arith.constant 0 : index
    %c0_30 = arith.constant 0 : index
    %107 = vector.load %arg2[%c13, %c0_29, %c0_30] : memref<17x1x8xf32, #tpu.memory_space<vmem>>, vector<1x1x8xf32>
    %108 = vector.shape_cast %107 : vector<1x1x8xf32> to vector<1x8xf32>
    %109 = vector.shape_cast %108 : vector<1x8xf32> to vector<1x1x8xf32>
    %110 = vector.broadcast %106 : vector<2x112x1xf32> to vector<2x112x8xf32>
    %111 = vector.broadcast %109 : vector<1x1x8xf32> to vector<2x112x8xf32>
    %112 = arith.mulf %110, %111 : vector<2x112x8xf32>
    %113 = arith.addf %105, %112 : vector<2x112x8xf32>
    %114 = vector.extract_strided_slice %0 {offsets = [0, 14, 0], sizes = [2, 112, 1], strides = [1, 1, 1]} : vector<2x128x1xf32> to vector<2x112x1xf32>
    %c14 = arith.constant 14 : index
    %c0_31 = arith.constant 0 : index
    %c0_32 = arith.constant 0 : index
    %115 = vector.load %arg2[%c14, %c0_31, %c0_32] : memref<17x1x8xf32, #tpu.memory_space<vmem>>, vector<1x1x8xf32>
    %116 = vector.shape_cast %115 : vector<1x1x8xf32> to vector<1x8xf32>
    %117 = vector.shape_cast %116 : vector<1x8xf32> to vector<1x1x8xf32>
    %118 = vector.broadcast %114 : vector<2x112x1xf32> to vector<2x112x8xf32>
    %119 = vector.broadcast %117 : vector<1x1x8xf32> to vector<2x112x8xf32>
    %120 = arith.mulf %118, %119 : vector<2x112x8xf32>
    %121 = arith.addf %113, %120 : vector<2x112x8xf32>
    %122 = vector.extract_strided_slice %0 {offsets = [0, 15, 0], sizes = [2, 112, 1], strides = [1, 1, 1]} : vector<2x128x1xf32> to vector<2x112x1xf32>
    %c15 = arith.constant 15 : index
    %c0_33 = arith.constant 0 : index
    %c0_34 = arith.constant 0 : index
    %123 = vector.load %arg2[%c15, %c0_33, %c0_34] : memref<17x1x8xf32, #tpu.memory_space<vmem>>, vector<1x1x8xf32>
    %124 = vector.shape_cast %123 : vector<1x1x8xf32> to vector<1x8xf32>
    %125 = vector.shape_cast %124 : vector<1x8xf32> to vector<1x1x8xf32>
    %126 = vector.broadcast %122 : vector<2x112x1xf32> to vector<2x112x8xf32>
    %127 = vector.broadcast %125 : vector<1x1x8xf32> to vector<2x112x8xf32>
    %128 = arith.mulf %126, %127 : vector<2x112x8xf32>
    %129 = arith.addf %121, %128 : vector<2x112x8xf32>
    %130 = vector.extract_strided_slice %0 {offsets = [0, 16, 0], sizes = [2, 112, 1], strides = [1, 1, 1]} : vector<2x128x1xf32> to vector<2x112x1xf32>
    %c16 = arith.constant 16 : index
    %c0_35 = arith.constant 0 : index
    %c0_36 = arith.constant 0 : index
    %131 = vector.load %arg2[%c16, %c0_35, %c0_36] : memref<17x1x8xf32, #tpu.memory_space<vmem>>, vector<1x1x8xf32>
    %132 = vector.shape_cast %131 : vector<1x1x8xf32> to vector<1x8xf32>
    %133 = vector.shape_cast %132 : vector<1x8xf32> to vector<1x1x8xf32>
    %134 = vector.broadcast %130 : vector<2x112x1xf32> to vector<2x112x8xf32>
    %135 = vector.broadcast %133 : vector<1x1x8xf32> to vector<2x112x8xf32>
    %136 = arith.mulf %134, %135 : vector<2x112x8xf32>
    %137 = arith.addf %129, %136 : vector<2x112x8xf32>
    %cst_37 = arith.constant dense<0.000000e+00> : vector<2x8xf32>
    %138 = vector.multi_reduction <add>, %137, %cst_37 [1] : vector<2x112x8xf32> to vector<2x8xf32>
    %139 = vector.shape_cast %138 : vector<2x8xf32> to vector<2x1x8xf32>
    %cst_38 = arith.constant 1.120000e+02 : f32
    %140 = vector.broadcast %cst_38 : f32 to vector<2x1x8xf32>
    %141 = arith.divf %139, %140 : vector<2x1x8xf32>
    %142 = vector.broadcast %141 : vector<2x1x8xf32> to vector<2x112x8xf32>
    %143 = arith.subf %137, %142 : vector<2x112x8xf32>
    %144 = arith.mulf %143, %143 : vector<2x112x8xf32>
    %cst_39 = arith.constant dense<0.000000e+00> : vector<2x8xf32>
    %145 = vector.multi_reduction <add>, %144, %cst_39 [1] : vector<2x112x8xf32> to vector<2x8xf32>
    %146 = vector.shape_cast %145 : vector<2x8xf32> to vector<2x1x8xf32>
    %cst_40 = arith.constant 1.120000e+02 : f32
    %147 = vector.broadcast %cst_40 : f32 to vector<2x1x8xf32>
    %148 = arith.divf %146, %147 : vector<2x1x8xf32>
    %149 = vector.broadcast %141 : vector<2x1x8xf32> to vector<2x112x8xf32>
    %150 = arith.subf %137, %149 : vector<2x112x8xf32>
    %cst_41 = arith.constant 9.99999974E-6 : f32
    %151 = vector.broadcast %cst_41 : f32 to vector<2x1x8xf32>
    %152 = arith.addf %148, %151 : vector<2x1x8xf32>
    %153 = math.rsqrt %152 : vector<2x1x8xf32>
    %154 = vector.broadcast %153 : vector<2x1x8xf32> to vector<2x112x8xf32>
    %155 = arith.mulf %150, %154 : vector<2x112x8xf32>
    %cst_42 = arith.constant 0.000000e+00 : f32
    %156 = vector.broadcast %cst_42 : f32 to vector<2x104x16xf32>
    %157 = vector.extract_strided_slice %155 {offsets = [0, 0, 0], sizes = [2, 104, 8], strides = [1, 1, 1]} : vector<2x112x8xf32> to vector<2x104x8xf32>
    %c0_43 = arith.constant 0 : index
    %c0_44 = arith.constant 0 : index
    %c0_45 = arith.constant 0 : index
    %158 = vector.load %arg3[%c0_43, %c0_44, %c0_45] : memref<9x8x16xf32, #tpu.memory_space<vmem>>, vector<1x8x16xf32>
    %159 = vector.shape_cast %158 : vector<1x8x16xf32> to vector<8x16xf32>
    "tpu.trace_start"() <{level = 10 : i32, message = "btc,cd->btd"}> : () -> ()
    %cst_46 = arith.constant dense<0.000000e+00> : vector<2x104x16xf32>
    %160 = tpu.matmul %157, %159, %cst_46 {dimension_numbers = #tpu.dot_dimension_numbers<[2], [0], [0, 1], [1], [0, 0, 0, 1, 1, 1], [], []>} : vector<2x104x8xf32>, vector<8x16xf32>, vector<2x104x16xf32> -> vector<2x104x16xf32>
    "tpu.trace_stop"() : () -> ()
    %161 = arith.addf %156, %160 : vector<2x104x16xf32>
    %162 = vector.extract_strided_slice %155 {offsets = [0, 1, 0], sizes = [2, 104, 8], strides = [1, 1, 1]} : vector<2x112x8xf32> to vector<2x104x8xf32>
    %c1_47 = arith.constant 1 : index
    %c0_48 = arith.constant 0 : index
    %c0_49 = arith.constant 0 : index
    %163 = vector.load %arg3[%c1_47, %c0_48, %c0_49] : memref<9x8x16xf32, #tpu.memory_space<vmem>>, vector<1x8x16xf32>
    %164 = vector.shape_cast %163 : vector<1x8x16xf32> to vector<8x16xf32>
    "tpu.trace_start"() <{level = 10 : i32, message = "btc,cd->btd"}> : () -> ()
    %cst_50 = arith.constant dense<0.000000e+00> : vector<2x104x16xf32>
    %165 = tpu.matmul %162, %164, %cst_50 {dimension_numbers = #tpu.dot_dimension_numbers<[2], [0], [0, 1], [1], [0, 0, 0, 1, 1, 1], [], []>} : vector<2x104x8xf32>, vector<8x16xf32>, vector<2x104x16xf32> -> vector<2x104x16xf32>
    "tpu.trace_stop"() : () -> ()
    %166 = arith.addf %161, %165 : vector<2x104x16xf32>
    %167 = vector.extract_strided_slice %155 {offsets = [0, 2, 0], sizes = [2, 104, 8], strides = [1, 1, 1]} : vector<2x112x8xf32> to vector<2x104x8xf32>
    %c2_51 = arith.constant 2 : index
    %c0_52 = arith.constant 0 : index
    %c0_53 = arith.constant 0 : index
    %168 = vector.load %arg3[%c2_51, %c0_52, %c0_53] : memref<9x8x16xf32, #tpu.memory_space<vmem>>, vector<1x8x16xf32>
    %169 = vector.shape_cast %168 : vector<1x8x16xf32> to vector<8x16xf32>
    "tpu.trace_start"() <{level = 10 : i32, message = "btc,cd->btd"}> : () -> ()
    %cst_54 = arith.constant dense<0.000000e+00> : vector<2x104x16xf32>
    %170 = tpu.matmul %167, %169, %cst_54 {dimension_numbers = #tpu.dot_dimension_numbers<[2], [0], [0, 1], [1], [0, 0, 0, 1, 1, 1], [], []>} : vector<2x104x8xf32>, vector<8x16xf32>, vector<2x104x16xf32> -> vector<2x104x16xf32>
    "tpu.trace_stop"() : () -> ()
    %171 = arith.addf %166, %170 : vector<2x104x16xf32>
    %172 = vector.extract_strided_slice %155 {offsets = [0, 3, 0], sizes = [2, 104, 8], strides = [1, 1, 1]} : vector<2x112x8xf32> to vector<2x104x8xf32>
    %c3_55 = arith.constant 3 : index
    %c0_56 = arith.constant 0 : index
    %c0_57 = arith.constant 0 : index
    %173 = vector.load %arg3[%c3_55, %c0_56, %c0_57] : memref<9x8x16xf32, #tpu.memory_space<vmem>>, vector<1x8x16xf32>
    %174 = vector.shape_cast %173 : vector<1x8x16xf32> to vector<8x16xf32>
    "tpu.trace_start"() <{level = 10 : i32, message = "btc,cd->btd"}> : () -> ()
    %cst_58 = arith.constant dense<0.000000e+00> : vector<2x104x16xf32>
    %175 = tpu.matmul %172, %174, %cst_58 {dimension_numbers = #tpu.dot_dimension_numbers<[2], [0], [0, 1], [1], [0, 0, 0, 1, 1, 1], [], []>} : vector<2x104x8xf32>, vector<8x16xf32>, vector<2x104x16xf32> -> vector<2x104x16xf32>
    "tpu.trace_stop"() : () -> ()
    %176 = arith.addf %171, %175 : vector<2x104x16xf32>
    %177 = vector.extract_strided_slice %155 {offsets = [0, 4, 0], sizes = [2, 104, 8], strides = [1, 1, 1]} : vector<2x112x8xf32> to vector<2x104x8xf32>
    %c4_59 = arith.constant 4 : index
    %c0_60 = arith.constant 0 : index
    %c0_61 = arith.constant 0 : index
    %178 = vector.load %arg3[%c4_59, %c0_60, %c0_61] : memref<9x8x16xf32, #tpu.memory_space<vmem>>, vector<1x8x16xf32>
    %179 = vector.shape_cast %178 : vector<1x8x16xf32> to vector<8x16xf32>
    "tpu.trace_start"() <{level = 10 : i32, message = "btc,cd->btd"}> : () -> ()
    %cst_62 = arith.constant dense<0.000000e+00> : vector<2x104x16xf32>
    %180 = tpu.matmul %177, %179, %cst_62 {dimension_numbers = #tpu.dot_dimension_numbers<[2], [0], [0, 1], [1], [0, 0, 0, 1, 1, 1], [], []>} : vector<2x104x8xf32>, vector<8x16xf32>, vector<2x104x16xf32> -> vector<2x104x16xf32>
    "tpu.trace_stop"() : () -> ()
    %181 = arith.addf %176, %180 : vector<2x104x16xf32>
    %182 = vector.extract_strided_slice %155 {offsets = [0, 5, 0], sizes = [2, 104, 8], strides = [1, 1, 1]} : vector<2x112x8xf32> to vector<2x104x8xf32>
    %c5_63 = arith.constant 5 : index
    %c0_64 = arith.constant 0 : index
    %c0_65 = arith.constant 0 : index
    %183 = vector.load %arg3[%c5_63, %c0_64, %c0_65] : memref<9x8x16xf32, #tpu.memory_space<vmem>>, vector<1x8x16xf32>
    %184 = vector.shape_cast %183 : vector<1x8x16xf32> to vector<8x16xf32>
    "tpu.trace_start"() <{level = 10 : i32, message = "btc,cd->btd"}> : () -> ()
    %cst_66 = arith.constant dense<0.000000e+00> : vector<2x104x16xf32>
    %185 = tpu.matmul %182, %184, %cst_66 {dimension_numbers = #tpu.dot_dimension_numbers<[2], [0], [0, 1], [1], [0, 0, 0, 1, 1, 1], [], []>} : vector<2x104x8xf32>, vector<8x16xf32>, vector<2x104x16xf32> -> vector<2x104x16xf32>
    "tpu.trace_stop"() : () -> ()
    %186 = arith.addf %181, %185 : vector<2x104x16xf32>
    %187 = vector.extract_strided_slice %155 {offsets = [0, 6, 0], sizes = [2, 104, 8], strides = [1, 1, 1]} : vector<2x112x8xf32> to vector<2x104x8xf32>
    %c6_67 = arith.constant 6 : index
    %c0_68 = arith.constant 0 : index
    %c0_69 = arith.constant 0 : index
    %188 = vector.load %arg3[%c6_67, %c0_68, %c0_69] : memref<9x8x16xf32, #tpu.memory_space<vmem>>, vector<1x8x16xf32>
    %189 = vector.shape_cast %188 : vector<1x8x16xf32> to vector<8x16xf32>
    "tpu.trace_start"() <{level = 10 : i32, message = "btc,cd->btd"}> : () -> ()
    %cst_70 = arith.constant dense<0.000000e+00> : vector<2x104x16xf32>
    %190 = tpu.matmul %187, %189, %cst_70 {dimension_numbers = #tpu.dot_dimension_numbers<[2], [0], [0, 1], [1], [0, 0, 0, 1, 1, 1], [], []>} : vector<2x104x8xf32>, vector<8x16xf32>, vector<2x104x16xf32> -> vector<2x104x16xf32>
    "tpu.trace_stop"() : () -> ()
    %191 = arith.addf %186, %190 : vector<2x104x16xf32>
    %192 = vector.extract_strided_slice %155 {offsets = [0, 7, 0], sizes = [2, 104, 8], strides = [1, 1, 1]} : vector<2x112x8xf32> to vector<2x104x8xf32>
    %c7_71 = arith.constant 7 : index
    %c0_72 = arith.constant 0 : index
    %c0_73 = arith.constant 0 : index
    %193 = vector.load %arg3[%c7_71, %c0_72, %c0_73] : memref<9x8x16xf32, #tpu.memory_space<vmem>>, vector<1x8x16xf32>
    %194 = vector.shape_cast %193 : vector<1x8x16xf32> to vector<8x16xf32>
    "tpu.trace_start"() <{level = 10 : i32, message = "btc,cd->btd"}> : () -> ()
    %cst_74 = arith.constant dense<0.000000e+00> : vector<2x104x16xf32>
    %195 = tpu.matmul %192, %194, %cst_74 {dimension_numbers = #tpu.dot_dimension_numbers<[2], [0], [0, 1], [1], [0, 0, 0, 1, 1, 1], [], []>} : vector<2x104x8xf32>, vector<8x16xf32>, vector<2x104x16xf32> -> vector<2x104x16xf32>
    "tpu.trace_stop"() : () -> ()
    %196 = arith.addf %191, %195 : vector<2x104x16xf32>
    %197 = vector.extract_strided_slice %155 {offsets = [0, 8, 0], sizes = [2, 104, 8], strides = [1, 1, 1]} : vector<2x112x8xf32> to vector<2x104x8xf32>
    %c8_75 = arith.constant 8 : index
    %c0_76 = arith.constant 0 : index
    %c0_77 = arith.constant 0 : index
    %198 = vector.load %arg3[%c8_75, %c0_76, %c0_77] : memref<9x8x16xf32, #tpu.memory_space<vmem>>, vector<1x8x16xf32>
    %199 = vector.shape_cast %198 : vector<1x8x16xf32> to vector<8x16xf32>
    "tpu.trace_start"() <{level = 10 : i32, message = "btc,cd->btd"}> : () -> ()
    %cst_78 = arith.constant dense<0.000000e+00> : vector<2x104x16xf32>
    %200 = tpu.matmul %197, %199, %cst_78 {dimension_numbers = #tpu.dot_dimension_numbers<[2], [0], [0, 1], [1], [0, 0, 0, 1, 1, 1], [], []>} : vector<2x104x8xf32>, vector<8x16xf32>, vector<2x104x16xf32> -> vector<2x104x16xf32>
    "tpu.trace_stop"() : () -> ()
    %201 = arith.addf %196, %200 : vector<2x104x16xf32>
    %cst_79 = arith.constant dense<0.000000e+00> : vector<2x16xf32>
    %202 = vector.multi_reduction <add>, %201, %cst_79 [1] : vector<2x104x16xf32> to vector<2x16xf32>
    %203 = vector.shape_cast %202 : vector<2x16xf32> to vector<2x1x16xf32>
    %cst_80 = arith.constant 1.040000e+02 : f32
    %204 = vector.broadcast %cst_80 : f32 to vector<2x1x16xf32>
    %205 = arith.divf %203, %204 : vector<2x1x16xf32>
    %206 = vector.broadcast %205 : vector<2x1x16xf32> to vector<2x104x16xf32>
    %207 = arith.subf %201, %206 : vector<2x104x16xf32>
    %208 = arith.mulf %207, %207 : vector<2x104x16xf32>
    %cst_81 = arith.constant dense<0.000000e+00> : vector<2x16xf32>
    %209 = vector.multi_reduction <add>, %208, %cst_81 [1] : vector<2x104x16xf32> to vector<2x16xf32>
    %210 = vector.shape_cast %209 : vector<2x16xf32> to vector<2x1x16xf32>
    %cst_82 = arith.constant 1.040000e+02 : f32
    %211 = vector.broadcast %cst_82 : f32 to vector<2x1x16xf32>
    %212 = arith.divf %210, %211 : vector<2x1x16xf32>
    %213 = vector.broadcast %205 : vector<2x1x16xf32> to vector<2x104x16xf32>
    %214 = arith.subf %201, %213 : vector<2x104x16xf32>
    %cst_83 = arith.constant 9.99999974E-6 : f32
    %215 = vector.broadcast %cst_83 : f32 to vector<2x1x16xf32>
    %216 = arith.addf %212, %215 : vector<2x1x16xf32>
    %217 = math.rsqrt %216 : vector<2x1x16xf32>
    %218 = vector.broadcast %217 : vector<2x1x16xf32> to vector<2x104x16xf32>
    %219 = arith.mulf %214, %218 : vector<2x104x16xf32>
    %c0_84 = arith.constant 0 : index
    %c0_85 = arith.constant 0 : index
    %220 = vector.load %arg4[%c0_84, %c0_85] : memref<16x128xf32, #tpu.memory_space<vmem>>, vector<16x128xf32>
    "tpu.trace_start"() <{level = 10 : i32, message = "btc,cg->btg"}> : () -> ()
    %cst_86 = arith.constant dense<0.000000e+00> : vector<2x104x128xf32>
    %221 = tpu.matmul %219, %220, %cst_86 {dimension_numbers = #tpu.dot_dimension_numbers<[2], [0], [0, 1], [1], [0, 0, 0, 1, 1, 1], [], []>} : vector<2x104x16xf32>, vector<16x128xf32>, vector<2x104x128xf32> -> vector<2x104x128xf32>
    "tpu.trace_stop"() : () -> ()
    %c0_87 = arith.constant 0 : index
    %c0_88 = arith.constant 0 : index
    %222 = vector.load %arg6[%c0_87, %c0_88] : memref<1x128xf32, #tpu.memory_space<vmem>>, vector<1x128xf32>
    %223 = vector.shape_cast %222 : vector<1x128xf32> to vector<1x1x128xf32>
    %224 = vector.broadcast %223 : vector<1x1x128xf32> to vector<2x104x128xf32>
    %225 = arith.addf %221, %224 : vector<2x104x128xf32>
    %226 = tpu.transpose %225, [1, 0, 2] : vector<2x104x128xf32> -> vector<104x2x128xf32>
    %c0_89 = arith.constant 0 : index
    %c0_90 = arith.constant 0 : index
    %c0_91 = arith.constant 0 : index
    %227 = vector.load %arg12[%c0_89, %c0_90, %c0_91] : memref<104x2x128xf32, #tpu.memory_space<vmem>>, vector<104x2x128xf32>
    tpu.vector_store %arg12[%c0_89, %c0_90, %c0_91], %226 {strides = array<i32>} : memref<104x2x128xf32, #tpu.memory_space<vmem>>, vector<104x2x128xf32>,
    %c0_92 = arith.constant 0 : index
    %c0_93 = arith.constant 0 : index
    %228 = vector.load %arg5[%c0_92, %c0_93] : memref<32x128xf32, #tpu.memory_space<vmem>>, vector<32x128xf32>
    %cst_94 = arith.constant 0.000000e+00 : f32
    %229 = vector.broadcast %cst_94 : f32 to vector<2x32xf32>
    %cst_95 = arith.constant 0.000000e+00 : f32
    %230 = vector.broadcast %cst_95 : f32 to vector<2x32xf32>
    %c0_i32 = arith.constant 0 : i32
    %c104_i32 = arith.constant 104 : i32
    %231 = arith.addi %c0_i32, %c104_i32 : i32
    %c1_i32 = arith.constant 1 : i32
    %232:2 = scf.for %arg13 = %c0_i32 to %231 step %c1_i32 iter_args(%arg14 = %229, %arg15 = %230) -> (vector<2x32xf32>, vector<2x32xf32>)  : i32 {
      %246 = arith.index_cast %arg13 : i32 to index
      %c0_110 = arith.constant 0 : index
      %c0_111 = arith.constant 0 : index
      %247 = vector.load %arg12[%246, %c0_110, %c0_111] : memref<104x2x128xf32, #tpu.memory_space<vmem>>, vector<1x2x128xf32>
      %248 = vector.shape_cast %247 : vector<1x2x128xf32> to vector<2x128xf32>
      %cst_112 = arith.constant dense<0.000000e+00> : vector<2x128xf32>
      %249 = tpu.matmul %arg14, %228, %cst_112 {dimension_numbers = #tpu.dot_dimension_numbers<[1], [0], [0], [1], [0, 0, 1, 1], [], []>} : vector<2x32xf32>, vector<32x128xf32>, vector<2x128xf32> -> vector<2x128xf32>
      %250 = arith.addf %248, %249 : vector<2x128xf32>
      %251 = vector.extract_strided_slice %250 {offsets = [0, 0], sizes = [2, 32], strides = [1, 1]} : vector<2x128xf32> to vector<2x32xf32>
      %252 = arith.negf %251 : vector<2x32xf32>
      %253 = math.exp %252 : vector<2x32xf32>
      %cst_113 = arith.constant 1.000000e+00 : f32
      %254 = vector.broadcast %cst_113 : f32 to vector<2x32xf32>
      %255 = arith.addf %254, %253 : vector<2x32xf32>
      %256 = arith.divf %254, %255 : vector<2x32xf32>
      %257 = vector.extract_strided_slice %250 {offsets = [0, 32], sizes = [2, 32], strides = [1, 1]} : vector<2x128xf32> to vector<2x32xf32>
      %258 = arith.negf %257 : vector<2x32xf32>
      %259 = math.exp %258 : vector<2x32xf32>
      %cst_114 = arith.constant 1.000000e+00 : f32
      %260 = vector.broadcast %cst_114 : f32 to vector<2x32xf32>
      %261 = arith.addf %260, %259 : vector<2x32xf32>
      %262 = arith.divf %260, %261 : vector<2x32xf32>
      %263 = vector.extract_strided_slice %250 {offsets = [0, 64], sizes = [2, 32], strides = [1, 1]} : vector<2x128xf32> to vector<2x32xf32>
      %264 = math.tanh %263 : vector<2x32xf32>
      %265 = vector.extract_strided_slice %250 {offsets = [0, 96], sizes = [2, 32], strides = [1, 1]} : vector<2x128xf32> to vector<2x32xf32>
      %266 = arith.negf %265 : vector<2x32xf32>
      %267 = math.exp %266 : vector<2x32xf32>
      %cst_115 = arith.constant 1.000000e+00 : f32
      %268 = vector.broadcast %cst_115 : f32 to vector<2x32xf32>
      %269 = arith.addf %268, %267 : vector<2x32xf32>
      %270 = arith.divf %268, %269 : vector<2x32xf32>
      %271 = arith.mulf %262, %arg15 : vector<2x32xf32>
      %272 = arith.mulf %256, %264 : vector<2x32xf32>
      %273 = arith.addf %271, %272 : vector<2x32xf32>
      %274 = math.tanh %273 : vector<2x32xf32>
      %275 = arith.mulf %270, %274 : vector<2x32xf32>
      scf.yield %275, %273 : vector<2x32xf32>, vector<2x32xf32>
    }
    %c104_i32_96 = arith.constant 104 : i32
    %c0_97 = arith.constant 0 : index
    %c0_98 = arith.constant 0 : index
    %233 = vector.load %arg7[%c0_97, %c0_98] : memref<32x32xf32, #tpu.memory_space<vmem>>, vector<32x32xf32>
    %cst_99 = arith.constant dense<0.000000e+00> : vector<2x32xf32>
    %234 = tpu.matmul %232#0, %233, %cst_99 {dimension_numbers = #tpu.dot_dimension_numbers<[1], [0], [0], [1], [0, 0, 1, 1], [], []>} : vector<2x32xf32>, vector<32x32xf32>, vector<2x32xf32> -> vector<2x32xf32>
    %c0_100 = arith.constant 0 : index
    %c0_101 = arith.constant 0 : index
    %235 = vector.load %arg8[%c0_100, %c0_101] : memref<1x32xf32, #tpu.memory_space<vmem>>, vector<1x32xf32>
    %236 = vector.broadcast %235 : vector<1x32xf32> to vector<2x32xf32>
    %237 = arith.addf %234, %236 : vector<2x32xf32>
    %cst_102 = arith.constant 0.000000e+00 : f32
    %238 = vector.broadcast %cst_102 : f32 to vector<2x32xf32>
    %239 = arith.maximumf %237, %238 : vector<2x32xf32>
    %c0_103 = arith.constant 0 : index
    %c0_104 = arith.constant 0 : index
    %240 = vector.load %arg9[%c0_103, %c0_104] : memref<32x4xf32, #tpu.memory_space<vmem>>, vector<32x4xf32>
    %cst_105 = arith.constant dense<0.000000e+00> : vector<2x4xf32>
    %241 = tpu.matmul %239, %240, %cst_105 {dimension_numbers = #tpu.dot_dimension_numbers<[1], [0], [0], [1], [0, 0, 1, 1], [], []>} : vector<2x32xf32>, vector<32x4xf32>, vector<2x4xf32> -> vector<2x4xf32>
    %c0_106 = arith.constant 0 : index
    %c0_107 = arith.constant 0 : index
    %242 = vector.load %arg10[%c0_106, %c0_107] : memref<1x4xf32, #tpu.memory_space<vmem>>, vector<1x4xf32>
    %243 = vector.broadcast %242 : vector<1x4xf32> to vector<2x4xf32>
    %244 = arith.addf %241, %243 : vector<2x4xf32>
    %c0_108 = arith.constant 0 : index
    %c0_109 = arith.constant 0 : index
    %245 = vector.load %arg11[%c0_108, %c0_109] : memref<2x4xf32, #tpu.memory_space<vmem>>, vector<2x4xf32>
    tpu.vector_store %arg11[%c0_108, %c0_109], %244 {strides = array<i32>} : memref<2x4xf32, #tpu.memory_space<vmem>>, vector<2x4xf32>,
    return
  }
  func.func @transform_0(%arg0: i32) -> (i32, i32, i32) {
    %c0_i32 = arith.constant 0 : i32
    %c0_i32_0 = arith.constant 0 : i32
    %c0_i32_1 = arith.constant 0 : i32
    return %arg0, %c0_i32, %c0_i32_0 : i32, i32, i32
  }
  func.func @transform_1(%arg0: i32) -> (i32, i32, i32) {
    %c0_i32 = arith.constant 0 : i32
    %c0_i32_0 = arith.constant 0 : i32
    %c0_i32_1 = arith.constant 0 : i32
    %c0_i32_2 = arith.constant 0 : i32
    return %c0_i32, %c0_i32_0, %c0_i32_1 : i32, i32, i32
  }
  func.func @transform_2(%arg0: i32) -> (i32, i32, i32) {
    %c0_i32 = arith.constant 0 : i32
    %c0_i32_0 = arith.constant 0 : i32
    %c0_i32_1 = arith.constant 0 : i32
    %c0_i32_2 = arith.constant 0 : i32
    return %c0_i32, %c0_i32_0, %c0_i32_1 : i32, i32, i32
  }
  func.func @transform_3(%arg0: i32) -> (i32, i32) {
    %c0_i32 = arith.constant 0 : i32
    %c0_i32_0 = arith.constant 0 : i32
    %c0_i32_1 = arith.constant 0 : i32
    return %c0_i32, %c0_i32_0 : i32, i32
  }
  func.func @transform_4(%arg0: i32) -> (i32, i32) {
    %c0_i32 = arith.constant 0 : i32
    %c0_i32_0 = arith.constant 0 : i32
    %c0_i32_1 = arith.constant 0 : i32
    return %c0_i32, %c0_i32_0 : i32, i32
  }
  func.func @transform_5(%arg0: i32) -> (i32, i32) {
    %c0_i32 = arith.constant 0 : i32
    %c0_i32_0 = arith.constant 0 : i32
    %c0_i32_1 = arith.constant 0 : i32
    return %c0_i32, %c0_i32_0 : i32, i32
  }
  func.func @transform_6(%arg0: i32) -> (i32, i32) {
    %c0_i32 = arith.constant 0 : i32
    %c0_i32_0 = arith.constant 0 : i32
    %c0_i32_1 = arith.constant 0 : i32
    return %c0_i32, %c0_i32_0 : i32, i32
  }
  func.func @transform_7(%arg0: i32) -> (i32, i32) {
    %c0_i32 = arith.constant 0 : i32
    %c0_i32_0 = arith.constant 0 : i32
    %c0_i32_1 = arith.constant 0 : i32
    return %c0_i32, %c0_i32_0 : i32, i32
  }
  func.func @transform_8(%arg0: i32) -> (i32, i32) {
    %c0_i32 = arith.constant 0 : i32
    %c0_i32_0 = arith.constant 0 : i32
    %c0_i32_1 = arith.constant 0 : i32
    return %c0_i32, %c0_i32_0 : i32, i32
  }
  func.func @transform_9(%arg0: i32) -> (i32, i32) {
    %c0_i32 = arith.constant 0 : i32
    %c0_i32_0 = arith.constant 0 : i32
    %c0_i32_1 = arith.constant 0 : i32
    return %c0_i32, %c0_i32_0 : i32, i32
  }
  func.func @transform_10(%arg0: i32) -> (i32, i32) {
    %c0_i32 = arith.constant 0 : i32
    %c0_i32_0 = arith.constant 0 : i32
    return %arg0, %c0_i32 : i32, i32
  }
}

</mosaic_0001>

<bundles_post_ra>
// kernel: m20_forward.1
= control target key start
LH: loop header
LB: loop body
LE: loop exit
PB: predicated region body
PF: predicated region fallthrough
CT: control target
= control target key end

     0   :  { %v9210_v2 = vmov 0   ;;  %s14399_s0 = inlined_call_operand.vmem [shape: f32[2,128,1], index: 0, kind: input, shape index: {}]   ;;  %s14400_s1 = inlined_call_operand.vmem [shape: f32[17,1,8], index: 1, kind: input, shape index: {}]   ;;  %s14401_s2 = inlined_call_operand.vmem [shape: f32[9,8,16], index: 2, kind: input, shape index: {}]   ;;  %s14402_s3 = inlined_call_operand.vmem [shape: f32[16,128], index: 3, kind: input, shape index: {}]   ;;  %s14403_s4 = inlined_call_operand.vmem [shape: f32[32,128], index: 4, kind: input, shape index: {}]   ;;  %s14404_s5 = inlined_call_operand.vmem [shape: f32[1,128], index: 5, kind: input, shape index: {}]   ;;  %s14405_s6 = inlined_call_operand.vmem [shape: f32[32,32], index: 6, kind: input, shape index: {}]   ;;  %s14406_s7 = inlined_call_operand.vmem [shape: f32[1,32], index: 7, kind: input, shape index: {}]   ;;  %s14407_s8 = inlined_call_operand.vmem [shape: f32[32,4], index: 8, kind: input, shape index: {}]   ;;  %s14408_s9 = inlined_call_operand.vmem [shape: f32[1,4], index: 9, kind: input, shape index: {}]   ;;  %s14409_s10 = inlined_call_operand.hbm [shape: f32[2,4], index: 10, kind: output, shape index: {}]  }
   0x1   :  { %v38_v0 = vld [vmem:[%s14399_s0 + $0x10] sm:$0xff]  ;;  %v36_v1 = vld [vmem:[%s14399_s0] sm:$0xff]  ;;  %9113 = vset.pattern.permute.xlu1 %v9210_v2  ;;  %9112 = vset.pattern.permute.xlu0 %v9210_v2  ;;  %v39_v3 = vld [vmem:[%s14399_s0 + $0x18] sm:$0xff] }
   0x2   :  { %81 = vperm.xlu1 %9113, %v38_v0   ;;  %71 = vperm.xlu0 %9112, %v36_v1   ;;  %v37_v4 = vld [vmem:[%s14399_s0 + $0x8] sm:$0xff]  ;;  %v40_v6 = vld [vmem:[%s14399_s0 + $0x20] sm:$0xff]  ;;  %v43_v7 = vld [vmem:[%s14399_s0 + $0x38] sm:$0xff] }
   0x3   :  { %v41_v5 = vld [vmem:[%s14399_s0 + $0x28] sm:$0xff]  ;;  %v42_v8 = vld [vmem:[%s14399_s0 + $0x30] sm:$0xff] }
   0x6   :  { %86 = vperm.xlu1 %9113, %v39_v3   ;;  %76 = vperm.xlu0 %9112, %v37_v4  }
   0xa   :  { %96 = vperm.xlu1 %9113, %v41_v5   ;;  %91 = vperm.xlu0 %9112, %v40_v6  }
   0xb   :  { %15 = vsyncpa [#allocation4], 0  ;;  %v45_v9 = vld [vmem:[%s14399_s0 + $0x48] sm:$0xff]  ;;  %v44_v10 = vld [vmem:[%s14399_s0 + $0x40] sm:$0xff]  ;;  %vm349_vm0 = vcmask 1046528   ;;  %vm532_vm1 = vcmask 1045504  }
   0xc   :  { %v47_v11 = vld [vmem:[%s14399_s0 + $0x58] sm:$0xff]  ;;  %v46_v12 = vld [vmem:[%s14399_s0 + $0x50] sm:$0xff]  ;;  %v49_v13 = vld [vmem:[%s14399_s0 + $0x68] sm:$0xff]  ;;  %vm715_vm2 = vcmask 1044480   ;;  %vm898_vm3 = vcmask 1043456   ;;  %vm1081_vm4 = vcmask 1042432  }
   0xd   :  { %v48_v14 = vld [vmem:[%s14399_s0 + $0x60] sm:$0xff]  ;;  %v50_v16 = vld [vmem:[%s14399_s0 + $0x70] sm:$0xff]  ;;  %v53_v18 = vld [vmem:[%s14399_s0 + $0x88] sm:$0xff]  ;;  %vm1264_vm5 = vcmask 1041408   ;;  %vm1447_vm6 = vcmask 1040384   ;;  %vm2974_vm7 = vcmask 64512  }
   0xe   :  { %106 = vperm.xlu1 %9113, %v43_v7   ;;  %101 = vperm.xlu0 %9112, %v42_v8   ;;  %v52_v15 = vld [vmem:[%s14399_s0 + $0x80] sm:$0xff]  ;;  %v54_v17 = vld [vmem:[%s14399_s0 + $0x90] sm:$0xff]  ;;  %v55_v20 = vld [vmem:[%s14399_s0 + $0x98] sm:$0xff]  ;;  %vm5980_vm8 = vcmask 130048  }
   0xf   :  { %v56_v19 = vld [vmem:[%s14399_s0 + $0xa0] sm:$0xff]  ;;  %v58_v21 = vld [vmem:[%s14399_s0 + $0xb0] sm:$0xff]  ;;  %v57_v22 = vld [vmem:[%s14399_s0 + $0xa8] sm:$0xff] }
  0x10   :  { %v60_v23 = vld [vmem:[%s14399_s0 + $0xc0] sm:$0xff]  ;;  %v59_v24 = vld [vmem:[%s14399_s0 + $0xb8] sm:$0xff]  ;;  %v61_v26 = vld [vmem:[%s14399_s0 + $0xc8] sm:$0xff] }
  0x11   :  { %v51_v25 = vld [vmem:[%s14399_s0 + $0x78] sm:$0xff]  ;;  %v62_v28 = vld [vmem:[%s14399_s0 + $0xd0] sm:$0xff]  ;;  %v65_v29 = vld [vmem:[%s14399_s0 + $0xe8] sm:$0xff] }
  0x12   :  { %116 = vperm.xlu1 %9113, %v45_v9   ;;  %111 = vperm.xlu0 %9112, %v44_v10   ;;  %v63_v27 = vld [vmem:[%s14399_s0 + $0xd8] sm:$0xff]  ;;  %v64_v30 = vld [vmem:[%s14399_s0 + $0xe0] sm:$0xff]  ;;  %v66_v32 = vld [vmem:[%s14399_s0 + $0xf0] sm:$0xff] }
  0x13   :  { %v67_v31 = vld [vmem:[%s14399_s0 + $0xf8] sm:$0xff]  ;;  %v9387_v39 = vld [vmem:[%s14400_s1 + $0x1] ss:$0 sm:$0xff]  ;;  %v9392_v40 = vld [vmem:[%s14400_s1 + $0x2] ss:$0 sm:$0xff] }
  0x14   :  { %v9399_v42 = vld [vmem:[%s14400_s1] ss:$0 sm:$0xff]  ;;  %v9404_v43 = vld [vmem:[%s14400_s1 + $0x3] ss:$0 sm:$0xff]  ;;  %v9413_v45 = vld [vmem:[%s14400_s1 + $0x4] ss:$0 sm:$0xff] }
  0x15   :  { %v9429_v51 = vld [vmem:[%s14400_s1 + $0x5] ss:$0 sm:$0xff]  ;;  %v9437_v54 = vld [vmem:[%s14400_s1 + $0x6] ss:$0 sm:$0xff]  ;;  %v9442_v55 = vld [vmem:[%s14400_s1 + $0x7] ss:$0 sm:$0xff] }
  0x16   :  { %126 = vperm.xlu1 %9113, %v47_v11   ;;  %121 = vperm.xlu0 %9112, %v46_v12  }
  0x1a   :  { %136 = vperm.xlu1 %9113, %v49_v13   ;;  %131 = vperm.xlu0 %9112, %v48_v14  }
  0x1e   :  { %141 = vperm.xlu1 %9113, %v52_v15   ;;  %275 = vperm.xlu0 %9112, %v50_v16  }
  0x22   :  { %151 = vperm.xlu1 %9113, %v54_v17   ;;  %146 = vperm.xlu0 %9112, %v53_v18  }
  0x26   :  { %161 = vperm.xlu1 %9113, %v56_v19   ;;  %156 = vperm.xlu0 %9112, %v55_v20  }
  0x2a   :  { %171 = vperm.xlu1 %9113, %v58_v21   ;;  %166 = vperm.xlu0 %9112, %v57_v22  }
  0x2e   :  { %181 = vperm.xlu1 %9113, %v60_v23   ;;  %176 = vperm.xlu0 %9112, %v59_v24  }
  0x32   :  { %1630 = vperm.xlu1 %9113, %v51_v25   ;;  %186 = vperm.xlu0 %9112, %v61_v26  }
  0x36   :  { %196 = vperm.xlu1 %9113, %v63_v27   ;;  %191 = vperm.xlu0 %9112, %v62_v28  }
  0x3a   :  { %206 = vperm.xlu1 %9113, %v65_v29   ;;  %201 = vperm.xlu0 %9112, %v64_v30  }
  0x3e   :  { %1635 = vperm.xlu1 %9113, %v67_v31   ;;  %280 = vperm.xlu0 %9112, %v66_v32  }
  0x81   :  { %v9374_v33 = vpop.permute.xlu1 %81  ;;  %v72_v34 = vpop.permute.xlu0 %71 }
  0x82   :  { %v9408_v44 = vmul.f32 %v9392_v40, %v9374_v33  ;;  %v289_v46 = vmul.f32 %v9387_v39, %v72_v34  ;;  %v291_v47 = vmul.f32 %v9387_v39, %v9374_v33  ;;  %v9424_v50 = vmul.f32 %v9404_v43, %v9374_v33 }
  0x83   :  { %v472_v52 = vmul.f32 %v9392_v40, %v72_v34  ;;  %v217_v53 = vmul.f32 %v9399_v42, %v9374_v33  ;;  %v215_v56 = vmul.f32 %v9399_v42, %v72_v34  ;;  %v655_v57 = vmul.f32 %v9404_v43, %v72_v34 }
  0x84   :  { %v536_v59 = vrot.slane %v9408_v44, 2  ;;  %v9448_v60 = vmul.f32 %v9413_v45, %v72_v34  ;;  %v350_v63 = vrot.slane %v289_v46, 1  ;;  %v9455_v0 = vmul.f32 %v9429_v51, %v72_v34 }
  0x85   :  { %v9376_v35 = vpop.permute.xlu1 %86  ;;  %v9378_v36 = vpop.permute.xlu0 %76  ;;  %v353_v2 = vrot.slane %v291_v47, 1  ;;  %v14412_v5 = vrot.slane %v9424_v50, 3  ;;  %v533_v6 = vrot.slane %v472_v52, 2  ;;  %v9467_v7 = vmul.f32 %v9437_v54, %v72_v34 }
  0x86   :  { %14745 = vst [vmem:[#allocation6_spill] sm:$0xff] %v9378_v36  ;;  %v290_v41 = vmul.f32 %v9387_v39, %v9378_v36  ;;  %14746 = vst [vmem:[#allocation7_spill] sm:$0xff] %v9448_v60  ;;  %v473_v61 = vmul.f32 %v9392_v40, %v9378_v36  ;;  %v656_v62 = vmul.f32 %v9404_v43, %v9378_v36  ;;  %v716_v13 = vrot.slane %v655_v57, 3 }
  0x87   :  { %14747 = vst [vmem:[#allocation8_spill] sm:$0xff] %v9455_v0  ;;  %v9459_v1 = vmul.f32 %v9387_v39, %v9376_v35  ;;  %14748 = vst [vmem:[#allocation9_spill] sm:$0xff] %v9467_v7  ;;  %v9470_v8 = vmul.f32 %v9442_v55, %v72_v34  ;;  %v9474_v9 = vmul.f32 %v9392_v40, %v9376_v35 }
  0x88   :  { %v351_v58 = vrot.slane %v290_v41, 1  ;;  %v9480_v12 = vmul.f32 %v9413_v45, %v9378_v36  ;;  %v216_v14 = vmul.f32 %v9399_v42, %v9378_v36  ;;  %v534_v15 = vrot.slane %v473_v61, 2 }
  0x89   :  { %v9380_v37 = vpop.permute.xlu1 %96  ;;  %v9382_v38 = vpop.permute.xlu0 %91  ;;  %14749 = vst [vmem:[#allocation10_spill] sm:$0xff] %v9470_v8  ;;  %14750 = vst [vmem:[#allocation11_spill] sm:$0xff] %v9474_v9  ;;  %v717_v16 = vrot.slane %v656_v62, 3  ;;  %v14411_v19 = vrot.slane %v9459_v1, 1  ;;  %v9489_v20 = vmul.f32 %v9429_v51, %v9378_v36  ;;  %v9498_v26 = vmul.f32 %v9437_v54, %v9378_v36 }
  0x8a   :  { %v352_v10 = vsel %vm349_vm0, %v350_v63, %v351_v58  ;;  %v354_v11 = vsel %vm349_vm0, %v351_v58, %v353_v2  ;;  %14751 = vst [vmem:[#allocation12_spill] sm:$0xff] %v9480_v12  ;;  %v14410_v28 = vrot.slane %v9474_v9, 2  ;;  %v9505_v30 = vmul.f32 %v9442_v55, %v9378_v36 }
  0x8b   :  { %14752 = vst [vmem:[#allocation13_spill] sm:$0xff] %v9489_v20  ;;  %v436_v24 = vadd.f32 %v352_v10, %v215_v56  ;;  %v437_v25 = vadd.f32 %v354_v11, %v216_v14  ;;  %14753 = vst [vmem:[#allocation14_spill] sm:$0xff] %v9498_v26  ;;  %v535_v31 = vsel %vm532_vm1, %v533_v6, %v534_v15 }
  0x8c   :  { %14754 = vst [vmem:[#allocation15_spill] sm:$0xff] %v9505_v30  ;;  %v537_v32 = vsel %vm532_vm1, %v534_v15, %v536_v59  ;;  %v9512_v34 = vsel %vm715_vm2, %v716_v13, %v717_v16  ;;  %v9517_v41 = vsel %vm715_vm2, %v717_v16, %v14412_v5  ;;  %v9522_v47 = vmul.f32 %v9387_v39, %v9382_v38 }
  0x8d   :  { %v9418_v48 = vpop.permute.xlu1 %106  ;;  %v9420_v49 = vpop.permute.xlu0 %101  ;;  %14755 = vst [vmem:[#allocation16_spill] sm:$0xff] %v9512_v34  ;;  %14756 = vst [vmem:[#allocation17_spill] sm:$0xff] %v9517_v41  ;;  %v9530_v57 = vmul.f32 %v9387_v39, %v9380_v37  ;;  %v356_v58 = vsel %vm349_vm0, %v353_v2, %v14411_v19  ;;  %v9535_v61 = vadd.f32 %v535_v31, %v436_v24 }
  0x8e   :  { %v9537_v62 = vadd.f32 %v537_v32, %v437_v25  ;;  %v9542_v6 = vmul.f32 %v9404_v43, %v9376_v35  ;;  %v9547_v11 = vmul.f32 %v9399_v42, %v9376_v35  ;;  %v9551_v13 = vmul.f32 %v9399_v42, %v9380_v37 }
  0x8f   :  { %14758 = vst [vmem:[#allocation19_spill] sm:$0xff] %v9535_v61  ;;  %v9555_v2 = vmul.f32 %v9387_v39, %v9418_v48  ;;  %v438_v15 = vadd.f32 %v356_v58, %v217_v53  ;;  %v9563_v16 = vmul.f32 %v9392_v40, %v9380_v37  ;;  %v9567_v24 = vmul.f32 %v9392_v40, %v9418_v48 }
  0x90   :  { %14759 = vst [vmem:[#allocation20_spill] sm:$0xff] %v9537_v62  ;;  %14760 = vst [vmem:[#allocation21_spill] sm:$0xff] %v9542_v6  ;;  %v9572_v31 = vmul.f32 %v9399_v42, %v9418_v48  ;;  %v539_v23 = vsel %vm532_vm1, %v536_v59, %v14410_v28  ;;  %v9594_v63 = vmul.f32 %v9404_v43, %v9380_v37 }
  0x91   :  { %v9461_v3 = vpop.permute.xlu1 %116  ;;  %v9463_v4 = vpop.permute.xlu0 %111  ;;  %14761 = vst [vmem:[#allocation22_spill] sm:$0xff] %v9563_v16  ;;  %14762 = vst [vmem:[#allocation23_spill] sm:$0xff] %v9567_v24  ;;  %v9604_v29 = vmul.f32 %v9404_v43, %v9418_v48  ;;  %v621_v19 = vadd.f32 %v539_v23, %v438_v15  ;;  %v9624_v18 = vmul.f32 %v9413_v45, %v9376_v35  ;;  %v14770_v23 = vrot.slane %v9542_v6, 3 }
  0x92   :  { %v9559_v14 = vmul.f32 %v9387_v39, %v9461_v3  ;;  %v9577_v27 = vmul.f32 %v9392_v40, %v9461_v3  ;;  %v9585_v10 = vmul.f32 %v9399_v42, %v9461_v3  ;;  %14764 = vst [vmem:[#allocation25_spill] sm:$0xff] %v9594_v63  ;;  %v9608_v44 = vmul.f32 %v9404_v43, %v9461_v3 }
  0x93   :  { %14765 = vst [vmem:[#allocation26_spill] sm:$0xff] %v9604_v29  ;;  %14769 = vst [vmem:[#allocation30_spill] sm:$0xff] %v9624_v18  ;;  %v14771_v15 = vrot.slane %v9424_v50, 3  ;;  %v9638_v59 = vmul.f32 %v9413_v45, %v9374_v33  ;;  %v9645_v7 = vmul.f32 %v9413_v45, %v9380_v37  ;;  %v9665_v30 = vmul.f32 %v9413_v45, %v9418_v48 }
  0x94   :  { %14763 = vst [vmem:[#allocation24_spill] sm:$0xff] %v9577_v27  ;;  %14766 = vst [vmem:[#allocation27_spill] sm:$0xff] %v9608_v44  ;;  %v9671_v0 = vmul.f32 %v9413_v45, %v9461_v3 }
  0x95   :  { %v9491_v21 = vpop.permute.xlu1 %126  ;;  %v9493_v22 = vpop.permute.xlu0 %121  ;;  %v722_v32 = vsel %vm715_vm2, %v14771_v15, %v14770_v23  ;;  %14772 = vst [vmem:[#allocation31_spill] sm:$0xff] %v9638_v59  ;;  %14773 = vst [vmem:[#allocation32_spill] sm:$0xff] %v9645_v7 }
  0x96   :  { %v9599_v46 = vmul.f32 %v9387_v39, %v9491_v21  ;;  %v9615_v25 = vmul.f32 %v9392_v40, %v9491_v21  ;;  %v9620_v5 = vmul.f32 %v9404_v43, %v9491_v21  ;;  %v9628_v28 = vmul.f32 %v9399_v42, %v9491_v21  ;;  %14778 = vst [vmem:[#allocation37_spill] sm:$0xff] %v9665_v30 }
  0x97   :  { %14779 = vst [vmem:[#allocation38_spill] sm:$0xff] %v9671_v0  ;;  %v804_v12 = vadd.f32 %v722_v32, %v621_v19  ;;  %v9680_v44 = vmul.f32 %v9413_v45, %v9491_v21  ;;  %v14787_v19 = vrot.slane %v9638_v59, 4 }
  0x98   :  { %14767 = vst [vmem:[#allocation28_spill] sm:$0xff] %v9615_v25  ;;  %14768 = vst [vmem:[#allocation29_spill] sm:$0xff] %v9620_v5  ;;  %v14786_v5 = vrot.slane %v9624_v18, 4 }
  0x99   :  { %v9524_v52 = vpop.permute.xlu1 %136  ;;  %v9526_v56 = vpop.permute.xlu0 %131  ;;  %14780 = vst [vmem:[#allocation39_spill] sm:$0xff] %v9680_v44 }
  0x9a   :  { %14757 = vst [vmem:[#allocation18_spill] sm:$0xff] %v9524_v52  ;;  %v9653_v23 = vmul.f32 %v9387_v39, %v9524_v52  ;;  %v9657_v15 = vmul.f32 %v9392_v40, %v9524_v52  ;;  %v9661_v8 = vmul.f32 %v9404_v43, %v9524_v52  ;;  %v9676_v60 = vmul.f32 %v9399_v42, %v9524_v52 }
  0x9b   :  { %v9684_v17 = vmul.f32 %v9413_v45, %v9524_v52  ;;  %v905_v32 = vsel %vm898_vm3, %v14787_v19, %v14786_v5 }
  0x9c   :  { %14776 = vst [vmem:[#allocation35_spill] sm:$0xff] %v9657_v15  ;;  %14777 = vst [vmem:[#allocation36_spill] sm:$0xff] %v9661_v8  ;;  %v9767_v15 = vadd.f32 %v905_v32, %v804_v12 }
  0x9d   :  { %v9579_v53 = vpop.permute.xlu1 %141  ;;  %v9581_v58 = vpop.permute.xlu0 %275  ;;  %14781 = vst [vmem:[#allocation40_spill] sm:$0xff] %v9684_v17 }
  0x9e   :  { %v9702_v41 = vmul.f32 %v9387_v39, %v9579_v53  ;;  %v9706_v62 = vmul.f32 %v9392_v40, %v9579_v53  ;;  %v9716_v63 = vmul.f32 %v9404_v43, %v9579_v53  ;;  %v9720_v6 = vmul.f32 %v9413_v45, %v9579_v53 }
  0x9f   :  { %v9724_v30 = vmul.f32 %v9429_v51, %v9579_v53  ;;  %v9729_v18 = vmul.f32 %v9399_v42, %v9579_v53  ;;  %v9740_v8 = vmul.f32 %v9437_v54, %v9579_v53  ;;  %v9744_v7 = vmul.f32 %v9442_v55, %v9579_v53 }
  0xa0   :  { %14784 = vst [vmem:[#allocation43_spill] sm:$0xff] %v9702_v41  ;;  %14785 = vst [vmem:[#allocation44_spill] sm:$0xff] %v9706_v62 }
  0xa1   :  { %v9647_v26 = vpop.permute.xlu1 %151  ;;  %v9649_v50 = vpop.permute.xlu0 %146  ;;  %14788 = vst [vmem:[#allocation45_spill] sm:$0xff] %v9716_v63  ;;  %14789 = vst [vmem:[#allocation46_spill] sm:$0xff] %v9720_v6 }
  0xa2   :  { %14774 = vst [vmem:[#allocation33_spill] sm:$0xff] %v9647_v26  ;;  %14775 = vst [vmem:[#allocation34_spill] sm:$0xff] %v9649_v50  ;;  %v9688_v36 = vmul.f32 %v9387_v39, %v9647_v26  ;;  %v9692_v20 = vmul.f32 %v9387_v39, %v9649_v50  ;;  %v9752_v19 = vmul.f32 %v9392_v40, %v9649_v50 }
  0xa3   :  { %14790 = vst [vmem:[#allocation47_spill] sm:$0xff] %v9724_v30  ;;  %14791 = vst [vmem:[#allocation48_spill] sm:$0xff] %v9729_v18  ;;  %v9748_v18 = vmul.f32 %v9392_v40, %v9647_v26  ;;  %v9758_v17 = vmul.f32 %v9404_v43, %v9647_v26  ;;  %v9762_v53 = vmul.f32 %v9404_v43, %v9649_v50 }
  0xa4   :  { %14782 = vst [vmem:[#allocation41_spill] sm:$0xff] %v9688_v36  ;;  %14783 = vst [vmem:[#allocation42_spill] sm:$0xff] %v9692_v20  ;;  %v14800_v5 = vrot.slane %v9688_v36, 1  ;;  %v14801_v59 = vrot.slane %v9692_v20, 1  ;;  %v9776_v41 = vmul.f32 %v9413_v45, %v9649_v50  ;;  %v230_v61 = vmul.f32 %v9399_v42, %v9649_v50 }
  0xa5   :  { %v9733_v29 = vpop.permute.xlu1 %161  ;;  %v9735_v0 = vpop.permute.xlu0 %156  ;;  %14794 = vst [vmem:[#allocation51_spill] sm:$0xff] %v9740_v8  ;;  %14795 = vst [vmem:[#allocation52_spill] sm:$0xff] %v9744_v7  ;;  %v9794_v44 = vmul.f32 %v9399_v42, %v9647_v26  ;;  %v9804_v8 = vmul.f32 %v9429_v51, %v9649_v50  ;;  %v14812_v50 = vrot.slane %v9752_v19, 2 }
  0xa6   :  { %14792 = vst [vmem:[#allocation49_spill] sm:$0xff] %v9733_v29  ;;  %14793 = vst [vmem:[#allocation50_spill] sm:$0xff] %v9735_v0  ;;  %v383_v62 = vsel %vm349_vm0, %v14801_v59, %v14800_v5  ;;  %v9780_v25 = vmul.f32 %v9387_v39, %v9733_v29  ;;  %v9784_v34 = vmul.f32 %v9387_v39, %v9735_v0 }
  0xa7   :  { %14796 = vst [vmem:[#allocation53_spill] sm:$0xff] %v9748_v18  ;;  %14797 = vst [vmem:[#allocation54_spill] sm:$0xff] %v9752_v19  ;;  %v451_v32 = vadd.f32 %v383_v62, %v230_v61  ;;  %v9808_v5 = vmul.f32 %v9392_v40, %v9733_v29  ;;  %v9812_v59 = vmul.f32 %v9404_v43, %v9733_v29  ;;  %v14811_v62 = vrot.slane %v9748_v18, 2 }
  0xa8   :  { %14798 = vst [vmem:[#allocation55_spill] sm:$0xff] %v9758_v17  ;;  %14799 = vst [vmem:[#allocation56_spill] sm:$0xff] %v9762_v53  ;;  %v386_v6 = vrot.slane %v9780_v25, 1  ;;  %v9818_v7 = vmul.f32 %v9413_v45, %v9733_v29  ;;  %v9828_v26 = vmul.f32 %v9399_v42, %v9733_v29  ;;  %v14815_v61 = vrot.slane %v9762_v53, 3 }
  0xa9   :  { %14802 = vst [vmem:[#allocation57_spill] sm:$0xff] %v9776_v41  ;;  %14803 = vst [vmem:[#allocation58_spill] sm:$0xff] %v9784_v34  ;;  %v9798_v63 = vpop.permute.xlu1 %171  ;;  %v9800_v12 = vpop.permute.xlu0 %166  ;;  %v14814_v41 = vrot.slane %v9758_v17, 3  ;;  %v9853_v19 = vmul.f32 %v9404_v43, %v9735_v0 }
  0xaa   :  { %14804 = vst [vmem:[#allocation59_spill] sm:$0xff] %v9794_v44  ;;  %14805 = vst [vmem:[#allocation60_spill] sm:$0xff] %v9798_v63  ;;  %v9832_v30 = vmul.f32 %v9387_v39, %v9798_v63  ;;  %v309_v25 = vmul.f32 %v9387_v39, %v9800_v12  ;;  %v9867_v44 = vmul.f32 %v9413_v45, %v9735_v0 }
  0xab   :  { %14806 = vst [vmem:[#allocation61_spill] sm:$0xff] %v9800_v12  ;;  %14807 = vst [vmem:[#allocation62_spill] sm:$0xff] %v9804_v8  ;;  %v566_v8 = vsel %vm532_vm1, %v14812_v50, %v14811_v62  ;;  %v9841_v18 = vsel %vm715_vm2, %v14815_v61, %v14814_v41  ;;  %v9845_v50 = vmul.f32 %v9429_v51, %v9733_v29  ;;  %v14821_v29 = vrot.slane %v9784_v34, 1 }
  0xac   :  { %14808 = vst [vmem:[#allocation63_spill] sm:$0xff] %v9808_v5  ;;  %14809 = vst [vmem:[#allocation64_spill] sm:$0xff] %v9812_v59  ;;  %v9849_v62 = vmul.f32 %v9392_v40, %v9735_v0  ;;  %v232_v41 = vmul.f32 %v9399_v42, %v9735_v0  ;;  %v9876_v53 = vmul.f32 %v9404_v43, %v9798_v63  ;;  %v388_v17 = vrot.slane %v309_v25, 1 }
  0xad   :  { %14810 = vst [vmem:[#allocation65_spill] sm:$0xff] %v9818_v7  ;;  %14813 = vst [vmem:[#allocation66_spill] sm:$0xff] %v9828_v26  ;;  %v9855_v26 = vadd.f32 %v566_v8, %v451_v32  ;;  %v9871_v8 = vmul.f32 %v9392_v40, %v9798_v63  ;;  %v9880_v61 = vmul.f32 %v9392_v40, %v9800_v12  ;;  %v9905_v7 = vpop.permute.xlu1 %181  ;;  %v9938_v36 = vpop.permute.xlu0 %176 }
  0xae   :  { %14816 = vst [vmem:[#allocation67_spill] sm:$0xff] %v9841_v18  ;;  %14817 = vst [vmem:[#allocation68_spill] sm:$0xff] %v9845_v50  ;;  %v387_v18 = vsel %vm349_vm0, %v14821_v29, %v386_v6  ;;  %v9891_v32 = vmul.f32 %v9413_v45, %v9798_v63  ;;  %v9895_v25 = vmul.f32 %v9429_v51, %v9798_v63 }
  0xaf   :  { %14818 = vst [vmem:[#allocation69_spill] sm:$0xff] %v9849_v62  ;;  %14819 = vst [vmem:[#allocation70_spill] sm:$0xff] %v9853_v19  ;;  %v9899_v59 = vmul.f32 %v9437_v54, %v9798_v63  ;;  %v9903_v29 = vmul.f32 %v9442_v55, %v9798_v63  ;;  %v9907_v0 = vadd.f32 %v387_v18, %v232_v41  ;;  %v573_v62 = vrot.slane %v9871_v8, 2 }
  0xb0   :  { %14820 = vst [vmem:[#allocation71_spill] sm:$0xff] %v9855_v26  ;;  %14822 = vst [vmem:[#allocation72_spill] sm:$0xff] %v9867_v44  ;;  %v9887_v26 = vmul.f32 %v9399_v42, %v9798_v63  ;;  %v9912_v19 = vmul.f32 %v9404_v43, %v9800_v12  ;;  %v9916_v5 = vmul.f32 %v9413_v45, %v9800_v12  ;;  %v14833_v63 = vrot.slane %v9832_v30, 1 }
  0xb1   :  { %14823 = vst [vmem:[#allocation73_spill] sm:$0xff] %v9876_v53  ;;  %14824 = vst [vmem:[#allocation74_spill] sm:$0xff] %v9880_v61  ;;  %v234_v41 = vmul.f32 %v9399_v42, %v9800_v12  ;;  %v9928_v50 = vmul.f32 %v9429_v51, %v9800_v12  ;;  %v9932_v44 = vmul.f32 %v9437_v54, %v9800_v12 }
  0xb2   :  { %14825 = vst [vmem:[#allocation75_spill] sm:$0xff] %v9891_v32  ;;  %14826 = vst [vmem:[#allocation76_spill] sm:$0xff] %v9895_v25  ;;  %v391_v34 = vsel %vm349_vm0, %v388_v17, %v14833_v63  ;;  %v9936_v8 = vmul.f32 %v9387_v39, %v9905_v7  ;;  %v9948_v16 = vmul.f32 %v9399_v42, %v9905_v7  ;;  %v14840_v63 = vrot.slane %v9880_v61, 2 }
  0xb3   :  { %14827 = vst [vmem:[#allocation77_spill] sm:$0xff] %v9899_v59  ;;  %14828 = vst [vmem:[#allocation78_spill] sm:$0xff] %v9903_v29  ;;  %v455_v27 = vadd.f32 %v391_v34, %v234_v41  ;;  %v9951_v9 = vsel %vm349_vm0, %v386_v6, %v388_v17  ;;  %v311_v34 = vmul.f32 %v9387_v39, %v9938_v36 }
  0xb4   :  { %14829 = vst [vmem:[#allocation79_spill] sm:$0xff] %v9905_v7  ;;  %14830 = vst [vmem:[#allocation80_spill] sm:$0xff] %v9907_v0  ;;  %v574_v18 = vsel %vm532_vm1, %v14840_v63, %v573_v62  ;;  %v9958_v0 = vmul.f32 %v9392_v40, %v9905_v7  ;;  %v9967_v17 = vmul.f32 %v9404_v43, %v9905_v7  ;;  %v14853_v59 = vrot.slane %v9936_v8, 1 }
  0xb5   :  { %14831 = vst [vmem:[#allocation81_spill] sm:$0xff] %v9912_v19  ;;  %14832 = vst [vmem:[#allocation82_spill] sm:$0xff] %v9916_v5  ;;  %v9971_v6 = vmul.f32 %v9413_v45, %v9905_v7  ;;  %v9975_v63 = vmul.f32 %v9429_v51, %v9905_v7  ;;  %v9979_v24 = vmul.f32 %v9437_v54, %v9905_v7  ;;  %v392_v25 = vrot.slane %v311_v34, 1 }
  0xb6   :  { %14834 = vst [vmem:[#allocation83_spill] sm:$0xff] %v9928_v50  ;;  %14835 = vst [vmem:[#allocation84_spill] sm:$0xff] %v9932_v44  ;;  %v494_v20 = vmul.f32 %v9392_v40, %v9938_v36  ;;  %v9983_v41 = vadd.f32 %v574_v18, %v455_v27  ;;  %v9987_v12 = vmul.f32 %v9442_v55, %v9905_v7 }
  0xb7   :  { %14836 = vst [vmem:[#allocation85_spill] sm:$0xff] %v9936_v8  ;;  %14837 = vst [vmem:[#allocation86_spill] sm:$0xff] %v9938_v36  ;;  %v677_v29 = vmul.f32 %v9404_v43, %v9938_v36  ;;  %v9993_v44 = vmul.f32 %v9413_v45, %v9938_v36  ;;  %v9998_v50 = vmul.f32 %v9429_v51, %v9938_v36 }
  0xb8   :  { %14838 = vst [vmem:[#allocation87_spill] sm:$0xff] %v9948_v16  ;;  %14839 = vst [vmem:[#allocation88_spill] sm:$0xff] %v9951_v9  ;;  %v10002_v27 = vmul.f32 %v9437_v54, %v9938_v36  ;;  %v236_v7 = vmul.f32 %v9399_v42, %v9938_v36  ;;  %v10009_v45 = vmul.f32 %v9442_v55, %v9938_v36  ;;  %v14852_v9 = vrot.slane %v9832_v30, 1 }
  0xb9   :  { %14841 = vst [vmem:[#allocation89_spill] sm:$0xff] %v9958_v0  ;;  %14842 = vst [vmem:[#allocation90_spill] sm:$0xff] %v9967_v17  ;;  %v10013_v34 = vmul.f32 %v9429_v51, %v9376_v35  ;;  %v758_v19 = vrot.slane %v677_v29, 3  ;;  %v10022_v36 = vmul.f32 %v9429_v51, %v9374_v33  ;;  %v395_v32 = vsel %vm349_vm0, %v392_v25, %v14853_v59 }
  0xba   :  { %14843 = vst [vmem:[#allocation91_spill] sm:$0xff] %v9971_v6  ;;  %14844 = vst [vmem:[#allocation92_spill] sm:$0xff] %v9975_v63  ;;  %v393_v16 = vsel %vm349_vm0, %v14852_v9, %v392_v25  ;;  %v10035_v18 = vmul.f32 %v9429_v51, %v9380_v37  ;;  %v10040_v30 = vmul.f32 %v9437_v54, %v9376_v35  ;;  %v14855_v59 = vrot.slane %v9958_v0, 2 }
  0xbb   :  { %14845 = vst [vmem:[#allocation93_spill] sm:$0xff] %v9979_v24  ;;  %14846 = vst [vmem:[#allocation94_spill] sm:$0xff] %v9983_v41  ;;  %v575_v41 = vrot.slane %v494_v20, 2  ;;  %v10052_v29 = vmul.f32 %v9429_v51, %v9418_v48  ;;  %v10056_v5 = vmul.f32 %v9429_v51, %v9461_v3  ;;  %v10059_v20 = vadd.f32 %v393_v16, %v9887_v26 }
  0xbc   :  { %14847 = vst [vmem:[#allocation95_spill] sm:$0xff] %v9987_v12  ;;  %14848 = vst [vmem:[#allocation96_spill] sm:$0xff] %v9993_v44  ;;  %v10061_v61 = vadd.f32 %v395_v32, %v236_v7  ;;  %v10080_v7 = vmul.f32 %v9429_v51, %v9491_v21  ;;  %v10084_v26 = vmul.f32 %v9429_v51, %v9524_v52  ;;  %v14863_v16 = vrot.slane %v10013_v34, 5 }
  0xbd   :  { %14849 = vst [vmem:[#allocation97_spill] sm:$0xff] %v9998_v50  ;;  %14850 = vst [vmem:[#allocation98_spill] sm:$0xff] %v10002_v27  ;;  %v10043_v9 = vsel %vm532_vm1, %v573_v62, %v575_v41  ;;  %v10048_v25 = vsel %vm532_vm1, %v575_v41, %v14855_v59  ;;  %v14534_v62 = vrot.slane %v10022_v36, 5  ;;  %v10066_v41 = vmul.f32 %v9437_v54, %v9374_v33 }
  0xbe   :  { %14851 = vst [vmem:[#allocation99_spill] sm:$0xff] %v10009_v45  ;;  %14854 = vst [vmem:[#allocation100_spill] sm:$0xff] %v10043_v9  ;;  %v14859_v59 = vrot.slane %v9876_v53, 3  ;;  %v14861_v45 = vrot.slane %v9967_v17, 3  ;;  %v10127_v50 = vmul.f32 %v9442_v55, %v9380_v37  ;;  %v10131_v27 = vmul.f32 %v9442_v55, %v9418_v48 }
  0xbf   :  { %14856 = vst [vmem:[#allocation101_spill] sm:$0xff] %v10048_v25  ;;  %14857 = vst [vmem:[#allocation102_spill] sm:$0xff] %v10059_v20  ;;  %v1088_v32 = vsel %vm1081_vm4, %v14534_v62, %v14863_v16  ;;  %v10106_v16 = vmul.f32 %v9437_v54, %v9418_v48  ;;  %v14873_v53 = vrot.slane %v10040_v30, 6  ;;  %v14874_v63 = vrot.slane %v10066_v41, 6 }
  0xc0   :  { %14858 = vst [vmem:[#allocation103_spill] sm:$0xff] %v10061_v61  ;;  %v10071_v12 = vsel %vm715_vm2, %v14859_v59, %v758_v19  ;;  %v10076_v24 = vsel %vm715_vm2, %v758_v19, %v14861_v45  ;;  %v10095_v19 = vmul.f32 %v9442_v55, %v9376_v35  ;;  %v1170_v51 = vadd.f32 %v1088_v32, %v9767_v15 }
  0xc1   :  { %14860 = vst [vmem:[#allocation104_spill] sm:$0xff] %v10071_v12  ;;  %14862 = vst [vmem:[#allocation105_spill] sm:$0xff] %v10076_v24  ;;  %v10102_v12 = vmul.f32 %v9437_v54, %v9380_v37  ;;  %v10110_v59 = vmul.f32 %v9437_v54, %v9461_v3  ;;  %v10115_v45 = vmul.f32 %v9442_v55, %v9374_v33 }
  0xc2   :  { %14864 = vst [vmem:[#allocation106_spill] sm:$0xff] %v10095_v19  ;;  %14866 = vst [vmem:[#allocation108_spill] sm:$0xff] %v10106_v16  ;;  %v10119_v15 = vmul.f32 %v9437_v54, %v9491_v21  ;;  %v10123_v32 = vmul.f32 %v9437_v54, %v9524_v52  ;;  %v1271_v17 = vsel %vm1264_vm5, %v14874_v63, %v14873_v53  ;;  %v10156_v53 = vld [vmem:[%s14400_s1 + $0x8] ss:$0 sm:$0xff]  ;;  %v14880_v63 = vrot.slane %v10095_v19, 7 }
  0xc3   :  { %14865 = vst [vmem:[#allocation107_spill] sm:$0xff] %v10102_v12  ;;  %14867 = vst [vmem:[#allocation109_spill] sm:$0xff] %v10110_v59  ;;  %v10141_v54 = vmul.f32 %v9442_v55, %v9461_v3  ;;  %v1353_v24 = vadd.f32 %v1271_v17, %v1170_v51  ;;  %v10147_v9 = vmul.f32 %v9442_v55, %v9491_v21  ;;  %v14545_v17 = vrot.slane %v10115_v45, 7  ;;  %v10165_v51 = vld [vmem:[%s14400_s1 + $0x9] ss:$0 sm:$0xff] }
  0xc4   :  { %14868 = vst [vmem:[#allocation110_spill] sm:$0xff] %v10115_v45  ;;  %14869 = vst [vmem:[#allocation111_spill] sm:$0xff] %v10119_v15  ;;  %v10151_v62 = vmul.f32 %v9442_v55, %v9524_v52  ;;  %v10179_v25 = vmul.f32 %v10156_v53, %v9374_v33  ;;  %v10183_v55 = vmul.f32 %v10165_v51, %v9376_v35 }
  0xc5   :  { %14870 = vst [vmem:[#allocation112_spill] sm:$0xff] %v10123_v32  ;;  %14871 = vst [vmem:[#allocation113_spill] sm:$0xff] %v10127_v50  ;;  %v1454_v8 = vsel %vm1447_vm6, %v14545_v17, %v14880_v63  ;;  %v10189_v61 = vmul.f32 %v10165_v51, %v9374_v33  ;;  %v1572_v63 = vmul.f32 %v10156_v53, %v9376_v35  ;;  %v10266_v50 = vld [vmem:[%s14400_s1 + $0xb] ss:$0 sm:$0xff] }
  0xc6   :  { %14872 = vst [vmem:[#allocation114_spill] sm:$0xff] %v10131_v27  ;;  %14875 = vst [vmem:[#allocation115_spill] sm:$0xff] %v10141_v54  ;;  %v1536_v20 = vadd.f32 %v1454_v8, %v1353_v24  ;;  %v10195_v0 = vmul.f32 %v10156_v53, %v9380_v37  ;;  %v10199_v17 = vmul.f32 %v10156_v53, %v9418_v48  ;;  %v10208_v24 = vld [vmem:[%s14400_s1 + $0xa] ss:$0 sm:$0xff] }
  0xc7   :  { %14876 = vst [vmem:[#allocation116_spill] sm:$0xff] %v10147_v9  ;;  %14877 = vst [vmem:[#allocation117_spill] sm:$0xff] %v10151_v62  ;;  %v10203_v44 = vmul.f32 %v10165_v51, %v9380_v37  ;;  %v10212_v8 = vmul.f32 %v10156_v53, %v9461_v3  ;;  %v10216_v6 = vmul.f32 %v10165_v51, %v9418_v48  ;;  %v14904_v19 = vrot.slane %v10189_v61, 1 }
  0xc8   :  { %14878 = vst [vmem:[#allocation118_spill] sm:$0xff] %v10156_v53  ;;  %14879 = vst [vmem:[#allocation119_spill] sm:$0xff] %v10165_v51  ;;  %v10232_v62 = vmul.f32 %v10156_v53, %v9524_v52  ;;  %v10239_v54 = vadd.f32 %v1572_v63, %v1536_v20  ;;  %v10243_v27 = vmul.f32 %v10165_v51, %v9524_v52 }
  0xc9   :  { %14881 = vst [vmem:[#allocation120_spill] sm:$0xff] %v10179_v25  ;;  %14882 = vst [vmem:[#allocation121_spill] sm:$0xff] %v10183_v55  ;;  %v10228_v25 = vmul.f32 %v10156_v53, %v9491_v21  ;;  %v10253_v53 = vmul.f32 %v10208_v24, %v9380_v37  ;;  %v10257_v20 = vmul.f32 %v10208_v24, %v9418_v48 }
  0xca   :  { %14883 = vst [vmem:[#allocation122_spill] sm:$0xff] %v10189_v61  ;;  %14884 = vst [vmem:[#allocation123_spill] sm:$0xff] %v10195_v0  ;;  %v10224_v0 = vmul.f32 %v10208_v24, %v9376_v35  ;;  %v10261_v63 = vmul.f32 %v10208_v24, %v9461_v3  ;;  %v10285_v9 = vmul.f32 %v10208_v24, %v9524_v52 }
  0xcb   :  { %14885 = vst [vmem:[#allocation124_spill] sm:$0xff] %v10199_v17  ;;  %14886 = vst [vmem:[#allocation125_spill] sm:$0xff] %v10203_v44  ;;  %v10220_v17 = vmul.f32 %v10165_v51, %v9461_v3  ;;  %v10294_v44 = vmul.f32 %v10266_v50, %v9374_v33 }
  0xcc   :  { %14887 = vst [vmem:[#allocation126_spill] sm:$0xff] %v10208_v24  ;;  %14888 = vst [vmem:[#allocation127_spill] sm:$0xff] %v10212_v8  ;;  %v10236_v8 = vmul.f32 %v10165_v51, %v9491_v21  ;;  %v14903_v51 = vrot.slane %v10183_v55, 1 }
  0xcd   :  { %14889 = vst [vmem:[#allocation128_spill] sm:$0xff] %v10216_v6  ;;  %14890 = vst [vmem:[#allocation129_spill] sm:$0xff] %v10220_v17  ;;  %v14912_v6 = vrot.slane %v10224_v0, 2  ;;  %v10327_v17 = vmul.f32 %v10266_v50, %v9491_v21 }
  0xce   :  { %14891 = vst [vmem:[#allocation130_spill] sm:$0xff] %v10224_v0  ;;  %14892 = vst [vmem:[#allocation131_spill] sm:$0xff] %v10228_v25  ;;  %v10248_v25 = vmul.f32 %v10208_v24, %v9374_v33  ;;  %v10280_v45 = vsel %vm349_vm0, %v14904_v19, %v14903_v51  ;;  %v10298_v19 = vmul.f32 %v10266_v50, %v9380_v37  ;;  %v14928_v0 = vrot.slane %v10294_v44, 3 }
  0xcf   :  { %14893 = vst [vmem:[#allocation132_spill] sm:$0xff] %v10232_v62  ;;  %14894 = vst [vmem:[#allocation133_spill] sm:$0xff] %v10236_v8  ;;  %v10289_v62 = vmul.f32 %v10266_v50, %v9376_v35  ;;  %v10302_v51 = vmul.f32 %v10266_v50, %v9418_v48  ;;  %v10311_v8 = vld [vmem:[%s14400_s1 + $0xc] ss:$0 sm:$0xff] }
  0xd0   :  { %14895 = vst [vmem:[#allocation134_spill] sm:$0xff] %v10239_v54  ;;  %14896 = vst [vmem:[#allocation135_spill] sm:$0xff] %v10243_v27  ;;  %v10272_v54 = vmul.f32 %v10208_v24, %v9491_v21  ;;  %v14913_v55 = vrot.slane %v10248_v25, 2  ;;  %v10349_v24 = vld [vmem:[%s14400_s1 + $0xd] ss:$0 sm:$0xff]  ;;  %v10365_v32 = vmul.f32 %v10311_v8, %v9491_v21 }
  0xd1   :  { %14897 = vst [vmem:[#allocation136_spill] sm:$0xff] %v10248_v25  ;;  %14898 = vst [vmem:[#allocation137_spill] sm:$0xff] %v10253_v53  ;;  %v14927_v53 = vrot.slane %v10289_v62, 3 }
  0xd2   :  { %14899 = vst [vmem:[#allocation138_spill] sm:$0xff] %v10257_v20  ;;  %14900 = vst [vmem:[#allocation139_spill] sm:$0xff] %v10261_v63  ;;  %v10318_v61 = vsel %vm532_vm1, %v14913_v55, %v14912_v6  ;;  %v10332_v63 = vmul.f32 %v10266_v50, %v9524_v52  ;;  %v10337_v6 = vmul.f32 %v10311_v8, %v9376_v35 }
  0xd3   :  { %14901 = vst [vmem:[#allocation140_spill] sm:$0xff] %v10266_v50  ;;  %14902 = vst [vmem:[#allocation141_spill] sm:$0xff] %v10272_v54  ;;  %v10344_v54 = vmul.f32 %v10311_v8, %v9374_v33  ;;  %v10353_v20 = vmul.f32 %v10311_v8, %v9380_v37  ;;  %v10357_v55 = vmul.f32 %v10311_v8, %v9418_v48 }
  0xd4   :  { %14905 = vst [vmem:[#allocation142_spill] sm:$0xff] %v10280_v45  ;;  %14906 = vst [vmem:[#allocation143_spill] sm:$0xff] %v10285_v9  ;;  %v10323_v45 = vmul.f32 %v10266_v50, %v9461_v3  ;;  %v10371_v50 = vmul.f32 %v10311_v8, %v9524_v52  ;;  %v10375_v9 = vmul.f32 %v10349_v24, %v9376_v35  ;;  %v14936_v59 = vrot.slane %v10337_v6, 4 }
  0xd5   :  { %14907 = vst [vmem:[#allocation144_spill] sm:$0xff] %v10289_v62  ;;  %14908 = vst [vmem:[#allocation145_spill] sm:$0xff] %v10294_v44  ;;  %v10382_v25 = vsel %vm715_vm2, %v14928_v0, %v14927_v53  ;;  %v10401_v0 = vmul.f32 %v10349_v24, %v9461_v3  ;;  %v7781_v53 = vld [vmem:[%s14400_s1 + $0xe] ss:$0 sm:$0xff]  ;;  %v10413_v62 = vmul.f32 %v10349_v24, %v9491_v21  ;;  %v14937_v27 = vrot.slane %v10344_v54, 4 }
  0xd6   :  { %14909 = vst [vmem:[#allocation146_spill] sm:$0xff] %v10298_v19  ;;  %14910 = vst [vmem:[#allocation147_spill] sm:$0xff] %v10302_v51  ;;  %v10388_v19 = vmul.f32 %v10349_v24, %v9374_v33  ;;  %v10417_v15 = vmul.f32 %v7781_v53, %v9376_v35  ;;  %v10432_v51 = vmul.f32 %v7781_v53, %v9374_v33 }
  0xd7   :  { %14911 = vst [vmem:[#allocation148_spill] sm:$0xff] %v10311_v8  ;;  %14914 = vst [vmem:[#allocation149_spill] sm:$0xff] %v10318_v61  ;;  %v10361_v61 = vmul.f32 %v10311_v8, %v9461_v3  ;;  %v10424_v8 = vsel %vm898_vm3, %v14937_v27, %v14936_v59  ;;  %v7783_v27 = vld [vmem:[%s14400_s1 + $0xf] ss:$0 sm:$0xff]  ;;  %v10444_v59 = vmul.f32 %v7781_v53, %v9418_v48 }
  0xd8   :  { %14915 = vst [vmem:[#allocation150_spill] sm:$0xff] %v10323_v45  ;;  %14916 = vst [vmem:[#allocation151_spill] sm:$0xff] %v10327_v17  ;;  %v10393_v17 = vmul.f32 %v10349_v24, %v9380_v37  ;;  %v10397_v45 = vmul.f32 %v10349_v24, %v9418_v48  ;;  %v14947_v44 = vrot.slane %v10388_v19, 5 }
  0xd9   :  { %14917 = vst [vmem:[#allocation152_spill] sm:$0xff] %v10332_v63  ;;  %14918 = vst [vmem:[#allocation153_spill] sm:$0xff] %v10337_v6  ;;  %v10447_v63 = vmul.f32 %v7781_v53, %v9461_v3  ;;  %v10470_v6 = vmul.f32 %v7783_v27, %v9374_v33 }
  0xda   :  { %14919 = vst [vmem:[#allocation154_spill] sm:$0xff] %v10344_v54  ;;  %14920 = vst [vmem:[#allocation155_spill] sm:$0xff] %v10349_v24  ;;  %v10501_v54 = vmul.f32 %v7783_v27, %v9524_v52 }
  0xdb   :  { %14921 = vst [vmem:[#allocation156_spill] sm:$0xff] %v10353_v20  ;;  %14922 = vst [vmem:[#allocation157_spill] sm:$0xff] %v10357_v55  ;;  %v7785_v55 = vld [vmem:[%s14400_s1 + $0x10] ss:$0 sm:$0xff]  ;;  %v295_v20 = vmul.f32 %v9387_v39, %v9420_v49 }
  0xdc   :  { %14923 = vst [vmem:[#allocation158_spill] sm:$0xff] %v10361_v61  ;;  %14924 = vst [vmem:[#allocation159_spill] sm:$0xff] %v10365_v32  ;;  %v10438_v61 = vmul.f32 %v7781_v53, %v9380_v37  ;;  %v14946_v32 = vrot.slane %v10375_v9, 5 }
  0xdd   :  { %14925 = vst [vmem:[#allocation160_spill] sm:$0xff] %v10371_v50  ;;  %14926 = vst [vmem:[#allocation161_spill] sm:$0xff] %v10375_v9  ;;  %v10453_v50 = vmul.f32 %v7783_v27, %v9376_v35  ;;  %v10473_v9 = vmul.f32 %v7783_v27, %v9380_v37 }
  0xde   :  { %14929 = vst [vmem:[#allocation162_spill] sm:$0xff] %v10382_v25  ;;  %14930 = vst [vmem:[#allocation163_spill] sm:$0xff] %v10388_v19  ;;  %v10428_v25 = vmul.f32 %v10349_v24, %v9524_v52  ;;  %v14645_v24 = vrot.slane %v10470_v6, 7  ;;  %v299_v19 = vmul.f32 %v9387_v39, %v9493_v22 }
  0xdf   :  { %14931 = vst [vmem:[#allocation164_spill] sm:$0xff] %v10393_v17  ;;  %14932 = vst [vmem:[#allocation165_spill] sm:$0xff] %v10397_v45  ;;  %v10464_v17 = vmul.f32 %v7781_v53, %v9524_v52  ;;  %v10483_v45 = vmul.f32 %v7783_v27, %v9491_v21  ;;  %v14960_v52 = vrot.slane %v10453_v50, 7 }
  0xe0   :  { %14933 = vst [vmem:[#allocation166_spill] sm:$0xff] %v10401_v0  ;;  %14934 = vst [vmem:[#allocation167_spill] sm:$0xff] %v10413_v62  ;;  %v10460_v0 = vsel %vm1081_vm4, %v14947_v44, %v14946_v32  ;;  %v10477_v32 = vmul.f32 %v7783_v27, %v9418_v48  ;;  %v10508_v44 = vmul.f32 %v7785_v55, %v9374_v33 }
  0xe1   :  { %14935 = vst [vmem:[#allocation168_spill] sm:$0xff] %v10417_v15  ;;  %14938 = vst [vmem:[#allocation169_spill] sm:$0xff] %v10424_v8  ;;  %v10450_v8 = vmul.f32 %v7781_v53, %v9491_v21  ;;  %v10480_v53 = vmul.f32 %v7783_v27, %v9461_v3  ;;  %v10525_v33 = vmul.f32 %v7785_v55, %v9376_v35 }
  0xe2   :  { %14939 = vst [vmem:[#allocation170_spill] sm:$0xff] %v10428_v25  ;;  %14940 = vst [vmem:[#allocation171_spill] sm:$0xff] %v10432_v51  ;;  %v14956_v25 = vrot.slane %v10432_v51, 6  ;;  %v10532_v27 = vmul.f32 %v7785_v55, %v9380_v37  ;;  %v219_v35 = vmul.f32 %v9399_v42, %v9382_v38 }
  0xe3   :  { %14941 = vst [vmem:[#allocation172_spill] sm:$0xff] %v10438_v61  ;;  %14942 = vst [vmem:[#allocation173_spill] sm:$0xff] %v10444_v59  ;;  %v14955_v61 = vrot.slane %v10417_v15, 6 }
  0xe4   :  { %14943 = vst [vmem:[#allocation174_spill] sm:$0xff] %v10447_v63  ;;  %14944 = vst [vmem:[#allocation175_spill] sm:$0xff] %v10450_v8  ;;  %v297_v8 = vmul.f32 %v9387_v39, %v9463_v4  ;;  %v14999_v63 = vld [vmem:[#allocation20_spill] sm:$0xff] }
  0xe5   :  { %14945 = vst [vmem:[#allocation176_spill] sm:$0xff] %v10453_v50  ;;  %14948 = vst [vmem:[#allocation177_spill] sm:$0xff] %v10460_v0  ;;  %v10497_v62 = vsel %vm1264_vm5, %v14956_v25, %v14955_v61  ;;  %v10522_v0 = vsel %vm1447_vm6, %v14645_v24, %v14960_v52  ;;  %v301_v61 = vmul.f32 %v9387_v39, %v9526_v56  ;;  %v361_v52 = vrot.slane %v295_v20, 1 }
  0xe6   :  { %14949 = vst [vmem:[#allocation178_spill] sm:$0xff] %v10464_v17  ;;  %14950 = vst [vmem:[#allocation179_spill] sm:$0xff] %v10470_v6  ;;  %v303_v25 = vmul.f32 %v9387_v39, %v9581_v58  ;;  %v10541_v24 = vmul.f32 %v7785_v55, %v9491_v21  ;;  %v14968_v39 = vrot.slane %v9459_v1, 1  ;;  %v225_v21 = vmul.f32 %v9399_v42, %v9493_v22 }
  0xe7   :  { %14951 = vst [vmem:[#allocation180_spill] sm:$0xff] %v10473_v9  ;;  %14952 = vst [vmem:[#allocation181_spill] sm:$0xff] %v10477_v32  ;;  %v14967_v32 = vrot.slane %v9522_v47, 1  ;;  %v369_v20 = vrot.slane %v299_v19, 1  ;;  %v476_v19 = vmul.f32 %v9392_v40, %v9382_v38  ;;  %v14978_v9 = vrot.slane %v9653_v23, 1 }
  0xe8   :  { %14953 = vst [vmem:[#allocation182_spill] sm:$0xff] %v10480_v53  ;;  %14954 = vst [vmem:[#allocation183_spill] sm:$0xff] %v10483_v45  ;;  %v10535_v45 = vmul.f32 %v7785_v55, %v9418_v48  ;;  %v10538_v53 = vmul.f32 %v7785_v55, %v9461_v3  ;;  %v221_v48 = vmul.f32 %v9399_v42, %v9420_v49 }
  0xe9   :  { %14957 = vst [vmem:[#allocation184_spill] sm:$0xff] %v10497_v62  ;;  %14958 = vst [vmem:[#allocation185_spill] sm:$0xff] %v10501_v54  ;;  %v358_v37 = vsel %vm349_vm0, %v14968_v39, %v14967_v32  ;;  %v223_v3 = vmul.f32 %v9399_v42, %v9463_v4  ;;  %v227_v55 = vmul.f32 %v9399_v42, %v9526_v56  ;;  %v14970_v1 = vmov %v14967_v32 }
  0xea   :  { %14959 = vst [vmem:[#allocation186_spill] sm:$0xff] %v10508_v44  ;;  %14961 = vst [vmem:[#allocation187_spill] sm:$0xff] %v10522_v0  ;;  %v377_v39 = vrot.slane %v303_v25, 1  ;;  %v478_v42 = vmul.f32 %v9392_v40, %v9420_v49  ;;  %v14972_v44 = vrot.slane %v9555_v2, 1  ;;  %v14979_v0 = vmov %v14978_v9 }
  0xeb   :  { %14962 = vst [vmem:[#allocation188_spill] sm:$0xff] %v10525_v33  ;;  %14963 = vst [vmem:[#allocation189_spill] sm:$0xff] %v10532_v27  ;;  %v365_v27 = vrot.slane %v297_v8, 1  ;;  %v373_v8 = vrot.slane %v301_v61, 1  ;;  %v439_v33 = vadd.f32 %v358_v37, %v9547_v11  ;;  %v482_v11 = vmul.f32 %v9392_v40, %v9493_v22 }
  0xec   :  { %14964 = vst [vmem:[#allocation190_spill] sm:$0xff] %v10535_v45  ;;  %14965 = vst [vmem:[#allocation191_spill] sm:$0xff] %v10538_v53  ;;  %v364_v47 = vsel %vm349_vm0, %v361_v52, %v14972_v44  ;;  %v540_v6 = vrot.slane %v476_v19, 2 }
  0xed   :  { %14966 = vst [vmem:[#allocation192_spill] sm:$0xff] %v10541_v24  ;;  %v14969_v24 = vrot.slane %v9530_v57, 1  ;;  %v480_v57 = vmul.f32 %v9392_v40, %v9463_v4  ;;  %v376_v50 = vsel %vm349_vm0, %v373_v8, %v14978_v9 }
  0xef   :  { %v360_v32 = vsel %vm349_vm0, %v14970_v1, %v14969_v24  ;;  %v14971_v53 = vmov %v14969_v24  ;;  %v14973_v24 = vmov %v14972_v44  ;;  %v14976_v44 = vrot.slane %v9599_v46, 1 }
  0xf0   :  { %v362_v45 = vsel %vm349_vm0, %v14971_v53, %v361_v52  ;;  %v366_v61 = vsel %vm349_vm0, %v14973_v24, %v365_v27  ;;  %v14974_v53 = vrot.slane %v9559_v14, 1  ;;  %v440_v52 = vadd.f32 %v360_v32, %v219_v35 }
  0xf1   :  { %v372_v2 = vsel %vm349_vm0, %v369_v20, %v14976_v44  ;;  %v14977_v24 = vmov %v14976_v44  ;;  %v441_v14 = vadd.f32 %v362_v45, %v9551_v13  ;;  %v484_v46 = vmul.f32 %v9392_v40, %v9526_v56 }
  0xf2   :  { %v368_v25 = vsel %vm349_vm0, %v365_v27, %v14974_v53  ;;  %v14975_v37 = vmov %v14974_v53  ;;  %v374_v17 = vsel %vm349_vm0, %v14977_v24, %v373_v8  ;;  %v378_v27 = vsel %vm349_vm0, %v14979_v0, %v377_v39 }
  0xf3   :  { %v370_v1 = vsel %vm349_vm0, %v14975_v37, %v369_v20  ;;  %v442_v53 = vadd.f32 %v364_v47, %v221_v48  ;;  %v443_v37 = vadd.f32 %v366_v61, %v9572_v31  ;;  %v544_v20 = vrot.slane %v478_v42, 2  ;;  %v14988_v47 = vld [vmem:[#allocation24_spill] sm:$0xff] }
  0xf4   :  { %v444_v35 = vadd.f32 %v368_v25, %v223_v3  ;;  %v548_v32 = vrot.slane %v480_v57, 2  ;;  %v552_v44 = vrot.slane %v482_v11, 2  ;;  %v445_v24 = vadd.f32 %v370_v1, %v9585_v10  ;;  %v14980_v3 = vld [vmem:[#allocation11_spill] sm:$0xff]  ;;  %v14982_v10 = vld [vmem:[#allocation22_spill] sm:$0xff]  ;;  %v14991_v1 = vld [vmem:[#allocation28_spill] sm:$0xff] }
  0xf5   :  { %v446_v9 = vadd.f32 %v372_v2, %v225_v21  ;;  %v447_v23 = vadd.f32 %v374_v17, %v9628_v28  ;;  %v486_v0 = vmul.f32 %v9392_v40, %v9581_v58  ;;  %v448_v13 = vadd.f32 %v376_v50, %v227_v55  ;;  %v14985_v50 = vld [vmem:[#allocation23_spill] sm:$0xff] }
  0xf6   :  { %v449_v45 = vadd.f32 %v378_v27, %v9676_v60  ;;  %v659_v31 = vmul.f32 %v9404_v43, %v9382_v38  ;;  %v661_v48 = vmul.f32 %v9404_v43, %v9420_v49  ;;  %v14981_v8 = vrot.slane %v14980_v3, 2 }
  0xf7   :  { %v14983_v21 = vrot.slane %v14982_v10, 2  ;;  %v14986_v60 = vrot.slane %v14985_v50, 2  ;;  %v14989_v61 = vrot.slane %v14988_v47, 2  ;;  %v556_v25 = vrot.slane %v484_v46, 2  ;;  %v9122_v46 = vld [vmem:[%s14400_s1 + $0x3] ss:$0 sm:$0xff] }
  0xf8   :  { %v541_v39 = vsel %vm532_vm1, %v14981_v8, %v540_v6  ;;  %v14992_v2 = vrot.slane %v14991_v1, 2  ;;  %v560_v3 = vrot.slane %v486_v0, 2 }
  0xf9   :  { %v543_v28 = vsel %vm532_vm1, %v540_v6, %v14983_v21  ;;  %v14984_v17 = vmov %v14983_v21  ;;  %v547_v55 = vsel %vm532_vm1, %v544_v20, %v14986_v60  ;;  %v14987_v19 = vmov %v14986_v60 }
  0xfa   :  { %v545_v40 = vsel %vm532_vm1, %v14984_v17, %v544_v20  ;;  %v549_v42 = vsel %vm532_vm1, %v14987_v19, %v548_v32  ;;  %v551_v57 = vsel %vm532_vm1, %v548_v32, %v14989_v61  ;;  %v14990_v11 = vmov %v14989_v61 }
  0xfb   :  { %v553_v6 = vsel %vm532_vm1, %v14990_v11, %v552_v44  ;;  %v555_v27 = vsel %vm532_vm1, %v552_v44, %v14992_v2  ;;  %v622_v8 = vadd.f32 %v541_v39, %v439_v33  ;;  %v663_v20 = vmul.f32 %v9404_v43, %v9463_v4 }
  0xfc   :  { %v623_v10 = vadd.f32 %v543_v28, %v440_v52  ;;  %v624_v21 = vadd.f32 %v545_v40, %v441_v14  ;;  %v625_v17 = vadd.f32 %v547_v55, %v442_v53  ;;  %v665_v32 = vmul.f32 %v9404_v43, %v9493_v22  ;;  %v14994_v52 = vld [vmem:[#allocation35_spill] sm:$0xff] }
  0xfd   :  { %v626_v50 = vadd.f32 %v549_v42, %v443_v37  ;;  %v627_v60 = vadd.f32 %v551_v57, %v444_v35  ;;  %v667_v19 = vmul.f32 %v9122_v46, %v9526_v56  ;;  %v669_v44 = vmul.f32 %v9122_v46, %v9581_v58  ;;  %v14998_v46 = vld [vmem:[#allocation16_spill] sm:$0xff] }
  0xfe   :  { %v14993_v33 = vmov %v14992_v2  ;;  %v14995_v14 = vrot.slane %v14994_v52, 2  ;;  %v723_v39 = vrot.slane %v659_v31, 3  ;;  %v727_v43 = vrot.slane %v661_v48, 3  ;;  %v14997_v2 = vld [vmem:[#allocation19_spill] sm:$0xff]  ;;  %v15001_v48 = vld [vmem:[#allocation21_spill] sm:$0xff] }
  0xff   :  { %v557_v0 = vsel %vm532_vm1, %v14993_v33, %v556_v25  ;;  %v628_v28 = vadd.f32 %v553_v6, %v445_v24  ;;  %v629_v40 = vadd.f32 %v555_v27, %v446_v9  ;;  %v731_v55 = vrot.slane %v663_v20, 3 }
 0x100   :  { %v559_v53 = vsel %vm532_vm1, %v556_v25, %v14995_v14  ;;  %v14996_v37 = vmov %v14995_v14  ;;  %v630_v42 = vadd.f32 %v557_v0, %v447_v23  ;;  %v735_v57 = vrot.slane %v665_v32, 3  ;;  %v15000_v25 = vld [vmem:[#allocation17_spill] sm:$0xff]  ;;  %v15009_v32 = vld [vmem:[#allocation27_spill] sm:$0xff]  ;;  %v9123_v0 = vld [vmem:[%s14400_s1 + $0x4] ss:$0 sm:$0xff] }
 0x101   :  { %v561_v35 = vsel %vm532_vm1, %v14996_v37, %v560_v3  ;;  %v631_v47 = vadd.f32 %v559_v53, %v448_v13  ;;  %v739_v11 = vrot.slane %v667_v19, 3  ;;  %v743_v1 = vrot.slane %v669_v44, 3  ;;  %v15003_v3 = vld [vmem:[#allocation25_spill] sm:$0xff] }
 0x102   :  { %v632_v61 = vadd.f32 %v561_v35, %v449_v45  ;;  %v802_v33 = vadd.f32 %v14998_v46, %v14997_v2  ;;  %v803_v31 = vadd.f32 %v15000_v25, %v14999_v63  ;;  %v15002_v14 = vrot.slane %v15001_v48, 3  ;;  %v15006_v45 = vld [vmem:[#allocation26_spill] sm:$0xff]  ;;  %v15012_v35 = vld [vmem:[#allocation29_spill] sm:$0xff] }
 0x103   :  { %v15004_v24 = vrot.slane %v15003_v3, 3  ;;  %v15007_v6 = vrot.slane %v15006_v45, 3  ;;  %v15010_v19 = vrot.slane %v15009_v32, 3  ;;  %v842_v53 = vmul.f32 %v9123_v0, %v9382_v38  ;;  %v15015_v3 = vld [vmem:[#allocation36_spill] sm:$0xff] }
 0x104   :  { %v724_v52 = vsel %vm715_vm2, %v15002_v14, %v723_v39  ;;  %v15013_v2 = vrot.slane %v15012_v35, 3  ;;  %v846_v25 = vmul.f32 %v9123_v0, %v9463_v4 }
 0x105   :  { %v726_v9 = vsel %vm715_vm2, %v723_v39, %v15004_v24  ;;  %v15005_v23 = vmov %v15004_v24  ;;  %v730_v27 = vsel %vm715_vm2, %v727_v43, %v15007_v6  ;;  %v15008_v20 = vmov %v15007_v6 }
 0x106   :  { %v728_v13 = vsel %vm715_vm2, %v15005_v23, %v727_v43  ;;  %v732_v63 = vsel %vm715_vm2, %v15008_v20, %v731_v55  ;;  %v734_v44 = vsel %vm715_vm2, %v731_v55, %v15010_v19  ;;  %v844_v39 = vmul.f32 %v9123_v0, %v9420_v49 }
 0x107   :  { %v15011_v37 = vmov %v15010_v19  ;;  %v738_v46 = vsel %vm715_vm2, %v735_v57, %v15013_v2  ;;  %v848_v55 = vmul.f32 %v9123_v0, %v9493_v22  ;;  %v15014_v48 = vmov %v15013_v2 }
 0x108   :  { %v736_v43 = vsel %vm715_vm2, %v15011_v37, %v735_v57  ;;  %v740_v14 = vsel %vm715_vm2, %v15014_v48, %v739_v11  ;;  %v15016_v24 = vrot.slane %v15015_v3, 3  ;;  %v850_v20 = vmul.f32 %v9123_v0, %v9526_v56 }
 0x109   :  { %v805_v32 = vadd.f32 %v724_v52, %v622_v8  ;;  %v806_v57 = vadd.f32 %v726_v9, %v623_v10  ;;  %v807_v19 = vadd.f32 %v728_v13, %v624_v21  ;;  %v852_v37 = vmul.f32 %v9123_v0, %v9581_v58  ;;  %v15020_v8 = vld [vmem:[#allocation7_spill] sm:$0xff]  ;;  %v15025_v9 = vld [vmem:[#allocation30_spill] sm:$0xff] }
 0x10a   :  { %v742_v23 = vsel %vm715_vm2, %v739_v11, %v15016_v24  ;;  %v15017_v45 = vmov %v15016_v24  ;;  %v808_v2 = vadd.f32 %v730_v27, %v625_v17  ;;  %v809_v59 = vadd.f32 %v732_v63, %v626_v50  ;;  %v15022_v52 = vld [vmem:[#allocation31_spill] sm:$0xff] }
 0x10b   :  { %v744_v6 = vsel %vm715_vm2, %v15017_v45, %v743_v1  ;;  %v906_v35 = vrot.slane %v842_v53, 4  ;;  %v910_v62 = vrot.slane %v844_v39, 4  ;;  %v810_v48 = vadd.f32 %v734_v44, %v627_v60  ;;  %v15018_v45 = vld [vmem:[#allocation12_spill] sm:$0xff] }
 0x10c   :  { %v811_v15 = vadd.f32 %v736_v43, %v628_v28  ;;  %v914_v51 = vrot.slane %v846_v25, 4  ;;  %v918_v54 = vrot.slane %v848_v55, 4  ;;  %v812_v11 = vadd.f32 %v738_v46, %v629_v40  ;;  %v15033_v43 = vld [vmem:[#allocation38_spill] sm:$0xff] }
 0x10d   :  { %v813_v24 = vadd.f32 %v740_v14, %v630_v42  ;;  %v814_v3 = vadd.f32 %v742_v23, %v631_v47  ;;  %v922_v16 = vrot.slane %v850_v20, 4  ;;  %v815_v1 = vadd.f32 %v744_v6, %v632_v61  ;;  %v15027_v42 = vld [vmem:[#allocation32_spill] sm:$0xff]  ;;  %v15036_v23 = vld [vmem:[#allocation39_spill] sm:$0xff] }
 0x10e   :  { %v15019_v12 = vrot.slane %v15018_v45, 4  ;;  %v15021_v10 = vrot.slane %v15020_v8, 4  ;;  %v15023_v17 = vrot.slane %v15022_v52, 4  ;;  %v926_v28 = vrot.slane %v852_v37, 4 }
 0x10f   :  { %v15026_v13 = vrot.slane %v15025_v9, 4  ;;  %v15028_v47 = vrot.slane %v15027_v42, 4  ;;  %v15034_v46 = vrot.slane %v15033_v43, 4  ;;  %v15037_v6 = vrot.slane %v15036_v23, 4 }
 0x110   :  { %v901_v21 = vsel %vm898_vm3, %v15021_v10, %v15019_v12  ;;  %v15024_v50 = vmov %v15019_v12  ;;  %v15030_v12 = vld [vmem:[#allocation37_spill] sm:$0xff] }
 0x111   :  { %v903_v60 = vsel %vm898_vm3, %v15024_v50, %v15023_v17  ;;  %v907_v40 = vsel %vm898_vm3, %v15026_v13, %v906_v35  ;;  %v909_v61 = vsel %vm898_vm3, %v906_v35, %v15028_v47  ;;  %v15029_v27 = vmov %v15028_v47  ;;  %v15039_v35 = vld [vmem:[#allocation40_spill] sm:$0xff] }
 0x112   :  { %v911_v63 = vsel %vm898_vm3, %v15029_v27, %v910_v62  ;;  %v15031_v44 = vrot.slane %v15030_v12, 4  ;;  %v917_v25 = vsel %vm898_vm3, %v914_v51, %v15034_v46  ;;  %v15035_v55 = vmov %v15034_v46 }
 0x113   :  { %v919_v14 = vsel %vm898_vm3, %v15035_v55, %v918_v54  ;;  %v921_v20 = vsel %vm898_vm3, %v918_v54, %v15037_v6  ;;  %v15038_v37 = vmov %v15037_v6  ;;  %v15040_v45 = vrot.slane %v15039_v35, 4 }
 0x114   :  { %v913_v0 = vsel %vm898_vm3, %v910_v62, %v15031_v44  ;;  %v15032_v53 = vmov %v15031_v44  ;;  %v923_v62 = vsel %vm898_vm3, %v15038_v37, %v922_v16  ;;  %v985_v50 = vadd.f32 %v901_v21, %v802_v33 }
 0x115   :  { %v915_v39 = vsel %vm898_vm3, %v15032_v53, %v914_v51  ;;  %v925_v8 = vsel %vm898_vm3, %v922_v16, %v15040_v45  ;;  %v9124_v51 = vld [vmem:[%s14400_s1 + $0x5] ss:$0 sm:$0xff]  ;;  %v15041_v17 = vmov %v15040_v45  ;;  %v986_v9 = vadd.f32 %v903_v60, %v803_v31 }
 0x116   :  { %v1025_v10 = vmul.f32 %v9124_v51, %v9382_v38  ;;  %v1027_v52 = vmul.f32 %v9124_v51, %v9420_v49  ;;  %v927_v54 = vsel %vm898_vm3, %v15041_v17, %v926_v28  ;;  %v1029_v13 = vmul.f32 %v9124_v51, %v9463_v4 }
 0x117   :  { %v988_v42 = vadd.f32 %v907_v40, %v805_v32  ;;  %v989_v47 = vadd.f32 %v909_v61, %v806_v57  ;;  %v990_v27 = vadd.f32 %v911_v63, %v807_v19  ;;  %v1031_v16 = vmul.f32 %v9124_v51, %v9493_v22  ;;  %v15042_v32 = vld [vmem:[#allocation13_spill] sm:$0xff]  ;;  %v15044_v19 = vld [vmem:[#allocation8_spill] sm:$0xff] }
 0x118   :  { %v991_v12 = vadd.f32 %v913_v0, %v808_v2  ;;  %v992_v44 = vadd.f32 %v915_v39, %v809_v59  ;;  %v1033_v53 = vmul.f32 %v9124_v51, %v9526_v56  ;;  %v1035_v43 = vmul.f32 %v9124_v51, %v9581_v58 }
 0x119   :  { %v993_v46 = vadd.f32 %v917_v25, %v810_v48  ;;  %v994_v55 = vadd.f32 %v919_v14, %v811_v15  ;;  %v1089_v23 = vrot.slane %v1025_v10, 5  ;;  %v1093_v6 = vrot.slane %v1027_v52, 5 }
 0x11a   :  { %v995_v28 = vadd.f32 %v921_v20, %v812_v11  ;;  %v996_v33 = vadd.f32 %v923_v62, %v813_v24  ;;  %v997_v31 = vadd.f32 %v925_v8, %v814_v3  ;;  %v1097_v21 = vrot.slane %v1029_v13, 5  ;;  %v10783_v8 = vld [vmem:[%s14400_s1 + $0x6] ss:$0 sm:$0xff] }
 0x11b   :  { %v998_v60 = vadd.f32 %v927_v54, %v815_v1  ;;  %v15043_v57 = vrot.slane %v15042_v32, 5  ;;  %v15045_v40 = vrot.slane %v15044_v19, 5  ;;  %v15046_v59 = vrot.slane %v10022_v36, 5 }
 0x11c   :  { %v1101_v15 = vrot.slane %v1031_v16, 5  ;;  %v1105_v63 = vrot.slane %v1033_v53, 5  ;;  %v1109_v0 = vrot.slane %v1035_v43, 5  ;;  %v15048_v3 = vrot.slane %v10013_v34, 5 }
 0x11d   :  { %v1084_v2 = vsel %vm1081_vm4, %v15045_v40, %v15043_v57  ;;  %v15047_v61 = vmov %v15043_v57  ;;  %v15049_v39 = vrot.slane %v10035_v18, 5  ;;  %v15051_v20 = vrot.slane %v10052_v29, 5 }
 0x11e   :  { %v1086_v48 = vsel %vm1081_vm4, %v15047_v61, %v15046_v59  ;;  %v1168_v11 = vadd.f32 %v1084_v2, %v985_v50  ;;  %v1090_v1 = vsel %vm1081_vm4, %v15048_v3, %v1089_v23  ;;  %v15053_v34 = vrot.slane %v10056_v5, 5 }
 0x11f   :  { %v1169_v24 = vadd.f32 %v1086_v48, %v986_v9  ;;  %v1092_v25 = vsel %vm1081_vm4, %v1089_v23, %v15049_v39  ;;  %v15050_v14 = vmov %v15049_v39  ;;  %v1096_v37 = vsel %vm1081_vm4, %v1093_v6, %v15051_v20 }
 0x120   :  { %v1094_v36 = vsel %vm1081_vm4, %v15050_v14, %v1093_v6  ;;  %v15052_v62 = vmov %v15051_v20  ;;  %v1100_v45 = vsel %vm1081_vm4, %v1097_v21, %v15053_v34  ;;  %v1208_v18 = vmul.f32 %v10783_v8, %v9382_v38  ;;  %v15059_v14 = vld [vmem:[#allocation14_spill] sm:$0xff] }
 0x121   :  { %v1098_v35 = vsel %vm1081_vm4, %v15052_v62, %v1097_v21  ;;  %v1210_v51 = vmul.f32 %v10783_v8, %v9420_v49  ;;  %v15054_v10 = vmov %v15053_v34  ;;  %v15055_v52 = vrot.slane %v10080_v7, 5 }
 0x122   :  { %v1102_v29 = vsel %vm1081_vm4, %v15054_v10, %v1101_v15  ;;  %v1212_v54 = vmul.f32 %v10783_v8, %v9463_v4  ;;  %v1214_v50 = vmul.f32 %v10783_v8, %v9493_v22  ;;  %v15057_v16 = vrot.slane %v10084_v26, 5 }
 0x123   :  { %v1104_v17 = vsel %vm1081_vm4, %v1101_v15, %v15055_v52  ;;  %v15056_v9 = vmov %v15055_v52  ;;  %v1216_v23 = vmul.f32 %v10783_v8, %v9526_v56  ;;  %v1171_v6 = vadd.f32 %v1090_v1, %v988_v42 }
 0x124   :  { %v1106_v13 = vsel %vm1081_vm4, %v15056_v9, %v1105_v63  ;;  %v1108_v5 = vsel %vm1081_vm4, %v1105_v63, %v15057_v16  ;;  %v15058_v53 = vmov %v15057_v16  ;;  %v1172_v21 = vadd.f32 %v1092_v25, %v989_v47  ;;  %v15061_v47 = vld [vmem:[#allocation9_spill] sm:$0xff]  ;;  %v15078_v9 = vld [vmem:[#allocation112_spill] sm:$0xff] }
 0x125   :  { %v1110_v43 = vsel %vm1081_vm4, %v15058_v53, %v1109_v0  ;;  %v1173_v32 = vadd.f32 %v1094_v36, %v990_v27  ;;  %v1218_v57 = vmul.f32 %v10783_v8, %v9581_v58  ;;  %v1174_v7 = vadd.f32 %v1096_v37, %v991_v12  ;;  %v15069_v37 = vld [vmem:[#allocation108_spill] sm:$0xff] }
 0x126   :  { %v1175_v19 = vadd.f32 %v1098_v35, %v992_v44  ;;  %v1272_v40 = vrot.slane %v1208_v18, 6  ;;  %v1276_v2 = vrot.slane %v1210_v51, 6  ;;  %v1176_v59 = vadd.f32 %v1100_v45, %v993_v46  ;;  %v15072_v45 = vld [vmem:[#allocation109_spill] sm:$0xff] }
 0x127   :  { %v1177_v61 = vadd.f32 %v1102_v29, %v994_v55  ;;  %v1280_v48 = vrot.slane %v1212_v54, 6  ;;  %v1284_v15 = vrot.slane %v1214_v50, 6  ;;  %v1178_v26 = vadd.f32 %v1104_v17, %v995_v28  ;;  %v15075_v29 = vld [vmem:[#allocation111_spill] sm:$0xff] }
 0x128   :  { %v1179_v63 = vadd.f32 %v1106_v13, %v996_v33  ;;  %v1180_v0 = vadd.f32 %v1108_v5, %v997_v31  ;;  %v1288_v3 = vrot.slane %v1216_v23, 6  ;;  %v1181_v39 = vadd.f32 %v1110_v43, %v998_v60  ;;  %v15066_v33 = vld [vmem:[#allocation107_spill] sm:$0xff]  ;;  %v10855_v5 = vld [vmem:[%s14400_s1 + $0x7] ss:$0 sm:$0xff] }
 0x129   :  { %v15060_v42 = vrot.slane %v15059_v14, 6  ;;  %v15062_v27 = vrot.slane %v15061_v47, 6  ;;  %v15063_v12 = vrot.slane %v10066_v41, 6  ;;  %v1292_v55 = vrot.slane %v1218_v57, 6 }
 0x12a   :  { %v15065_v25 = vrot.slane %v10040_v30, 6  ;;  %v15067_v31 = vrot.slane %v15066_v33, 6  ;;  %v15070_v62 = vrot.slane %v15069_v37, 6  ;;  %v15073_v30 = vrot.slane %v15072_v45, 6 }
 0x12b   :  { %v1267_v1 = vsel %vm1264_vm5, %v15062_v27, %v15060_v42  ;;  %v15064_v44 = vmov %v15060_v42  ;;  %v15076_v52 = vrot.slane %v15075_v29, 6  ;;  %v15079_v13 = vrot.slane %v15078_v9, 6  ;;  %v15093_v29 = vld [vmem:[#allocation114_spill] sm:$0xff] }
 0x12c   :  { %v1269_v46 = vsel %vm1264_vm5, %v15064_v44, %v15063_v12  ;;  %v1273_v28 = vsel %vm1264_vm5, %v15065_v25, %v1272_v40  ;;  %v1275_v60 = vsel %vm1264_vm5, %v1272_v40, %v15067_v31  ;;  %v15068_v36 = vmov %v15067_v31 }
 0x12d   :  { %v1277_v20 = vsel %vm1264_vm5, %v15068_v36, %v1276_v2  ;;  %v1279_v41 = vsel %vm1264_vm5, %v1276_v2, %v15070_v62  ;;  %v15071_v35 = vmov %v15070_v62  ;;  %v1283_v18 = vsel %vm1264_vm5, %v1280_v48, %v15073_v30 }
 0x12e   :  { %v1281_v34 = vsel %vm1264_vm5, %v15071_v35, %v1280_v48  ;;  %v15074_v51 = vmov %v15073_v30  ;;  %v1287_v17 = vsel %vm1264_vm5, %v1284_v15, %v15076_v52  ;;  %v15077_v54 = vmov %v15076_v52  ;;  %v15085_v35 = vld [vmem:[#allocation110_spill] sm:$0xff] }
 0x12f   :  { %v1285_v10 = vsel %vm1264_vm5, %v15074_v51, %v1284_v15  ;;  %v1289_v50 = vsel %vm1264_vm5, %v15077_v54, %v1288_v3  ;;  %v1291_v16 = vsel %vm1264_vm5, %v1288_v3, %v15079_v13  ;;  %v1391_v53 = vmul.f32 %v10855_v5, %v9382_v38  ;;  %v15096_v54 = vld [vmem:[#allocation115_spill] sm:$0xff] }
 0x130   :  { %v1393_v43 = vmul.f32 %v10855_v5, %v9420_v49  ;;  %v15080_v23 = vmov %v15079_v13  ;;  %v1351_v40 = vadd.f32 %v1267_v1, %v1168_v11  ;;  %v1395_v2 = vmul.f32 %v10855_v5, %v9463_v4 }
 0x131   :  { %v1293_v57 = vsel %vm1264_vm5, %v15080_v23, %v1292_v55  ;;  %v1397_v48 = vmul.f32 %v10855_v5, %v9493_v22  ;;  %v1352_v15 = vadd.f32 %v1269_v46, %v1169_v24  ;;  %v1354_v3 = vadd.f32 %v1273_v28, %v1171_v6  ;;  %v15081_v24 = vld [vmem:[#allocation15_spill] sm:$0xff]  ;;  %v15083_v46 = vld [vmem:[#allocation10_spill] sm:$0xff] }
 0x132   :  { %v1399_v14 = vmul.f32 %v10855_v5, %v9526_v56  ;;  %v1401_v42 = vmul.f32 %v10855_v5, %v9581_v58  ;;  %v1355_v47 = vadd.f32 %v1275_v60, %v1172_v21  ;;  %v1356_v27 = vadd.f32 %v1277_v20, %v1173_v32  ;;  %v15088_v60 = vld [vmem:[#allocation106_spill] sm:$0xff] }
 0x133   :  { %v1357_v12 = vadd.f32 %v1279_v41, %v1174_v7  ;;  %v1358_v44 = vadd.f32 %v1281_v34, %v1175_v19  ;;  %v1359_v55 = vadd.f32 %v1283_v18, %v1176_v59  ;;  %v1360_v11 = vadd.f32 %v1285_v10, %v1177_v61  ;;  %v15090_v34 = vld [vmem:[#allocation113_spill] sm:$0xff] }
 0x134   :  { %v1455_v1 = vrot.slane %v1391_v53, 7  ;;  %v1459_v25 = vrot.slane %v1393_v43, 7  ;;  %v1361_v33 = vadd.f32 %v1287_v17, %v1178_v26  ;;  %v1362_v31 = vadd.f32 %v1289_v50, %v1179_v63  ;;  %v15099_v53 = vld [vmem:[#allocation116_spill] sm:$0xff] }
 0x135   :  { %v1463_v36 = vrot.slane %v1395_v2, 7  ;;  %v1467_v37 = vrot.slane %v1397_v48, 7  ;;  %v15082_v6 = vrot.slane %v15081_v24, 7  ;;  %v15084_v28 = vrot.slane %v15083_v46, 7  ;;  %v15102_v2 = vld [vmem:[#allocation117_spill] sm:$0xff] }
 0x136   :  { %v15086_v45 = vrot.slane %v15085_v35, 7  ;;  %v1471_v7 = vrot.slane %v1399_v14, 7  ;;  %v1475_v19 = vrot.slane %v1401_v42, 7  ;;  %v1363_v59 = vadd.f32 %v1291_v16, %v1180_v0 }
 0x137   :  { %v1450_v62 = vsel %vm1447_vm6, %v15084_v28, %v15082_v6  ;;  %v15087_v21 = vmov %v15082_v6  ;;  %v1364_v61 = vadd.f32 %v1293_v57, %v1181_v39  ;;  %v15089_v20 = vrot.slane %v15088_v60, 7 }
 0x138   :  { %v1452_v32 = vsel %vm1447_vm6, %v15087_v21, %v15086_v45  ;;  %v1534_v26 = vadd.f32 %v1450_v62, %v1351_v40  ;;  %v15091_v30 = vrot.slane %v15090_v34, 7  ;;  %v15094_v52 = vrot.slane %v15093_v29, 7  ;;  %v15105_v21 = vld [vmem:[#allocation6_spill] sm:$0xff]  ;;  %v15108_v34 = vld [vmem:[#allocation120_spill] sm:$0xff] }
 0x139   :  { %v1535_v63 = vadd.f32 %v1452_v32, %v1352_v15  ;;  %v1456_v41 = vsel %vm1447_vm6, %v15089_v20, %v1455_v1  ;;  %v15097_v50 = vrot.slane %v15096_v54, 7  ;;  %v15100_v43 = vrot.slane %v15099_v53, 7  ;;  %v15106_v32 = vld [vmem:[#allocation118_spill] sm:$0xff] }
 0x13a   :  { %v1458_v18 = vsel %vm1447_vm6, %v1455_v1, %v15091_v30  ;;  %v15092_v51 = vmov %v15091_v30  ;;  %v1462_v17 = vsel %vm1447_vm6, %v1459_v25, %v15094_v52  ;;  %v15095_v0 = vmov %v15094_v52  ;;  %v15110_v52 = vld [vmem:[#allocation124_spill] sm:$0xff] }
 0x13b   :  { %v1460_v10 = vsel %vm1447_vm6, %v15092_v51, %v1459_v25  ;;  %v1464_v39 = vsel %vm1447_vm6, %v15095_v0, %v1463_v36  ;;  %v1466_v9 = vsel %vm1447_vm6, %v1463_v36, %v15097_v50  ;;  %v15098_v13 = vmov %v15097_v50  ;;  %v15109_v51 = vld [vmem:[#allocation123_spill] sm:$0xff] }
 0x13c   :  { %v1468_v16 = vsel %vm1447_vm6, %v15098_v13, %v1467_v37  ;;  %v1470_v23 = vsel %vm1447_vm6, %v1467_v37, %v15100_v43  ;;  %v15101_v57 = vmov %v15100_v43  ;;  %v15103_v48 = vrot.slane %v15102_v2, 7  ;;  %v15111_v50 = vld [vmem:[#allocation127_spill] sm:$0xff] }
 0x13d   :  { %v1472_v40 = vsel %vm1447_vm6, %v15101_v57, %v1471_v7  ;;  %v1537_v1 = vadd.f32 %v1456_v41, %v1354_v3  ;;  %v1538_v25 = vadd.f32 %v1458_v18, %v1355_v47  ;;  %v1539_v36 = vadd.f32 %v1460_v10, %v1356_v27  ;;  %v15107_v47 = vld [vmem:[#allocation119_spill] sm:$0xff]  ;;  %v10941_v41 = vpop.permute.xlu1 %1630 }
 0x13e   :  { %v1474_v15 = vsel %vm1447_vm6, %v1471_v7, %v15103_v48  ;;  %v15104_v14 = vmov %v15103_v48  ;;  %v1540_v24 = vadd.f32 %v1462_v17, %v1357_v12  ;;  %v1541_v6 = vadd.f32 %v1464_v39, %v1358_v44  ;;  %v15112_v57 = vld [vmem:[#allocation131_spill] sm:$0xff]  ;;  %v15113_v48 = vld [vmem:[#allocation132_spill] sm:$0xff] }
 0x13f   :  { %v1476_v42 = vsel %vm1447_vm6, %v15104_v14, %v1475_v19  ;;  %v1542_v46 = vadd.f32 %v1466_v9, %v1359_v55  ;;  %v1543_v28 = vadd.f32 %v1468_v16, %v1360_v11  ;;  %v1544_v37 = vadd.f32 %v1470_v23, %v1361_v33 }
 0x140   :  { %v1545_v62 = vadd.f32 %v1472_v40, %v1362_v31  ;;  %v1546_v35 = vadd.f32 %v1474_v15, %v1363_v59  ;;  %v1547_v45 = vadd.f32 %v1476_v42, %v1364_v61  ;;  %v1570_v60 = vmul.f32 %v15106_v32, %v15105_v21  ;;  %v15114_v42 = vld [vmem:[#allocation122_spill] sm:$0xff] }
 0x141   :  { %v1573_v7 = vmul.f32 %v15106_v32, %v9382_v38  ;;  %v1575_v19 = vmul.f32 %v15106_v32, %v9420_v49  ;;  %v1577_v3 = vmul.f32 %v15106_v32, %v9463_v4  ;;  %v1644_v27 = vmul.f32 %v15107_v47, %v15105_v21 }
 0x142   :  { %v1647_v12 = vmul.f32 %v15107_v47, %v9382_v38  ;;  %v1579_v44 = vmul.f32 %v15106_v32, %v9493_v22  ;;  %v1581_v55 = vmul.f32 %v15106_v32, %v9526_v56  ;;  %v1649_v11 = vmul.f32 %v15107_v47, %v9420_v49 }
 0x143   :  { %v1651_v33 = vmul.f32 %v15107_v47, %v9463_v4  ;;  %v1583_v31 = vmul.f32 %v15106_v32, %v9581_v58  ;;  %v1598_v59 = vadd.f32 %v1570_v60, %v1534_v26  ;;  %v1653_v61 = vmul.f32 %v15107_v47, %v9493_v22 }
 0x144   :  { %v1655_v20 = vmul.f32 %v15107_v47, %v9526_v56  ;;  %v1599_v30 = vadd.f32 %v15108_v34, %v1535_v63  ;;  %v1601_v18 = vadd.f32 %v1573_v7, %v1537_v1  ;;  %v1602_v10 = vadd.f32 %v15109_v51, %v1538_v25  ;;  %v15130_v51 = vld [vmem:[#allocation135_spill] sm:$0xff] }
 0x145   :  { %v1603_v29 = vadd.f32 %v1575_v19, %v1539_v36  ;;  %v1604_v17 = vadd.f32 %v15110_v52, %v1540_v24  ;;  %v1657_v0 = vmul.f32 %v15107_v47, %v9581_v58  ;;  %v1704_v26 = vrot.slane %v1644_v27, 1  ;;  %v15116_v36 = vld [vmem:[#allocation121_spill] sm:$0xff] }
 0x146   :  { %v1709_v39 = vrot.slane %v1647_v12, 1  ;;  %v1605_v54 = vadd.f32 %v1577_v3, %v1541_v6  ;;  %v1606_v9 = vadd.f32 %v15111_v50, %v1542_v46  ;;  %v1713_v13 = vrot.slane %v1649_v11, 1  ;;  %v15118_v46 = vld [vmem:[#allocation125_spill] sm:$0xff] }
 0x147   :  { %v1717_v16 = vrot.slane %v1651_v33, 1  ;;  %v1607_v53 = vadd.f32 %v1579_v44, %v1543_v28  ;;  %v1658_v63 = vmul.f32 %v15107_v47, %v10941_v41  ;;  %v1721_v43 = vrot.slane %v1653_v61, 1  ;;  %v15124_v47 = vld [vmem:[#allocation129_spill] sm:$0xff] }
 0x148   :  { %v1725_v23 = vrot.slane %v1655_v20, 1  ;;  %v1608_v40 = vadd.f32 %v15112_v57, %v1544_v37  ;;  %v1609_v2 = vadd.f32 %v1581_v55, %v1545_v62  ;;  %v1610_v15 = vadd.f32 %v15113_v48, %v1546_v35  ;;  %v15121_v62 = vld [vmem:[#allocation128_spill] sm:$0xff]  ;;  %v15127_v11 = vld [vmem:[#allocation133_spill] sm:$0xff]  ;;  %v15134_v48 = vld [vmem:[#allocation142_spill] sm:$0xff] }
 0x149   :  { %v1611_v14 = vadd.f32 %v1583_v31, %v1547_v45  ;;  %v15115_v1 = vrot.slane %v15114_v42, 1  ;;  %v15117_v24 = vrot.slane %v15116_v36, 1  ;;  %v15119_v28 = vrot.slane %v15118_v46, 1 }
 0x14a   :  { %v1729_v60 = vrot.slane %v1657_v0, 1  ;;  %v15122_v35 = vrot.slane %v15121_v62, 1  ;;  %v15125_v27 = vrot.slane %v15124_v47, 1  ;;  %v15128_v33 = vrot.slane %v15127_v11, 1 }
 0x14b   :  { %v1706_v25 = vsel %vm349_vm0, %v1704_v26, %v15115_v1  ;;  %v1710_v6 = vsel %vm349_vm0, %v15117_v24, %v1709_v39  ;;  %v1712_v32 = vsel %vm349_vm0, %v1709_v39, %v15119_v28  ;;  %v15120_v7 = vmov %v15119_v28  ;;  %v15132_v26 = vld [vmem:[#allocation126_spill] sm:$0xff] }
 0x14c   :  { %v1714_v37 = vsel %vm349_vm0, %v15120_v7, %v1713_v13  ;;  %v1716_v45 = vsel %vm349_vm0, %v1713_v13, %v15122_v35  ;;  %v15123_v19 = vmov %v15122_v35  ;;  %v1720_v12 = vsel %vm349_vm0, %v1717_v16, %v15125_v27  ;;  %v15135_v1 = vld [vmem:[#allocation134_spill] sm:$0xff] }
 0x14d   :  { %v1718_v3 = vsel %vm349_vm0, %v15123_v19, %v1717_v16  ;;  %v15126_v44 = vmov %v15125_v27  ;;  %v1724_v31 = vsel %vm349_vm0, %v1721_v43, %v15128_v33  ;;  %v15129_v61 = vmov %v15128_v33 }
 0x14e   :  { %v1722_v55 = vsel %vm349_vm0, %v15126_v44, %v1721_v43  ;;  %v1726_v20 = vsel %vm349_vm0, %v15129_v61, %v1725_v23  ;;  %v1731_v34 = vrot.slane %v1658_v63, 1  ;;  %v15131_v52 = vrot.slane %v15130_v51, 1 }
 0x14f   :  { %v1826_v39 = vmul.f32 %v15132_v26, %v15105_v21  ;;  %v1829_v50 = vmul.f32 %v15132_v26, %v9382_v38  ;;  %v1831_v13 = vmul.f32 %v15132_v26, %v9420_v49  ;;  %v1790_v57 = vadd.f32 %v1706_v25, %v1598_v59 }
 0x150   :  { %v1728_v0 = vsel %vm349_vm0, %v1725_v23, %v15131_v52  ;;  %v15133_v16 = vmov %v15131_v52  ;;  %v1833_v63 = vmul.f32 %v15132_v26, %v9463_v4  ;;  %v1835_v23 = vmul.f32 %v15132_v26, %v9493_v22 }
 0x151   :  { %v1730_v43 = vsel %vm349_vm0, %v15133_v16, %v1729_v60  ;;  %v1791_v42 = vadd.f32 %v15134_v48, %v1599_v30  ;;  %v1792_v36 = vadd.f32 %v1710_v6, %v15135_v1  ;;  %v1837_v24 = vmul.f32 %v15132_v26, %v9526_v56 }
 0x152   :  { %v1839_v46 = vmul.f32 %v15132_v26, %v9581_v58  ;;  %v1732_v28 = vsel %vm349_vm0, %v1729_v60, %v1731_v34  ;;  %v1793_v7 = vadd.f32 %v1712_v32, %v1601_v18  ;;  %v1794_v59 = vadd.f32 %v1714_v37, %v1602_v10  ;;  %v15136_v10 = vld [vmem:[#allocation136_spill] sm:$0xff]  ;;  %v15138_v32 = vld [vmem:[#allocation130_spill] sm:$0xff] }
 0x153   :  { %v1795_v25 = vadd.f32 %v1716_v45, %v1603_v29  ;;  %v1796_v62 = vadd.f32 %v1718_v3, %v1604_v17  ;;  %v1886_v35 = vrot.slane %v1826_v39, 2  ;;  %v1891_v19 = vrot.slane %v1829_v50, 2 }
 0x154   :  { %v1895_v47 = vrot.slane %v1831_v13, 2  ;;  %v1797_v27 = vadd.f32 %v1720_v12, %v1605_v54  ;;  %v1798_v44 = vadd.f32 %v1722_v55, %v1606_v9  ;;  %v1899_v30 = vrot.slane %v1833_v63, 2  ;;  %v15140_v9 = vld [vmem:[#allocation137_spill] sm:$0xff]  ;;  %v15146_v55 = vld [vmem:[#allocation139_spill] sm:$0xff] }
 0x155   :  { %v1903_v11 = vrot.slane %v1835_v23, 2  ;;  %v1799_v6 = vadd.f32 %v1724_v31, %v1607_v53  ;;  %v1800_v33 = vadd.f32 %v1726_v20, %v1608_v40  ;;  %v1907_v61 = vrot.slane %v1837_v24, 2  ;;  %v15152_v63 = vld [vmem:[#allocation143_spill] sm:$0xff] }
 0x156   :  { %v1911_v51 = vrot.slane %v1839_v46, 2  ;;  %v1801_v52 = vadd.f32 %v1728_v0, %v1609_v2  ;;  %v1802_v16 = vadd.f32 %v1730_v43, %v1610_v15  ;;  %v1803_v48 = vadd.f32 %v1732_v28, %v1611_v14  ;;  %v15143_v15 = vld [vmem:[#allocation138_spill] sm:$0xff] }
 0x157   :  { %v1840_v18 = vmul.f32 %v15132_v26, %v10941_v41  ;;  %v15137_v29 = vrot.slane %v15136_v10, 2  ;;  %v15139_v60 = vrot.slane %v15138_v32, 2  ;;  %v15141_v37 = vrot.slane %v15140_v9, 2  ;;  %v15149_v26 = vld [vmem:[#allocation141_spill] sm:$0xff] }
 0x158   :  { %v15144_v14 = vrot.slane %v15143_v15, 2  ;;  %v15147_v31 = vrot.slane %v15146_v55, 2  ;;  %v15150_v39 = vrot.slane %v15149_v26, 2  ;;  %v15153_v23 = vrot.slane %v15152_v63, 2  ;;  %v15156_v10 = vld [vmem:[#allocation149_spill] sm:$0xff] }
 0x159   :  { %v1888_v17 = vsel %vm532_vm1, %v1886_v35, %v15137_v29  ;;  %v1892_v54 = vsel %vm532_vm1, %v15139_v60, %v1891_v19  ;;  %v1894_v53 = vsel %vm532_vm1, %v1891_v19, %v15141_v37  ;;  %v15142_v40 = vmov %v15141_v37  ;;  %v15155_v35 = vld [vmem:[#allocation140_spill] sm:$0xff]  ;;  %v15157_v26 = vld [vmem:[#allocation145_spill] sm:$0xff] }
 0x15a   :  { %v1896_v2 = vsel %vm532_vm1, %v15142_v40, %v1895_v47  ;;  %v1898_v45 = vsel %vm532_vm1, %v1895_v47, %v15144_v14  ;;  %v15145_v3 = vmov %v15144_v14  ;;  %v1902_v20 = vsel %vm532_vm1, %v1899_v30, %v15147_v31 }
 0x15b   :  { %v1900_v12 = vsel %vm532_vm1, %v15145_v3, %v1899_v30  ;;  %v15148_v34 = vmov %v15147_v31  ;;  %v1906_v50 = vsel %vm532_vm1, %v1903_v11, %v15150_v39  ;;  %v15151_v13 = vmov %v15150_v39 }
 0x15c   :  { %v1904_v0 = vsel %vm532_vm1, %v15148_v34, %v1903_v11  ;;  %v1908_v43 = vsel %vm532_vm1, %v15151_v13, %v1907_v61  ;;  %v1910_v1 = vsel %vm532_vm1, %v1907_v61, %v15153_v23  ;;  %v15154_v24 = vmov %v15153_v23 }
 0x15d   :  { %v1912_v46 = vsel %vm532_vm1, %v15154_v24, %v1911_v51  ;;  %v1913_v28 = vrot.slane %v1840_v18, 2  ;;  %v2008_v19 = vmul.f32 %v15155_v35, %v15105_v21  ;;  %v2011_v47 = vmul.f32 %v15155_v35, %v9382_v38 }
 0x15e   :  { %v2013_v30 = vmul.f32 %v15155_v35, %v9420_v49  ;;  %v1972_v11 = vadd.f32 %v1888_v17, %v1790_v57  ;;  %v1973_v29 = vadd.f32 %v15156_v10, %v1791_v42  ;;  %v2015_v61 = vmul.f32 %v15155_v35, %v9463_v4 }
 0x15f   :  { %v2017_v32 = vmul.f32 %v15155_v35, %v9493_v22  ;;  %v1974_v60 = vadd.f32 %v1892_v54, %v1792_v36  ;;  %v1975_v18 = vadd.f32 %v1894_v53, %v1793_v7  ;;  %v1976_v9 = vadd.f32 %v1896_v2, %v1794_v59 }
 0x160   :  { %v2019_v37 = vmul.f32 %v15155_v35, %v9526_v56  ;;  %v1977_v40 = vadd.f32 %v1898_v45, %v1795_v25  ;;  %v1978_v15 = vadd.f32 %v1900_v12, %v1796_v62  ;;  %v2021_v14 = vmul.f32 %v15155_v35, %v9581_v58 }
 0x161   :  { %v2022_v57 = vmul.f32 %v15155_v35, %v10941_v41  ;;  %v1914_v42 = vsel %vm532_vm1, %v1911_v51, %v1913_v28  ;;  %v2068_v17 = vrot.slane %v2008_v19, 3  ;;  %v2073_v3 = vrot.slane %v2011_v47, 3  ;;  %v15159_v51 = vld [vmem:[#allocation144_spill] sm:$0xff]  ;;  %v15170_v35 = vld [vmem:[#allocation151_spill] sm:$0xff] }
 0x162   :  { %v2077_v55 = vrot.slane %v2013_v30, 3  ;;  %v1979_v31 = vadd.f32 %v1902_v20, %v1797_v27  ;;  %v1980_v36 = vadd.f32 %v1904_v0, %v1798_v44  ;;  %v2081_v7 = vrot.slane %v2015_v61, 3  ;;  %v15161_v27 = vld [vmem:[#allocation146_spill] sm:$0xff]  ;;  %v15173_v61 = vld [vmem:[#allocation152_spill] sm:$0xff] }
 0x163   :  { %v2085_v59 = vrot.slane %v2017_v32, 3  ;;  %v1981_v54 = vadd.f32 %v1906_v50, %v1799_v6  ;;  %v1982_v53 = vadd.f32 %v1908_v43, %v1800_v33  ;;  %v1983_v2 = vadd.f32 %v1910_v1, %v1801_v52  ;;  %v15164_v52 = vld [vmem:[#allocation147_spill] sm:$0xff]  ;;  %v15167_v43 = vld [vmem:[#allocation150_spill] sm:$0xff] }
 0x164   :  { %v2089_v25 = vrot.slane %v2019_v37, 3  ;;  %v1984_v62 = vadd.f32 %v1912_v46, %v1802_v16  ;;  %v1985_v45 = vadd.f32 %v1914_v42, %v1803_v48  ;;  %v2093_v12 = vrot.slane %v2021_v14, 3  ;;  %v15175_v14 = vld [vmem:[#allocation148_spill] sm:$0xff] }
 0x165   :  { %v2095_v34 = vrot.slane %v2022_v57, 3  ;;  %v15158_v39 = vrot.slane %v15157_v26, 3  ;;  %v15160_v63 = vrot.slane %v15159_v51, 3  ;;  %v15162_v44 = vrot.slane %v15161_v27, 3  ;;  %v15177_v26 = vld [vmem:[#allocation162_spill] sm:$0xff] }
 0x166   :  { %v15165_v16 = vrot.slane %v15164_v52, 3  ;;  %v15168_v1 = vrot.slane %v15167_v43, 3  ;;  %v15171_v19 = vrot.slane %v15170_v35, 3  ;;  %v15174_v32 = vrot.slane %v15173_v61, 3  ;;  %v15180_v61 = vld [vmem:[#allocation153_spill] sm:$0xff] }
 0x167   :  { %v2070_v13 = vsel %vm715_vm2, %v2068_v17, %v15158_v39  ;;  %v2074_v23 = vsel %vm715_vm2, %v15160_v63, %v2073_v3  ;;  %v2076_v20 = vsel %vm715_vm2, %v2073_v3, %v15162_v44  ;;  %v15163_v6 = vmov %v15162_v44 }
 0x168   :  { %v2078_v33 = vsel %vm715_vm2, %v15163_v6, %v2077_v55  ;;  %v2080_v48 = vsel %vm715_vm2, %v2077_v55, %v15165_v16  ;;  %v15166_v0 = vmov %v15165_v16  ;;  %v2084_v24 = vsel %vm715_vm2, %v2081_v7, %v15168_v1 }
 0x169   :  { %v2082_v50 = vsel %vm715_vm2, %v15166_v0, %v2081_v7  ;;  %v15169_v46 = vmov %v15168_v1  ;;  %v2088_v47 = vsel %vm715_vm2, %v2085_v59, %v15171_v19  ;;  %v15172_v30 = vmov %v15171_v19 }
 0x16a   :  { %v2086_v28 = vsel %vm715_vm2, %v15169_v46, %v2085_v59  ;;  %v2090_v10 = vsel %vm715_vm2, %v15172_v30, %v2089_v25  ;;  %v2092_v37 = vsel %vm715_vm2, %v2089_v25, %v15174_v32  ;;  %v2190_v57 = vmul.f32 %v15175_v14, %v15105_v21 }
 0x16b   :  { %v15176_v42 = vmov %v15174_v32  ;;  %v2096_v3 = vsel %vm715_vm2, %v2093_v12, %v2095_v34  ;;  %v2193_v55 = vmul.f32 %v15175_v14, %v9382_v38  ;;  %v2195_v7 = vmul.f32 %v15175_v14, %v9420_v49 }
 0x16c   :  { %v2094_v17 = vsel %vm715_vm2, %v15176_v42, %v2093_v12  ;;  %v2154_v59 = vadd.f32 %v2070_v13, %v1972_v11  ;;  %v2155_v39 = vadd.f32 %v15177_v26, %v1973_v29  ;;  %v2197_v25 = vmul.f32 %v15175_v14, %v9463_v4  ;;  %v15191_v42 = vld [vmem:[#allocation159_spill] sm:$0xff]  ;;  %v15194_v26 = vld [vmem:[#allocation160_spill] sm:$0xff] }
 0x16d   :  { %v2199_v51 = vmul.f32 %v15175_v14, %v9493_v22  ;;  %v2156_v63 = vadd.f32 %v2074_v23, %v1974_v60  ;;  %v2157_v27 = vadd.f32 %v2076_v20, %v1975_v18  ;;  %v2158_v44 = vadd.f32 %v2078_v33, %v1976_v9 }
 0x16e   :  { %v2201_v12 = vmul.f32 %v15175_v14, %v9526_v56  ;;  %v2159_v34 = vadd.f32 %v2080_v48, %v1977_v40  ;;  %v2203_v6 = vmul.f32 %v15175_v14, %v9581_v58  ;;  %v2204_v11 = vmul.f32 %v15175_v14, %v10941_v41  ;;  %v15178_v48 = vld [vmem:[#allocation154_spill] sm:$0xff] }
 0x16f   :  { %v2250_v29 = vrot.slane %v2190_v57, 4  ;;  %v2160_v13 = vadd.f32 %v2082_v50, %v1978_v15  ;;  %v2161_v52 = vadd.f32 %v2084_v24, %v1979_v31  ;;  %v2255_v16 = vrot.slane %v2193_v55, 4  ;;  %v15182_v50 = vld [vmem:[#allocation156_spill] sm:$0xff] }
 0x170   :  { %v2259_v0 = vrot.slane %v2195_v7, 4  ;;  %v2162_v43 = vadd.f32 %v2086_v28, %v1980_v36  ;;  %v2163_v1 = vadd.f32 %v2088_v47, %v1981_v54  ;;  %v2263_v60 = vrot.slane %v2197_v25, 4 }
 0x171   :  { %v2267_v18 = vrot.slane %v2199_v51, 4  ;;  %v2164_v9 = vadd.f32 %v2090_v10, %v1982_v53  ;;  %v2165_v23 = vadd.f32 %v2092_v37, %v1983_v2  ;;  %v2166_v20 = vadd.f32 %v2094_v17, %v1984_v62  ;;  %v15185_v62 = vld [vmem:[#allocation157_spill] sm:$0xff]  ;;  %v15188_v10 = vld [vmem:[#allocation158_spill] sm:$0xff] }
 0x172   :  { %v2271_v33 = vrot.slane %v2201_v12, 4  ;;  %v2167_v40 = vadd.f32 %v2096_v3, %v1985_v45  ;;  %v15179_v46 = vrot.slane %v15178_v48, 4  ;;  %v2275_v19 = vrot.slane %v2203_v6, 4  ;;  %v15196_v12 = vld [vmem:[#allocation155_spill] sm:$0xff] }
 0x173   :  { %v2277_v30 = vrot.slane %v2204_v11, 4  ;;  %v15181_v15 = vrot.slane %v15180_v61, 4  ;;  %v15183_v36 = vrot.slane %v15182_v50, 4  ;;  %v15186_v45 = vrot.slane %v15185_v62, 4 }
 0x174   :  { %v2252_v35 = vsel %vm898_vm3, %v2250_v29, %v15179_v46  ;;  %v15189_v32 = vrot.slane %v15188_v10, 4  ;;  %v15192_v17 = vrot.slane %v15191_v42, 4  ;;  %v15195_v25 = vrot.slane %v15194_v26, 4  ;;  %v15198_v46 = vld [vmem:[#allocation169_spill] sm:$0xff]  ;;  %v15209_v26 = vld [vmem:[#allocation166_spill] sm:$0xff] }
 0x175   :  { %v2256_v31 = vsel %vm898_vm3, %v15181_v15, %v2255_v16  ;;  %v2258_v54 = vsel %vm898_vm3, %v2255_v16, %v15183_v36  ;;  %v15184_v53 = vmov %v15183_v36  ;;  %v2262_v24 = vsel %vm898_vm3, %v2259_v0, %v15186_v45 }
 0x176   :  { %v2260_v2 = vsel %vm898_vm3, %v15184_v53, %v2259_v0  ;;  %v15187_v28 = vmov %v15186_v45  ;;  %v2266_v37 = vsel %vm898_vm3, %v2263_v60, %v15189_v32  ;;  %v15190_v14 = vmov %v15189_v32 }
 0x177   :  { %v2264_v47 = vsel %vm898_vm3, %v15187_v28, %v2263_v60  ;;  %v2268_v57 = vsel %vm898_vm3, %v15190_v14, %v2267_v18  ;;  %v2270_v3 = vsel %vm898_vm3, %v2267_v18, %v15192_v17  ;;  %v15193_v55 = vmov %v15192_v17  ;;  %v11162_v18 = vld [vmem:[%s14400_s1 + $0xd] ss:$0 sm:$0xff] }
 0x178   :  { %v2272_v7 = vsel %vm898_vm3, %v15193_v55, %v2271_v33  ;;  %v2274_v51 = vsel %vm898_vm3, %v2271_v33, %v15195_v25  ;;  %v2372_v6 = vmul.f32 %v15196_v12, %v15105_v21  ;;  %v2375_v11 = vmul.f32 %v15196_v12, %v9382_v38 }
 0x179   :  { %v15197_v29 = vmov %v15195_v25  ;;  %v2278_v0 = vsel %vm898_vm3, %v2275_v19, %v2277_v30  ;;  %v2377_v60 = vmul.f32 %v15196_v12, %v9420_v49  ;;  %v2379_v33 = vmul.f32 %v11162_v18, %v9463_v4 }
 0x17a   :  { %v2276_v16 = vsel %vm898_vm3, %v15197_v29, %v2275_v19  ;;  %v2336_v48 = vadd.f32 %v2252_v35, %v2154_v59  ;;  %v2337_v61 = vadd.f32 %v15198_v46, %v2155_v39  ;;  %v2381_v15 = vmul.f32 %v11162_v18, %v9493_v22  ;;  %v7786_v46 = vld [vmem:[%s14401_s2 + $0x8] sm:$0xff] }
 0x17b   :  { %v2383_v19 = vmul.f32 %v11162_v18, %v9526_v56  ;;  %v2338_v30 = vadd.f32 %v2256_v31, %v2156_v63  ;;  %v2339_v50 = vadd.f32 %v2258_v54, %v2157_v27  ;;  %v2340_v36 = vadd.f32 %v2260_v2, %v2158_v44  ;;  %v15199_v2 = vld [vmem:[#allocation163_spill] sm:$0xff]  ;;  %8400 = vmatprep.subr.mxu1 %v7786_v46 }
 0x17c   :  { %v2385_v53 = vmul.f32 %v11162_v18, %v9581_v58  ;;  %v2341_v62 = vadd.f32 %v2262_v24, %v2159_v34  ;;  %v2342_v45 = vadd.f32 %v2264_v47, %v2160_v13  ;;  %v2432_v28 = vrot.slane %v2372_v6, 5  ;;  %v15201_v24 = vld [vmem:[#allocation161_spill] sm:$0xff]  ;;  %v15203_v47 = vld [vmem:[#allocation164_spill] sm:$0xff]  ;;  %8401 = vmatpush3.msra.mxu1 %v7786_v46 }
 0x17d   :  { %v2437_v10 = vrot.slane %v2375_v11, 5  ;;  %v2343_v32 = vadd.f32 %v2266_v37, %v2161_v52  ;;  %v2344_v59 = vadd.f32 %v2268_v57, %v2162_v43  ;;  %v2441_v35 = vrot.slane %v2377_v60, 5  ;;  %v15212_v11 = vld [vmem:[#allocation167_spill] sm:$0xff]  ;;  %v15224_v46 = vld [vmem:[#allocation184_spill] sm:$0xff] }
 0x17e   :  { %v2445_v39 = vrot.slane %v2379_v33, 5  ;;  %v2345_v14 = vadd.f32 %v2270_v3, %v2163_v1  ;;  %v2386_v42 = vmul.f32 %v11162_v18, %v10941_v41  ;;  %v2449_v17 = vrot.slane %v2381_v15, 5  ;;  %v7893_v15 = vld [vmem:[%s14401_s2 + $0x20] sm:$0xff] }
 0x17f   :  { %v2453_v55 = vrot.slane %v2383_v19, 5  ;;  %v2346_v63 = vadd.f32 %v2272_v7, %v2164_v9  ;;  %v2347_v27 = vadd.f32 %v2274_v51, %v2165_v23  ;;  %v2348_v44 = vadd.f32 %v2276_v16, %v2166_v20  ;;  %v15206_v23 = vld [vmem:[#allocation165_spill] sm:$0xff]  ;;  %v15215_v19 = vld [vmem:[#allocation170_spill] sm:$0xff]  ;;  %8564 = vmatprep.subr.mxu0 %v7893_v15 }
 0x180   :  { %v2457_v31 = vrot.slane %v2385_v53, 5  ;;  %v2349_v54 = vadd.f32 %v2278_v0, %v2167_v40  ;;  %v15200_v34 = vrot.slane %v15199_v2, 5  ;;  %v15202_v52 = vrot.slane %v15201_v24, 5  ;;  %v15218_v2 = vld [vmem:[#allocation185_spill] sm:$0xff]  ;;  %8565 = vmatpush3.msra.mxu0 %v7893_v15  ;;  %v15225_v15 = vld [vmem:[#allocation172_spill] sm:$0xff] }
 0x181   :  { %v15204_v1 = vrot.slane %v15203_v47, 5  ;;  %v15207_v20 = vrot.slane %v15206_v23, 5  ;;  %v15210_v25 = vrot.slane %v15209_v26, 5  ;;  %v15213_v29 = vrot.slane %v15212_v11, 5  ;;  %v15219_v24 = vld [vmem:[#allocation177_spill] sm:$0xff] }
 0x182   :  { %v2434_v13 = vsel %vm1081_vm4, %v2432_v28, %v15200_v34  ;;  %v2438_v43 = vsel %vm1081_vm4, %v15202_v52, %v2437_v10  ;;  %v2459_v33 = vrot.slane %v2386_v42, 5  ;;  %v15216_v53 = vrot.slane %v15215_v19, 5  ;;  %v11220_v42 = vld [vmem:[%s14400_s1 + $0xe] ss:$0 sm:$0xff] }
 0x183   :  { %v2440_v37 = vsel %vm1081_vm4, %v2437_v10, %v15204_v1  ;;  %v15205_v57 = vmov %v15204_v1  ;;  %v2444_v40 = vsel %vm1081_vm4, %v2441_v35, %v15207_v20  ;;  %v15208_v3 = vmov %v15207_v20 }
 0x184   :  { %v2442_v9 = vsel %vm1081_vm4, %v15205_v57, %v2441_v35  ;;  %v2446_v7 = vsel %vm1081_vm4, %v15208_v3, %v2445_v39  ;;  %v2448_v51 = vsel %vm1081_vm4, %v2445_v39, %v15210_v25  ;;  %v15211_v12 = vmov %v15210_v25 }
 0x185   :  { %v2450_v6 = vsel %vm1081_vm4, %v15211_v12, %v2449_v17  ;;  %v2452_v16 = vsel %vm1081_vm4, %v2449_v17, %v15213_v29  ;;  %v15214_v0 = vmov %v15213_v29  ;;  %v2456_v28 = vsel %vm1081_vm4, %v2453_v55, %v15216_v53  ;;  %v15220_v12 = vld [vmem:[#allocation171_spill] sm:$0xff] }
 0x186   :  { %v2454_v60 = vsel %vm1081_vm4, %v15214_v0, %v2453_v55  ;;  %v15217_v10 = vmov %v15216_v53  ;;  %v2518_v39 = vadd.f32 %v2434_v13, %v2336_v48  ;;  %v2554_v17 = vmul.f32 %v11220_v42, %v15105_v21 }
 0x187   :  { %v2458_v35 = vsel %vm1081_vm4, %v15217_v10, %v2457_v31  ;;  %v2819_v34 = vrot.slane %v15218_v2, 7  ;;  %v2519_v52 = vadd.f32 %v15219_v24, %v2337_v61  ;;  %v2520_v47 = vadd.f32 %v2438_v43, %v2338_v30  ;;  %v15228_v24 = vld [vmem:[#allocation173_spill] sm:$0xff]  ;;  %v11444_v2 = vpop.permute.xlu1 %196 }
 0x188   :  { %v2557_v55 = vmul.f32 %v11220_v42, %v9382_v38  ;;  %v2521_v48 = vadd.f32 %v2440_v37, %v2339_v50  ;;  %v2522_v13 = vadd.f32 %v2442_v9, %v2340_v36  ;;  %v2523_v1 = vadd.f32 %v2444_v40, %v2341_v62  ;;  %v7920_v37 = vld [vmem:[%s14401_s2 + $0x28] sm:$0xff]  ;;  %15272 = vst [vmem:[#allocation23_spill] sm:$0xff] %v11444_v2 }
 0x189   :  { %v2559_v57 = vmul.f32 %v11220_v42, %v9420_v49  ;;  %v2460_v23 = vsel %vm1081_vm4, %v2457_v31, %v2459_v33  ;;  %v2524_v20 = vadd.f32 %v2446_v7, %v2342_v45  ;;  %v11231_v3 = vadd.f32 %v2448_v51, %v2343_v32  ;;  %v11248_v32 = vld [vmem:[%s14400_s1 + $0xf] ss:$0 sm:$0xff]  ;;  %8605 = vmatprep.subr.mxu0 %v7920_v37  ;;  %v15234_v37 = vld [vmem:[#allocation179_spill] sm:$0xff] }
 0x18a   :  { %v2561_v61 = vmul.f32 %v11220_v42, %v9463_v4  ;;  %v11235_v30 = vadd.f32 %v2450_v6, %v2344_v59  ;;  %v2563_v43 = vmul.f32 %v11220_v42, %v9493_v22  ;;  %v2565_v50 = vmul.f32 %v11220_v42, %v9526_v56 }
 0x18b   :  { %v2614_v36 = vrot.slane %v2554_v17, 6  ;;  %v11241_v62 = vadd.f32 %v2452_v16, %v2345_v14  ;;  %v2567_v31 = vmul.f32 %v11220_v42, %v9581_v58  ;;  %v2619_v45 = vrot.slane %v2557_v55, 6  ;;  %v15222_v16 = vld [vmem:[#allocation168_spill] sm:$0xff] }
 0x18c   :  { %v2736_v59 = vmul.f32 %v11248_v32, %v15105_v21  ;;  %v11255_v9 = vadd.f32 %v2454_v60, %v2346_v63  ;;  %v11257_v14 = vadd.f32 %v2456_v28, %v2347_v27  ;;  %v2623_v40 = vrot.slane %v2559_v57, 6 }
 0x18d   :  { %v2739_v7 = vmul.f32 %v11248_v32, %v9382_v38  ;;  %v11261_v26 = vadd.f32 %v2458_v35, %v2348_v44  ;;  %v11263_v25 = vadd.f32 %v2460_v23, %v2349_v54  ;;  %v2568_v21 = vmul.f32 %v11220_v42, %v10941_v41 }
 0x18e   :  { %v2627_v51 = vrot.slane %v2561_v61, 6  ;;  %v15221_v6 = vrot.slane %v15220_v12, 6  ;;  %v2631_v11 = vrot.slane %v2563_v43, 6  ;;  %v2635_v27 = vrot.slane %v2565_v50, 6  ;;  %v15231_v43 = vld [vmem:[#allocation174_spill] sm:$0xff]  ;;  %v15236_v12 = vld [vmem:[#allocation175_spill] sm:$0xff] }
 0x18f   :  { %v2796_v29 = vrot.slane %v2736_v59, 7  ;;  %v15223_v0 = vrot.slane %v15222_v16, 6  ;;  %v2639_v33 = vrot.slane %v2567_v31, 6  ;;  %v2701_v54 = vadd.f32 %v15224_v46, %v2519_v52  ;;  %v15239_v16 = vld [vmem:[#allocation187_spill] sm:$0xff]  ;;  %v15240_v46 = vld [vmem:[#allocation176_spill] sm:$0xff] }
 0x190   :  { %v2616_v63 = vsel %vm1264_vm5, %v2614_v36, %v15221_v6  ;;  %v15226_v19 = vrot.slane %v15225_v15, 6  ;;  %v2741_v35 = vmul.f32 %v11248_v32, %v9420_v49  ;;  %v2801_v17 = vrot.slane %v2739_v7, 7 }
 0x191   :  { %v2620_v60 = vsel %vm1264_vm5, %v15223_v0, %v2619_v45  ;;  %v2700_v44 = vadd.f32 %v2616_v63, %v2518_v39  ;;  %v15229_v55 = vrot.slane %v15228_v24, 6  ;;  %v15232_v50 = vrot.slane %v15231_v43, 6 }
 0x192   :  { %v2622_v53 = vsel %vm1264_vm5, %v2619_v45, %v15226_v19  ;;  %v15227_v28 = vmov %v15226_v19  ;;  %v2702_v23 = vadd.f32 %v2620_v60, %v2520_v47  ;;  %v2743_v59 = vmul.f32 %v11248_v32, %v9463_v4 }
 0x193   :  { %v2624_v10 = vsel %vm1264_vm5, %v15227_v28, %v2623_v40  ;;  %v2626_v57 = vsel %vm1264_vm5, %v2623_v40, %v15229_v55  ;;  %v15230_v39 = vmov %v15229_v55  ;;  %v2703_v61 = vadd.f32 %v2622_v53, %v2521_v48  ;;  %v15242_v53 = vld [vmem:[#allocation180_spill] sm:$0xff] }
 0x194   :  { %v2628_v52 = vsel %vm1264_vm5, %v15230_v39, %v2627_v51  ;;  %v2630_v36 = vsel %vm1264_vm5, %v2627_v51, %v15232_v50  ;;  %v15233_v31 = vmov %v15232_v50  ;;  %v15235_v7 = vrot.slane %v15234_v37, 7  ;;  %v15244_v50 = vld [vmem:[#allocation178_spill] sm:$0xff] }
 0x195   :  { %v2632_v45 = vsel %vm1264_vm5, %v15233_v31, %v2631_v11  ;;  %v15237_v6 = vrot.slane %v15236_v12, 6  ;;  %v2883_v0 = vadd.f32 %v15239_v16, %v2701_v54  ;;  %v2641_v60 = vrot.slane %v2568_v21, 6 }
 0x196   :  { %v2798_v40 = vsel %vm1447_vm6, %v2796_v29, %v15235_v7  ;;  %v15241_v15 = vrot.slane %v15240_v46, 7  ;;  %v15243_v28 = vrot.slane %v15242_v53, 7  ;;  %v2805_v24 = vrot.slane %v2741_v35, 7  ;;  %v15254_v46 = vld [vmem:[#allocation182_spill] sm:$0xff] }
 0x197   :  { %v2634_v47 = vsel %vm1264_vm5, %v2631_v11, %v15237_v6  ;;  %v15238_v48 = vmov %v15237_v6  ;;  %v2882_v51 = vadd.f32 %v2798_v40, %v2700_v44  ;;  %v2704_v55 = vadd.f32 %v2624_v10, %v2522_v13  ;;  %v11323_v13 = vld [vmem:[%s14400_s1 + $0x10] ss:$0 sm:$0xff]  ;;  %v15247_v10 = vld [vmem:[#allocation186_spill] sm:$0xff] }
 0x198   :  { %v2636_v63 = vsel %vm1264_vm5, %v15238_v48, %v2635_v27  ;;  %v2802_v19 = vsel %vm1447_vm6, %v15241_v15, %v2801_v17  ;;  %v2804_v29 = vsel %vm1447_vm6, %v2801_v17, %v15243_v28  ;;  %v2705_v39 = vadd.f32 %v2626_v57, %v2523_v1 }
 0x199   :  { %v2884_v11 = vadd.f32 %v2802_v19, %v2702_v23  ;;  %v2885_v43 = vadd.f32 %v2804_v29, %v2703_v61  ;;  %v15245_v31 = vrot.slane %v15244_v50, 6  ;;  %v2745_v37 = vmul.f32 %v11248_v32, %v9493_v22  ;;  %v15250_v61 = vld [vmem:[#allocation181_spill] sm:$0xff] }
 0x19a   :  { %v2809_v7 = vrot.slane %v2743_v59, 7  ;;  %v2706_v40 = vadd.f32 %v2628_v52, %v2524_v20  ;;  %v2920_v1 = vmul.f32 %v11323_v13, %v9382_v38  ;;  %v11328_v35 = vadd.f32 %v15247_v10, %v2882_v51  ;;  %v15252_v51 = vld [vmem:[#allocation189_spill] sm:$0xff] }
 0x19b   :  { %v2638_v44 = vsel %vm1264_vm5, %v2635_v27, %v15245_v31  ;;  %v15246_v54 = vmov %v15245_v31  ;;  %v15248_v27 = vld [vmem:[#allocation188_spill] sm:$0xff]  ;;  %v2642_v57 = vsel %vm1264_vm5, %v2639_v33, %v2641_v60  ;;  %v2707_v23 = vadd.f32 %v2630_v36, %v11231_v3 }
 0x19c   :  { %v2640_v21 = vsel %vm1264_vm5, %v15246_v54, %v2639_v33  ;;  %v11331_v17 = vadd.f32 %v15248_v27, %v2883_v0  ;;  %v15249_v20 = vmov %v15243_v28  ;;  %v15251_v59 = vrot.slane %v15250_v61, 7 }
 0x19d   :  { %v2806_v52 = vsel %vm1447_vm6, %v15249_v20, %v2805_v24  ;;  %v11341_v48 = vadd.f32 %v2920_v1, %v2884_v11  ;;  %v11344_v16 = vadd.f32 %v15252_v51, %v2885_v43  ;;  %v2708_v0 = vadd.f32 %v2632_v45, %v11235_v30  ;;  %v15256_v11 = vld [vmem:[#allocation190_spill] sm:$0xff]  ;;  %v11394_v51 = vpop.permute.xlu0 %186 }
 0x19e   :  { %v2808_v12 = vsel %vm1447_vm6, %v2805_v24, %v15251_v59  ;;  %v2886_v6 = vadd.f32 %v2806_v52, %v2704_v55  ;;  %v2747_v3 = vmul.f32 %v11248_v32, %v9526_v56  ;;  %v15253_v33 = vmov %v15251_v59  ;;  %v15260_v59 = vld [vmem:[#allocation191_spill] sm:$0xff]  ;;  %15261 = vst [vmem:[#allocation11_spill] sm:$0xff] %v11394_v51 }
 0x19f   :  { %v2887_v38 = vadd.f32 %v2808_v12, %v2705_v39  ;;  %v2810_v36 = vsel %vm1447_vm6, %v15253_v33, %v2809_v7  ;;  %v2813_v60 = vrot.slane %v2745_v37, 7  ;;  %v15255_v15 = vrot.slane %v15254_v46, 7 }
 0x1a0   :  { %v2922_v53 = vmul.f32 %v11323_v13, %v9420_v49  ;;  %v2975_v28 = vsel %vm2974_vm7, %v11328_v35, 0.0  ;;  %v2976_v30 = vsel %vm2974_vm7, %v11331_v17, 0.0  ;;  %v2709_v45 = vadd.f32 %v2634_v47, %v11241_v62 }
 0x1a1   :  { %v2812_v19 = vsel %vm1447_vm6, %v2809_v7, %v15255_v15  ;;  %v2888_v29 = vadd.f32 %v2810_v36, %v2706_v40  ;;  %v2977_v55 = vadd.f32 %v2976_v30, %v2975_v28  ;;  %v11365_v43 = vadd.f32 %v15256_v11, %v2887_v38  ;;  %v15258_v40 = vld [vmem:[#allocation183_spill] sm:$0xff] }
 0x1a2   :  { %v2889_v24 = vadd.f32 %v2812_v19, %v2707_v23  ;;  %v11362_v39 = vadd.f32 %v2922_v53, %v2886_v6  ;;  %v2978_v50 = vsel %vm2974_vm7, %v11341_v48, 0.0  ;;  %v2980_v49 = vsel %vm2974_vm7, %v11344_v16, 0.0 }
 0x1a3   :  { %v2710_v31 = vadd.f32 %v2636_v63, %v11255_v9  ;;  %v2749_v54 = vmul.f32 %v11248_v32, %v9581_v58  ;;  %v2750_v62 = vmul.f32 %v11248_v32, %v10941_v41  ;;  %v2979_v47 = vadd.f32 %v2978_v50, %v2977_v55  ;;  %v15266_v55 = vld [vmem:[#allocation91_spill] sm:$0xff]  ;;  %v15268_v50 = vld [vmem:[#allocation96_spill] sm:$0xff] }
 0x1a4   :  { %v15257_v37 = vmov %v15255_v15  ;;  %v15259_v1 = vrot.slane %v15258_v40, 7  ;;  %v2817_v27 = vrot.slane %v2747_v3, 7  ;;  %v2924_v23 = vmul.f32 %v11323_v13, %v9463_v4 }
 0x1a5   :  { %v2814_v7 = vsel %vm1447_vm6, %v15257_v37, %v2813_v60  ;;  %v2711_v9 = vadd.f32 %v2638_v44, %v11257_v14  ;;  %v2981_v52 = vadd.f32 %v2980_v49, %v2979_v47  ;;  %v11388_v12 = vadd.f32 %v15260_v59, %v2889_v24  ;;  %v15271_v47 = vld [vmem:[#allocation18_spill] sm:$0xff] }
 0x1a6   :  { %v2816_v10 = vsel %vm1447_vm6, %v2813_v60, %v15259_v1  ;;  %v2890_v63 = vadd.f32 %v2814_v7, %v2708_v0  ;;  %v11385_v61 = vadd.f32 %v2924_v23, %v2888_v29  ;;  %v2982_v6 = vsel %vm2974_vm7, %v11362_v39, 0.0  ;;  %v15265_v29 = vld [vmem:[#allocation101_spill] sm:$0xff] }
 0x1a7   :  { %v2891_v20 = vadd.f32 %v2816_v10, %v2709_v45  ;;  %v2984_v38 = vsel %vm2974_vm7, %v11365_v43, 0.0  ;;  %v2712_v4 = vadd.f32 %v2640_v21, %v11261_v26  ;;  %v2713_v14 = vadd.f32 %v2642_v57, %v11263_v25  ;;  %v11409_v26 = vld [vmem:[%s14400_s1 + $0x1] ss:$0 sm:$0xff]  ;;  %v15263_v57 = vld [vmem:[#allocation192_spill] sm:$0xff] }
 0x1a8   :  { %v2821_v44 = vrot.slane %v2749_v54, 7  ;;  %v2983_v0 = vadd.f32 %v2982_v6, %v2981_v52  ;;  %v15262_v3 = vmov %v15259_v1  ;;  %v2820_v36 = vsel %vm1447_vm6, %v2817_v27, %v2819_v34  ;;  %v15264_v45 = vld [vmem:[#allocation103_spill] sm:$0xff]  ;;  %v11461_v6 = vld [vmem:[%s14400_s1 + $0x2] ss:$0 sm:$0xff] }
 0x1a9   :  { %v2818_v33 = vsel %vm1447_vm6, %v15262_v3, %v2817_v27  ;;  %v2823_v60 = vrot.slane %v2750_v62, 7  ;;  %v2926_v46 = vmul.f32 %v11323_v13, %v9493_v22  ;;  %v2893_v19 = vadd.f32 %v2820_v36, %v2711_v9 }
 0x1aa   :  { %v2892_v15 = vadd.f32 %v2818_v33, %v2710_v31  ;;  %v2985_v53 = vadd.f32 %v2984_v38, %v2983_v0  ;;  %v11413_v25 = vmul.f32 %v11409_v26, %v11394_v51  ;;  %v11418_v28 = vadd.f32 %v15263_v57, %v2891_v20  ;;  %v15277_v0 = vld [vmem:[#allocation105_spill] sm:$0xff] }
 0x1ab   :  { %v11415_v21 = vadd.f32 %v2926_v46, %v2890_v63  ;;  %v2986_v22 = vsel %vm2974_vm7, %v11385_v61, 0.0  ;;  %v2988_v30 = vsel %vm2974_vm7, %v11388_v12, 0.0  ;;  %v640_v24 = vadd.f32 %v15265_v29, %v15264_v45  ;;  %v11512_v29 = vld [vmem:[%s14400_s1 + $0x5] ss:$0 sm:$0xff] }
 0x1ac   :  { %v15267_v11 = vrot.slane %v15266_v55, 4  ;;  %v15269_v49 = vrot.slane %v15268_v50, 4  ;;  %v2822_v54 = vsel %vm1447_vm6, %v2819_v34, %v2821_v44  ;;  %v2987_v62 = vadd.f32 %v2986_v22, %v2985_v53 }
 0x1ad   :  { %v2929_v37 = vmul.f32 %v11323_v13, %v15271_v47  ;;  %v2824_v7 = vsel %vm1447_vm6, %v2821_v44, %v2823_v60  ;;  %v2894_v40 = vadd.f32 %v2822_v54, %v2712_v4  ;;  %v2928_v1 = vmul.f32 %v11323_v13, %v9526_v56  ;;  %v11454_v56 = vpop.permute.xlu0 %191  ;;  %v11470_v4 = vld [vmem:[%s14400_s1 + $0x3] ss:$0 sm:$0xff]  ;;  %v15282_v47 = vld [vmem:[#allocation87_spill] sm:$0xff] }
 0x1ae   :  { %v11431_v31 = vsel %vm898_vm3, %v15269_v49, %v15267_v11  ;;  %v2895_v10 = vadd.f32 %v2824_v7, %v2713_v14  ;;  %v2930_v27 = vmul.f32 %v11323_v13, %v9581_v58  ;;  %v2989_v23 = vadd.f32 %v2988_v30, %v2987_v62  ;;  %15273 = vst [vmem:[#allocation24_spill] sm:$0xff] %v11454_v56  ;;  %v11503_v30 = vld [vmem:[%s14400_s1 + $0x4] ss:$0 sm:$0xff] }
 0x1af   :  { %15270 = vst [vmem:[#allocation22_spill] sm:$0xff] %v11431_v31  ;;  %v396_v9 = vrot.slane %v11413_v25, 1  ;;  %v11446_v34 = vadd.f32 %v2928_v1, %v2892_v15  ;;  %v11448_v63 = vadd.f32 %v2929_v37, %v2893_v19  ;;  %v2990_v20 = vsel %vm2974_vm7, %v11415_v21, 0.0  ;;  %v15279_v15 = vld [vmem:[#allocation85_spill] sm:$0xff] }
 0x1b0   :  { %v2992_v52 = vsel %vm2974_vm7, %v11418_v28, 0.0  ;;  %v2931_v58 = vmul.f32 %v11323_v13, %v10941_v41  ;;  %v2991_v59 = vadd.f32 %v2990_v20, %v2989_v23  ;;  %v11465_v38 = vmul.f32 %v11461_v6, %v11394_v51  ;;  %v15274_v41 = vld [vmem:[#allocation102_spill] sm:$0xff]  ;;  %v15275_v13 = vld [vmem:[#allocation100_spill] sm:$0xff] }
 0x1b1   :  { %v11474_v14 = vmul.f32 %v11470_v4, %v11394_v51  ;;  %v11478_v44 = vadd.f32 %v15275_v13, %v15274_v41  ;;  %v11481_v3 = vadd.f32 %v15277_v0, %v640_v24  ;;  %v11483_v33 = vadd.f32 %v2930_v27, %v2894_v40  ;;  %v15284_v13 = vld [vmem:[#allocation89_spill] sm:$0xff] }
 0x1b2   :  { %v11487_v36 = vmul.f32 %v11409_v26, %v11444_v2  ;;  %v11489_v60 = vadd.f32 %v2931_v58, %v2895_v10  ;;  %v2993_v46 = vadd.f32 %v2992_v52, %v2991_v59  ;;  %v15280_v19 = vrot.slane %v15279_v15, 1  ;;  %v15286_v15 = vld [vmem:[#allocation90_spill] sm:$0xff] }
 0x1b3   :  { %15276 = vst [vmem:[#allocation28_spill] sm:$0xff] %v11478_v44  ;;  %15278 = vst [vmem:[#allocation35_spill] sm:$0xff] %v11481_v3  ;;  %v314_v25 = vmul.f32 %v11409_v26, %v11454_v56  ;;  %v2994_v57 = vsel %vm2974_vm7, %v11446_v34, 0.0  ;;  %v2996_v22 = vsel %vm2974_vm7, %v11448_v63, 0.0  ;;  %v11507_v45 = vmul.f32 %v11503_v30, %v11394_v51 }
 0x1b4   :  { %v397_v53 = vsel %vm349_vm0, %v15280_v19, %v396_v9  ;;  %v11516_v24 = vmul.f32 %v11512_v29, %v11394_v51  ;;  %v2995_v11 = vadd.f32 %v2994_v57, %v2993_v46  ;;  %v579_v49 = vrot.slane %v11465_v38, 2 }
 0x1b5   :  { %v14666_v54 = vrot.slane %v11474_v14, 3  ;;  %v11522_v62 = vmul.f32 %v10783_v8, %v11394_v51  ;;  %v458_v37 = vadd.f32 %v397_v53, %v15282_v47  ;;  %v11527_v7 = vmul.f32 %v10855_v5, %v11394_v51  ;;  %v11537_v8 = vld [vmem:[%s14400_s1] ss:$0 sm:$0xff] }
 0x1b6   :  { %v14665_v40 = vrot.slane %v11487_v36, 1  ;;  %v398_v1 = vrot.slane %v314_v25, 1  ;;  %v2997_v10 = vadd.f32 %v2996_v22, %v2995_v11  ;;  %v2998_v27 = vsel %vm2974_vm7, %v11483_v33, 0.0  ;;  %v11562_v11 = vld [vmem:[%s14400_s1 + $0x9] ss:$0 sm:$0xff] }
 0x1b7   :  { %15281 = vst [vmem:[#allocation19_spill] sm:$0xff] %v11522_v62  ;;  %15283 = vst [vmem:[#allocation16_spill] sm:$0xff] %v11527_v7  ;;  %v3000_v23 = vsel %vm2974_vm7, %v11489_v60, 0.0  ;;  %v238_v20 = vmul.f32 %v11537_v8, %v11394_v51  ;;  %v14667_v52 = vrot.slane %v11507_v45, 4  ;;  %v14670_v58 = vrot.slane %v11516_v24, 5  ;;  %v15290_v25 = vld [vmem:[#allocation92_spill] sm:$0xff] }
 0x1b8   :  { %v11545_v59 = vmul.f32 %v11461_v6, %v11444_v2  ;;  %v497_v38 = vmul.f32 %v11461_v6, %v11454_v56  ;;  %v2999_v41 = vadd.f32 %v2998_v27, %v2997_v10  ;;  %v15285_v0 = vrot.slane %v15284_v13, 2 }
 0x1b9   :  { %v15287_v19 = vrot.slane %v15286_v15, 3  ;;  %v11566_v47 = vmul.f32 %v11562_v11, %v11394_v51  ;;  %v401_v10 = vsel %vm349_vm0, %v398_v1, %v14665_v40  ;;  %v11573_v13 = vmul.f32 %v11470_v4, %v11444_v2 }
 0x1ba   :  { %v580_v46 = vsel %vm532_vm1, %v15285_v0, %v579_v49  ;;  %v3001_v27 = vadd.f32 %v3000_v23, %v2999_v41  ;;  %v399_v0 = vsel %vm349_vm0, %v396_v9, %v398_v1  ;;  %v11581_v15 = vmul.f32 %v11503_v30, %v11444_v2 }
 0x1bb   :  { %v763_v53 = vsel %vm715_vm2, %v15287_v19, %v14666_v54  ;;  %v641_v57 = vadd.f32 %v580_v46, %v458_v37  ;;  %15288 = vst [vmem:[#allocation20_spill] sm:$0xff] %v11566_v47  ;;  %v239_v37 = vmul.f32 %v11537_v8, %v11454_v56  ;;  %v581_v19 = vrot.slane %v497_v38, 2  ;;  %v11604_v46 = vld [vmem:[%s14400_s1 + $0x8] ss:$0 sm:$0xff]  ;;  %v11675_v47 = vpop.permute.xlu0 %201 }
 0x1bc   :  { %v680_v22 = vmul.f32 %v11470_v4, %v11454_v56  ;;  %v3002_v23 = vrot.slane %v3001_v27, 4  ;;  %v15289_v41 = vrot.slane %v15266_v55, 4  ;;  %v11592_v9 = vmul.f32 %v11512_v29, %v11444_v2  ;;  %15301 = vst [vmem:[#allocation12_spill] sm:$0xff] %v11675_v47 }
 0x1bd   :  { %v460_v1 = vadd.f32 %v401_v10, %v239_v37  ;;  %v15291_v54 = vrot.slane %v15290_v25, 5  ;;  %v11608_v55 = vmul.f32 %v11604_v46, %v11394_v51  ;;  %v459_v10 = vadd.f32 %v399_v0, %v238_v20 }
 0x1be   :  { %v946_v40 = vsel %vm898_vm3, %v15289_v41, %v14667_v52  ;;  %v11612_v41 = vmul.f32 %v11537_v8, %v11444_v2  ;;  %v3003_v37 = vadd.f32 %v3002_v23, %v3001_v27  ;;  %v824_v52 = vadd.f32 %v763_v53, %v641_v57  ;;  %v11627_v57 = vld [vmem:[%s14400_s1 + $0x6] ss:$0 sm:$0xff] }
 0x1bf   :  { %v11599_v38 = vsel %vm1081_vm4, %v15291_v54, %v14670_v58  ;;  %15293 = vst [vmem:[#allocation21_spill] sm:$0xff] %v11608_v55  ;;  %v14675_v54 = vrot.slane %v11573_v13, 3  ;;  %v764_v31 = vrot.slane %v680_v22, 3  ;;  %v863_v51 = vmul.f32 %v11503_v30, %v11454_v56 }
 0x1c0   :  { %15292 = vst [vmem:[#allocation17_spill] sm:$0xff] %v11599_v38  ;;  %v15294_v38 = vrot.slane %v11545_v59, 2  ;;  %v3004_v55 = vrot.slane %v3003_v37, 2  ;;  %v582_v20 = vsel %vm532_vm1, %v579_v49, %v581_v19  ;;  %v11631_v27 = vmul.f32 %v11627_v57, %v11444_v2 }
 0x1c1   :  { %v11635_v22 = vmul.f32 %v10855_v5, %v11444_v2  ;;  %v642_v0 = vadd.f32 %v582_v20, %v459_v10  ;;  %v1046_v23 = vmul.f32 %v11512_v29, %v11454_v56  ;;  %v11639_v49 = vadd.f32 %v946_v40, %v824_v52 }
 0x1c2   :  { %v584_v25 = vsel %vm532_vm1, %v581_v19, %v15294_v38  ;;  %v3005_v38 = vadd.f32 %v3004_v55, %v3003_v37  ;;  %v11648_v19 = vld [vmem:[%s14400_s1 + $0xa] ss:$0 sm:$0xff]  ;;  %v767_v52 = vsel %vm715_vm2, %v764_v31, %v14675_v54  ;;  %v947_v55 = vrot.slane %v863_v51, 4  ;;  %v11681_v51 = vld [vmem:[%s14400_s1 + $0x7] ss:$0 sm:$0xff] }
 0x1c3   :  { %v643_v53 = vadd.f32 %v584_v25, %v460_v1  ;;  %15295 = vst [vmem:[#allocation25_spill] sm:$0xff] %v11639_v49  ;;  %v11643_v25 = vmul.f32 %v11562_v11, %v11444_v2  ;;  %v11652_v5 = vmul.f32 %v11648_v19, %v11444_v2  ;;  %v11657_v1 = vld [vmem:[%s14400_s1 + $0xb] ss:$0 sm:$0xff]  ;;  %v1229_v10 = vmul.f32 %v11627_v57, %v11454_v56 }
 0x1c4   :  { %v11661_v40 = vmul.f32 %v11657_v1, %v11444_v2  ;;  %v3006_v37 = vrot.slane %v3005_v38, 1  ;;  %v11670_v20 = vmul.f32 %v11604_v46, %v11444_v2  ;;  %v15300_v7 = vrot.slane %v11474_v14, 3 }
 0x1c5   :  { %15296 = vst [vmem:[#allocation26_spill] sm:$0xff] %v11643_v25  ;;  %15297 = vst [vmem:[#allocation27_spill] sm:$0xff] %v11652_v5  ;;  %v826_v58 = vadd.f32 %v767_v52, %v643_v53  ;;  %v1130_v54 = vrot.slane %v1046_v23, 5  ;;  %v11685_v2 = vmul.f32 %v11681_v51, %v11454_v56  ;;  %v1313_v23 = vrot.slane %v1229_v10, 6 }
 0x1c6   :  { %15298 = vst [vmem:[#allocation29_spill] sm:$0xff] %v11661_v40  ;;  %15299 = vst [vmem:[#allocation36_spill] sm:$0xff] %v11670_v20  ;;  %v765_v3 = vsel %vm715_vm2, %v15300_v7, %v764_v31  ;;  %v3007_v20 = vadd.f32 %v3006_v37, %v3005_v38  ;;  %v11696_v52 = vmul.f32 %v11409_v26, %v11675_v47  ;;  %v15304_v38 = vrot.slane %v11507_v45, 4 }
 0x1c7   :  { %v825_v50 = vadd.f32 %v765_v3, %v642_v0  ;;  %15302 = vst [vmem:[#allocation7_spill] sm:$0xff] %v11685_v2  ;;  %v15303_v3 = vrot.slane %v11581_v15, 4  ;;  %v11705_v7 = vmul.f32 %v11461_v6, %v11675_v47  ;;  %v15305_v14 = vrot.slane %v11516_v24, 5 }
 0x1c8   :  { %v11698_v49 = vmul.f32 0.008928572, %v3007_v20  ;;  %v948_v37 = vsel %vm898_vm3, %v15304_v38, %v947_v55  ;;  %v11713_v20 = vmul.f32 %v11604_v46, %v11454_v56  ;;  %v11729_v24 = vmul.f32 %v11470_v4, %v11675_v47 }
 0x1c9   :  { %v950_v0 = vsel %vm898_vm3, %v947_v55, %v15303_v3  ;;  %v1008_v53 = vadd.f32 %v948_v37, %v825_v50  ;;  %v1131_v10 = vsel %vm1081_vm4, %v15305_v14, %v1130_v54  ;;  %v11725_v50 = vmul.f32 %v11562_v11, %v11454_v56 }
 0x1ca   :  { %v1009_v31 = vadd.f32 %v950_v0, %v826_v58  ;;  %15306 = vst [vmem:[#allocation31_spill] sm:$0xff] %v11713_v20  ;;  %v11717_v45 = vsub.f32 %v11328_v35, %v11698_v49  ;;  %v11721_v58 = vsub.f32 %v11331_v17, %v11698_v49  ;;  %v11733_v55 = vsub.f32 %v11341_v48, %v11698_v49 }
 0x1cb   :  { %15307 = vst [vmem:[#allocation30_spill] sm:$0xff] %v11725_v50  ;;  %v15308_v14 = vrot.slane %v11592_v9, 5  ;;  %v15309_v0 = vrot.slane %v11522_v62, 6  ;;  %v15311_v3 = vrot.slane %v11631_v27, 6  ;;  %v11749_v48 = vmul.f32 %v11648_v19, %v11454_v56 }
 0x1cc   :  { %v11773_v38 = vmul.f32 %v11503_v30, %v11675_v47  ;;  %v11777_v56 = vsub.f32 %v11362_v39, %v11698_v49  ;;  %v3074_v25 = vmul.f32 %v11733_v55, %v11733_v55  ;;  %v15320_v39 = vrot.slane %v11705_v7, 2 }
 0x1cd   :  { %v1133_v35 = vsel %vm1081_vm4, %v1130_v54, %v15308_v14  ;;  %v11741_v17 = vsel %vm1264_vm5, %v15309_v0, %v1313_v23  ;;  %v1316_v40 = vsel %vm1264_vm5, %v1313_v23, %v15311_v3  ;;  %15312 = vst [vmem:[#allocation37_spill] sm:$0xff] %v11749_v48  ;;  %v11754_v54 = vsub.f32 %v11344_v16, %v11698_v49 }
 0x1ce   :  { %15310 = vst [vmem:[#allocation32_spill] sm:$0xff] %v11741_v17  ;;  %v1192_v37 = vadd.f32 %v1133_v35, %v1009_v31  ;;  %v3072_v14 = vmul.f32 %v11717_v45, %v11717_v45  ;;  %v3073_v31 = vmul.f32 %v11721_v58, %v11721_v58  ;;  %v15313_v35 = vrot.slane %v11635_v22, 7 }
 0x1cf   :  { %v15314_v23 = vrot.slane %v11685_v2, 7  ;;  %v11767_v0 = vadd.f32 %v1131_v10, %v1008_v53  ;;  %v15318_v53 = vrot.slane %v11487_v36, 1  ;;  %v15321_v50 = vrot.slane %v11545_v59, 2 }
 0x1d0   :  { %v11790_v5 = vadd.f32 %v1316_v40, %v1192_v37  ;;  %v11804_v36 = vsub.f32 %v11365_v43, %v11698_v49  ;;  %v3075_v40 = vmul.f32 %v11754_v54, %v11754_v54  ;;  %v3100_v37 = vsel %vm2974_vm7, %v3072_v14, 0.0 }
 0x1d1   :  { %v11765_v3 = vsel %vm1447_vm6, %v15314_v23, %v15313_v35  ;;  %15316 = vst [vmem:[#allocation39_spill] sm:$0xff] %v11767_v0  ;;  %v15317_v35 = vrot.slane %v11696_v52, 1  ;;  %v11788_v23 = vmul.f32 %v11512_v29, %v11675_v47  ;;  %v586_v20 = vsel %vm532_vm1, %v15321_v50, %v15320_v39 }
 0x1d2   :  { %15315 = vst [vmem:[#allocation38_spill] sm:$0xff] %v11765_v3  ;;  %15319 = vst [vmem:[#allocation40_spill] sm:$0xff] %v11790_v5  ;;  %v11800_v3 = vmul.f32 %v11627_v57, %v11675_v47  ;;  %v11812_v59 = vsub.f32 %v11385_v61, %v11698_v49  ;;  %v15324_v39 = vrot.slane %v11729_v24, 3  ;;  %v15325_v16 = vrot.slane %v11573_v13, 3 }
 0x1d3   :  { %v403_v10 = vsel %vm349_vm0, %v15318_v53, %v15317_v35  ;;  %15322 = vst [vmem:[#allocation13_spill] sm:$0xff] %v11804_v36  ;;  %v3101_v35 = vsel %vm2974_vm7, %v3073_v31, 0.0  ;;  %v3076_v48 = vmul.f32 %v11777_v56, %v11777_v56  ;;  %v3103_v14 = vsel %vm2974_vm7, %v3074_v25, 0.0 }
 0x1d4   :  { %15323 = vst [vmem:[#allocation8_spill] sm:$0xff] %v11812_v59  ;;  %v3102_v50 = vadd.f32 %v3101_v35, %v3100_v37  ;;  %v461_v53 = vadd.f32 %v403_v10, %v11612_v41  ;;  %v11820_v43 = vsel %vm715_vm2, %v15325_v16, %v15324_v39  ;;  %v951_v31 = vrot.slane %v11773_v38, 4  ;;  %v11831_v10 = vpop.permute.xlu1 %206 }
 0x1d5   :  { %v11829_v37 = vsub.f32 %v11388_v12, %v11698_v49  ;;  %15327 = vst [vmem:[#allocation9_spill] sm:$0xff] %v11831_v10  ;;  %v11835_v13 = vmul.f32 %v11604_v46, %v11675_v47  ;;  %v11839_v16 = vmul.f32 %v11562_v11, %v11675_v47  ;;  %v3077_v25 = vmul.f32 %v11804_v36, %v11804_v36 }
 0x1d6   :  { %v3104_v41 = vadd.f32 %v3103_v14, %v3102_v50  ;;  %v3105_v38 = vsel %vm2974_vm7, %v3075_v40, 0.0  ;;  %v11846_v12 = vmul.f32 %v11648_v19, %v11675_v47  ;;  %v11850_v35 = vmul.f32 %v11657_v1, %v11675_v47 }
 0x1d7   :  { %15326 = vst [vmem:[#allocation14_spill] sm:$0xff] %v11829_v37  ;;  %v11854_v50 = vsub.f32 %v11415_v21, %v11698_v49  ;;  %v3078_v39 = vmul.f32 %v11812_v59, %v11812_v59  ;;  %v644_v61 = vadd.f32 %v586_v20, %v461_v53  ;;  %v3107_v5 = vsel %vm2974_vm7, %v3076_v48, 0.0 }
 0x1d8   :  { %v3106_v14 = vadd.f32 %v3105_v38, %v3104_v41  ;;  %v11861_v40 = vmul.f32 %v11409_v26, %v11831_v10  ;;  %v11865_v2 = vmul.f32 %v11461_v6, %v11831_v10  ;;  %v11869_v17 = vmul.f32 %v11470_v4, %v11831_v10 }
 0x1d9   :  { %15328 = vst [vmem:[#allocation107_spill] sm:$0xff] %v11854_v50  ;;  %v11873_v21 = vsub.f32 %v11418_v28, %v11698_v49  ;;  %v3079_v20 = vmul.f32 %v11829_v37, %v11829_v37  ;;  %v15329_v53 = vrot.slane %v11581_v15, 4  ;;  %v3109_v38 = vsel %vm2974_vm7, %v3077_v25, 0.0 }
 0x1da   :  { %v3108_v48 = vadd.f32 %v3107_v5, %v3106_v14  ;;  %v14696_v0 = vrot.slane %v11861_v40, 1  ;;  %v11885_v44 = vmul.f32 %v11503_v30, %v11831_v10  ;;  %v11889_v28 = vsub.f32 %v11446_v34, %v11698_v49 }
 0x1db   :  { %v952_v41 = vsel %vm898_vm3, %v15329_v53, %v951_v31  ;;  %v15331_v5 = vrot.slane %v11788_v23, 5  ;;  %v15332_v15 = vrot.slane %v11592_v9, 5  ;;  %v241_v25 = vmul.f32 %v11537_v8, %v11675_v47 }
 0x1dc   :  { %15330 = vst [vmem:[#allocation108_spill] sm:$0xff] %v11889_v28  ;;  %v3110_v37 = vadd.f32 %v3109_v38, %v3108_v48  ;;  %v3080_v53 = vmul.f32 %v11854_v50, %v11854_v50  ;;  %v3111_v62 = vsel %vm2974_vm7, %v3078_v39, 0.0  ;;  %v15333_v34 = vrot.slane %v11696_v52, 1 }
 0x1dd   :  { %v11896_v14 = vsel %vm1081_vm4, %v15332_v15, %v15331_v5  ;;  %v11911_v9 = vsub.f32 %v11448_v63, %v11698_v49  ;;  %v3081_v5 = vmul.f32 %v11873_v21, %v11873_v21  ;;  %v3113_v50 = vsel %vm2974_vm7, %v3079_v20, 0.0 }
 0x1de   :  { %v405_v48 = vsel %vm349_vm0, %v15333_v34, %v14696_v0  ;;  %v3112_v15 = vadd.f32 %v3111_v62, %v3110_v37  ;;  %v15334_v39 = vrot.slane %v11865_v2, 2  ;;  %v15335_v36 = vrot.slane %v11705_v7, 2  ;;  %v11930_v62 = vld [vmem:[%s14400_s1 + $0xc] ss:$0 sm:$0xff] }
 0x1df   :  { %v462_v59 = vadd.f32 %v405_v48, %v241_v25  ;;  %v14698_v34 = vrot.slane %v11885_v44, 4  ;;  %v11924_v0 = vmul.f32 %v11512_v29, %v11831_v10  ;;  %v11934_v37 = vmul.f32 %v11930_v62, %v11675_v47 }
 0x1e0   :  { %v588_v52 = vsel %vm532_vm1, %v15335_v36, %v15334_v39  ;;  %v3114_v63 = vadd.f32 %v3113_v50, %v3112_v15  ;;  %v11938_v36 = vsub.f32 %v11483_v33, %v11698_v49  ;;  %v3082_v20 = vmul.f32 %v11889_v28, %v11889_v28 }
 0x1e1   :  { %15336 = vst [vmem:[#allocation109_spill] sm:$0xff] %v11934_v37  ;;  %v645_v7 = vadd.f32 %v588_v52, %v462_v59  ;;  %v3115_v50 = vsel %vm2974_vm7, %v3080_v53, 0.0  ;;  %v15337_v25 = vrot.slane %v11869_v17, 3  ;;  %v15338_v48 = vrot.slane %v11729_v24, 3 }
 0x1e2   :  { %v11950_v39 = vsub.f32 %v11489_v60, %v11698_v49  ;;  %v3083_v59 = vmul.f32 %v11911_v9, %v11911_v9  ;;  %v3116_v33 = vadd.f32 %v3115_v50, %v3114_v63  ;;  %v3117_v38 = vsel %vm2974_vm7, %v3081_v5, 0.0  ;;  %v11970_v50 = vpop.permute.xlu1 %1635 }
 0x1e3   :  { %v771_v15 = vsel %vm715_vm2, %v15338_v48, %v15337_v25  ;;  %v954_v53 = vsel %vm898_vm3, %v951_v31, %v14698_v34  ;;  %v1136_v28 = vrot.slane %v11924_v0, 5  ;;  %v11961_v24 = vmul.f32 %v11627_v57, %v11831_v10  ;;  %15339 = vst [vmem:[#allocation111_spill] sm:$0xff] %v11970_v50 }
 0x1e4   :  { %v828_v52 = vadd.f32 %v771_v15, %v645_v7  ;;  %v3118_v25 = vadd.f32 %v3117_v38, %v3116_v33  ;;  %v827_v60 = vadd.f32 %v11820_v43, %v644_v61  ;;  %v3084_v63 = vmul.f32 %v11938_v36, %v11938_v36  ;;  %v11980_v33 = vpop.permute.xlu0 %280 }
 0x1e5   :  { %v3119_v5 = vsel %vm2974_vm7, %v3082_v20, 0.0  ;;  %v3085_v15 = vmul.f32 %v11950_v39, %v11950_v39  ;;  %v1414_v43 = vmul.f32 %v11681_v51, %v11675_v47  ;;  %v11978_v61 = vmul.f32 %v11681_v51, %v11831_v10  ;;  %15340 = vst [vmem:[#allocation112_spill] sm:$0xff] %v11980_v33 }
 0x1e6   :  { %v1011_v48 = vadd.f32 %v954_v53, %v828_v52  ;;  %v3120_v38 = vadd.f32 %v3119_v5, %v3118_v25  ;;  %v3121_v20 = vsel %vm2974_vm7, %v3083_v59, 0.0  ;;  %v15341_v52 = vrot.slane %v11788_v23, 5 }
 0x1e7   :  { %v1317_v31 = vrot.slane %v11800_v3, 6  ;;  %v1319_v25 = vrot.slane %v11961_v24, 6  ;;  %v1010_v7 = vadd.f32 %v952_v41, %v827_v60  ;;  %v11992_v49 = vmul.f32 %v11562_v11, %v11970_v50 }
 0x1e8   :  { %v1137_v53 = vsel %vm1081_vm4, %v15341_v52, %v1136_v28  ;;  %v3122_v5 = vadd.f32 %v3121_v20, %v3120_v38  ;;  %v3123_v47 = vsel %vm2974_vm7, %v3084_v63, 0.0  ;;  %v318_v59 = vmul.f32 %v11409_v26, %v11980_v33 }
 0x1e9   :  { %v1194_v34 = vadd.f32 %v1137_v53, %v1011_v48  ;;  %v501_v23 = vmul.f32 %v11461_v6, %v11980_v33  ;;  %v684_v3 = vmul.f32 %v11470_v4, %v11980_v33  ;;  %v3125_v24 = vsel %vm2974_vm7, %v3085_v15, 0.0 }
 0x1ea   :  { %v3124_v52 = vadd.f32 %v3123_v47, %v3122_v5  ;;  %v1500_v41 = vrot.slane %v1414_v43, 7  ;;  %v1502_v60 = vrot.slane %v11978_v61, 7  ;;  %v1320_v38 = vsel %vm1264_vm5, %v1317_v31, %v1319_v25 }
 0x1eb   :  { %v406_v48 = vrot.slane %v318_v59, 1  ;;  %v589_v20 = vrot.slane %v501_v23, 2  ;;  %v867_v63 = vmul.f32 %v11503_v30, %v11980_v33  ;;  %v242_v6 = vmul.f32 %v11537_v8, %v11831_v10 }
 0x1ec   :  { %v3126_v26 = vadd.f32 %v3125_v24, %v3124_v52  ;;  %v1193_v53 = vadd.f32 %v11896_v14, %v1010_v7  ;;  %v1377_v4 = vadd.f32 %v1320_v38, %v1194_v34  ;;  %v12011_v47 = vmul.f32 %v11648_v19, %v11970_v50 }
 0x1ed   :  { %v15342_v15 = vrot.slane %v11861_v40, 1  ;;  %v772_v61 = vrot.slane %v684_v3, 3  ;;  %v1050_v5 = vmul.f32 %v11512_v29, %v11980_v33  ;;  %v15343_v23 = vrot.slane %v11631_v27, 6 }
 0x1ee   :  { %v3127_v59 = vrot.slane %v3126_v26, 4  ;;  %v1503_v14 = vsel %vm1447_vm6, %v1500_v41, %v1502_v60  ;;  %v15344_v7 = vrot.slane %v11865_v2, 2  ;;  %v955_v24 = vrot.slane %v867_v63, 4 }
 0x1ef   :  { %v407_v43 = vsel %vm349_vm0, %v15342_v15, %v406_v48  ;;  %v1318_v8 = vsel %vm1264_vm5, %v15343_v23, %v1317_v31  ;;  %v1233_v40 = vmul.f32 %v11627_v57, %v11980_v33  ;;  %v12029_v3 = vmul.f32 %v11562_v11, %v11980_v33 }
 0x1f0   :  { %v463_v34 = vadd.f32 %v407_v43, %v242_v6  ;;  %v590_v52 = vsel %vm532_vm1, %v15344_v7, %v589_v20  ;;  %v3128_v38 = vadd.f32 %v3127_v59, %v3126_v26  ;;  %v1376_v48 = vadd.f32 %v1318_v8, %v1193_v53 }
 0x1f1   :  { %v1560_v27 = vadd.f32 %v1503_v14, %v1377_v4  ;;  %v1671_v31 = vmul.f32 %v11562_v11, %v11831_v10  ;;  %v15345_v6 = vrot.slane %v11869_v17, 3  ;;  %v1138_v20 = vrot.slane %v1050_v5, 5 }
 0x1f2   :  { %v646_v15 = vadd.f32 %v590_v52, %v463_v34  ;;  %v1416_v63 = vmul.f32 %v11681_v51, %v11980_v33  ;;  %v3129_v43 = vrot.slane %v3128_v38, 2  ;;  %v1596_v23 = vmul.f32 %v11604_v46, %v11831_v10 }
 0x1f3   :  { %v773_v2 = vsel %vm715_vm2, %v15345_v6, %v772_v61  ;;  %v1853_v26 = vmul.f32 %v11648_v19, %v11831_v10  ;;  %v15346_v4 = vrot.slane %v11885_v44, 4  ;;  %v1321_v59 = vrot.slane %v1233_v40, 6 }
 0x1f4   :  { %v829_v53 = vadd.f32 %v773_v2, %v646_v15  ;;  %v1758_v17 = vrot.slane %v12029_v3, 1  ;;  %v12048_v61 = vmul.f32 %v11648_v19, %v11980_v33  ;;  %v3130_v5 = vadd.f32 %v3129_v43, %v3128_v38 }
 0x1f5   :  { %v956_v11 = vsel %vm898_vm3, %v15346_v4, %v955_v24  ;;  %v15347_v8 = vrot.slane %v11635_v22, 7  ;;  %v1624_v34 = vadd.f32 %v1596_v23, %v1560_v27  ;;  %v1756_v15 = vrot.slane %v1671_v31, 1 }
 0x1f6   :  { %v1012_v7 = vadd.f32 %v956_v11, %v829_v53  ;;  %v1139_v44 = vsel %vm1081_vm4, %v1136_v28, %v1138_v20  ;;  %v1504_v24 = vrot.slane %v1416_v63, 7  ;;  %v3131_v40 = vrot.slane %v3130_v5, 1 }
 0x1f7   :  { %v1501_v14 = vsel %vm1447_vm6, %v15347_v8, %v1500_v41  ;;  %v12058_v3 = vmul.f32 %v11657_v1, %v11970_v50  ;;  %v12062_v19 = vmul.f32 %v11930_v62, %v11970_v50  ;;  %v1322_v41 = vsel %vm1264_vm5, %v1319_v25, %v1321_v59 }
 0x1f8   :  { %v1559_v52 = vadd.f32 %v1501_v14, %v1376_v48  ;;  %v1195_v22 = vadd.f32 %v1139_v44, %v1012_v7  ;;  %v1759_v38 = vsel %vm349_vm0, %v1756_v15, %v1758_v17  ;;  %v1940_v48 = vrot.slane %v12048_v61, 2 }
 0x1f9   :  { %v2036_v0 = vmul.f32 %v11657_v1, %v11980_v33  ;;  %v3132_v28 = vadd.f32 %v3131_v40, %v3130_v5  ;;  %v2401_v27 = vmul.f32 %v11162_v18, %v11970_v50  ;;  %v1816_v6 = vadd.f32 %v1759_v38, %v1624_v34 }
 0x1fa   :  { %v1378_v31 = vadd.f32 %v1322_v41, %v1195_v22  ;;  %v1623_v2 = vadd.f32 %v11835_v13, %v1559_v52  ;;  %v1938_v20 = vrot.slane %v1853_v26, 2  ;;  %v2035_v63 = vmul.f32 %v11657_v1, %v11831_v10 }
 0x1fb   :  { %v1505_v25 = vsel %vm1447_vm6, %v1502_v60, %v1504_v24  ;;  %v3166_v43 = vmul.f32 0.008928572, %v3132_v28  ;;  %v1760_v23 = vrot.slane %v11992_v49, 1  ;;  %v1942_v53 = vrot.slane %v12011_v47, 2  ;;  %v15415_v28 = vld [vmem:[#allocation14_spill] sm:$0xff] }
 0x1fc   :  { %v1561_v4 = vadd.f32 %v1505_v25, %v1378_v31  ;;  %v2217_v11 = vmul.f32 %v11930_v62, %v11831_v10  ;;  %v1941_v59 = vsel %vm532_vm1, %v1938_v20, %v1940_v48  ;;  %v2122_v61 = vrot.slane %v2036_v0, 3  ;;  %v15354_v25 = vld [vmem:[#allocation42_spill] sm:$0xff] }
 0x1fd   :  { %v2218_v13 = vmul.f32 %v11930_v62, %v11980_v33  ;;  %v3168_v26 = vadd.f32 1e-05, %v3166_v43  ;;  %v15348_v1 = vrot.slane %v11839_v16, 1  ;;  %v1597_v49 = vmul.f32 %v11604_v46, %v11980_v33  ;;  %v15356_v43 = vld [vmem:[#allocation43_spill] sm:$0xff] }
 0x1fe   :  { %v1998_v5 = vadd.f32 %v1941_v59, %v1816_v6  ;;  %v2124_v47 = vrot.slane %v12058_v3, 3  ;;  %v12090_v8 = vmul.f32 %v11220_v42, %v11970_v50  ;;  %v2120_v34 = vrot.slane %v2035_v63, 3 }
 0x1ff   :  { %v1757_v60 = vsel %vm349_vm0, %v15348_v1, %v1756_v15  ;;  %9114 = vrsqrt.f32 %v3168_v26  ;;  %v2306_v7 = vrot.slane %v12062_v19, 4  ;;  %v12095_v52 = vmul.f32 %v11248_v32, %v11970_v50 }
 0x200   :  { %15349 = vst [vmem:[#allocation15_spill] sm:$0xff] %v12090_v8  ;;  %v1815_v14 = vadd.f32 %v1757_v60, %v1623_v2  ;;  %v1625_v15 = vadd.f32 %v1597_v49, %v1561_v4  ;;  %v2302_v44 = vrot.slane %v2217_v11, 4  ;;  %v2123_v46 = vsel %vm715_vm2, %v2120_v34, %v2122_v61  ;;  %v15358_v11 = vld [vmem:[#allocation58_spill] sm:$0xff] }
 0x201   :  { %15350 = vst [vmem:[#allocation10_spill] sm:$0xff] %v12095_v52  ;;  %v2304_v24 = vrot.slane %v2218_v13, 4  ;;  %v2400_v40 = vmul.f32 %v11162_v18, %v11980_v33  ;;  %v15351_v3 = vrot.slane %v11846_v12, 2  ;;  %v12105_v41 = vmul.f32 %v11162_v18, %v11831_v10  ;;  %v15360_v13 = vld [vmem:[#allocation41_spill] sm:$0xff]  ;;  %v15393_v2 = vld [vmem:[#allocation70_spill] sm:$0xff] }
 0x202   :  { %v12109_v19 = vmul.f32 %v11220_v42, %v11831_v10  ;;  %v2180_v38 = vadd.f32 %v2123_v46, %v1998_v5  ;;  %v2488_v0 = vrot.slane %v2401_v27, 5  ;;  %v1761_v6 = vsel %vm349_vm0, %v1758_v17, %v1760_v23 }
 0x203   :  { %v1939_v22 = vsel %vm532_vm1, %v15351_v3, %v1938_v20  ;;  %15352 = vst [vmem:[#allocation110_spill] sm:$0xff] %v12105_v41  ;;  %v1817_v63 = vadd.f32 %v1761_v6, %v1625_v15  ;;  %v15355_v20 = vrot.slane %v15354_v25, 1  ;;  %v15357_v4 = vrot.slane %v15356_v43, 1  ;;  %v15367_v6 = vld [vmem:[#allocation48_spill] sm:$0xff]  ;;  %v15419_v15 = vld [vmem:[#allocation107_spill] sm:$0xff] }
 0x204   :  { %15353 = vst [vmem:[#allocation106_spill] sm:$0xff] %v12109_v19  ;;  %v1997_v31 = vadd.f32 %v1939_v22, %v1815_v14  ;;  %v15359_v59 = vrot.slane %v15358_v11, 1  ;;  %v15361_v26 = vrot.slane %v15360_v13, 1  ;;  %v15362_v1 = vrot.slane %v11850_v35, 3  ;;  %v15369_v11 = vld [vmem:[#allocation66_spill] sm:$0xff] }
 0x205   :  { %v381_v18 = vsel %vm349_vm0, %v15357_v4, %v15355_v20  ;;  %v15363_v17 = vrot.slane %v11934_v37, 4  ;;  %v2305_v49 = vsel %vm898_vm3, %v2302_v44, %v2304_v24  ;;  %v2486_v5 = vrot.slane %v2400_v40, 5  ;;  %v15368_v20 = vld [vmem:[#allocation59_spill] sm:$0xff] }
 0x206   :  { %v385_v27 = vsel %vm349_vm0, %v15361_v26, %v15359_v59  ;;  %v2121_v60 = vsel %vm715_vm2, %v15362_v1, %v2120_v34  ;;  %v14701_v14 = vrot.slane %v12105_v41, 5  ;;  %v12137_v46 = vmul.f32 %v11248_v32, %v11831_v10  ;;  %v15370_v59 = vld [vmem:[#allocation88_spill] sm:$0xff]  ;;  %v15380_v1 = vld [vmem:[#allocation53_spill] sm:$0xff] }
 0x207   :  { %v12130_v23 = vsel %vm898_vm3, %v15363_v17, %v2302_v44  ;;  %v2362_v3 = vadd.f32 %v2305_v49, %v2180_v38  ;;  %v12139_v22 = vadd.f32 %v2121_v60, %v1997_v31  ;;  %v1943_v34 = vsel %vm532_vm1, %v1940_v48, %v1942_v53  ;;  %v15382_v17 = vld [vmem:[#allocation63_spill] sm:$0xff] }
 0x208   :  { %15364 = vst [vmem:[#allocation113_spill] sm:$0xff] %v12130_v23  ;;  %15365 = vst [vmem:[#allocation114_spill] sm:$0xff] %v12137_v46  ;;  %v450_v25 = vadd.f32 %v381_v18, %v15367_v6  ;;  %v452_v43 = vadd.f32 %v385_v27, %v15368_v20  ;;  %v1999_v4 = vadd.f32 %v1943_v34, %v1817_v63  ;;  %v15376_v63 = vld [vmem:[#allocation44_spill] sm:$0xff]  ;;  %v15381_v60 = vrot.slane %v15380_v1, 2  ;;  %v15391_v1 = vld [vmem:[#allocation45_spill] sm:$0xff] }
 0x209   :  { %15366 = vst [vmem:[#allocation115_spill] sm:$0xff] %v12139_v22  ;;  %v2125_v44 = vsel %vm715_vm2, %v2122_v61, %v2124_v47  ;;  %v2307_v40 = vsel %vm898_vm3, %v2304_v24, %v2306_v7  ;;  %v454_v13 = vadd.f32 %v15370_v59, %v15369_v11  ;;  %v2487_v38 = vsel %vm1081_vm4, %v14701_v14, %v2486_v5  ;;  %v12162_v61 = vpop.eup %9114  ;;  %v15374_v7 = vld [vmem:[#allocation54_spill] sm:$0xff] }
 0x20a   :  { %v12152_v31 = vsel %vm1081_vm4, %v2486_v5, %v2488_v0  ;;  %v12156_v48 = vmul.f32 %v11220_v42, %v11980_v33  ;;  %v12160_v53 = vmul.f32 %v11248_v32, %v11980_v33  ;;  %v12164_v47 = vadd.f32 %v2487_v38, %v2362_v3  ;;  %v15378_v0 = vld [vmem:[#allocation69_spill] sm:$0xff]  ;;  %v15385_v3 = vld [vmem:[#allocation74_spill] sm:$0xff]  ;;  %v15388_v38 = vld [vmem:[#allocation80_spill] sm:$0xff] }
 0x20b   :  { %v15375_v24 = vrot.slane %v15374_v7, 2  ;;  %v15377_v18 = vrot.slane %v15376_v63, 2  ;;  %v15379_v27 = vrot.slane %v15378_v0, 2  ;;  %v15383_v49 = vrot.slane %v15382_v17, 2 }
 0x20c   :  { %15371 = vst [vmem:[#allocation116_spill] sm:$0xff] %v12156_v48  ;;  %15372 = vst [vmem:[#allocation117_spill] sm:$0xff] %v12160_v53  ;;  %v15386_v34 = vrot.slane %v15385_v3, 2  ;;  %v12282_v14 = vmul.f32 %v12162_v61, %v15419_v15 }
 0x20d   :  { %15373 = vst [vmem:[#allocation6_spill] sm:$0xff] %v12164_v47  ;;  %v564_v26 = vsel %vm532_vm1, %v15377_v18, %v15375_v24  ;;  %v568_v42 = vsel %vm532_vm1, %v15381_v60, %v15379_v27  ;;  %v15384_v32 = vmov %v15379_v27  ;;  %v15387_v6 = vmov %v15383_v49  ;;  %v15389_v18 = vld [vmem:[#allocation56_spill] sm:$0xff]  ;;  %v15515_v47 = vld [vmem:[#allocation21_spill] sm:$0xff] }
 0x20e   :  { %v570_v5 = vsel %vm532_vm1, %v15384_v32, %v15383_v49  ;;  %v572_v20 = vsel %vm532_vm1, %v15387_v6, %v15386_v34  ;;  %v633_v11 = vadd.f32 %v564_v26, %v450_v25  ;;  %v635_v59 = vadd.f32 %v568_v42, %v452_v43  ;;  %v15395_v32 = vld [vmem:[#allocation55_spill] sm:$0xff]  ;;  %v15402_v42 = vld [vmem:[#allocation81_spill] sm:$0xff]  ;;  %15420 = vst [vmem:[#allocation122_spill] sm:$0xff] %v12282_v14 }
 0x20f   :  { %v636_v7 = vadd.f32 %v570_v5, %v15388_v38  ;;  %v2181_v24 = vadd.f32 %v2125_v44, %v1999_v4  ;;  %v637_v63 = vadd.f32 %v572_v20, %v454_v13  ;;  %v15390_v27 = vrot.slane %v15389_v18, 3  ;;  %v15399_v4 = vld [vmem:[#allocation64_spill] sm:$0xff] }
 0x210   :  { %v15392_v60 = vrot.slane %v15391_v1, 3  ;;  %v15394_v49 = vrot.slane %v15393_v2, 3  ;;  %v15396_v3 = vrot.slane %v15395_v32, 3  ;;  %v12199_v25 = vmul.f32 %v12162_v61, %v11717_v45  ;;  %v15408_v2 = vld [vmem:[#allocation73_spill] sm:$0xff] }
 0x211   :  { %v12203_v43 = vmul.f32 %v12162_v61, %v11721_v58  ;;  %v15400_v44 = vrot.slane %v15399_v4, 3  ;;  %v15403_v5 = vrot.slane %v15402_v42, 3  ;;  %v12217_v45 = vmul.f32 %v12162_v61, %v11733_v55  ;;  %v15411_v1 = vld [vmem:[#allocation13_spill] sm:$0xff] }
 0x212   :  { %v747_v0 = vsel %vm715_vm2, %v15392_v60, %v15390_v27  ;;  %v751_v17 = vsel %vm715_vm2, %v15396_v3, %v15394_v49  ;;  %15397 = vst [vmem:[#allocation118_spill] sm:$0xff] %v12199_v25  ;;  %v15401_v13 = vmov %v15394_v49  ;;  %v12221_v58 = vmul.f32 %v12162_v61, %v11754_v54 }
 0x213   :  { %15398 = vst [vmem:[#allocation119_spill] sm:$0xff] %v12203_v43  ;;  %v753_v26 = vsel %vm715_vm2, %v15401_v13, %v15400_v44  ;;  %v15404_v34 = vmov %v15400_v44  ;;  %15405 = vst [vmem:[#allocation120_spill] sm:$0xff] %v12217_v45  ;;  %v12225_v20 = vmul.f32 %v12162_v61, %v11777_v56  ;;  %v15409_v38 = vrot.slane %v15408_v2, 3  ;;  %v15413_v44 = vld [vmem:[#allocation8_spill] sm:$0xff] }
 0x214   :  { %v755_v6 = vsel %vm715_vm2, %v15404_v34, %v15403_v5  ;;  %15406 = vst [vmem:[#allocation123_spill] sm:$0xff] %v12221_v58  ;;  %v15410_v18 = vmov %v15403_v5  ;;  %v12234_v60 = vmul.f32 %v12162_v61, %v15411_v1  ;;  %v3231_v55 = vrot.slane %v12199_v25, 1 }
 0x215   :  { %15407 = vst [vmem:[#allocation124_spill] sm:$0xff] %v12225_v20  ;;  %v757_v27 = vsel %vm715_vm2, %v15410_v18, %v15409_v38  ;;  %v3232_v49 = vrot.slane %v12203_v43, 1  ;;  %v4439_v54 = vrot.slane %v12199_v25, 4  ;;  %v4440_v32 = vrot.slane %v12203_v43, 4 }
 0x216   :  { %15412 = vst [vmem:[#allocation127_spill] sm:$0xff] %v12234_v60  ;;  %v3234_v56 = vrot.slane %v12217_v45, 1  ;;  %v4442_v3 = vrot.slane %v12217_v45, 4  ;;  %v3236_v4 = vrot.slane %v12221_v58, 1  ;;  %v12245_v13 = vmul.f32 %v12162_v61, %v15413_v44 }
 0x217   :  { %v3233_v42 = vsel %vm349_vm0, %v3231_v55, %v3232_v49  ;;  %v4444_v5 = vrot.slane %v12221_v58, 4  ;;  %v12249_v34 = vadd.f32 %v747_v0, %v633_v11  ;;  %v4441_v2 = vsel %vm898_vm3, %v4439_v54, %v4440_v32 }
 0x218   :  { %15414 = vst [vmem:[#allocation131_spill] sm:$0xff] %v12245_v13  ;;  %8402 = vmatprep.mubr.msk.f32.mxu1 %vm2974_vm7, %v3233_v42  ;;  %v3235_v38 = vsel %vm349_vm0, %v3232_v49, %v3234_v56  ;;  %v4443_v18 = vsel %vm898_vm3, %v4440_v32, %v4442_v3  ;;  %v3238_v1 = vrot.slane %v12225_v20, 1  ;;  %v12258_v44 = vmul.f32 %v12162_v61, %v15415_v28  ;;  %v15417_v28 = vld [vmem:[#allocation71_spill] sm:$0xff] }
 0x219   :  { %8566 = vmatprep.mubr.msk.f32.mxu0 %vm2974_vm7, %v4441_v2  ;;  %8403 = vmatmul.mubr.msk.f32.vlgmr.msra.gmra.mrb[0].mxu1 %vm2974_vm7, %v3235_v38  ;;  %v3237_v11 = vsel %vm349_vm0, %v3234_v56, %v3236_v4  ;;  %v4446_v0 = vrot.slane %v12225_v20, 4  ;;  %v3240_v55 = vrot.slane %v12234_v60, 1  ;;  %v4445_v49 = vsel %vm898_vm3, %v4442_v3, %v4444_v5  ;;  %v15418_v32 = vld [vmem:[#allocation67_spill] sm:$0xff] }
 0x21a   :  { %15416 = vst [vmem:[#allocation132_spill] sm:$0xff] %v12258_v44  ;;  %8567 = vmatmul.mubr.msk.f32.vlgmr.msra.gmra.mrb[0].mxu0 %vm2974_vm7, %v4443_v18  ;;  %8405 = vmatprep.mubr.msk.f32.mxu1 %vm2974_vm7, %v3237_v11  ;;  %v4448_v54 = vrot.slane %v12234_v60, 4  ;;  %v12271_v42 = vadd.f32 %v15418_v32, %v15417_v28  ;;  %v12273_v2 = vadd.f32 %v751_v17, %v635_v59  ;;  %v9144_v18 = vld [vmem:[%s14401_s2 + $0x28] sm:$0xff]  ;;  %v4452_v15 = vrot.slane %v12258_v44, 4 }
 0x21b   :  { %v2363_v38 = vadd.f32 %v2307_v40, %v2181_v24  ;;  %8569 = vmatprep.mubr.msk.f32.mxu0 %vm2974_vm7, %v4445_v49  ;;  %8606 = vmatpush3.msra.mxu0 %v9144_v18  ;;  %v819_v11 = vadd.f32 %v753_v26, %v636_v7  ;;  %v820_v3 = vadd.f32 %v755_v6, %v637_v63  ;;  %v3242_v40 = vrot.slane %v12245_v13, 1  ;;  %v15422_v26 = vld [vmem:[#allocation94_spill] sm:$0xff]  ;;  %v15424_v28 = vld [vmem:[#allocation104_spill] sm:$0xff] }
 0x21c   :  { %v12286_v59 = vmul.f32 %v12162_v61, %v11873_v21  ;;  %v3239_v17 = vsel %vm349_vm0, %v3236_v4, %v3238_v1  ;;  %v4447_v24 = vsel %vm898_vm3, %v4444_v5, %v4446_v0  ;;  %v3241_v49 = vsel %vm349_vm0, %v3238_v1, %v3240_v55  ;;  %v15423_v4 = vld [vmem:[#allocation28_spill] sm:$0xff]  ;;  %v15426_v1 = vld [vmem:[#allocation33_spill] sm:$0xff] }
 0x21d   :  { %8406 = vmatmul.mubr.msk.f32.gmra.mrb[2].mxu1 %vm2974_vm7, %v3239_v17  ;;  %v4450_v7 = vrot.slane %v12245_v13, 4  ;;  %v3244_v63 = vrot.slane %v12258_v44, 1  ;;  %v4449_v21 = vsel %vm898_vm3, %v4446_v0, %v4448_v54  ;;  %v821_v6 = vadd.f32 %v757_v27, %v15422_v26  ;;  %v15427_v17 = vld [vmem:[#allocation57_spill] sm:$0xff]  ;;  %v15433_v26 = vld [vmem:[#allocation72_spill] sm:$0xff] }
 0x21e   :  { %15421 = vst [vmem:[#allocation121_spill] sm:$0xff] %v12286_v59  ;;  %8570 = vmatmul.mubr.msk.f32.gmra.mrb[2].mxu0 %vm2974_vm7, %v4447_v24  ;;  %8408 = vmatprep.mubr.msk.f32.mxu1 %vm2974_vm7, %v3241_v49  ;;  %v822_v32 = vadd.f32 %v15424_v28, %v15423_v4  ;;  %v12303_v5 = vadd.f32 %v12152_v31, %v2363_v38  ;;  %v15428_v24 = vrot.slane %v15427_v17, 4  ;;  %v15429_v49 = vld [vmem:[#allocation46_spill] sm:$0xff]  ;;  %v15431_v44 = vld [vmem:[#allocation65_spill] sm:$0xff]  ;;  %v15434_v13 = vrot.slane %v15433_v26, 4  ;;  %v15435_v31 = vld [vmem:[#allocation108_spill] sm:$0xff] }
 0x21f   :  { %8572 = vmatprep.mubr.msk.f32.mxu0 %vm2974_vm7, %v4449_v21  ;;  %v12308_v18 = vmul.f32 %v11503_v30, %v15426_v1  ;;  %v15430_v0 = vrot.slane %v15429_v49, 4  ;;  %v15432_v27 = vrot.slane %v15431_v44, 4  ;;  %v12322_v38 = vmul.f32 %v12162_v61, %v15435_v31  ;;  %v15439_v31 = vld [vmem:[#allocation82_spill] sm:$0xff]  ;;  %v15446_v60 = vld [vmem:[#allocation96_spill] sm:$0xff] }
 0x220   :  { %15425 = vst [vmem:[#allocation125_spill] sm:$0xff] %v12303_v5  ;;  %v12326_v30 = vmul.f32 %v12162_v61, %v11911_v9  ;;  %v3243_v21 = vsel %vm349_vm0, %v3240_v55, %v3242_v40  ;;  %v3246_v28 = vrot.slane %v12282_v14, 1  ;;  %v3245_v49 = vsel %vm349_vm0, %v3242_v40, %v3244_v63 }
 0x221   :  { %v930_v56 = vsel %vm898_vm3, %v15430_v0, %v15428_v24  ;;  %v936_v4 = vsel %vm898_vm3, %v15434_v13, %v15432_v27  ;;  %15436 = vst [vmem:[#allocation128_spill] sm:$0xff] %v12322_v38  ;;  %8409 = vmatmul.mubr.msk.f32.gmra.mrb[4].mxu1 %vm2974_vm7, %v3243_v21  ;;  %v4451_v24 = vsel %vm898_vm3, %v4448_v54, %v4450_v7  ;;  %v4454_v13 = vrot.slane %v12282_v14, 4 }
 0x222   :  { %15437 = vst [vmem:[#allocation129_spill] sm:$0xff] %v12326_v30  ;;  %v3248_v0 = vrot.slane %v12286_v59, 1  ;;  %v12337_v27 = vmul.f32 %v12162_v61, %v11938_v36  ;;  %8573 = vmatmul.mubr.msk.f32.gmra.mrb[4].mxu0 %vm2974_vm7, %v4451_v24  ;;  %8411 = vmatprep.mubr.msk.f32.mxu1 %vm2974_vm7, %v3245_v49  ;;  %v4453_v9 = vsel %vm898_vm3, %v4450_v7, %v4452_v15  ;;  %v4456_v55 = vrot.slane %v12286_v59, 4  ;;  %v15443_v24 = vld [vmem:[#allocation75_spill] sm:$0xff] }
 0x223   :  { %v15440_v54 = vrot.slane %v15439_v31, 4  ;;  %v15441_v40 = vrot.slane %v15431_v44, 4  ;;  %v12350_v14 = vmul.f32 %v12162_v61, %v11950_v39  ;;  %8575 = vmatprep.mubr.msk.f32.mxu0 %vm2974_vm7, %v4453_v9  ;;  %v931_v36 = vrot.slane %v12308_v18, 4 }
 0x224   :  { %15438 = vst [vmem:[#allocation133_spill] sm:$0xff] %v12337_v27  ;;  %v15444_v49 = vrot.slane %v15443_v24, 4  ;;  %v15447_v20 = vrot.slane %v15446_v60, 4  ;;  %v3250_v39 = vrot.slane %v12322_v38, 1  ;;  %v4458_v61 = vrot.slane %v12322_v38, 4 }
 0x225   :  { %v938_v21 = vsel %vm898_vm3, %v15441_v40, %v15440_v54  ;;  %15442 = vst [vmem:[#allocation135_spill] sm:$0xff] %v12350_v14  ;;  %v15445_v7 = vmov %v15440_v54  ;;  %v3247_v40 = vsel %vm349_vm0, %v3244_v63, %v3246_v28  ;;  %v999_v18 = vadd.f32 %v930_v56, %v12249_v34 }
 0x226   :  { %v940_v59 = vsel %vm898_vm3, %v15445_v7, %v15444_v49  ;;  %v15448_v44 = vmov %v15444_v49  ;;  %8412 = vmatmul.mubr.msk.f32.gmra.mrb[6].mxu1 %vm2974_vm7, %v3247_v40  ;;  %v4455_v9 = vsel %vm898_vm3, %v4452_v15, %v4454_v13  ;;  %v3249_v31 = vsel %vm349_vm0, %v3246_v28, %v3248_v0 }
 0x227   :  { %v942_v54 = vsel %vm898_vm3, %v15448_v44, %v15447_v20  ;;  %v3252_v60 = vrot.slane %v12326_v30, 1  ;;  %v4460_v24 = vrot.slane %v12326_v30, 4  ;;  %8576 = vmatmul.mubr.msk.f32.gmra.mrb[6].mxu0 %vm2974_vm7, %v4455_v9  ;;  %8414 = vmatprep.mubr.msk.f32.mxu1 %vm2974_vm7, %v3249_v31  ;;  %v4457_v20 = vsel %vm898_vm3, %v4454_v13, %v4456_v55  ;;  %v15449_v31 = vld [vmem:[#allocation62_spill] sm:$0xff] }
 0x228   :  { %v3254_v63 = vrot.slane %v12337_v27, 1  ;;  %v4462_v34 = vrot.slane %v12337_v27, 4  ;;  %v1002_v56 = vadd.f32 %v936_v4, %v819_v11  ;;  %8578 = vmatprep.mubr.msk.f32.mxu0 %vm2974_vm7, %v4457_v20  ;;  %v3256_v15 = vrot.slane %v12350_v14, 1  ;;  %v15450_v20 = vld [vmem:[#allocation50_spill] sm:$0xff] }
 0x229   :  { %v4464_v28 = vrot.slane %v12350_v14, 4  ;;  %v1003_v49 = vadd.f32 %v938_v21, %v820_v3  ;;  %v1004_v7 = vadd.f32 %v940_v59, %v821_v6  ;;  %v3251_v44 = vsel %vm349_vm0, %v3248_v0, %v3250_v39  ;;  %v15472_v59 = vld [vmem:[#allocation25_spill] sm:$0xff] }
 0x22a   :  { %v4459_v40 = vsel %vm898_vm3, %v4456_v55, %v4458_v61  ;;  %v1005_v9 = vadd.f32 %v942_v54, %v822_v32  ;;  %v1112_v13 = vrot.slane %v15449_v31, 5  ;;  %8415 = vmatmul.mubr.msk.f32.gmra.mrb[8].mxu1 %vm2974_vm7, %v3251_v44  ;;  %v3253_v27 = vsel %vm349_vm0, %v3250_v39, %v3252_v60  ;;  %v15473_v14 = vld [vmem:[#allocation17_spill] sm:$0xff] }
 0x22b   :  { %v4461_v11 = vsel %vm898_vm3, %v4458_v61, %v4460_v24  ;;  %v1038_v4 = vmul.f32 %v11512_v29, %v15426_v1  ;;  %v1039_v3 = vmul.f32 %v11512_v29, %v15450_v20  ;;  %8579 = vmatmul.mubr.msk.f32.gmra.mrb[8].mxu0 %vm2974_vm7, %v4459_v40  ;;  %8417 = vmatprep.mubr.msk.f32.mxu1 %vm2974_vm7, %v3253_v27  ;;  %v15451_v0 = vrot.slane %v15427_v17, 4  ;;  %v15455_v17 = vld [vmem:[#allocation47_spill] sm:$0xff] }
 0x22c   :  { %v3255_v6 = vsel %vm349_vm0, %v3252_v60, %v3254_v63  ;;  %v4463_v32 = vsel %vm898_vm3, %v4460_v24, %v4462_v34  ;;  %8581 = vmatprep.mubr.msk.f32.mxu0 %vm2974_vm7, %v4461_v11  ;;  %v3257_v21 = vsel %vm349_vm0, %v3254_v63, %v3256_v15  ;;  %v4465_v29 = vsel %vm898_vm3, %v4462_v34, %v4464_v28  ;;  %v15453_v60 = vld [vmem:[#allocation35_spill] sm:$0xff]  ;;  %v15454_v24 = vld [vmem:[#allocation22_spill] sm:$0xff]  ;;  %v15459_v63 = vld [vmem:[#allocation68_spill] sm:$0xff] }
 0x22d   :  { %v932_v55 = vsel %vm898_vm3, %v15451_v0, %v931_v36  ;;  %v15452_v54 = vrot.slane %v15433_v26, 4  ;;  %v1006_v44 = vadd.f32 %v15454_v24, %v15453_v60  ;;  %v15456_v40 = vrot.slane %v15455_v17, 5  ;;  %v15457_v11 = vld [vmem:[#allocation83_spill] sm:$0xff]  ;;  %v15465_v24 = vld [vmem:[#allocation97_spill] sm:$0xff] }
 0x22e   :  { %v1000_v27 = vadd.f32 %v932_v55, %v12271_v42  ;;  %v15458_v0 = vrot.slane %v15457_v11, 5  ;;  %v15460_v15 = vrot.slane %v15459_v63, 5  ;;  %8418 = vmatmul.mubr.msk.f32.gmra.mrb[10].mxu1 %vm2974_vm7, %v3255_v6  ;;  %v1114_v26 = vrot.slane %v1038_v4, 5  ;;  %v15461_v42 = vld [vmem:[#allocation76_spill] sm:$0xff] }
 0x22f   :  { %v934_v39 = vsel %vm898_vm3, %v931_v36, %v15452_v54  ;;  %v1113_v31 = vsel %vm1081_vm4, %v15456_v40, %v1112_v13  ;;  %v1116_v36 = vrot.slane %v1039_v3, 5  ;;  %v15462_v28 = vrot.slane %v15461_v42, 5  ;;  %v15464_v54 = vld [vmem:[#allocation34_spill] sm:$0xff]  ;;  %8582 = vmatmul.mubr.msk.f32.gmra.mrb[10].mxu0 %vm2974_vm7, %v4463_v32  ;;  %8420 = vmatprep.mubr.msk.f32.mxu1 %vm2974_vm7, %v3257_v21  ;;  %v15468_v11 = vld [vmem:[#allocation92_spill] sm:$0xff] }
 0x230   :  { %v1001_v61 = vadd.f32 %v934_v39, %v12273_v2  ;;  %v1121_v34 = vsel %vm1081_vm4, %v15460_v15, %v15458_v0  ;;  %v15463_v2 = vmov %v15458_v0  ;;  %v1220_v39 = vmul.f32 %v11627_v57, %v15464_v54  ;;  %8584 = vmatprep.mubr.msk.f32.mxu0 %vm2974_vm7, %v4465_v29 }
 0x231   :  { %v1123_v55 = vsel %vm1081_vm4, %v15463_v2, %v15462_v28  ;;  %v15466_v17 = vrot.slane %v15465_v24, 5  ;;  %v15467_v4 = vmov %v15462_v28  ;;  %v1221_v6 = vmul.f32 %v11627_v57, %v15426_v1  ;;  %v15471_v2 = vld [vmem:[#allocation49_spill] sm:$0xff] }
 0x232   :  { %v1222_v40 = vmul.f32 %v11627_v57, %v15450_v20  ;;  %v15469_v0 = vrot.slane %v15468_v11, 5  ;;  %v1182_v15 = vadd.f32 %v1113_v31, %v999_v18  ;;  %v1186_v28 = vadd.f32 %v1121_v34, %v1003_v49 }
 0x233   :  { %v1125_v3 = vsel %vm1081_vm4, %v15467_v4, %v15466_v17  ;;  %v15470_v32 = vmov %v15466_v17  ;;  %v1223_v42 = vmul.f32 %v11627_v57, %v15471_v2  ;;  %v1187_v17 = vadd.f32 %v1123_v55, %v1004_v7  ;;  %v15477_v55 = vld [vmem:[#allocation84_spill] sm:$0xff] }
 0x234   :  { %v1127_v21 = vsel %vm1081_vm4, %v15470_v32, %v15469_v0  ;;  %v1188_v4 = vadd.f32 %v1125_v3, %v1005_v9  ;;  %v1190_v30 = vadd.f32 %v15473_v14, %v15472_v59  ;;  %v1115_v38 = vsel %vm1081_vm4, %v1112_v13, %v1114_v26  ;;  %v15475_v9 = vld [vmem:[#allocation77_spill] sm:$0xff]  ;;  %v15479_v13 = vld [vmem:[#allocation98_spill] sm:$0xff] }
 0x235   :  { %v1189_v60 = vadd.f32 %v1127_v21, %v1006_v44  ;;  %v1117_v29 = vsel %vm1081_vm4, %v1114_v26, %v1116_v36  ;;  %v15474_v11 = vrot.slane %v15459_v63, 5  ;;  %v1295_v0 = vrot.slane %v1220_v39, 6 }
 0x236   :  { %v1183_v18 = vadd.f32 %v1115_v38, %v1000_v27  ;;  %v1184_v49 = vadd.f32 %v1117_v29, %v1001_v61  ;;  %v1297_v31 = vrot.slane %v1221_v6, 6  ;;  %v1299_v34 = vrot.slane %v1222_v40, 6  ;;  %v15485_v40 = vld [vmem:[#allocation51_spill] sm:$0xff] }
 0x237   :  { %v1119_v24 = vsel %vm1081_vm4, %v1116_v36, %v15474_v11  ;;  %v1301_v7 = vrot.slane %v1223_v42, 6  ;;  %v15476_v44 = vrot.slane %v15475_v9, 6  ;;  %v15478_v3 = vrot.slane %v15477_v55, 6  ;;  %v15482_v36 = vld [vmem:[#allocation93_spill] sm:$0xff]  ;;  %v15487_v42 = vld [vmem:[#allocation19_spill] sm:$0xff] }
 0x238   :  { %v1185_v57 = vadd.f32 %v1119_v24, %v1002_v56  ;;  %v15480_v59 = vrot.slane %v15479_v13, 6  ;;  %v15483_v39 = vrot.slane %v15482_v36, 6  ;;  %v1403_v56 = vmul.f32 %v11681_v51, %v15464_v54 }
 0x239   :  { %v1306_v14 = vsel %vm1264_vm5, %v15478_v3, %v15476_v44  ;;  %v15481_v26 = vmov %v15476_v44  ;;  %v1404_v61 = vmul.f32 %v11681_v51, %v15426_v1  ;;  %v1405_v6 = vmul.f32 %v11681_v51, %v15450_v20  ;;  %v15490_v44 = vld [vmem:[#allocation61_spill] sm:$0xff] }
 0x23a   :  { %v1308_v63 = vsel %vm1264_vm5, %v15481_v26, %v15480_v59  ;;  %v15484_v38 = vmov %v15480_v59  ;;  %v15486_v32 = vrot.slane %v15485_v40, 6  ;;  %v15488_v29 = vrot.slane %v15487_v42, 6 }
 0x23b   :  { %v1310_v27 = vsel %vm1264_vm5, %v15484_v38, %v15483_v39  ;;  %v15489_v11 = vmov %v15483_v39  ;;  %v1406_v9 = vmul.f32 %v11681_v51, %v15471_v2  ;;  %v1407_v3 = vmul.f32 %v11681_v51, %v15490_v44 }
 0x23c   :  { %v1296_v21 = vsel %vm1264_vm5, %v15486_v32, %v1295_v0  ;;  %v1312_v24 = vsel %vm1264_vm5, %v15489_v11, %v15488_v29  ;;  %v1298_v13 = vsel %vm1264_vm5, %v1295_v0, %v1297_v31  ;;  %v1300_v59 = vsel %vm1264_vm5, %v1297_v31, %v1299_v34 }
 0x23d   :  { %v1365_v26 = vadd.f32 %v1296_v21, %v1182_v15  ;;  %v1370_v39 = vadd.f32 %v1306_v14, %v1187_v17  ;;  %v1302_v38 = vsel %vm1264_vm5, %v1299_v34, %v1301_v7  ;;  %v15491_v40 = vrot.slane %v15477_v55, 6  ;;  %v15492_v15 = vld [vmem:[#allocation39_spill] sm:$0xff]  ;;  %v15493_v17 = vld [vmem:[#allocation32_spill] sm:$0xff]  ;;  %v15496_v55 = vld [vmem:[#allocation78_spill] sm:$0xff] }
 0x23e   :  { %v1366_v32 = vadd.f32 %v1298_v13, %v1183_v18  ;;  %v1371_v42 = vadd.f32 %v1308_v63, %v1188_v4  ;;  %v1372_v29 = vadd.f32 %v1310_v27, %v1189_v60  ;;  %v1478_v11 = vrot.slane %v1403_v56, 7  ;;  %v15494_v34 = vld [vmem:[#allocation99_spill] sm:$0xff] }
 0x23f   :  { %v1304_v36 = vsel %vm1264_vm5, %v1301_v7, %v15491_v40  ;;  %v1480_v58 = vrot.slane %v1404_v61, 7  ;;  %v1482_v45 = vrot.slane %v1405_v6, 7  ;;  %v1367_v43 = vadd.f32 %v1300_v59, %v1184_v49  ;;  %v15498_v4 = vld [vmem:[#allocation95_spill] sm:$0xff] }
 0x240   :  { %v1368_v51 = vadd.f32 %v1302_v38, %v1185_v57  ;;  %v1484_v25 = vrot.slane %v1406_v9, 7  ;;  %v1486_v0 = vrot.slane %v1407_v3, 7  ;;  %v1369_v33 = vadd.f32 %v1304_v36, %v1186_v28  ;;  %v15501_v57 = vld [vmem:[#allocation16_spill] sm:$0xff]  ;;  %v15504_v27 = vld [vmem:[#allocation7_spill] sm:$0xff] }
 0x241   :  { %v1373_v31 = vadd.f32 %v1312_v24, %v1190_v30  ;;  %v1374_v14 = vadd.f32 %v15493_v17, %v15492_v15  ;;  %v15495_v21 = vrot.slane %v15494_v34, 7  ;;  %v15497_v50 = vrot.slane %v15496_v55, 7 }
 0x242   :  { %v15499_v60 = vrot.slane %v15498_v4, 7  ;;  %v15502_v63 = vrot.slane %v15501_v57, 7  ;;  %v15505_v56 = vrot.slane %v15504_v27, 7  ;;  %v1481_v13 = vsel %vm1447_vm6, %v1478_v11, %v1480_v58 }
 0x243   :  { %v1491_v18 = vsel %vm1447_vm6, %v15497_v50, %v15495_v21  ;;  %v15500_v7 = vmov %v15495_v21  ;;  %v15507_v50 = vld [vmem:[#allocation52_spill] sm:$0xff]  ;;  %v1483_v59 = vsel %vm1447_vm6, %v1480_v58, %v1482_v45  ;;  %v1485_v40 = vsel %vm1447_vm6, %v1482_v45, %v1484_v25 }
 0x244   :  { %v1493_v49 = vsel %vm1447_vm6, %v15500_v7, %v15499_v60  ;;  %v15503_v28 = vmov %v15499_v60  ;;  %v15506_v61 = vmov %v15502_v63  ;;  %v1554_v24 = vadd.f32 %v1491_v18, %v1371_v42  ;;  %v9145_v45 = vld [vmem:[%s14400_s1 + $0x8] ss:$0 sm:$0xff] }
 0x245   :  { %v1495_v30 = vsel %vm1447_vm6, %v15503_v28, %v15502_v63  ;;  %v1497_v6 = vsel %vm1447_vm6, %v15506_v61, %v15505_v56  ;;  %v15508_v9 = vrot.slane %v15507_v50, 7  ;;  %v1555_v38 = vadd.f32 %v1493_v49, %v1372_v29  ;;  %v15511_v63 = vld [vmem:[#allocation38_spill] sm:$0xff]  ;;  %v15514_v61 = vld [vmem:[#allocation79_spill] sm:$0xff] }
 0x246   :  { %v1487_v36 = vsel %vm1447_vm6, %v1484_v25, %v1486_v0  ;;  %v15509_v15 = vrot.slane %v15496_v55, 7  ;;  %v1549_v21 = vadd.f32 %v1481_v13, %v1366_v32  ;;  %v1550_v42 = vadd.f32 %v1483_v59, %v1367_v43  ;;  %v15512_v55 = vld [vmem:[#allocation60_spill] sm:$0xff]  ;;  %v15513_v28 = vld [vmem:[#allocation86_spill] sm:$0xff] }
 0x247   :  { %v1479_v3 = vsel %vm1447_vm6, %v15508_v9, %v1478_v11  ;;  %v1551_v18 = vadd.f32 %v1485_v40, %v1368_v51  ;;  %v1552_v4 = vadd.f32 %v1487_v36, %v1369_v33  ;;  %v1556_v7 = vadd.f32 %v1495_v30, %v1373_v31  ;;  %v15510_v11 = vld [vmem:[#allocation40_spill] sm:$0xff] }
 0x248   :  { %v1489_v17 = vsel %vm1447_vm6, %v1486_v0, %v15509_v15  ;;  %v1548_v34 = vadd.f32 %v1479_v3, %v1365_v26  ;;  %v1557_v57 = vadd.f32 %v1497_v6, %v1374_v14  ;;  %v1558_v58 = vadd.f32 %v15511_v63, %v15510_v11  ;;  %v9146_v33 = vld [vmem:[%s14400_s1 + $0x9] ss:$0 sm:$0xff] }
 0x249   :  { %v1553_v60 = vadd.f32 %v1489_v17, %v1370_v39  ;;  %v1584_v25 = vmul.f32 %v9145_v45, %v15464_v54  ;;  %v1585_v29 = vmul.f32 %v9145_v45, %v15426_v1  ;;  %v1586_v26 = vmul.f32 %v9145_v45, %v15450_v20 }
 0x24a   :  { %v1659_v43 = vmul.f32 %v9146_v33, %v15464_v54  ;;  %v1660_v39 = vmul.f32 %v9146_v33, %v15426_v1  ;;  %v1661_v32 = vmul.f32 %v9146_v33, %v15450_v20  ;;  %v1662_v51 = vmul.f32 %v9146_v33, %v15471_v2 }
 0x24b   :  { %v1663_v0 = vmul.f32 %v9146_v33, %v15490_v44  ;;  %v1587_v31 = vmul.f32 %v9145_v45, %v15471_v2  ;;  %v1588_v14 = vmul.f32 %v9145_v45, %v15490_v44  ;;  %v1664_v49 = vmul.f32 %v9146_v33, %v15512_v55 }
 0x24c   :  { %v1665_v30 = vmul.f32 %v9146_v33, %v15513_v28  ;;  %v1589_v27 = vmul.f32 %v9145_v45, %v15512_v55  ;;  %v1590_v56 = vmul.f32 %v9145_v45, %v15513_v28  ;;  %v1591_v6 = vmul.f32 %v9145_v45, %v15514_v61  ;;  %v15516_v45 = vld [vmem:[#allocation31_spill] sm:$0xff] }
 0x24d   :  { %v1612_v50 = vadd.f32 %v1584_v25, %v1548_v34  ;;  %v1613_v9 = vadd.f32 %v1585_v29, %v1549_v21  ;;  %v1614_v3 = vadd.f32 %v1586_v26, %v1550_v42  ;;  %v1666_v13 = vmul.f32 %v9146_v33, %v15514_v61  ;;  %v15517_v21 = vld [vmem:[#allocation36_spill] sm:$0xff]  ;;  %v15518_v29 = vld [vmem:[#allocation30_spill] sm:$0xff] }
 0x24e   :  { %v1733_v59 = vrot.slane %v1659_v43, 1  ;;  %v1734_v40 = vrot.slane %v1660_v39, 1  ;;  %v1736_v36 = vrot.slane %v1661_v32, 1  ;;  %v1738_v15 = vrot.slane %v1662_v51, 1  ;;  %v15520_v33 = vld [vmem:[#allocation20_spill] sm:$0xff] }
 0x24f   :  { %v1740_v17 = vrot.slane %v1663_v0, 1  ;;  %v1615_v11 = vadd.f32 %v1587_v31, %v1551_v18  ;;  %v1616_v63 = vadd.f32 %v1588_v14, %v1552_v4  ;;  %v1742_v52 = vrot.slane %v1664_v49, 1 }
 0x250   :  { %v1744_v10 = vrot.slane %v1665_v30, 1  ;;  %v1617_v53 = vadd.f32 %v1589_v27, %v1553_v60  ;;  %v1618_v5 = vadd.f32 %v1590_v56, %v1554_v24  ;;  %v1619_v46 = vadd.f32 %v1591_v6, %v1555_v38  ;;  %v15522_v30 = vld [vmem:[#allocation11_spill] sm:$0xff] }
 0x251   :  { %v1620_v8 = vadd.f32 %v15515_v47, %v1556_v7  ;;  %v1621_v34 = vadd.f32 %v15516_v45, %v1557_v57  ;;  %v1622_v42 = vadd.f32 %v15517_v21, %v1558_v58  ;;  %v1746_v25 = vrot.slane %v1666_v13, 1  ;;  %v9147_v7 = vld [vmem:[%s14400_s1 + $0xa] ss:$0 sm:$0xff]  ;;  %v15524_v13 = vld [vmem:[#allocation26_spill] sm:$0xff] }
 0x252   :  { %v15519_v26 = vrot.slane %v15518_v29, 1  ;;  %v15521_v43 = vrot.slane %v15520_v33, 1  ;;  %v1735_v18 = vsel %vm349_vm0, %v1733_v59, %v1734_v40  ;;  %v1737_v4 = vsel %vm349_vm0, %v1734_v40, %v1736_v36 }
 0x253   :  { %v1739_v24 = vsel %vm349_vm0, %v1736_v36, %v1738_v15  ;;  %v1741_v38 = vsel %vm349_vm0, %v1738_v15, %v1740_v17  ;;  %v1743_v47 = vsel %vm349_vm0, %v1740_v17, %v1742_v52  ;;  %v1745_v60 = vsel %vm349_vm0, %v1742_v52, %v1744_v10 }
 0x254   :  { %v1751_v39 = vsel %vm349_vm0, %v15521_v43, %v15519_v26  ;;  %v1841_v57 = vmul.f32 %v9147_v7, %v15464_v54  ;;  %v1842_v58 = vmul.f32 %v9147_v7, %v15426_v1  ;;  %v1843_v32 = vmul.f32 %v9147_v7, %v15450_v20 }
 0x255   :  { %v1844_v51 = vmul.f32 %v9147_v7, %v15471_v2  ;;  %v1845_v0 = vmul.f32 %v9147_v7, %v15490_v44  ;;  %v1846_v31 = vmul.f32 %v9147_v7, %v15512_v55  ;;  %v1747_v14 = vsel %vm349_vm0, %v1744_v10, %v1746_v25 }
 0x256   :  { %v1847_v52 = vmul.f32 %v9147_v7, %v15513_v28  ;;  %v1848_v49 = vmul.f32 %v9147_v7, %v15514_v61  ;;  %v1849_v27 = vmul.f32 %v9147_v7, %v15522_v30  ;;  %v15523_v56 = vmov %v15521_v43 }
 0x257   :  { %v1749_v6 = vsel %vm349_vm0, %v1746_v25, %v15523_v56  ;;  %v15525_v59 = vrot.slane %v15524_v13, 1  ;;  %v15526_v40 = vmov %v15519_v26  ;;  %v15527_v15 = vrot.slane %v11839_v16, 1 }
 0x258   :  { %v1804_v45 = vadd.f32 %v1735_v18, %v1612_v50  ;;  %v1805_v21 = vadd.f32 %v1737_v4, %v1613_v9  ;;  %v1806_v26 = vadd.f32 %v1739_v24, %v1614_v3  ;;  %v1915_v43 = vrot.slane %v1841_v57, 2 }
 0x259   :  { %v1753_v36 = vsel %vm349_vm0, %v15526_v40, %v15525_v59  ;;  %v15528_v10 = vmov %v15525_v59  ;;  %v1916_v7 = vrot.slane %v1842_v58, 2  ;;  %v1918_v33 = vrot.slane %v1843_v32, 2  ;;  %v15531_v58 = vld [vmem:[#allocation27_spill] sm:$0xff] }
 0x25a   :  { %v1755_v17 = vsel %vm349_vm0, %v15528_v10, %v15527_v15  ;;  %v1920_v48 = vrot.slane %v1844_v51, 2  ;;  %v1922_v25 = vrot.slane %v1845_v0, 2  ;;  %v1924_v56 = vrot.slane %v1846_v31, 2 }
 0x25b   :  { %v1807_v19 = vadd.f32 %v1741_v38, %v1615_v11  ;;  %v1926_v41 = vrot.slane %v1847_v52, 2  ;;  %v1928_v29 = vrot.slane %v1848_v49, 2  ;;  %v1930_v23 = vrot.slane %v1849_v27, 2 }
 0x25c   :  { %v1808_v59 = vadd.f32 %v1743_v47, %v1616_v63  ;;  %v1809_v40 = vadd.f32 %v1745_v60, %v1617_v53  ;;  %v1810_v16 = vadd.f32 %v1747_v14, %v1618_v5  ;;  %v1811_v22 = vadd.f32 %v1749_v6, %v1619_v46  ;;  %v15529_v47 = vld [vmem:[#allocation37_spill] sm:$0xff] }
 0x25d   :  { %v1812_v13 = vadd.f32 %v1751_v39, %v1620_v8  ;;  %v1813_v37 = vadd.f32 %v1753_v36, %v1621_v34  ;;  %v1814_v15 = vadd.f32 %v1755_v17, %v1622_v42  ;;  %v1917_v50 = vsel %vm532_vm1, %v1915_v43, %v1916_v7  ;;  %v9148_v8 = vld [vmem:[%s14400_s1 + $0xb] ss:$0 sm:$0xff] }
 0x25e   :  { %v1919_v9 = vsel %vm532_vm1, %v1916_v7, %v1918_v33  ;;  %v1921_v3 = vsel %vm532_vm1, %v1918_v33, %v1920_v48  ;;  %v1923_v18 = vsel %vm532_vm1, %v1920_v48, %v1922_v25  ;;  %v1925_v11 = vsel %vm532_vm1, %v1922_v25, %v1924_v56 }
 0x25f   :  { %v1927_v4 = vsel %vm532_vm1, %v1924_v56, %v1926_v41  ;;  %v1929_v63 = vsel %vm532_vm1, %v1926_v41, %v1928_v29  ;;  %v1931_v53 = vsel %vm532_vm1, %v1928_v29, %v1930_v23  ;;  %v2023_v46 = vmul.f32 %v9148_v8, %v15464_v54 }
 0x260   :  { %v2024_v5 = vmul.f32 %v9148_v8, %v15426_v1  ;;  %v2025_v34 = vmul.f32 %v9148_v8, %v15450_v20  ;;  %v2026_v48 = vmul.f32 %v9148_v8, %v15471_v2  ;;  %v2027_v42 = vmul.f32 %v9148_v8, %v15490_v44 }
 0x261   :  { %v2028_v39 = vmul.f32 %v9148_v8, %v15512_v55  ;;  %v2029_v41 = vmul.f32 %v9148_v8, %v15513_v28  ;;  %v2030_v24 = vmul.f32 %v9148_v8, %v15514_v61  ;;  %v2031_v38 = vmul.f32 %v9148_v8, %v15522_v30 }
 0x262   :  { %v15530_v60 = vrot.slane %v15529_v47, 2  ;;  %v15532_v32 = vrot.slane %v15531_v58, 2  ;;  %v15534_v31 = vrot.slane %v11846_v12, 2  ;;  %v1986_v49 = vadd.f32 %v1917_v50, %v1804_v45 }
 0x263   :  { %v1987_v27 = vadd.f32 %v1919_v9, %v1805_v21  ;;  %v1988_v6 = vadd.f32 %v1921_v3, %v1806_v26  ;;  %v1989_v36 = vadd.f32 %v1923_v18, %v1807_v19  ;;  %v2097_v10 = vrot.slane %v2023_v46, 3  ;;  %v9149_v46 = vld [vmem:[%s14400_s1 + $0xc] ss:$0 sm:$0xff] }
 0x264   :  { %v1933_v57 = vsel %vm532_vm1, %v1930_v23, %v15530_v60  ;;  %v15533_v51 = vmov %v15530_v60  ;;  %v15535_v14 = vmov %v15532_v32  ;;  %v2098_v17 = vrot.slane %v2024_v5, 3 }
 0x265   :  { %v1935_v0 = vsel %vm532_vm1, %v15533_v51, %v15532_v32  ;;  %v1937_v52 = vsel %vm532_vm1, %v15535_v14, %v15534_v31  ;;  %v2100_v43 = vrot.slane %v2025_v34, 3  ;;  %v2102_v23 = vrot.slane %v2026_v48, 3  ;;  %v15536_v32 = vld [vmem:[#allocation24_spill] sm:$0xff] }
 0x266   :  { %v2104_v7 = vrot.slane %v2027_v42, 3  ;;  %v2106_v33 = vrot.slane %v2028_v39, 3  ;;  %v2108_v25 = vrot.slane %v2029_v41, 3  ;;  %v2110_v56 = vrot.slane %v2030_v24, 3 }
 0x267   :  { %v2112_v29 = vrot.slane %v2031_v38, 3  ;;  %v1990_v47 = vadd.f32 %v1925_v11, %v1808_v59  ;;  %v1991_v60 = vadd.f32 %v1927_v4, %v1809_v40  ;;  %v1992_v12 = vadd.f32 %v1929_v63, %v1810_v16 }
 0x268   :  { %v2032_v58 = vmul.f32 %v9148_v8, %v15536_v32  ;;  %v1993_v51 = vadd.f32 %v1931_v53, %v1811_v22  ;;  %v1994_v31 = vadd.f32 %v1933_v57, %v1812_v13  ;;  %v1995_v45 = vadd.f32 %v1935_v0, %v1813_v37  ;;  %v15538_v13 = vld [vmem:[#allocation29_spill] sm:$0xff] }
 0x269   :  { %v1996_v21 = vadd.f32 %v1937_v52, %v1814_v15  ;;  %v2099_v19 = vsel %vm715_vm2, %v2097_v10, %v2098_v17  ;;  %v2101_v26 = vsel %vm715_vm2, %v2098_v17, %v2100_v43  ;;  %v2103_v50 = vsel %vm715_vm2, %v2100_v43, %v2102_v23 }
 0x26a   :  { %v2105_v9 = vsel %vm715_vm2, %v2102_v23, %v2104_v7  ;;  %v2107_v3 = vsel %vm715_vm2, %v2104_v7, %v2106_v33  ;;  %v2109_v59 = vsel %vm715_vm2, %v2106_v33, %v2108_v25  ;;  %v2111_v40 = vsel %vm715_vm2, %v2108_v25, %v2110_v56 }
 0x26b   :  { %v2113_v16 = vsel %vm715_vm2, %v2110_v56, %v2112_v29  ;;  %v2114_v22 = vrot.slane %v2032_v58, 3  ;;  %v15537_v37 = vrot.slane %v11850_v35, 3  ;;  %v15539_v15 = vrot.slane %v15538_v13, 3  ;;  %v15541_v56 = vld [vmem:[#allocation23_spill] sm:$0xff] }
 0x26c   :  { %v2205_v11 = vmul.f32 %v11930_v62, %v15464_v54  ;;  %v2206_v4 = vmul.f32 %v11930_v62, %v15426_v1  ;;  %v2168_v63 = vadd.f32 %v2099_v19, %v1986_v49  ;;  %v2207_v53 = vmul.f32 %v11930_v62, %v15450_v20 }
 0x26d   :  { %v2119_v18 = vsel %vm715_vm2, %v15539_v15, %v15537_v37  ;;  %v2208_v8 = vmul.f32 %v11930_v62, %v15471_v2  ;;  %v2209_v35 = vmul.f32 %v11930_v62, %v15490_v44  ;;  %v2210_v5 = vmul.f32 %v9149_v46, %v15512_v55 }
 0x26e   :  { %v2211_v34 = vmul.f32 %v9149_v46, %v15513_v28  ;;  %v2212_v48 = vmul.f32 %v9149_v46, %v15514_v61  ;;  %v2213_v42 = vmul.f32 %v9149_v46, %v15522_v30  ;;  %v2169_v39 = vadd.f32 %v2101_v26, %v1987_v27 }
 0x26f   :  { %v2170_v41 = vadd.f32 %v2103_v50, %v1988_v6  ;;  %v2171_v24 = vadd.f32 %v2105_v9, %v1989_v36  ;;  %v2172_v38 = vadd.f32 %v2107_v3, %v1990_v47  ;;  %v2115_v57 = vsel %vm715_vm2, %v2112_v29, %v2114_v22 }
 0x270   :  { %v2173_v0 = vadd.f32 %v2109_v59, %v1991_v60  ;;  %v2279_v62 = vrot.slane %v2205_v11, 4  ;;  %v2280_v14 = vrot.slane %v2206_v4, 4  ;;  %v2214_v52 = vmul.f32 %v9149_v46, %v15536_v32 }
 0x271   :  { %v2282_v49 = vrot.slane %v2207_v53, 4  ;;  %v2284_v10 = vrot.slane %v2208_v8, 4  ;;  %v2286_v17 = vrot.slane %v2209_v35, 4  ;;  %v2288_v43 = vrot.slane %v2210_v5, 4 }
 0x272   :  { %v2290_v23 = vrot.slane %v2211_v34, 4  ;;  %v2292_v7 = vrot.slane %v2212_v48, 4  ;;  %v2294_v33 = vrot.slane %v2213_v42, 4  ;;  %v15540_v25 = vmov %v15539_v15  ;;  %v15542_v48 = vld [vmem:[#allocation109_spill] sm:$0xff] }
 0x273   :  { %v2117_v27 = vsel %vm715_vm2, %v2114_v22, %v15540_v25  ;;  %v2174_v6 = vadd.f32 %v2111_v40, %v1992_v12  ;;  %v2175_v36 = vadd.f32 %v2113_v16, %v1993_v51  ;;  %v2215_v29 = vmul.f32 %v9149_v46, %v15541_v56  ;;  %v9150_v16 = vld [vmem:[%s14400_s1 + $0xd] ss:$0 sm:$0xff] }
 0x274   :  { %v2176_v47 = vadd.f32 %v2115_v57, %v1994_v31  ;;  %v2177_v60 = vadd.f32 %v2117_v27, %v1995_v45  ;;  %v2178_v58 = vadd.f32 %v2119_v18, %v1996_v21  ;;  %v2281_v19 = vsel %vm898_vm3, %v2279_v62, %v2280_v14 }
 0x275   :  { %v2283_v26 = vsel %vm898_vm3, %v2280_v14, %v2282_v49  ;;  %v2285_v50 = vsel %vm898_vm3, %v2282_v49, %v2284_v10  ;;  %v2287_v9 = vsel %vm898_vm3, %v2284_v10, %v2286_v17  ;;  %v2296_v3 = vrot.slane %v2214_v52, 4  ;;  %v15544_v10 = vld [vmem:[#allocation12_spill] sm:$0xff] }
 0x276   :  { %v2289_v59 = vsel %vm898_vm3, %v2286_v17, %v2288_v43  ;;  %v2291_v22 = vsel %vm898_vm3, %v2288_v43, %v2290_v23  ;;  %v2293_v12 = vsel %vm898_vm3, %v2290_v23, %v2292_v7  ;;  %v2295_v51 = vsel %vm898_vm3, %v2292_v7, %v2294_v33 }
 0x277   :  { %v2298_v31 = vrot.slane %v2215_v29, 4  ;;  %v2350_v45 = vadd.f32 %v2281_v19, %v2168_v63  ;;  %v2351_v21 = vadd.f32 %v2283_v26, %v2169_v39  ;;  %v2352_v40 = vadd.f32 %v2285_v50, %v2170_v41  ;;  %v15546_v26 = vld [vmem:[#allocation113_spill] sm:$0xff] }
 0x278   :  { %v2387_v37 = vmul.f32 %v9150_v16, %v15464_v54  ;;  %v2388_v13 = vmul.f32 %v9150_v16, %v15426_v1  ;;  %v2389_v15 = vmul.f32 %v9150_v16, %v15450_v20  ;;  %v2390_v18 = vmul.f32 %v9150_v16, %v15471_v2 }
 0x279   :  { %v2297_v11 = vsel %vm898_vm3, %v2294_v33, %v2296_v3  ;;  %v2353_v4 = vadd.f32 %v2287_v9, %v2171_v24  ;;  %v2354_v53 = vadd.f32 %v2289_v59, %v2172_v38  ;;  %v2391_v63 = vmul.f32 %v9150_v16, %v15490_v44 }
 0x27a   :  { %v2392_v8 = vmul.f32 %v9150_v16, %v15512_v55  ;;  %v2393_v35 = vmul.f32 %v9150_v16, %v15513_v28  ;;  %v2394_v46 = vmul.f32 %v9150_v16, %v15514_v61  ;;  %v2395_v5 = vmul.f32 %v9150_v16, %v15522_v30 }
 0x27b   :  { %v2299_v34 = vsel %vm898_vm3, %v2296_v3, %v2298_v31  ;;  %v15543_v42 = vrot.slane %v15542_v48, 4  ;;  %v2355_v41 = vadd.f32 %v2291_v22, %v2173_v0  ;;  %v2356_v57 = vadd.f32 %v2293_v12, %v2174_v6  ;;  %v15545_v6 = vld [vmem:[#allocation115_spill] sm:$0xff] }
 0x27c   :  { %v2461_v24 = vrot.slane %v2387_v37, 5  ;;  %v2462_v38 = vrot.slane %v2388_v13, 5  ;;  %v2464_v62 = vrot.slane %v2389_v15, 5  ;;  %v2466_v14 = vrot.slane %v2390_v18, 5  ;;  %v9151_v18 = vld [vmem:[%s14400_s1 + $0xe] ss:$0 sm:$0xff] }
 0x27d   :  { %v2301_v39 = vsel %vm898_vm3, %v2298_v31, %v15543_v42  ;;  %v2396_v52 = vmul.f32 %v9150_v16, %v15536_v32  ;;  %v2397_v49 = vmul.f32 %v9150_v16, %v15541_v56  ;;  %v2398_v17 = vmul.f32 %v9150_v16, %v15544_v10 }
 0x27e   :  { %v2468_v43 = vrot.slane %v2391_v63, 5  ;;  %v2470_v23 = vrot.slane %v2392_v8, 5  ;;  %v2472_v7 = vrot.slane %v2393_v35, 5  ;;  %v2474_v33 = vrot.slane %v2394_v46, 5 }
 0x27f   :  { %v2476_v25 = vrot.slane %v2395_v5, 5  ;;  %v2357_v27 = vadd.f32 %v2295_v51, %v2175_v36  ;;  %v2358_v29 = vadd.f32 %v2297_v11, %v2176_v47  ;;  %v2359_v19 = vadd.f32 %v2299_v34, %v2177_v60 }
 0x280   :  { %v2360_v0 = vadd.f32 %v2301_v39, %v2178_v58  ;;  %v2361_v50 = vadd.f32 %v15546_v26, %v15545_v6  ;;  %v2463_v9 = vsel %vm1081_vm4, %v2461_v24, %v2462_v38  ;;  %v2465_v3 = vsel %vm1081_vm4, %v2462_v38, %v2464_v62 }
 0x281   :  { %v2467_v59 = vsel %vm1081_vm4, %v2464_v62, %v2466_v14  ;;  %v2469_v22 = vsel %vm1081_vm4, %v2466_v14, %v2468_v43  ;;  %v2478_v12 = vrot.slane %v2396_v52, 5  ;;  %v2480_v31 = vrot.slane %v2397_v49, 5 }
 0x282   :  { %v2482_v16 = vrot.slane %v2398_v17, 5  ;;  %v2471_v37 = vsel %vm1081_vm4, %v2468_v43, %v2470_v23  ;;  %v2473_v36 = vsel %vm1081_vm4, %v2470_v23, %v2472_v7  ;;  %v2475_v47 = vsel %vm1081_vm4, %v2472_v7, %v2474_v33 }
 0x283   :  { %v2477_v60 = vsel %vm1081_vm4, %v2474_v33, %v2476_v25  ;;  %v2532_v58 = vadd.f32 %v2463_v9, %v2350_v45  ;;  %v2533_v51 = vadd.f32 %v2465_v3, %v2351_v21  ;;  %v12695_v13 = vadd.f32 %v2467_v59, %v2352_v40  ;;  %v15547_v40 = vld [vmem:[#allocation110_spill] sm:$0xff] }
 0x284   :  { %v2535_v15 = vadd.f32 %v2469_v22, %v2353_v4  ;;  %v2569_v11 = vmul.f32 %v9151_v18, %v15464_v54  ;;  %v2570_v63 = vmul.f32 %v9151_v18, %v15426_v1  ;;  %v2571_v8 = vmul.f32 %v9151_v18, %v15450_v20  ;;  %v12736_v22 = vld [vmem:[%s14400_s1 + $0xf] ss:$0 sm:$0xff] }
 0x285   :  { %v2572_v35 = vmul.f32 %v9151_v18, %v15471_v2  ;;  %v2479_v46 = vsel %vm1081_vm4, %v2476_v25, %v2478_v12  ;;  %v2481_v45 = vsel %vm1081_vm4, %v2478_v12, %v2480_v31  ;;  %v2483_v21 = vsel %vm1081_vm4, %v2480_v31, %v2482_v16 }
 0x286   :  { %v15548_v4 = vrot.slane %v15547_v40, 5  ;;  %v2536_v34 = vadd.f32 %v2471_v37, %v2354_v53  ;;  %v2537_v48 = vadd.f32 %v2473_v36, %v2355_v41  ;;  %v2573_v42 = vmul.f32 %v9151_v18, %v15490_v44 }
 0x287   :  { %v2574_v39 = vmul.f32 %v9151_v18, %v15512_v55  ;;  %v2538_v24 = vadd.f32 %v2475_v47, %v2356_v57  ;;  %v2575_v38 = vmul.f32 %v9151_v18, %v15513_v28  ;;  %v2576_v62 = vmul.f32 %v9151_v18, %v15514_v61 }
 0x288   :  { %v2485_v5 = vsel %vm1081_vm4, %v2482_v16, %v15548_v4  ;;  %v2577_v14 = vmul.f32 %v9151_v18, %v15522_v30  ;;  %v2643_v52 = vrot.slane %v2569_v11, 6  ;;  %v2644_v49 = vrot.slane %v2570_v63, 6 }
 0x289   :  { %v2646_v17 = vrot.slane %v2571_v8, 6  ;;  %v2648_v43 = vrot.slane %v2572_v35, 6  ;;  %v12715_v23 = vadd.f32 %v2477_v60, %v2357_v27  ;;  %v12717_v7 = vadd.f32 %v2479_v46, %v2358_v29 }
 0x28a   :  { %v12719_v53 = vadd.f32 %v2481_v45, %v2359_v19  ;;  %v12721_v41 = vadd.f32 %v2483_v21, %v2360_v0  ;;  %v2578_v57 = vmul.f32 %v9151_v18, %v15536_v32  ;;  %v2579_v33 = vmul.f32 %v9151_v18, %v15541_v56 }
 0x28b   :  { %v2650_v25 = vrot.slane %v2573_v42, 6  ;;  %v2652_v6 = vrot.slane %v2574_v39, 6  ;;  %v12725_v26 = vadd.f32 %v2485_v5, %v2361_v50  ;;  %v12728_v9 = vmul.f32 %v9151_v18, %v15544_v10 }
 0x28c   :  { %v2654_v3 = vrot.slane %v2575_v38, 6  ;;  %v2656_v27 = vrot.slane %v2576_v62, 6  ;;  %v2645_v29 = vsel %vm1264_vm5, %v2643_v52, %v2644_v49  ;;  %v2647_v19 = vsel %vm1264_vm5, %v2644_v49, %v2646_v17 }
 0x28d   :  { %v2649_v0 = vsel %vm1264_vm5, %v2646_v17, %v2648_v43  ;;  %v2658_v59 = vrot.slane %v2577_v14, 6  ;;  %v2751_v50 = vmul.f32 %v12736_v22, %v15464_v54  ;;  %v2752_v12 = vmul.f32 %v12736_v22, %v15426_v1 }
 0x28e   :  { %v2753_v31 = vmul.f32 %v12736_v22, %v15450_v20  ;;  %v2754_v16 = vmul.f32 %v12736_v22, %v15471_v2  ;;  %v2651_v37 = vsel %vm1264_vm5, %v2648_v43, %v2650_v25  ;;  %v2653_v36 = vsel %vm1264_vm5, %v2650_v25, %v2652_v6 }
 0x28f   :  { %v2660_v47 = vrot.slane %v2578_v57, 6  ;;  %v2662_v60 = vrot.slane %v2579_v33, 6  ;;  %v2655_v18 = vsel %vm1264_vm5, %v2652_v6, %v2654_v3  ;;  %v2657_v11 = vsel %vm1264_vm5, %v2654_v3, %v2656_v27 }
 0x290   :  { %v2755_v54 = vmul.f32 %v12736_v22, %v15490_v44  ;;  %v2756_v63 = vmul.f32 %v12736_v22, %v15512_v55  ;;  %v2659_v8 = vsel %vm1264_vm5, %v2656_v27, %v2658_v59  ;;  %v2664_v35 = vrot.slane %v12728_v9, 6  ;;  %v12840_v9 = vld [vmem:[%s14401_s2 + $0x30] sm:$0xff] }
 0x291   :  { %v2714_v46 = vadd.f32 %v2645_v29, %v2532_v58  ;;  %v2715_v45 = vadd.f32 %v2647_v19, %v2533_v51  ;;  %v2825_v21 = vrot.slane %v2751_v50, 7  ;;  %v2826_v40 = vrot.slane %v2752_v12, 7  ;;  %8646 = vmatprep.subr.mxu0 %v12840_v9 }
 0x292   :  { %v2828_v4 = vrot.slane %v2753_v31, 7  ;;  %v2830_v5 = vrot.slane %v2754_v16, 7  ;;  %v2661_v42 = vsel %vm1264_vm5, %v2658_v59, %v2660_v47  ;;  %v2663_v39 = vsel %vm1264_vm5, %v2660_v47, %v2662_v60  ;;  %v12778_v59 = vld [vmem:[%s14400_s1 + $0x10] ss:$0 sm:$0xff] }
 0x293   :  { %v2716_v38 = vadd.f32 %v2649_v0, %v12695_v13  ;;  %v2717_v62 = vadd.f32 %v2651_v37, %v2535_v15  ;;  %v2757_v14 = vmul.f32 %v12736_v22, %v15513_v28  ;;  %v2758_v52 = vmul.f32 %v12736_v22, %v15514_v61 }
 0x294   :  { %v2832_v49 = vrot.slane %v2755_v54, 7  ;;  %v2834_v58 = vrot.slane %v2756_v63, 7  ;;  %v2665_v51 = vsel %vm1264_vm5, %v2662_v60, %v2664_v35  ;;  %v2718_v17 = vadd.f32 %v2653_v36, %v2536_v34 }
 0x295   :  { %v2719_v43 = vadd.f32 %v2655_v18, %v2537_v48  ;;  %v2720_v57 = vadd.f32 %v2657_v11, %v2538_v24  ;;  %v2759_v33 = vmul.f32 %v12736_v22, %v15522_v30  ;;  %v2827_v13 = vsel %vm1447_vm6, %v2825_v21, %v2826_v40 }
 0x296   :  { %v2829_v15 = vsel %vm1447_vm6, %v2826_v40, %v2828_v4  ;;  %v2831_v25 = vsel %vm1447_vm6, %v2828_v4, %v2830_v5  ;;  %v2760_v6 = vmul.f32 %v12736_v22, %v15536_v32  ;;  %v2896_v3 = vadd.f32 %v2827_v13, %v2714_v46 }
 0x297   :  { %v2897_v27 = vadd.f32 %v2829_v15, %v2715_v45  ;;  %v2898_v29 = vadd.f32 %v2831_v25, %v2716_v38  ;;  %v2833_v19 = vsel %vm1447_vm6, %v2830_v5, %v2832_v49  ;;  %v2835_v34 = vsel %vm1447_vm6, %v2832_v49, %v2834_v58  ;;  %v15549_v49 = vld [vmem:[#allocation106_spill] sm:$0xff] }
 0x298   :  { %v2836_v48 = vrot.slane %v2757_v14, 7  ;;  %v2838_v24 = vrot.slane %v2758_v52, 7  ;;  %v2899_v0 = vadd.f32 %v2833_v19, %v2717_v62  ;;  %v2932_v50 = vmul.f32 %v12778_v59, %v15426_v1  ;;  %v15551_v19 = vld [vmem:[#allocation116_spill] sm:$0xff] }
 0x299   :  { %v2933_v12 = vmul.f32 %v12778_v59, %v15450_v20  ;;  %v2934_v31 = vmul.f32 %v12778_v59, %v15471_v2  ;;  %v2721_v16 = vadd.f32 %v2659_v8, %v12715_v23  ;;  %v2761_v37 = vmul.f32 %v12736_v22, %v15541_v56 }
 0x29a   :  { %v2840_v36 = vrot.slane %v2759_v33, 7  ;;  %v2900_v47 = vadd.f32 %v2835_v34, %v2718_v17  ;;  %v2935_v60 = vmul.f32 %v12778_v59, %v15490_v44  ;;  %v12791_v18 = vadd.f32 %v2932_v50, %v2896_v3 }
 0x29b   :  { %v12793_v11 = vadd.f32 %v2933_v12, %v2897_v27  ;;  %v12795_v1 = vadd.f32 %v2934_v31, %v2898_v29  ;;  %v2837_v20 = vsel %vm1447_vm6, %v2834_v58, %v2836_v48  ;;  %v2839_v2 = vsel %vm1447_vm6, %v2836_v48, %v2838_v24  ;;  %v15554_v48 = vld [vmem:[#allocation15_spill] sm:$0xff] }
 0x29c   :  { %v2842_v54 = vrot.slane %v2760_v6, 7  ;;  %v2936_v23 = vmul.f32 %v12778_v59, %v15512_v55  ;;  %v2722_v63 = vadd.f32 %v2661_v42, %v12717_v7  ;;  %v2901_v8 = vadd.f32 %v2837_v20, %v2719_v43 }
 0x29d   :  { %v2902_v46 = vadd.f32 %v2839_v2, %v2720_v57  ;;  %v12802_v45 = vadd.f32 %v2935_v60, %v2899_v0  ;;  %v3008_v21 = vsel %vm2974_vm7, %v12791_v18, 0.0  ;;  %v3009_v40 = vsel %vm2974_vm7, %v12793_v11, 0.0  ;;  %v15558_v60 = vld [vmem:[#allocation114_spill] sm:$0xff] }
 0x29e   :  { %v12804_v44 = vadd.f32 %v2936_v23, %v2900_v47  ;;  %v3011_v4 = vsel %vm2974_vm7, %v12795_v1, 0.0  ;;  %v2723_v5 = vadd.f32 %v2663_v39, %v12719_v53  ;;  %v2762_v55 = vmul.f32 %v12736_v22, %v15544_v10 }
 0x29f   :  { %v2844_v7 = vrot.slane %v2761_v37, 7  ;;  %v3010_v42 = vadd.f32 %v3009_v40, %v3008_v21  ;;  %v2841_v38 = vsel %vm1447_vm6, %v2838_v24, %v2840_v36  ;;  %v2843_v62 = vsel %vm1447_vm6, %v2840_v36, %v2842_v54  ;;  %v15557_v37 = vld [vmem:[#allocation6_spill] sm:$0xff]  ;;  %v15561_v21 = vld [vmem:[#allocation117_spill] sm:$0xff] }
 0x2a0   :  { %v2937_v14 = vmul.f32 %v12778_v59, %v15513_v28  ;;  %v2938_v52 = vmul.f32 %v12778_v59, %v15514_v61  ;;  %v15550_v58 = vrot.slane %v15549_v49, 6  ;;  %v2903_v39 = vadd.f32 %v2841_v38, %v2721_v16  ;;  %v3200_v61 = vld [vmem:[%s14401_s2] sm:$0xff] }
 0x2a1   :  { %v2904_v22 = vadd.f32 %v2843_v62, %v2722_v63  ;;  %v3012_v17 = vadd.f32 %v3011_v4, %v3010_v42  ;;  %v3013_v33 = vsel %vm2974_vm7, %v12802_v45, 0.0  ;;  %v3015_v28 = vsel %vm2974_vm7, %v12804_v44, 0.0  ;;  %8441 = vmatprep.subr.mxu1 %v3200_v61  ;;  %v15564_v42 = vld [vmem:[#allocation9_spill] sm:$0xff] }
 0x2a2   :  { %v2667_v53 = vsel %vm1264_vm5, %v2664_v35, %v15550_v58  ;;  %v12826_v43 = vadd.f32 %v2937_v14, %v2901_v8  ;;  %v12828_v57 = vadd.f32 %v2938_v52, %v2902_v46  ;;  %v2724_v35 = vadd.f32 %v2665_v51, %v12721_v41  ;;  %8442 = vmatpush3.msra.mxu1 %v3200_v61  ;;  %v15565_v52 = vld [vmem:[#allocation10_spill] sm:$0xff] }
 0x2a3   :  { %v2845_v13 = vsel %vm1447_vm6, %v2842_v54, %v2844_v7  ;;  %v2846_v15 = vrot.slane %v2762_v55, 7  ;;  %v3014_v25 = vadd.f32 %v3013_v33, %v3012_v17  ;;  %v2725_v6 = vadd.f32 %v2667_v53, %v12725_v26  ;;  %v15560_v54 = vld [vmem:[#allocation125_spill] sm:$0xff] }
 0x2a4   :  { %v2905_v3 = vadd.f32 %v2845_v13, %v2723_v5  ;;  %v2939_v27 = vmul.f32 %v12778_v59, %v15522_v30  ;;  %v2940_v29 = vmul.f32 %v12778_v59, %v15536_v32  ;;  %v15552_v34 = vrot.slane %v15551_v19, 6 }
 0x2a5   :  { %v15553_v41 = vmov %v15550_v58  ;;  %v15555_v24 = vrot.slane %v15554_v48, 6  ;;  %v2941_v50 = vmul.f32 %v12778_v59, %v15541_v56  ;;  %v3016_v30 = vadd.f32 %v3015_v28, %v3014_v25 }
 0x2a6   :  { %v2669_v51 = vsel %vm1264_vm5, %v15553_v41, %v15552_v34  ;;  %v15556_v0 = vmov %v15552_v34  ;;  %v12862_v12 = vadd.f32 %v2939_v27, %v2903_v39  ;;  %v12864_v32 = vadd.f32 %v2940_v29, %v2904_v22 }
 0x2a7   :  { %v2671_v26 = vsel %vm1264_vm5, %v15556_v0, %v15555_v24  ;;  %v3017_v31 = vsel %vm2974_vm7, %v12826_v43, 0.0  ;;  %v3019_v16 = vsel %vm2974_vm7, %v12828_v57, 0.0  ;;  %v2726_v36 = vadd.f32 %v2669_v51, %v15557_v37 }
 0x2a8   :  { %v2847_v47 = vsel %vm1447_vm6, %v2844_v7, %v2846_v15  ;;  %v15559_v20 = vrot.slane %v15558_v60, 7  ;;  %v3018_v56 = vadd.f32 %v3017_v31, %v3016_v30  ;;  %v2727_v23 = vadd.f32 %v2671_v26, %v15560_v54 }
 0x2a9   :  { %v2906_v63 = vadd.f32 %v2847_v47, %v2724_v35  ;;  %v2969_v46 = vadd.f32 %v2941_v50, %v2905_v3  ;;  %v15562_v40 = vrot.slane %v15561_v21, 7  ;;  %v2942_v7 = vmul.f32 %v12778_v59, %v15544_v10  ;;  %v15568_v35 = vld [vmem:[#allocation111_spill] sm:$0xff] }
 0x2aa   :  { %v2849_v2 = vsel %vm1447_vm6, %v2846_v15, %v15559_v20  ;;  %v15563_v4 = vmov %v15559_v20  ;;  %v3020_v55 = vadd.f32 %v3019_v16, %v3018_v56  ;;  %v2943_v38 = vmul.f32 %v12778_v59, %v15564_v42  ;;  %v15569_v15 = vld [vmem:[#allocation112_spill] sm:$0xff] }
 0x2ab   :  { %v2907_v8 = vadd.f32 %v2849_v2, %v2725_v6  ;;  %v2851_v5 = vsel %vm1447_vm6, %v15563_v4, %v15562_v40  ;;  %v3021_v62 = vsel %vm2974_vm7, %v12862_v12, 0.0  ;;  %v3023_v14 = vsel %vm2974_vm7, %v12864_v32, 0.0 }
 0x2ac   :  { %v15566_v49 = vrot.slane %v15565_v52, 7  ;;  %v15567_v58 = vmov %v15562_v40  ;;  %v2908_v39 = vadd.f32 %v2851_v5, %v2726_v36  ;;  %v3022_v22 = vadd.f32 %v3021_v62, %v3020_v55  ;;  %v12957_v52 = vld [vmem:[%s14401_s2 + $0x10] sm:$0xff] }
 0x2ad   :  { %v2970_v33 = vadd.f32 %v2942_v7, %v2906_v63  ;;  %v2971_v10 = vadd.f32 %v2943_v38, %v2907_v8  ;;  %v3025_v28 = vsel %vm2974_vm7, %v2969_v46, 0.0  ;;  %v2945_v13 = vmul.f32 %v12778_v59, %v15568_v35  ;;  %8482 = vmatprep.subr.mxu1 %v12957_v52 }
 0x2ae   :  { %v2853_v53 = vsel %vm1447_vm6, %v15567_v58, %v15566_v49  ;;  %v3024_v61 = vadd.f32 %v3023_v14, %v3022_v22  ;;  %v2944_v25 = vmul.f32 %v12778_v59, %v15569_v15 }
 0x2af   :  { %v2909_v17 = vadd.f32 %v2853_v53, %v2727_v23  ;;  %v3027_v29 = vsel %vm2974_vm7, %v2970_v33, 0.0  ;;  %v3029_v19 = vsel %vm2974_vm7, %v2971_v10, 0.0 }
 0x2b0   :  { %v3026_v6 = vadd.f32 %v3025_v28, %v3024_v61  ;;  %v2972_v3 = vadd.f32 %v2944_v25, %v2908_v39 }
 0x2b1   :  { %v2973_v27 = vadd.f32 %v2945_v13, %v2909_v17 }
 0x2b2   :  { %v3028_v34 = vadd.f32 %v3027_v29, %v3026_v6  ;;  %v3031_v51 = vsel %vm2974_vm7, %v2972_v3, 0.0 }
 0x2b3   :  { %v3033_v48 = vsel %vm2974_vm7, %v2973_v27, 0.0 }
 0x2b4   :  { %v3030_v41 = vadd.f32 %v3029_v19, %v3028_v34 }
 0x2b6   :  { %v3032_v24 = vadd.f32 %v3031_v51, %v3030_v41 }
 0x2b8   :  { %v3034_v0 = vadd.f32 %v3033_v48, %v3032_v24 }
 0x2ba   :  { %v3035_v26 = vrot.slane %v3034_v0, 4 }
 0x2bc   :  { %v3036_v50 = vadd.f32 %v3035_v26, %v3034_v0 }
 0x2be   :  { %v3037_v30 = vrot.slane %v3036_v50, 2 }
 0x2c0   :  { %v3038_v31 = vadd.f32 %v3037_v30, %v3036_v50 }
 0x2c2   :  { %v3039_v59 = vrot.slane %v3038_v31, 1 }
 0x2c4   :  { %v3040_v16 = vadd.f32 %v3039_v59, %v3038_v31 }
 0x2c6   :  { %v3043_v37 = vmul.f32 0.008928572, %v3040_v16 }
 0x2c8   :  { %v12904_v36 = vsub.f32 %v12791_v18, %v3043_v37  ;;  %v12907_v47 = vsub.f32 %v12793_v11, %v3043_v37  ;;  %v12910_v60 = vsub.f32 %v12795_v1, %v3043_v37  ;;  %v12913_v20 = vsub.f32 %v12802_v45, %v3043_v37 }
 0x2c9   :  { %v12920_v54 = vsub.f32 %v12804_v44, %v3043_v37  ;;  %v12925_v11 = vsub.f32 %v12826_v43, %v3043_v37  ;;  %v12932_v8 = vsub.f32 %v12828_v57, %v3043_v37  ;;  %v12938_v43 = vsub.f32 %v12862_v12, %v3043_v37 }
 0x2ca   :  { %v3086_v2 = vmul.f32 %v12904_v36, %v12904_v36  ;;  %v3087_v56 = vmul.f32 %v12907_v47, %v12907_v47  ;;  %v3088_v18 = vmul.f32 %v12910_v60, %v12910_v60  ;;  %v3089_v1 = vmul.f32 %v12913_v20, %v12913_v20 }
 0x2cb   :  { %v3090_v44 = vmul.f32 %v12920_v54, %v12920_v54  ;;  %v3091_v4 = vmul.f32 %v12925_v11, %v12925_v11  ;;  %v12944_v7 = vsub.f32 %v12864_v32, %v3043_v37  ;;  %v3092_v57 = vmul.f32 %v12932_v8, %v12932_v8 }
 0x2cc   :  { %v3133_v45 = vsel %vm2974_vm7, %v3086_v2, 0.0  ;;  %v3134_v23 = vsel %vm2974_vm7, %v3087_v56, 0.0  ;;  %v3136_v21 = vsel %vm2974_vm7, %v3088_v18, 0.0  ;;  %v3138_v5 = vsel %vm2974_vm7, %v3089_v1, 0.0 }
 0x2cd   :  { %v3135_v63 = vadd.f32 %v3134_v23, %v3133_v45  ;;  %v3140_v42 = vsel %vm2974_vm7, %v3090_v44, 0.0  ;;  %v12949_v62 = vsub.f32 %v2969_v46, %v3043_v37  ;;  %v3093_v12 = vmul.f32 %v12938_v43, %v12938_v43 }
 0x2ce   :  { %v3142_v14 = vsel %vm2974_vm7, %v3091_v4, 0.0  ;;  %v12960_v49 = vsub.f32 %v2970_v33, %v3043_v37  ;;  %v3094_v58 = vmul.f32 %v12944_v7, %v12944_v7  ;;  %v3144_v46 = vsel %vm2974_vm7, %v3092_v57, 0.0 }
 0x2cf   :  { %v3137_v40 = vadd.f32 %v3136_v21, %v3135_v63  ;;  %v12965_v39 = vsub.f32 %v2971_v10, %v3043_v37  ;;  %v3095_v22 = vmul.f32 %v12949_v62, %v12949_v62  ;;  %v3146_v17 = vsel %vm2974_vm7, %v3093_v12, 0.0 }
 0x2d0   :  { %v12970_v61 = vsub.f32 %v2972_v3, %v3043_v37  ;;  %v3096_v33 = vmul.f32 %v12960_v49, %v12960_v49  ;;  %v3148_v35 = vsel %vm2974_vm7, %v3094_v58, 0.0  ;;  %v12975_v15 = vsub.f32 %v2973_v27, %v3043_v37 }
 0x2d1   :  { %v3139_v55 = vadd.f32 %v3138_v5, %v3137_v40  ;;  %v3097_v10 = vmul.f32 %v12965_v39, %v12965_v39  ;;  %v3150_v25 = vsel %vm2974_vm7, %v3095_v22, 0.0 }
 0x2d2   :  { %v3098_v29 = vmul.f32 %v12970_v61, %v12970_v61  ;;  %v3152_v3 = vsel %vm2974_vm7, %v3096_v33, 0.0  ;;  %v3099_v34 = vmul.f32 %v12975_v15, %v12975_v15 }
 0x2d3   :  { %v3141_v38 = vadd.f32 %v3140_v42, %v3139_v55  ;;  %v3154_v41 = vsel %vm2974_vm7, %v3097_v10, 0.0 }
 0x2d4   :  { %v3156_v27 = vsel %vm2974_vm7, %v3098_v29, 0.0  ;;  %v3158_v24 = vsel %vm2974_vm7, %v3099_v34, 0.0 }
 0x2d5   :  { %v3143_v32 = vadd.f32 %v3142_v14, %v3141_v38 }
 0x2d7   :  { %v3145_v53 = vadd.f32 %v3144_v46, %v3143_v32 }
 0x2d9   :  { %v3147_v28 = vadd.f32 %v3146_v17, %v3145_v53 }
 0x2db   :  { %v3149_v13 = vadd.f32 %v3148_v35, %v3147_v28 }
 0x2dd   :  { %v3151_v6 = vadd.f32 %v3150_v25, %v3149_v13 }
 0x2df   :  { %v3153_v19 = vadd.f32 %v3152_v3, %v3151_v6 }
 0x2e1   :  { %v3155_v51 = vadd.f32 %v3154_v41, %v3153_v19 }
 0x2e3   :  { %v3157_v48 = vadd.f32 %v3156_v27, %v3155_v51 }
 0x2e5   :  { %v3159_v0 = vadd.f32 %v3158_v24, %v3157_v48 }
 0x2e7   :  { %v3160_v26 = vrot.slane %v3159_v0, 4 }
 0x2e9   :  { %v3161_v50 = vadd.f32 %v3160_v26, %v3159_v0 }
 0x2eb   :  { %v3162_v30 = vrot.slane %v3161_v50, 2 }
 0x2ed   :  { %v3163_v31 = vadd.f32 %v3162_v30, %v3161_v50 }
 0x2ef   :  { %v3164_v59 = vrot.slane %v3163_v31, 1 }
 0x2f1   :  { %v3165_v16 = vadd.f32 %v3164_v59, %v3163_v31 }
 0x2f3   :  { %v3167_v37 = vmul.f32 0.008928572, %v3165_v16 }
 0x2f5   :  { %v3169_v2 = vadd.f32 1e-05, %v3167_v37 }
 0x2f7   :  { %9116 = vrsqrt.f32 %v3169_v2 }
 0x301   :  { %v12988_v56 = vpop.eup %9116 }
 0x302   :  { %v12992_v18 = vmul.f32 %v12988_v56, %v12904_v36  ;;  %v12996_v1 = vmul.f32 %v12988_v56, %v12907_v47  ;;  %v13000_v45 = vmul.f32 %v12988_v56, %v12910_v60  ;;  %v13004_v23 = vmul.f32 %v12988_v56, %v12913_v20 }
 0x303   :  { %v13008_v63 = vmul.f32 %v12988_v56, %v12920_v54  ;;  %v13019_v20 = vmul.f32 %v12988_v56, %v12925_v11  ;;  %v13026_v57 = vmul.f32 %v12988_v56, %v12932_v8  ;;  %v13039_v8 = vmul.f32 %v12988_v56, %v12938_v43 }
 0x304   :  { %v3258_v44 = vrot.slane %v12992_v18, 1  ;;  %v3259_v36 = vrot.slane %v12996_v1, 1  ;;  %v4466_v21 = vrot.slane %v12992_v18, 4  ;;  %v4467_v47 = vrot.slane %v12996_v1, 4 }
 0x305   :  { %v3261_v40 = vrot.slane %v13000_v45, 1  ;;  %v4469_v60 = vrot.slane %v13000_v45, 4  ;;  %v3263_v4 = vrot.slane %v13004_v23, 1  ;;  %v4471_v55 = vrot.slane %v13004_v23, 4 }
 0x306   :  { %v3260_v54 = vsel %vm349_vm0, %v3258_v44, %v3259_v36  ;;  %v4468_v5 = vsel %vm898_vm3, %v4466_v21, %v4467_v47  ;;  %v3265_v11 = vrot.slane %v13008_v63, 1  ;;  %v4473_v12 = vrot.slane %v13008_v63, 4 }
 0x307   :  { %8421 = vmatmul.mubr.msk.f32.gmra.mrb[12].mxu1 %vm2974_vm7, %v3260_v54  ;;  %8585 = vmatmul.mubr.msk.f32.gmra.mrb[12].mxu0 %vm2974_vm7, %v4468_v5  ;;  %v3262_v42 = vsel %vm349_vm0, %v3259_v36, %v3261_v40  ;;  %v4470_v38 = vsel %vm898_vm3, %v4467_v47, %v4469_v60  ;;  %v3264_v14 = vsel %vm349_vm0, %v3261_v40, %v3263_v4  ;;  %v3267_v58 = vrot.slane %v13019_v20, 1  ;;  %v15570_v40 = vld [vmem:[#allocation118_spill] sm:$0xff] }
 0x308   :  { %8423 = vmatprep.mubr.msk.f32.mxu1 %vm2974_vm7, %v3262_v42  ;;  %8587 = vmatprep.mubr.msk.f32.mxu0 %vm2974_vm7, %v4470_v38  ;;  %v4472_v32 = vsel %vm898_vm3, %v4469_v60, %v4471_v55  ;;  %v4475_v46 = vrot.slane %v13019_v20, 4  ;;  %v3269_v53 = vrot.slane %v13026_v57, 1  ;;  %v3266_v22 = vsel %vm349_vm0, %v3263_v4, %v3265_v11  ;;  %v15571_v4 = vld [vmem:[#allocation119_spill] sm:$0xff]  ;;  %v15572_v42 = vld [vmem:[#allocation120_spill] sm:$0xff] }
 0x309   :  { %v4474_v17 = vsel %vm898_vm3, %v4471_v55, %v4473_v12  ;;  %v4477_v28 = vrot.slane %v13026_v57, 4  ;;  %v13052_v43 = vmul.f32 %v12988_v56, %v12944_v7  ;;  %v3271_v33 = vrot.slane %v13039_v8, 1 }
 0x30a   :  { %v13059_v35 = vmul.f32 %v12988_v56, %v12949_v62  ;;  %v3268_v13 = vsel %vm349_vm0, %v3265_v11, %v3267_v58  ;;  %v4476_v10 = vsel %vm898_vm3, %v4473_v12, %v4475_v46  ;;  %v3270_v25 = vsel %vm349_vm0, %v3267_v58, %v3269_v53  ;;  %v15573_v12 = vld [vmem:[#allocation123_spill] sm:$0xff]  ;;  %v15574_v58 = vld [vmem:[#allocation124_spill] sm:$0xff] }
 0x30b   :  { %8424 = vmatmul.mubr.msk.f32.gmra.mrb[14].mxu1 %vm2974_vm7, %v3264_v14  ;;  %8588 = vmatmul.mubr.msk.f32.gmra.mrb[14].mxu0 %vm2974_vm7, %v4472_v32  ;;  %v4479_v6 = vrot.slane %v13039_v8, 4  ;;  %v4478_v7 = vsel %vm898_vm3, %v4475_v46, %v4477_v28  ;;  %v3273_v29 = vrot.slane %v13052_v43, 1  ;;  %v4481_v3 = vrot.slane %v13052_v43, 4 }
 0x30c   :  { %8426 = vmatprep.mubr.msk.f32.mxu1 %vm2974_vm7, %v3266_v22  ;;  %8590 = vmatprep.mubr.msk.f32.mxu0 %vm2974_vm7, %v4474_v17  ;;  %v13072_v62 = vmul.f32 %v12988_v56, %v12960_v49  ;;  %v3272_v19 = vsel %vm349_vm0, %v3269_v53, %v3271_v33  ;;  %v3275_v34 = vrot.slane %v13059_v35, 1  ;;  %v4483_v51 = vrot.slane %v13059_v35, 4  ;;  %v15575_v53 = vld [vmem:[#allocation127_spill] sm:$0xff] }
 0x30d   :  { %v4480_v41 = vsel %vm898_vm3, %v4477_v28, %v4479_v6  ;;  %v13082_v27 = vmul.f32 %v12988_v56, %v12965_v39  ;;  %v13086_v49 = vmul.f32 %v12988_v56, %v12970_v61  ;;  %v3274_v48 = vsel %vm349_vm0, %v3271_v33, %v3273_v29  ;;  %v13143_v17 = vld [vmem:[%s14401_s2 + $0x38] sm:$0xff] }
 0x30e   :  { %v4482_v24 = vsel %vm898_vm3, %v4479_v6, %v4481_v3  ;;  %v3277_v0 = vrot.slane %v13072_v62, 1  ;;  %v4485_v26 = vrot.slane %v13072_v62, 4  ;;  %v3276_v39 = vsel %vm349_vm0, %v3273_v29, %v3275_v34  ;;  %v15577_v6 = vld [vmem:[#allocation132_spill] sm:$0xff]  ;;  %v15578_v29 = vld [vmem:[#allocation122_spill] sm:$0xff] }
 0x30f   :  { %8427 = vmatmul.mubr.msk.f32.gmra.mrb[16].mxu1 %vm2974_vm7, %v3268_v13  ;;  %8591 = vmatmul.mubr.msk.f32.gmra.mrb[16].mxu0 %vm2974_vm7, %v4476_v10  ;;  %v4484_v61 = vsel %vm898_vm3, %v4481_v3, %v4483_v51  ;;  %v3279_v50 = vrot.slane %v13082_v27, 1  ;;  %v4487_v30 = vrot.slane %v13082_v27, 4  ;;  %v13102_v31 = vmul.f32 %v12988_v56, %v12975_v15  ;;  %v15576_v13 = vld [vmem:[#allocation131_spill] sm:$0xff] }
 0x310   :  { %8429 = vmatprep.mubr.msk.f32.mxu1 %vm2974_vm7, %v3270_v25  ;;  %8593 = vmatprep.mubr.msk.f32.mxu0 %vm2974_vm7, %v4478_v7  ;;  %v3278_v59 = vsel %vm349_vm0, %v3275_v34, %v3277_v0  ;;  %v4486_v16 = vsel %vm898_vm3, %v4483_v51, %v4485_v26  ;;  %v3281_v37 = vrot.slane %v13086_v49, 1  ;;  %v4489_v2 = vrot.slane %v13086_v49, 4  ;;  %v13157_v25 = vld [vmem:[%s14401_s2 + $0x18] sm:$0xff]  ;;  %v15579_v34 = vld [vmem:[#allocation121_spill] sm:$0xff] }
 0x311   :  { %v3280_v44 = vsel %vm349_vm0, %v3277_v0, %v3279_v50  ;;  %v4488_v15 = vsel %vm898_vm3, %v4485_v26, %v4487_v30  ;;  %v3283_v56 = vrot.slane %v13102_v31, 1  ;;  %v4491_v36 = vrot.slane %v13102_v31, 4  ;;  %v15581_v26 = vld [vmem:[#allocation129_spill] sm:$0xff] }
 0x312   :  { %v3282_v21 = vsel %vm349_vm0, %v3279_v50, %v3281_v37  ;;  %v4490_v47 = vsel %vm898_vm3, %v4487_v30, %v4489_v2  ;;  %v4768_v60 = vrot.slane %v15570_v40, 5  ;;  %v4769_v54 = vrot.slane %v15571_v4, 5  ;;  %v15582_v50 = vld [vmem:[#allocation133_spill] sm:$0xff] }
 0x313   :  { %8430 = vmatmul.mubr.msk.f32.gmra.mrb[18].mxu1 %vm2974_vm7, %v3272_v19  ;;  %8594 = vmatmul.mubr.msk.f32.gmra.mrb[18].mxu0 %vm2974_vm7, %v4480_v41  ;;  %v3284_v5 = vsel %vm349_vm0, %v3281_v37, %v3283_v56  ;;  %v4492_v55 = vsel %vm898_vm3, %v4489_v2, %v4491_v36  ;;  %v4771_v38 = vrot.slane %v15572_v42, 5  ;;  %v4773_v14 = vrot.slane %v15573_v12, 5 }
 0x314   :  { %8432 = vmatprep.mubr.msk.f32.mxu1 %vm2974_vm7, %v3274_v48  ;;  %8596 = vmatprep.mubr.msk.f32.mxu0 %vm2974_vm7, %v4482_v24  ;;  %v4770_v11 = vsel %vm1081_vm4, %v4768_v60, %v4769_v54  ;;  %v4775_v46 = vrot.slane %v15574_v58, 5  ;;  %v4777_v22 = vrot.slane %v15575_v53, 5  ;;  %v4779_v10 = vrot.slane %v15576_v13, 5  ;;  %v15580_v48 = vld [vmem:[#allocation128_spill] sm:$0xff] }
 0x315   :  { %v4772_v32 = vsel %vm1081_vm4, %v4769_v54, %v4771_v38  ;;  %v4774_v28 = vsel %vm1081_vm4, %v4771_v38, %v4773_v14  ;;  %v4783_v3 = vrot.slane %v15578_v29, 5  ;;  %v4785_v41 = vrot.slane %v15579_v34, 5 }
 0x316   :  { %v4776_v33 = vsel %vm1081_vm4, %v4773_v14, %v4775_v46  ;;  %v4780_v7 = vsel %vm1081_vm4, %v4777_v22, %v4779_v10  ;;  %v4787_v24 = vrot.slane %v15580_v48, 5  ;;  %v4791_v30 = vrot.slane %v15582_v50, 5 }
 0x317   :  { %8433 = vmatmul.mubr.msk.f32.gmra.mrb[20].mxu1 %vm2974_vm7, %v3276_v39  ;;  %8597 = vmatmul.mubr.msk.f32.gmra.mrb[20].mxu0 %vm2974_vm7, %v4484_v61  ;;  %v4786_v0 = vsel %vm1081_vm4, %v4783_v3, %v4785_v41  ;;  %v4789_v39 = vrot.slane %v15581_v26, 5  ;;  %v4798_v36 = vrot.slane %v13000_v45, 5  ;;  %v4802_v54 = vrot.slane %v13008_v63, 5 }
 0x318   :  { %8435 = vmatprep.mubr.msk.f32.mxu1 %vm2974_vm7, %v3278_v59  ;;  %8599 = vmatprep.mubr.msk.f32.mxu0 %vm2974_vm7, %v4486_v16  ;;  %v4788_v61 = vsel %vm1081_vm4, %v4785_v41, %v4787_v24  ;;  %v15583_v16 = vld [vmem:[#allocation135_spill] sm:$0xff] }
 0x319   :  { %v4790_v59 = vsel %vm1081_vm4, %v4787_v24, %v4789_v39  ;;  %v4793_v37 = vrot.slane %v15583_v16, 5  ;;  %v4792_v2 = vsel %vm1081_vm4, %v4789_v39, %v4791_v30  ;;  %v3781_v24 = vrot.slane %v15570_v40, 2 }
 0x31a   :  { %v3782_v39 = vrot.slane %v15571_v4, 2 }
 0x31b   :  { %8436 = vmatmul.mubr.msk.f32.gmra.mrb[22].mxu1 %vm2974_vm7, %v3280_v44  ;;  %8600 = vmatmul.mubr.msk.f32.gmra.mrb[22].mxu0 %vm2974_vm7, %v4488_v15  ;;  %v4795_v44 = vrot.slane %v12992_v18, 5  ;;  %v4796_v15 = vrot.slane %v12996_v1, 5  ;;  %v4794_v56 = vsel %vm1081_vm4, %v4791_v30, %v4793_v37  ;;  %v5098_v30 = vrot.slane %v15571_v4, 6 }
 0x31c   :  { %8438 = vmatprep.mubr.msk.f32.mxu1 %vm2974_vm7, %v3282_v21  ;;  %8602 = vmatprep.mubr.msk.f32.mxu0 %vm2974_vm7, %v4490_v47  ;;  %v4800_v47 = vrot.slane %v13004_v23, 5  ;;  %v3784_v37 = vrot.slane %v15572_v42, 2 }
 0x31d   :  { %v4797_v21 = vsel %vm1081_vm4, %v4795_v44, %v4796_v15  ;;  %v4799_v60 = vsel %vm1081_vm4, %v4796_v15, %v4798_v36  ;;  %v3783_v44 = vsel %vm532_vm1, %v3781_v24, %v3782_v39  ;;  %v5114_v24 = vrot.slane %v15579_v34, 6 }
 0x31e   :  { %v4803_v38 = vsel %vm1081_vm4, %v4800_v47, %v4802_v54 }
 0x31f   :  { %8439 = vmatmul.mubr.msk.f32.gmra.mrb[24].mxu1 %vm2974_vm7, %v3284_v5  ;;  %8603 = vmatmul.mubr.msk.f32.gmra.mrb[24].mxu0 %vm2974_vm7, %v4492_v55  ;;  %v4801_v5 = vsel %vm1081_vm4, %v4798_v36, %v4800_v47  ;;  %v4804_v55 = vrot.slane %v13019_v20, 5  ;;  %v5102_v36 = vrot.slane %v15573_v12, 6 }
 0x320   :  { %8443 = vmatprep.mubr.msk.f32.mxu1 %vm2974_vm7, %v15570_v40  ;;  %8607 = vmatprep.mubr.msk.f32.mxu0 %vm2974_vm7, %v4770_v11  ;;  %v4806_v11 = vrot.slane %v13026_v57, 5 }
 0x321   :  { %v4805_v14 = vsel %vm1081_vm4, %v4802_v54, %v4804_v55  ;;  %v5104_v54 = vrot.slane %v15574_v58, 6 }
 0x323   :  { %8444 = vmatmul.mubr.msk.f32.vlgmr.msra.gmra.mrb[0].mxu1 %vm2974_vm7, %v15571_v4  ;;  %8608 = vmatmul.mubr.msk.f32.vlgmr.msra.gmra.mrb[0].mxu0 %vm2974_vm7, %v4772_v32  ;;  %v4808_v32 = vrot.slane %v13039_v8, 5 }
 0x324   :  { %8647 = vmatpush3.msra.mxu0 %v12840_v9  ;;  %8446 = vmatprep.mubr.msk.f32.mxu1 %vm2974_vm7, %v15572_v42  ;;  %v4778_v9 = vsel %vm1081_vm4, %v4775_v46, %v4777_v22  ;;  %v4807_v46 = vsel %vm1081_vm4, %v4804_v55, %v4806_v11  ;;  %v4810_v22 = vrot.slane %v13052_v43, 5  ;;  %v3790_v55 = vrot.slane %v15575_v53, 2 }
 0x325   :  { %8610 = vmatprep.mubr.msk.f32.mxu0 %vm2974_vm7, %v4774_v28  ;;  %8483 = vmatpush3.msra.mxu1 %v12957_v52  ;;  %v4781_v52 = vrot.slane %v15577_v6, 5  ;;  %v4809_v28 = vsel %vm1081_vm4, %v4806_v11, %v4808_v32  ;;  %v13296_v11 = vld [vmem:[%s14401_s2 + $0x40] sm:$0xff] }
 0x326   :  { %8687 = vmatprep.subr.mxu0 %v13143_v17  ;;  %8523 = vmatprep.subr.mxu1 %v13157_v25 }
 0x327   :  { %8447 = vmatmul.mubr.msk.f32.gmra.mrb[2].mxu1 %vm2974_vm7, %v15573_v12  ;;  %8611 = vmatmul.mubr.msk.f32.gmra.mrb[2].mxu0 %vm2974_vm7, %v4776_v33  ;;  %v4782_v19 = vsel %vm1081_vm4, %v4779_v10, %v4781_v52  ;;  %v4784_v51 = vsel %vm1081_vm4, %v4781_v52, %v4783_v3  ;;  %v4812_v33 = vrot.slane %v13059_v35, 5  ;;  %v4811_v10 = vsel %vm1081_vm4, %v4808_v32, %v4810_v22 }
 0x328   :  { %8449 = vmatprep.mubr.msk.f32.mxu1 %vm2974_vm7, %v15574_v58  ;;  %8613 = vmatprep.mubr.msk.f32.mxu0 %vm2974_vm7, %v4778_v9  ;;  %v4814_v9 = vrot.slane %v13072_v62, 5 }
 0x329   :  { %v4813_v52 = vsel %vm1081_vm4, %v4810_v22, %v4812_v33  ;;  %v3792_v22 = vrot.slane %v15576_v13, 2 }
 0x32a   :  { %v4815_v3 = vsel %vm1081_vm4, %v4812_v33, %v4814_v9 }
 0x32b   :  { %8450 = vmatmul.mubr.msk.f32.gmra.mrb[4].mxu1 %vm2974_vm7, %v15575_v53  ;;  %8614 = vmatmul.mubr.msk.f32.gmra.mrb[4].mxu0 %vm2974_vm7, %v4780_v7  ;;  %v4816_v7 = vrot.slane %v13082_v27, 5 }
 0x32c   :  { %8452 = vmatprep.mubr.msk.f32.mxu1 %vm2974_vm7, %v15576_v13  ;;  %8616 = vmatprep.mubr.msk.f32.mxu0 %vm2974_vm7, %v4782_v19  ;;  %v4818_v19 = vrot.slane %v13086_v49, 5 }
 0x32d   :  { %v4817_v41 = vsel %vm1081_vm4, %v4814_v9, %v4816_v7  ;;  %v3793_v9 = vsel %vm532_vm1, %v3790_v55, %v3792_v22 }
 0x32f   :  { %8453 = vmatmul.mubr.msk.f32.gmra.mrb[6].mxu1 %vm2974_vm7, %v15577_v6  ;;  %8617 = vmatmul.mubr.msk.f32.gmra.mrb[6].mxu0 %vm2974_vm7, %v4784_v51  ;;  %v4820_v51 = vrot.slane %v13102_v31, 5 }
 0x330   :  { %8455 = vmatprep.mubr.msk.f32.mxu1 %vm2974_vm7, %v15578_v29  ;;  %8619 = vmatprep.mubr.msk.f32.mxu0 %vm2974_vm7, %v4786_v0  ;;  %v4819_v0 = vsel %vm1081_vm4, %v4816_v7, %v4818_v19  ;;  %v3796_v7 = vrot.slane %v15578_v29, 2 }
 0x333   :  { %8456 = vmatmul.mubr.msk.f32.gmra.mrb[8].mxu1 %vm2974_vm7, %v15579_v34  ;;  %8620 = vmatmul.mubr.msk.f32.gmra.mrb[8].mxu0 %vm2974_vm7, %v4788_v61  ;;  %v5097_v61 = vrot.slane %v15570_v40, 6 }
 0x334   :  { %8458 = vmatprep.mubr.msk.f32.mxu1 %vm2974_vm7, %v15580_v48  ;;  %8622 = vmatprep.mubr.msk.f32.mxu0 %vm2974_vm7, %v4790_v59  ;;  %v4821_v59 = vsel %vm1081_vm4, %v4818_v19, %v4820_v51  ;;  %v3798_v51 = vrot.slane %v15579_v34, 2 }
 0x335   :  { %v5099_v15 = vsel %vm1264_vm5, %v5097_v61, %v5098_v30  ;;  %v3800_v61 = vrot.slane %v15580_v48, 2 }
 0x337   :  { %8459 = vmatmul.mubr.msk.f32.gmra.mrb[10].mxu1 %vm2974_vm7, %v15581_v26  ;;  %8623 = vmatmul.mubr.msk.f32.gmra.mrb[10].mxu0 %vm2974_vm7, %v4792_v2  ;;  %v5100_v2 = vrot.slane %v15572_v42, 6 }
 0x338   :  { %8461 = vmatprep.mubr.msk.f32.mxu1 %vm2974_vm7, %v15582_v50  ;;  %8625 = vmatprep.mubr.msk.f32.mxu0 %vm2974_vm7, %v4794_v56  ;;  %v3786_v56 = vrot.slane %v15573_v12, 2 }
 0x339   :  { %v5101_v47 = vsel %vm1264_vm5, %v5098_v30, %v5100_v2  ;;  %v5116_v30 = vrot.slane %v15580_v48, 6 }
 0x33b   :  { %8462 = vmatmul.mubr.msk.f32.gmra.mrb[12].mxu1 %vm2974_vm7, %v12992_v18  ;;  %8626 = vmatmul.mubr.msk.f32.gmra.mrb[12].mxu0 %vm2974_vm7, %v4797_v21  ;;  %v3785_v21 = vsel %vm532_vm1, %v3782_v39, %v3784_v37 }
 0x33c   :  { %8464 = vmatprep.mubr.msk.f32.mxu1 %vm2974_vm7, %v12996_v1  ;;  %8628 = vmatprep.mubr.msk.f32.mxu0 %vm2974_vm7, %v4799_v60  ;;  %v3788_v60 = vrot.slane %v15574_v58, 2 }
 0x33e   :  { %v3789_v32 = vsel %vm532_vm1, %v3786_v56, %v3788_v60 }
 0x33f   :  { %8465 = vmatmul.mubr.msk.f32.gmra.mrb[14].mxu1 %vm2974_vm7, %v13000_v45  ;;  %8629 = vmatmul.mubr.msk.f32.gmra.mrb[14].mxu0 %vm2974_vm7, %v4801_v5  ;;  %v3787_v5 = vsel %vm532_vm1, %v3784_v37, %v3786_v56  ;;  %v5120_v56 = vrot.slane %v15582_v50, 6 }
 0x340   :  { %8467 = vmatprep.mubr.msk.f32.mxu1 %vm2974_vm7, %v13004_v23  ;;  %8631 = vmatprep.mubr.msk.f32.mxu0 %vm2974_vm7, %v4803_v38  ;;  %v5106_v38 = vrot.slane %v15575_v53, 6 }
 0x342   :  { %v5107_v33 = vsel %vm1264_vm5, %v5104_v54, %v5106_v38 }
 0x343   :  { %8468 = vmatmul.mubr.msk.f32.gmra.mrb[16].mxu1 %vm2974_vm7, %v13008_v63  ;;  %8632 = vmatmul.mubr.msk.f32.gmra.mrb[16].mxu0 %vm2974_vm7, %v4805_v14  ;;  %v5103_v14 = vsel %vm1264_vm5, %v5100_v2, %v5102_v36  ;;  %v3802_v2 = vrot.slane %v15581_v26, 2 }
 0x344   :  { %8470 = vmatprep.mubr.msk.f32.mxu1 %vm2974_vm7, %v13019_v20  ;;  %8634 = vmatprep.mubr.msk.f32.mxu0 %vm2974_vm7, %v4807_v46  ;;  %v5105_v46 = vsel %vm1264_vm5, %v5102_v36, %v5104_v54  ;;  %v3801_v36 = vsel %vm532_vm1, %v3798_v51, %v3800_v61  ;;  %v3806_v54 = vrot.slane %v15583_v16, 2 }
 0x347   :  { %8471 = vmatmul.mubr.msk.f32.gmra.mrb[18].mxu1 %vm2974_vm7, %v13026_v57  ;;  %8635 = vmatmul.mubr.msk.f32.gmra.mrb[18].mxu0 %vm2974_vm7, %v4809_v28  ;;  %v5108_v28 = vrot.slane %v15576_v13, 6 }
 0x348   :  { %8473 = vmatprep.mubr.msk.f32.mxu1 %vm2974_vm7, %v13039_v8  ;;  %8637 = vmatprep.mubr.msk.f32.mxu0 %vm2974_vm7, %v4811_v10  ;;  %v5110_v10 = vrot.slane %v15577_v6, 6 }
 0x34b   :  { %8474 = vmatmul.mubr.msk.f32.gmra.mrb[20].mxu1 %vm2974_vm7, %v13052_v43  ;;  %8638 = vmatmul.mubr.msk.f32.gmra.mrb[20].mxu0 %vm2974_vm7, %v4813_v52  ;;  %v5109_v52 = vsel %vm1264_vm5, %v5106_v38, %v5108_v28 }
 0x34c   :  { %8476 = vmatprep.mubr.msk.f32.mxu1 %vm2974_vm7, %v13059_v35  ;;  %8640 = vmatprep.mubr.msk.f32.mxu0 %vm2974_vm7, %v4815_v3  ;;  %v5112_v3 = vrot.slane %v15578_v29, 6 }
 0x34e   :  { %v5113_v39 = vsel %vm1264_vm5, %v5110_v10, %v5112_v3  ;;  %v5115_v37 = vsel %vm1264_vm5, %v5112_v3, %v5114_v24 }
 0x34f   :  { %8477 = vmatmul.mubr.msk.f32.gmra.mrb[22].mxu1 %vm2974_vm7, %v13072_v62  ;;  %8641 = vmatmul.mubr.msk.f32.gmra.mrb[22].mxu0 %vm2974_vm7, %v4817_v41  ;;  %v5111_v41 = vsel %vm1264_vm5, %v5108_v28, %v5110_v10 }
 0x350   :  { %8479 = vmatprep.mubr.msk.f32.mxu1 %vm2974_vm7, %v13082_v27  ;;  %8643 = vmatprep.mubr.msk.f32.mxu0 %vm2974_vm7, %v4819_v0 }
 0x353   :  { %8480 = vmatmul.mubr.msk.f32.gmra.mrb[24].mxu1 %vm2974_vm7, %v13086_v49  ;;  %8644 = vmatmul.mubr.msk.f32.gmra.mrb[24].mxu0 %vm2974_vm7, %v4821_v59  ;;  %v3799_v59 = vsel %vm532_vm1, %v3796_v7, %v3798_v51  ;;  %v5131_v51 = vrot.slane %v13008_v63, 6 }
 0x354   :  { %8484 = vmatprep.mubr.msk.f32.mxu1 %vm2974_vm7, %v3783_v44  ;;  %8648 = vmatprep.mubr.msk.f32.mxu0 %vm2974_vm7, %v5099_v15  ;;  %v5118_v44 = vrot.slane %v15581_v26, 6  ;;  %v3804_v15 = vrot.slane %v15582_v50, 2 }
 0x356   :  { %v5121_v38 = vsel %vm1264_vm5, %v5118_v44, %v5120_v56  ;;  %v3807_v28 = vsel %vm532_vm1, %v3804_v15, %v3806_v54  ;;  %v5139_v54 = vrot.slane %v13052_v43, 6 }
 0x357   :  { %8485 = vmatmul.mubr.msk.f32.vlgmr.msra.gmra.mrb[0].mxu1 %vm2974_vm7, %v3785_v21  ;;  %8649 = vmatmul.mubr.msk.f32.vlgmr.msra.gmra.mrb[0].mxu0 %vm2974_vm7, %v5101_v47  ;;  %v5117_v21 = vsel %vm1264_vm5, %v5114_v24, %v5116_v30  ;;  %v3803_v47 = vsel %vm532_vm1, %v3800_v61, %v3802_v2  ;;  %v5133_v61 = vrot.slane %v13019_v20, 6 }
 0x358   :  { %8688 = vmatpush3.msra.mxu0 %v13143_v17  ;;  %8487 = vmatprep.mubr.msk.f32.mxu1 %vm2974_vm7, %v3787_v5  ;;  %v3791_v17 = vsel %vm532_vm1, %v3788_v60, %v3790_v55  ;;  %v5119_v60 = vsel %vm1264_vm5, %v5116_v30, %v5118_v44  ;;  %v5122_v5 = vrot.slane %v15583_v16, 6  ;;  %v3805_v55 = vsel %vm532_vm1, %v3802_v2, %v3804_v15 }
 0x359   :  { %8651 = vmatprep.mubr.msk.f32.mxu0 %vm2974_vm7, %v5103_v14  ;;  %8524 = vmatpush3.msra.mxu1 %v13157_v25  ;;  %v3794_v25 = vrot.slane %v15577_v6, 2  ;;  %v3808_v14 = vrot.slane %v12992_v18, 2  ;;  %v5135_v2 = vrot.slane %v13026_v57, 6  ;;  %v5134_v15 = vsel %vm1264_vm5, %v5131_v51, %v5133_v61 }
 0x35a   :  { %8728 = vmatprep.subr.mxu0 %v13296_v11 }
 0x35b   :  { %8488 = vmatmul.mubr.msk.f32.gmra.mrb[2].mxu1 %vm2974_vm7, %v3789_v32  ;;  %8652 = vmatmul.mubr.msk.f32.gmra.mrb[2].mxu0 %vm2974_vm7, %v5105_v46  ;;  %v3795_v19 = vsel %vm532_vm1, %v3792_v22, %v3794_v25  ;;  %v3797_v0 = vsel %vm532_vm1, %v3794_v25, %v3796_v7  ;;  %v3809_v32 = vrot.slane %v12996_v1, 2  ;;  %v5124_v46 = vrot.slane %v12992_v18, 6 }
 0x35c   :  { %8490 = vmatprep.mubr.msk.f32.mxu1 %vm2974_vm7, %v3791_v17  ;;  %8654 = vmatprep.mubr.msk.f32.mxu0 %vm2974_vm7, %v5107_v33  ;;  %v5125_v22 = vrot.slane %v12996_v1, 6  ;;  %v5123_v17 = vsel %vm1264_vm5, %v5120_v56, %v5122_v5  ;;  %v3811_v33 = vrot.slane %v13000_v45, 2  ;;  %v5127_v25 = vrot.slane %v13000_v45, 6 }
 0x35d   :  { %v3810_v10 = vsel %vm532_vm1, %v3808_v14, %v3809_v32  ;;  %v5129_v7 = vrot.slane %v13004_v23, 6  ;;  %v3821_v56 = vrot.slane %v13039_v8, 2  ;;  %v5141_v14 = vrot.slane %v13059_v35, 6 }
 0x35e   :  { %v3812_v3 = vsel %vm532_vm1, %v3809_v32, %v3811_v33 }
 0x35f   :  { %8491 = vmatmul.mubr.msk.f32.gmra.mrb[4].mxu1 %vm2974_vm7, %v3793_v9  ;;  %8655 = vmatmul.mubr.msk.f32.gmra.mrb[4].mxu0 %vm2974_vm7, %v5109_v52  ;;  %v5126_v9 = vsel %vm1264_vm5, %v5124_v46, %v5125_v22  ;;  %v3813_v52 = vrot.slane %v13004_v23, 2 }
 0x360   :  { %8493 = vmatprep.mubr.msk.f32.mxu1 %vm2974_vm7, %v3795_v19  ;;  %8657 = vmatprep.mubr.msk.f32.mxu0 %vm2974_vm7, %v5111_v41  ;;  %v5128_v19 = vsel %vm1264_vm5, %v5125_v22, %v5127_v25  ;;  %v3815_v41 = vrot.slane %v13008_v63, 2  ;;  %v3827_v22 = vrot.slane %v13072_v62, 2 }
 0x361   :  { %v3814_v24 = vsel %vm532_vm1, %v3811_v33, %v3813_v52  ;;  %v5142_v33 = vsel %vm1264_vm5, %v5139_v54, %v5141_v14 }
 0x362   :  { %v3816_v30 = vsel %vm532_vm1, %v3813_v52, %v3815_v41 }
 0x363   :  { %8494 = vmatmul.mubr.msk.f32.gmra.mrb[6].mxu1 %vm2974_vm7, %v3797_v0  ;;  %8658 = vmatmul.mubr.msk.f32.gmra.mrb[6].mxu0 %vm2974_vm7, %v5113_v39  ;;  %v5130_v0 = vsel %vm1264_vm5, %v5127_v25, %v5129_v7  ;;  %v3817_v39 = vrot.slane %v13019_v20, 2  ;;  %v3829_v25 = vrot.slane %v13082_v27, 2 }
 0x364   :  { %8496 = vmatprep.mubr.msk.f32.mxu1 %vm2974_vm7, %v3799_v59  ;;  %8660 = vmatprep.mubr.msk.f32.mxu0 %vm2974_vm7, %v5115_v37  ;;  %v5132_v59 = vsel %vm1264_vm5, %v5129_v7, %v5131_v51  ;;  %v3819_v37 = vrot.slane %v13026_v57, 2  ;;  %v3831_v7 = vrot.slane %v13086_v49, 2 }
 0x365   :  { %v3818_v44 = vsel %vm532_vm1, %v3815_v41, %v3817_v39  ;;  %v4111_v41 = vrot.slane %v15571_v4, 3  ;;  %v3830_v51 = vsel %vm532_vm1, %v3827_v22, %v3829_v25 }
 0x366   :  { %v3822_v5 = vsel %vm532_vm1, %v3819_v37, %v3821_v56 }
 0x367   :  { %8497 = vmatmul.mubr.msk.f32.gmra.mrb[8].mxu1 %vm2974_vm7, %v3801_v36  ;;  %8661 = vmatmul.mubr.msk.f32.gmra.mrb[8].mxu0 %vm2974_vm7, %v5117_v21  ;;  %v5137_v36 = vrot.slane %v13039_v8, 6  ;;  %v3820_v21 = vsel %vm532_vm1, %v3817_v39, %v3819_v37  ;;  %v5149_v39 = vrot.slane %v13102_v31, 6  ;;  %v5427_v37 = vrot.slane %v15571_v4, 7 }
 0x368   :  { %8499 = vmatprep.mubr.msk.f32.mxu1 %vm2974_vm7, %v3803_v47  ;;  %8663 = vmatprep.mubr.msk.f32.mxu0 %vm2974_vm7, %v5119_v60  ;;  %v5136_v47 = vsel %vm1264_vm5, %v5133_v61, %v5135_v2  ;;  %v3823_v60 = vrot.slane %v13052_v43, 2  ;;  %v3832_v61 = vsel %vm532_vm1, %v3829_v25, %v3831_v7 }
 0x369   :  { %v5140_v46 = vsel %vm1264_vm5, %v5137_v36, %v5139_v54 }
 0x36a   :  { %v3824_v32 = vsel %vm532_vm1, %v3821_v56, %v3823_v60  ;;  %v5429_v56 = vrot.slane %v15572_v42, 7 }
 0x36b   :  { %8500 = vmatmul.mubr.msk.f32.gmra.mrb[10].mxu1 %vm2974_vm7, %v3805_v55  ;;  %8664 = vmatmul.mubr.msk.f32.gmra.mrb[10].mxu0 %vm2974_vm7, %v5121_v38  ;;  %v5138_v55 = vsel %vm1264_vm5, %v5135_v2, %v5137_v36  ;;  %v3825_v38 = vrot.slane %v13059_v35, 2 }
 0x36c   :  { %8502 = vmatprep.mubr.msk.f32.mxu1 %vm2974_vm7, %v3807_v28  ;;  %8666 = vmatprep.mubr.msk.f32.mxu0 %vm2974_vm7, %v5123_v17  ;;  %v5143_v28 = vrot.slane %v13072_v62, 6  ;;  %v5430_v54 = vsel %vm1447_vm6, %v5427_v37, %v5429_v56 }
 0x36d   :  { %v3826_v17 = vsel %vm532_vm1, %v3823_v60, %v3825_v38 }
 0x36e   :  { %v5144_v52 = vsel %vm1264_vm5, %v5141_v14, %v5143_v28  ;;  %v4119_v14 = vrot.slane %v15575_v53, 3 }
 0x36f   :  { %8503 = vmatmul.mubr.msk.f32.gmra.mrb[12].mxu1 %vm2974_vm7, %v3810_v10  ;;  %8667 = vmatmul.mubr.msk.f32.gmra.mrb[12].mxu0 %vm2974_vm7, %v5126_v9  ;;  %v5145_v10 = vrot.slane %v13082_v27, 6  ;;  %v3828_v9 = vsel %vm532_vm1, %v3825_v38, %v3827_v22 }
 0x370   :  { %8505 = vmatprep.mubr.msk.f32.mxu1 %vm2974_vm7, %v3812_v3  ;;  %8669 = vmatprep.mubr.msk.f32.mxu0 %vm2974_vm7, %v5128_v19  ;;  %v5147_v3 = vrot.slane %v13086_v49, 6  ;;  %v4110_v19 = vrot.slane %v15570_v40, 3 }
 0x373   :  { %8506 = vmatmul.mubr.msk.f32.gmra.mrb[14].mxu1 %vm2974_vm7, %v3814_v24  ;;  %8670 = vmatmul.mubr.msk.f32.gmra.mrb[14].mxu0 %vm2974_vm7, %v5130_v0  ;;  %v5146_v24 = vsel %vm1264_vm5, %v5143_v28, %v5145_v10  ;;  %v3833_v0 = vrot.slane %v13102_v31, 2 }
 0x374   :  { %8508 = vmatprep.mubr.msk.f32.mxu1 %vm2974_vm7, %v3816_v30  ;;  %8672 = vmatprep.mubr.msk.f32.mxu0 %vm2974_vm7, %v5132_v59  ;;  %v5148_v30 = vsel %vm1264_vm5, %v5145_v10, %v5147_v3  ;;  %v5426_v59 = vrot.slane %v15570_v40, 7  ;;  %v4112_v40 = vsel %vm715_vm2, %v4110_v19, %v4111_v41  ;;  %v4123_v10 = vrot.slane %v15577_v6, 3 }
 0x375   :  { %v3834_v2 = vsel %vm532_vm1, %v3831_v7, %v3833_v0  ;;  %v5441_v19 = vrot.slane %v15578_v29, 7  ;;  %v5443_v0 = vrot.slane %v15579_v34, 7 }
 0x376   :  { %v5428_v36 = vsel %vm1447_vm6, %v5426_v59, %v5427_v37  ;;  %v5445_v59 = vrot.slane %v15580_v48, 7 }
 0x377   :  { %8509 = vmatmul.mubr.msk.f32.gmra.mrb[16].mxu1 %vm2974_vm7, %v3818_v44  ;;  %8673 = vmatmul.mubr.msk.f32.gmra.mrb[16].mxu0 %vm2974_vm7, %v5134_v15  ;;  %v5150_v44 = vsel %vm1264_vm5, %v5147_v3, %v5149_v39  ;;  %v4113_v15 = vrot.slane %v15572_v42, 3  ;;  %v4125_v3 = vrot.slane %v15578_v29, 3 }
 0x378   :  { %8511 = vmatprep.mubr.msk.f32.mxu1 %vm2974_vm7, %v3820_v21  ;;  %8675 = vmatprep.mubr.msk.f32.mxu0 %vm2974_vm7, %v5136_v47  ;;  %v4115_v21 = vrot.slane %v15573_v12, 3  ;;  %v5431_v47 = vrot.slane %v15573_v12, 7 }
 0x379   :  { %v4114_v60 = vsel %vm715_vm2, %v4111_v41, %v4113_v15  ;;  %v4126_v39 = vsel %vm715_vm2, %v4123_v10, %v4125_v3 }
 0x37a   :  { %v4116_v38 = vsel %vm715_vm2, %v4113_v15, %v4115_v21  ;;  %v5447_v15 = vrot.slane %v15581_v26, 7 }
 0x37b   :  { %8512 = vmatmul.mubr.msk.f32.gmra.mrb[18].mxu1 %vm2974_vm7, %v3822_v5  ;;  %8676 = vmatmul.mubr.msk.f32.gmra.mrb[18].mxu0 %vm2974_vm7, %v5138_v55  ;;  %v4117_v5 = vrot.slane %v15574_v58, 3  ;;  %v5433_v55 = vrot.slane %v15574_v58, 7 }
 0x37c   :  { %8514 = vmatprep.mubr.msk.f32.mxu1 %vm2974_vm7, %v3824_v32  ;;  %8678 = vmatprep.mubr.msk.f32.mxu0 %vm2974_vm7, %v5140_v46  ;;  %v5435_v32 = vrot.slane %v15575_v53, 7  ;;  %v5432_v46 = vsel %vm1447_vm6, %v5429_v56, %v5431_v47  ;;  %v4133_v56 = vrot.slane %v15582_v50, 3 }
 0x37d   :  { %v4118_v22 = vsel %vm715_vm2, %v4115_v21, %v4117_v5  ;;  %v5434_v28 = vsel %vm1447_vm6, %v5431_v47, %v5433_v55  ;;  %v5446_v21 = vsel %vm1447_vm6, %v5443_v0, %v5445_v59 }
 0x37e   :  { %v5436_v25 = vsel %vm1447_vm6, %v5433_v55, %v5435_v32 }
 0x37f   :  { %8515 = vmatmul.mubr.msk.f32.gmra.mrb[20].mxu1 %vm2974_vm7, %v3826_v17  ;;  %8679 = vmatmul.mubr.msk.f32.gmra.mrb[20].mxu0 %vm2974_vm7, %v5142_v33  ;;  %v4121_v17 = vrot.slane %v15576_v13, 3  ;;  %v5437_v33 = vrot.slane %v15576_v13, 7 }
 0x380   :  { %8517 = vmatprep.mubr.msk.f32.mxu1 %vm2974_vm7, %v3828_v9  ;;  %8681 = vmatprep.mubr.msk.f32.mxu0 %vm2974_vm7, %v5144_v52  ;;  %v5439_v9 = vrot.slane %v15577_v6, 7 }
 0x381   :  { %v4122_v52 = vsel %vm715_vm2, %v4119_v14, %v4121_v17  ;;  %v5438_v7 = vsel %vm1447_vm6, %v5435_v32, %v5437_v33  ;;  %v4124_v41 = vsel %vm715_vm2, %v4121_v17, %v4123_v10  ;;  %v4138_v32 = vrot.slane %v12996_v1, 3 }
 0x382   :  { %v4142_v10 = vrot.slane %v13004_v23, 3 }
 0x383   :  { %8518 = vmatmul.mubr.msk.f32.gmra.mrb[22].mxu1 %vm2974_vm7, %v3830_v51  ;;  %8682 = vmatmul.mubr.msk.f32.gmra.mrb[22].mxu0 %vm2974_vm7, %v5146_v24  ;;  %v5440_v51 = vsel %vm1447_vm6, %v5437_v33, %v5439_v9  ;;  %v4127_v24 = vrot.slane %v15579_v34, 3  ;;  %v4140_v33 = vrot.slane %v13000_v45, 3 }
 0x384   :  { %8520 = vmatprep.mubr.msk.f32.mxu1 %vm2974_vm7, %v3832_v61  ;;  %8684 = vmatprep.mubr.msk.f32.mxu0 %vm2974_vm7, %v5148_v30  ;;  %v5442_v61 = vsel %vm1447_vm6, %v5439_v9, %v5441_v19  ;;  %v4129_v30 = vrot.slane %v15580_v48, 3  ;;  %v5458_v9 = vrot.slane %v13004_v23, 7 }
 0x385   :  { %v4128_v37 = vsel %vm715_vm2, %v4125_v3, %v4127_v24  ;;  %v4144_v3 = vrot.slane %v13008_v63, 3 }
 0x387   :  { %8521 = vmatmul.mubr.msk.f32.gmra.mrb[24].mxu1 %vm2974_vm7, %v3834_v2  ;;  %8685 = vmatmul.mubr.msk.f32.gmra.mrb[24].mxu0 %vm2974_vm7, %v5150_v44  ;;  %v5444_v2 = vsel %vm1447_vm6, %v5441_v19, %v5443_v0  ;;  %v4131_v44 = vrot.slane %v15581_v26, 3  ;;  %v5460_v19 = vrot.slane %v13008_v63, 7  ;;  %v5462_v0 = vrot.slane %v13019_v20, 7 }
 0x388   :  { %8525 = vmatprep.mubr.msk.f32.mxu1 %vm2974_vm7, %v4112_v40  ;;  %8689 = vmatprep.mubr.msk.f32.mxu0 %vm2974_vm7, %v5428_v36  ;;  %v5449_v40 = vrot.slane %v15582_v50, 7  ;;  %v4130_v36 = vsel %vm715_vm2, %v4127_v24, %v4129_v30  ;;  %v4146_v24 = vrot.slane %v13019_v20, 3 }
 0x389   :  { %v4132_v47 = vsel %vm715_vm2, %v4129_v30, %v4131_v44  ;;  %v4134_v55 = vsel %vm715_vm2, %v4131_v44, %v4133_v56  ;;  %v4148_v30 = vrot.slane %v13026_v57, 3  ;;  %v4150_v44 = vrot.slane %v13039_v8, 3 }
 0x38b   :  { %8526 = vmatmul.mubr.msk.f32.vlgmr.msra.gmra.mrb[0].mxu1 %vm2974_vm7, %v4114_v60  ;;  %8690 = vmatmul.mubr.msk.f32.vlgmr.msra.gmra.mrb[0].mxu0 %vm2974_vm7, %v5430_v54  ;;  %v5448_v60 = vsel %vm1447_vm6, %v5445_v59, %v5447_v15  ;;  %v4135_v54 = vrot.slane %v15583_v16, 3  ;;  %v5464_v59 = vrot.slane %v13026_v57, 7 }
 0x38c   :  { %8729 = vmatpush3.msra.mxu0 %v13296_v11  ;;  %8528 = vmatprep.mubr.msk.f32.mxu1 %vm2974_vm7, %v4116_v38  ;;  %v4120_v11 = vsel %vm715_vm2, %v4117_v5, %v4119_v14  ;;  %v5451_v5 = vrot.slane %v15583_v16, 7  ;;  %v5450_v38 = vsel %vm1447_vm6, %v5447_v15, %v5449_v40  ;;  %v4137_v14 = vrot.slane %v12992_v18, 3 }
 0x38d   :  { %8692 = vmatprep.mubr.msk.f32.mxu0 %vm2974_vm7, %v5432_v46  ;;  %v5453_v46 = vrot.slane %v12992_v18, 7  ;;  %v5466_v15 = vrot.slane %v13039_v8, 7 }
 0x38e   :  { %v5452_v17 = vsel %vm1447_vm6, %v5449_v40, %v5451_v5  ;;  %v4139_v18 = vsel %vm715_vm2, %v4137_v14, %v4138_v32  ;;  %v5465_v40 = vsel %vm1447_vm6, %v5462_v0, %v5464_v59  ;;  %v5470_v5 = vrot.slane %v13059_v35, 7 }
 0x38f   :  { %8529 = vmatmul.mubr.msk.f32.gmra.mrb[2].mxu1 %vm2974_vm7, %v4118_v22  ;;  %8693 = vmatmul.mubr.msk.f32.gmra.mrb[2].mxu0 %vm2974_vm7, %v5434_v28  ;;  %v5454_v22 = vrot.slane %v12996_v1, 7  ;;  %v4136_v28 = vsel %vm715_vm2, %v4133_v56, %v4135_v54  ;;  %v4149_v56 = vsel %vm715_vm2, %v4146_v24, %v4148_v30  ;;  %v4154_v54 = vrot.slane %v13059_v35, 3 }
 0x390   :  { %8531 = vmatprep.mubr.msk.f32.mxu1 %vm2974_vm7, %v4120_v11  ;;  %8695 = vmatprep.mubr.msk.f32.mxu0 %vm2974_vm7, %v5436_v25  ;;  %v5456_v11 = vrot.slane %v13000_v45, 7  ;;  %v4156_v14 = vrot.slane %v13072_v62, 3 }
 0x391   :  { %v5455_v25 = vsel %vm1447_vm6, %v5453_v46, %v5454_v22 }
 0x393   :  { %8532 = vmatmul.mubr.msk.f32.gmra.mrb[4].mxu1 %vm2974_vm7, %v4122_v52  ;;  %8696 = vmatmul.mubr.msk.f32.gmra.mrb[4].mxu0 %vm2974_vm7, %v5438_v7  ;;  %v4141_v52 = vsel %vm715_vm2, %v4138_v32, %v4140_v33  ;;  %v5457_v7 = vsel %vm1447_vm6, %v5454_v22, %v5456_v11  ;;  %v5472_v32 = vrot.slane %v13072_v62, 7 }
 0x394   :  { %8534 = vmatprep.mubr.msk.f32.mxu1 %vm2974_vm7, %v4124_v41  ;;  %8698 = vmatprep.mubr.msk.f32.mxu0 %vm2974_vm7, %v5440_v51  ;;  %v4143_v41 = vsel %vm715_vm2, %v4140_v33, %v4142_v10  ;;  %v5459_v51 = vsel %vm1447_vm6, %v5456_v11, %v5458_v9  ;;  %v4157_v33 = vsel %vm715_vm2, %v4154_v54, %v4156_v14 }
 0x395   :  { %v5473_v11 = vsel %vm1447_vm6, %v5470_v5, %v5472_v32 }
 0x397   :  { %8535 = vmatmul.mubr.msk.f32.gmra.mrb[6].mxu1 %vm2974_vm7, %v4126_v39  ;;  %8699 = vmatmul.mubr.msk.f32.gmra.mrb[6].mxu0 %vm2974_vm7, %v5442_v61  ;;  %v4145_v39 = vsel %vm715_vm2, %v4142_v10, %v4144_v3  ;;  %v5461_v61 = vsel %vm1447_vm6, %v5458_v9, %v5460_v19 }
 0x398   :  { %8537 = vmatprep.mubr.msk.f32.mxu1 %vm2974_vm7, %v4128_v37  ;;  %8701 = vmatprep.mubr.msk.f32.mxu0 %vm2974_vm7, %v5444_v2  ;;  %v4147_v37 = vsel %vm715_vm2, %v4144_v3, %v4146_v24  ;;  %v5463_v2 = vsel %vm1447_vm6, %v5460_v19, %v5462_v0 }
 0x39b   :  { %8538 = vmatmul.mubr.msk.f32.gmra.mrb[8].mxu1 %vm2974_vm7, %v4130_v36  ;;  %8702 = vmatmul.mubr.msk.f32.gmra.mrb[8].mxu0 %vm2974_vm7, %v5446_v21  ;;  %v4152_v36 = vrot.slane %v13052_v43, 3  ;;  %v5468_v21 = vrot.slane %v13052_v43, 7 }
 0x39c   :  { %8540 = vmatprep.mubr.msk.f32.mxu1 %vm2974_vm7, %v4132_v47  ;;  %8704 = vmatprep.mubr.msk.f32.mxu0 %vm2974_vm7, %v5448_v60  ;;  %v4151_v47 = vsel %vm715_vm2, %v4148_v30, %v4150_v44  ;;  %v5467_v60 = vsel %vm1447_vm6, %v5464_v59, %v5466_v15 }
 0x39d   :  { %v4155_v46 = vsel %vm715_vm2, %v4152_v36, %v4154_v54  ;;  %v5471_v22 = vsel %vm1447_vm6, %v5468_v21, %v5470_v5 }
 0x39f   :  { %8541 = vmatmul.mubr.msk.f32.gmra.mrb[10].mxu1 %vm2974_vm7, %v4134_v55  ;;  %8705 = vmatmul.mubr.msk.f32.gmra.mrb[10].mxu0 %vm2974_vm7, %v5450_v38  ;;  %v4153_v55 = vsel %vm715_vm2, %v4150_v44, %v4152_v36  ;;  %v5469_v38 = vsel %vm1447_vm6, %v5466_v15, %v5468_v21 }
 0x3a0   :  { %8543 = vmatprep.mubr.msk.f32.mxu1 %vm2974_vm7, %v4136_v28  ;;  %8707 = vmatprep.mubr.msk.f32.mxu0 %vm2974_vm7, %v5452_v17  ;;  %v4158_v28 = vrot.slane %v13082_v27, 3  ;;  %v5474_v17 = vrot.slane %v13082_v27, 7 }
 0x3a2   :  { %v4159_v10 = vsel %vm715_vm2, %v4156_v14, %v4158_v28  ;;  %v5475_v9 = vsel %vm1447_vm6, %v5472_v32, %v5474_v17  ;;  %v6192_v32 = vld [vmem:[%s14402_s3] sm:$0xff] }
 0x3a3   :  { %8544 = vmatmul.mubr.msk.f32.gmra.mrb[12].mxu1 %vm2974_vm7, %v4139_v18  ;;  %8708 = vmatmul.mubr.msk.f32.gmra.mrb[12].mxu0 %vm2974_vm7, %v5455_v25  ;;  %v4160_v18 = vrot.slane %v13086_v49, 3  ;;  %v5476_v25 = vrot.slane %v13086_v49, 7 }
 0x3a4   :  { %8546 = vmatprep.mubr.msk.f32.mxu1 %vm2974_vm7, %v4141_v52  ;;  %8710 = vmatprep.mubr.msk.f32.mxu0 %vm2974_vm7, %v5457_v7  ;;  %v4162_v52 = vrot.slane %v13102_v31, 3  ;;  %v5478_v7 = vrot.slane %v13102_v31, 7 }
 0x3a5   :  { %v4161_v3 = vsel %vm715_vm2, %v4158_v28, %v4160_v18  ;;  %v5477_v19 = vsel %vm1447_vm6, %v5474_v17, %v5476_v25 }
 0x3a7   :  { %8547 = vmatmul.mubr.msk.f32.gmra.mrb[14].mxu1 %vm2974_vm7, %v4143_v41  ;;  %8711 = vmatmul.mubr.msk.f32.gmra.mrb[14].mxu0 %vm2974_vm7, %v5459_v51  ;;  %v4163_v41 = vsel %vm715_vm2, %v4160_v18, %v4162_v52  ;;  %v5479_v51 = vsel %vm1447_vm6, %v5476_v25, %v5478_v7 }
 0x3a8   :  { %8549 = vmatprep.mubr.msk.f32.mxu1 %vm2974_vm7, %v4145_v39  ;;  %8713 = vmatprep.mubr.msk.f32.mxu0 %vm2974_vm7, %v5461_v61 }
 0x3ab   :  { %8550 = vmatmul.mubr.msk.f32.gmra.mrb[16].mxu1 %vm2974_vm7, %v4147_v37  ;;  %8714 = vmatmul.mubr.msk.f32.gmra.mrb[16].mxu0 %vm2974_vm7, %v5463_v2 }
 0x3ac   :  { %8552 = vmatprep.mubr.msk.f32.mxu1 %vm2974_vm7, %v4149_v56  ;;  %8716 = vmatprep.mubr.msk.f32.mxu0 %vm2974_vm7, %v5465_v40 }
 0x3af   :  { %8553 = vmatmul.mubr.msk.f32.gmra.mrb[18].mxu1 %vm2974_vm7, %v4151_v47  ;;  %8717 = vmatmul.mubr.msk.f32.gmra.mrb[18].mxu0 %vm2974_vm7, %v5467_v60 }
 0x3b0   :  { %8555 = vmatprep.mubr.msk.f32.mxu1 %vm2974_vm7, %v4153_v55  ;;  %8719 = vmatprep.mubr.msk.f32.mxu0 %vm2974_vm7, %v5469_v38 }
 0x3b3   :  { %8556 = vmatmul.mubr.msk.f32.gmra.mrb[20].mxu1 %vm2974_vm7, %v4155_v46  ;;  %8720 = vmatmul.mubr.msk.f32.gmra.mrb[20].mxu0 %vm2974_vm7, %v5471_v22  ;;  %v6193_v46 = vld [vmem:[%s14402_s3 + $0x8] sm:$0xff] }
 0x3b4   :  { %8558 = vmatprep.mubr.msk.f32.mxu1 %vm2974_vm7, %v4157_v33  ;;  %8722 = vmatprep.mubr.msk.f32.mxu0 %vm2974_vm7, %v5473_v11  ;;  %v8845_v33 = vpack.c.bf16 %v6193_v46, %v6192_v32 }
 0x3b6   :  { %8846 = vmatprep.subr.bf16.mxu1 %v8845_v33 }
 0x3b7   :  { %8559 = vmatmul.mubr.msk.f32.gmra.mrb[22].mxu1 %vm2974_vm7, %v4159_v10  ;;  %8723 = vmatmul.mubr.msk.f32.gmra.mrb[22].mxu0 %vm2974_vm7, %v5475_v9 }
 0x3b8   :  { %8561 = vmatprep.mubr.msk.f32.mxu1 %vm2974_vm7, %v4161_v3  ;;  %8725 = vmatprep.mubr.msk.f32.mxu0 %vm2974_vm7, %v5477_v19 }
 0x3b9   :  { %8848 = vmatpush3.bf16.msra.mxu1 %v8845_v33 }
 0x3bb   :  { %8562 = vmatmul.mubr.msk.f32.gmra.mrb[24].mxu1 %vm2974_vm7, %v4163_v41  ;;  %8726 = vmatmul.mubr.msk.f32.gmra.mrb[24].mxu0 %vm2974_vm7, %v5479_v51 }
 0x3bc   :  { %8730 = vmatprep.mubr.msk.f32.mxu0 %vm2974_vm7, %v15571_v4 }
 0x3bf   :  { %8731 = vmatmul.mubr.msk.f32.vlgmr.msra.gmra.mrb[0].mxu0 %vm2974_vm7, %v15572_v42 }
 0x3c0   :  { %8733 = vmatprep.mubr.msk.f32.mxu0 %vm2974_vm7, %v15573_v12 }
 0x3c3   :  { %8734 = vmatmul.mubr.msk.f32.gmra.mrb[2].mxu0 %vm2974_vm7, %v15574_v58 }
 0x3c4   :  { %8736 = vmatprep.mubr.msk.f32.mxu0 %vm2974_vm7, %v15575_v53 }
 0x3c7   :  { %8737 = vmatmul.mubr.msk.f32.gmra.mrb[4].mxu0 %vm2974_vm7, %v15576_v13 }
 0x3c8   :  { %8739 = vmatprep.mubr.msk.f32.mxu0 %vm2974_vm7, %v15577_v6 }
 0x3cb   :  { %8740 = vmatmul.mubr.msk.f32.gmra.mrb[6].mxu0 %vm2974_vm7, %v15578_v29 }
 0x3cc   :  { %8742 = vmatprep.mubr.msk.f32.mxu0 %vm2974_vm7, %v15579_v34 }
 0x3cf   :  { %8743 = vmatmul.mubr.msk.f32.gmra.mrb[8].mxu0 %vm2974_vm7, %v15580_v48 }
 0x3d0   :  { %8745 = vmatprep.mubr.msk.f32.mxu0 %vm2974_vm7, %v15581_v26 }
 0x3d3   :  { %8746 = vmatmul.mubr.msk.f32.gmra.mrb[10].mxu0 %vm2974_vm7, %v15582_v50 }
 0x3d4   :  { %8748 = vmatprep.mubr.msk.f32.mxu0 %vm2974_vm7, %v15583_v16 }
 0x3d7   :  { %8749 = vmatmul.mubr.msk.f32.gmra.mrb[12].mxu0 %vm2974_vm7, %v12996_v1 }
 0x3d8   :  { %8751 = vmatprep.mubr.msk.f32.mxu0 %vm2974_vm7, %v13000_v45 }
 0x3db   :  { %8752 = vmatmul.mubr.msk.f32.gmra.mrb[14].mxu0 %vm2974_vm7, %v13004_v23 }
 0x3dc   :  { %8754 = vmatprep.mubr.msk.f32.mxu0 %vm2974_vm7, %v13008_v63 }
 0x3df   :  { %8755 = vmatmul.mubr.msk.f32.gmra.mrb[16].mxu0 %vm2974_vm7, %v13019_v20 }
 0x3e0   :  { %8757 = vmatprep.mubr.msk.f32.mxu0 %vm2974_vm7, %v13026_v57 }
 0x3e3   :  { %8758 = vmatmul.mubr.msk.f32.gmra.mrb[18].mxu0 %vm2974_vm7, %v13039_v8 }
 0x3e4   :  { %8760 = vmatprep.mubr.msk.f32.mxu0 %vm2974_vm7, %v13052_v43 }
 0x3e7   :  { %8761 = vmatmul.mubr.msk.f32.gmra.mrb[20].mxu0 %vm2974_vm7, %v13059_v35 }
 0x3e8   :  { %8763 = vmatprep.mubr.msk.f32.mxu0 %vm2974_vm7, %v13072_v62 }
 0x3eb   :  { %8764 = vmatmul.mubr.msk.f32.gmra.mrb[22].mxu0 %vm2974_vm7, %v13082_v27 }
 0x3ec   :  { %8766 = vmatprep.mubr.msk.f32.mxu0 %vm2974_vm7, %v13086_v49 }
 0x3ef   :  { %8767 = vmatmul.mubr.msk.f32.gmra.mrb[24].mxu0 %vm2974_vm7, %v13102_v31 }
 0x45e   :  { %v8527_v1 = vpop.f32.mrb[0].mxu1 }
 0x45f   :  { %v4282_v45 = vpop.f32.mrb[1].mxu1 }
 0x462   :  { %v8530_v23 = vpop.f32.mrb[2].mxu1 }
 0x463   :  { %v4292_v63 = vpop.f32.mrb[3].mxu1 }
 0x466   :  { %v8533_v20 = vpop.f32.mrb[4].mxu1 }
 0x467   :  { %v4302_v57 = vpop.f32.mrb[5].mxu1 }
 0x46a   :  { %v8536_v8 = vpop.f32.mrb[6].mxu1 }
 0x46b   :  { %v4312_v43 = vpop.f32.mrb[7].mxu1 }
 0x46e   :  { %v8539_v35 = vpop.f32.mrb[8].mxu1 }
 0x46f   :  { %v4322_v4 = vpop.f32.mrb[9].mxu1 }
 0x472   :  { %v8542_v62 = vpop.f32.mrb[10].mxu1 }
 0x473   :  { %v4332_v42 = vpop.f32.mrb[11].mxu1 }
 0x476   :  { %v13653_v12 = vpop.f32.mrb[12].mxu1 }
 0x477   :  { %v13655_v27 = vpop.f32.mrb[13].mxu1 }
 0x47a   :  { %v13657_v49 = vpop.f32.mrb[14].mxu1 }
 0x47b   :  { %v13659_v58 = vpop.f32.mrb[15].mxu1 }
 0x47e   :  { %v13661_v31 = vpop.f32.mrb[16].mxu1 }
 0x47f   :  { %v13663_v53 = vpop.f32.mrb[17].mxu1 }
 0x482   :  { %v13665_v13 = vpop.f32.mrb[18].mxu1 }
 0x483   :  { %v13667_v6 = vpop.f32.mrb[19].mxu1 }
 0x486   :  { %v13669_v29 = vpop.f32.mrb[20].mxu1 }
 0x487   :  { %v13671_v34 = vpop.f32.mrb[21].mxu1 }
 0x48a   :  { %v13673_v48 = vpop.f32.mrb[22].mxu1 }
 0x48b   :  { %v13675_v26 = vpop.f32.mrb[23].mxu1 }
 0x48e   :  { %v13677_v50 = vpop.f32.mrb[24].mxu1 }
 0x48f   :  { %v13679_v16 = vpop.f32.mrb[25].mxu1 }
 0x492   :  { %v8732_v24 = vpop.f32.mrb[0].mxu0 }
 0x493   :  { %v13681_v0 = vadd.f32 %v8732_v24, %v8527_v1  ;;  %v5825_v39 = vpop.f32.mrb[1].mxu0 }
 0x494   :  { %v13683_v61 = vadd.f32 %v5825_v39, %v4282_v45 }
 0x495   :  { %v5982_v30 = vsel %vm5980_vm8, %v13681_v0, 0.0 }
 0x496   :  { %v5981_v59 = vsel %vm5980_vm8, %v13683_v61, 0.0  ;;  %v8735_v37 = vpop.f32.mrb[2].mxu0 }
 0x497   :  { %v5983_v2 = vadd.f32 %v5982_v30, %v5981_v59  ;;  %v13689_v44 = vadd.f32 %v8735_v37, %v8530_v23  ;;  %v5835_v15 = vpop.f32.mrb[3].mxu0 }
 0x498   :  { %v13691_v56 = vadd.f32 %v5835_v15, %v4292_v63 }
 0x499   :  { %v5986_v54 = vsel %vm5980_vm8, %v13689_v44, 0.0 }
 0x49a   :  { %v5984_v40 = vsel %vm5980_vm8, %v13691_v56, 0.0  ;;  %v8738_v36 = vpop.f32.mrb[4].mxu0 }
 0x49b   :  { %v5985_v21 = vadd.f32 %v5984_v40, %v5983_v2  ;;  %v13695_v47 = vadd.f32 %v8738_v36, %v8533_v20  ;;  %v5845_v60 = vpop.f32.mrb[5].mxu0 }
 0x49c   :  { %v13699_v5 = vadd.f32 %v5845_v60, %v4302_v57 }
 0x49d   :  { %v5987_v55 = vadd.f32 %v5986_v54, %v5985_v21  ;;  %v5990_v11 = vsel %vm5980_vm8, %v13695_v47, 0.0 }
 0x49e   :  { %v5988_v38 = vsel %vm5980_vm8, %v13699_v5, 0.0  ;;  %v8741_v14 = vpop.f32.mrb[6].mxu0 }
 0x49f   :  { %v5989_v22 = vadd.f32 %v5988_v38, %v5987_v55  ;;  %v13709_v28 = vadd.f32 %v8741_v14, %v8536_v8  ;;  %v5855_v17 = vpop.f32.mrb[7].mxu0 }
 0x4a0   :  { %v13713_v18 = vadd.f32 %v5855_v17, %v4312_v43 }
 0x4a1   :  { %v5991_v25 = vadd.f32 %v5990_v11, %v5989_v22  ;;  %v5994_v19 = vsel %vm5980_vm8, %v13709_v28, 0.0 }
 0x4a2   :  { %v5992_v10 = vsel %vm5980_vm8, %v13713_v18, 0.0  ;;  %v8744_v9 = vpop.f32.mrb[8].mxu0 }
 0x4a3   :  { %v5993_v52 = vadd.f32 %v5992_v10, %v5991_v25  ;;  %v13717_v7 = vadd.f32 %v8744_v9, %v8539_v35  ;;  %v5865_v3 = vpop.f32.mrb[9].mxu0 }
 0x4a4   :  { %v13721_v41 = vadd.f32 %v5865_v3, %v4322_v4 }
 0x4a5   :  { %v5995_v51 = vadd.f32 %v5994_v19, %v5993_v52  ;;  %v5998_v57 = vsel %vm5980_vm8, %v13717_v7, 0.0 }
 0x4a6   :  { %v5996_v1 = vsel %vm5980_vm8, %v13721_v41, 0.0  ;;  %v8747_v45 = vpop.f32.mrb[10].mxu0 }
 0x4a7   :  { %v5997_v23 = vadd.f32 %v5996_v1, %v5995_v51  ;;  %v13725_v63 = vadd.f32 %v8747_v45, %v8542_v62  ;;  %v5875_v20 = vpop.f32.mrb[11].mxu0 }
 0x4a8   :  { %v8878_v8 = vadd.f32 %v5875_v20, %v4332_v42 }
 0x4a9   :  { %v5999_v43 = vadd.f32 %v5998_v57, %v5997_v23  ;;  %v6002_v59 = vsel %vm5980_vm8, %v13725_v63, 0.0 }
 0x4aa   :  { %v6000_v35 = vsel %vm5980_vm8, %v8878_v8, 0.0  ;;  %v8750_v24 = vpop.f32.mrb[12].mxu0 }
 0x4ab   :  { %v6001_v39 = vadd.f32 %v6000_v35, %v5999_v43  ;;  %v13731_v4 = vadd.f32 %v8750_v24, %v13653_v12  ;;  %v5885_v30 = vpop.f32.mrb[13].mxu0 }
 0x4ac   :  { %v8880_v62 = vadd.f32 %v5885_v30, %v13655_v27 }
 0x4ad   :  { %v6003_v37 = vadd.f32 %v6002_v59, %v6001_v39  ;;  %v6012_v60 = vsel %vm5980_vm8, %v13731_v4, 0.0 }
 0x4ae   :  { %v6004_v2 = vsel %vm5980_vm8, %v8880_v62, 0.0  ;;  %v8753_v15 = vpop.f32.mrb[14].mxu0 }
 0x4af   :  { %v6005_v40 = vadd.f32 %v6004_v2, %v6003_v37  ;;  %v13738_v42 = vadd.f32 %v8753_v15, %v13657_v49  ;;  %v5895_v36 = vpop.f32.mrb[15].mxu0 }
 0x4b0   :  { %v13741_v21 = vadd.f32 %v5895_v36, %v13659_v58 }
 0x4b1   :  { %v6006_v12 = vrot.slane %v6005_v40, 4  ;;  %v6015_v49 = vsel %vm5980_vm8, %v13738_v42, 0.0 }
 0x4b2   :  { %v6013_v54 = vsel %vm5980_vm8, %v13741_v21, 0.0  ;;  %v8756_v27 = vpop.f32.mrb[16].mxu0 }
 0x4b3   :  { %v6007_v55 = vadd.f32 %v6006_v12, %v6005_v40  ;;  %v6014_v38 = vadd.f32 %v6013_v54, %v6012_v60  ;;  %v13748_v14 = vadd.f32 %v8756_v27, %v13661_v31  ;;  %v5905_v32 = vpop.f32.mrb[17].mxu0 }
 0x4b4   :  { %v13753_v58 = vadd.f32 %v5905_v32, %v13663_v53 }
 0x4b5   :  { %v6008_v46 = vrot.slane %v6007_v55, 2  ;;  %v6016_v22 = vadd.f32 %v6015_v49, %v6014_v38  ;;  %v6019_v9 = vsel %vm5980_vm8, %v13748_v14, 0.0 }
 0x4b6   :  { %v6017_v17 = vsel %vm5980_vm8, %v13753_v58, 0.0  ;;  %v8759_v33 = vpop.f32.mrb[18].mxu0 }
 0x4b7   :  { %v6009_v11 = vadd.f32 %v6008_v46, %v6007_v55  ;;  %v6018_v25 = vadd.f32 %v6017_v17, %v6016_v22  ;;  %v13758_v10 = vadd.f32 %v8759_v33, %v13665_v13  ;;  %v5915_v31 = vpop.f32.mrb[19].mxu0 }
 0x4b8   :  { %v13763_v52 = vadd.f32 %v5915_v31, %v13667_v6 }
 0x4b9   :  { %v6010_v53 = vrot.slane %v6009_v11, 1  ;;  %v6020_v3 = vadd.f32 %v6019_v9, %v6018_v25  ;;  %v6023_v20 = vsel %vm5980_vm8, %v13758_v10, 0.0 }
 0x4ba   :  { %v6021_v19 = vsel %vm5980_vm8, %v13763_v52, 0.0  ;;  %v8762_v51 = vpop.f32.mrb[20].mxu0 }
 0x4bb   :  { %v6011_v1 = vadd.f32 %v6010_v53, %v6009_v11  ;;  %v6022_v45 = vadd.f32 %v6021_v19, %v6020_v3  ;;  %v13768_v23 = vadd.f32 %v8762_v51, %v13669_v29  ;;  %v5925_v13 = vpop.f32.mrb[21].mxu0 }
 0x4bc   :  { %v13773_v57 = vadd.f32 %v5925_v13, %v13671_v34 }
 0x4bd   :  { %v6044_v6 = vmul.f32 0.009615385, %v6011_v1  ;;  %v6024_v43 = vadd.f32 %v6023_v20, %v6022_v45  ;;  %v6027_v22 = vsel %vm5980_vm8, %v13768_v23, 0.0 }
 0x4be   :  { %v8765_v35 = vpop.f32.mrb[22].mxu0  ;;  %v6025_v36 = vsel %vm5980_vm8, %v13773_v57, 0.0 }
 0x4bf   :  { %v13776_v24 = vsub.f32 %v13683_v61, %v6044_v6  ;;  %v13779_v39 = vsub.f32 %v13681_v0, %v6044_v6  ;;  %v13782_v30 = vsub.f32 %v13691_v56, %v6044_v6  ;;  %v13785_v29 = vsub.f32 %v13689_v44, %v6044_v6  ;;  %v5935_v59 = vpop.f32.mrb[23].mxu0 }
 0x4c0   :  { %v13788_v37 = vsub.f32 %v13699_v5, %v6044_v6  ;;  %v13791_v34 = vsub.f32 %v13695_v47, %v6044_v6  ;;  %v13794_v2 = vsub.f32 %v13713_v18, %v6044_v6  ;;  %v13797_v61 = vsub.f32 %v13709_v28, %v6044_v6 }
 0x4c1   :  { %v13800_v0 = vsub.f32 %v13721_v41, %v6044_v6  ;;  %v13803_v56 = vsub.f32 %v13717_v7, %v6044_v6  ;;  %v13805_v44 = vsub.f32 %v8878_v8, %v6044_v6  ;;  %v13808_v5 = vsub.f32 %v13725_v63, %v6044_v6 }
 0x4c2   :  { %v13810_v15 = vsub.f32 %v8880_v62, %v6044_v6  ;;  %v6072_v47 = vmul.f32 %v13776_v24, %v13776_v24  ;;  %v6073_v28 = vmul.f32 %v13779_v39, %v13779_v39  ;;  %v8768_v18 = vpop.f32.mrb[24].mxu0  ;;  %v6074_v41 = vmul.f32 %v13782_v30, %v13782_v30 }
 0x4c3   :  { %v5945_v40 = vpop.f32.mrb[25].mxu0  ;;  %v6075_v7 = vmul.f32 %v13785_v29, %v13785_v29  ;;  %v6076_v12 = vmul.f32 %v13788_v37, %v13788_v37  ;;  %v6077_v54 = vmul.f32 %v13791_v34, %v13791_v34  ;;  %v6026_v38 = vadd.f32 %v6025_v36, %v6024_v43 }
 0x4c4   :  { %v6098_v8 = vsel %vm5980_vm8, %v6072_v47, 0.0  ;;  %v6099_v63 = vsel %vm5980_vm8, %v6073_v28, 0.0  ;;  %v6101_v60 = vsel %vm5980_vm8, %v6074_v41, 0.0  ;;  %v8889_v32 = vadd.f32 %v8765_v35, %v13673_v48 }
 0x4c5   :  { %v6100_v62 = vadd.f32 %v6099_v63, %v6098_v8  ;;  %v6103_v55 = vsel %vm5980_vm8, %v6075_v7, 0.0  ;;  %v8890_v49 = vadd.f32 %v5935_v59, %v13675_v26  ;;  %v8891_v17 = vadd.f32 %v8768_v18, %v13677_v50 }
 0x4c6   :  { %v8892_v33 = vadd.f32 %v5945_v40, %v13679_v16  ;;  %v6078_v11 = vmul.f32 %v13794_v2, %v13794_v2  ;;  %v6105_v25 = vsel %vm5980_vm8, %v6076_v12, 0.0  ;;  %v6028_v31 = vadd.f32 %v6027_v22, %v6026_v38 }
 0x4c7   :  { %v6102_v27 = vadd.f32 %v6101_v60, %v6100_v62  ;;  %v6029_v9 = vsel %vm5980_vm8, %v8890_v49, 0.0  ;;  %v6079_v48 = vmul.f32 %v13797_v61, %v13797_v61  ;;  %v6107_v26 = vsel %vm5980_vm8, %v6077_v54, 0.0 }
 0x4c8   :  { %v6030_v3 = vadd.f32 %v6029_v9, %v6028_v31  ;;  %v6031_v50 = vsel %vm5980_vm8, %v8889_v32, 0.0  ;;  %v6033_v16 = vsel %vm5980_vm8, %v8892_v33, 0.0  ;;  %v6080_v51 = vmul.f32 %v13800_v0, %v13800_v0 }
 0x4c9   :  { %v6104_v46 = vadd.f32 %v6103_v55, %v6102_v27  ;;  %v6109_v1 = vsel %vm5980_vm8, %v6078_v11, 0.0  ;;  %v6081_v20 = vmul.f32 %v13803_v56, %v13803_v56  ;;  %v6111_v6 = vsel %vm5980_vm8, %v6079_v48, 0.0 }
 0x4ca   :  { %v6032_v45 = vadd.f32 %v6031_v50, %v6030_v3  ;;  %v6035_v59 = vsel %vm5980_vm8, %v8891_v17, 0.0  ;;  %v6082_v47 = vmul.f32 %v13805_v44, %v13805_v44  ;;  %v6113_v28 = vsel %vm5980_vm8, %v6080_v51, 0.0 }
 0x4cb   :  { %v6106_v53 = vadd.f32 %v6105_v25, %v6104_v46  ;;  %v6083_v40 = vmul.f32 %v13808_v5, %v13808_v5  ;;  %v6115_v7 = vsel %vm5980_vm8, %v6081_v20, 0.0  ;;  %v6084_v62 = vmul.f32 %v13810_v15, %v13810_v15 }
 0x4cc   :  { %v6034_v43 = vadd.f32 %v6033_v16, %v6032_v45  ;;  %v6117_v36 = vsel %vm5980_vm8, %v6082_v47, 0.0 }
 0x4cd   :  { %v6108_v19 = vadd.f32 %v6107_v26, %v6106_v53  ;;  %v6119_v54 = vsel %vm5980_vm8, %v6083_v40, 0.0  ;;  %v6121_v38 = vsel %vm5980_vm8, %v6084_v62, 0.0 }
 0x4ce   :  { %v6036_v18 = vadd.f32 %v6035_v59, %v6034_v43 }
 0x4cf   :  { %v6110_v13 = vadd.f32 %v6109_v1, %v6108_v19 }
 0x4d0   :  { %v6037_v8 = vrot.slane %v6036_v18, 4 }
 0x4d1   :  { %v6112_v35 = vadd.f32 %v6111_v6, %v6110_v13 }
 0x4d2   :  { %v6038_v12 = vadd.f32 %v6037_v8, %v6036_v18 }
 0x4d3   :  { %v6114_v41 = vadd.f32 %v6113_v28, %v6112_v35 }
 0x4d4   :  { %v6039_v27 = vrot.slane %v6038_v12, 2 }
 0x4d5   :  { %v6116_v63 = vadd.f32 %v6115_v7, %v6114_v41 }
 0x4d6   :  { %v6040_v46 = vadd.f32 %v6039_v27, %v6038_v12 }
 0x4d7   :  { %v6118_v60 = vadd.f32 %v6117_v36, %v6116_v63 }
 0x4d8   :  { %v6041_v11 = vrot.slane %v6040_v46, 1 }
 0x4d9   :  { %v6120_v55 = vadd.f32 %v6119_v54, %v6118_v60 }
 0x4da   :  { %v6042_v31 = vadd.f32 %v6041_v11, %v6040_v46 }
 0x4db   :  { %v6122_v22 = vadd.f32 %v6121_v38, %v6120_v55 }
 0x4dc   :  { %v6045_v53 = vmul.f32 0.009615385, %v6042_v31 }
 0x4dd   :  { %v6123_v25 = vrot.slane %v6122_v22, 4 }
 0x4de   :  { %v13864_v26 = vsub.f32 %v13731_v4, %v6045_v53  ;;  %v13867_v3 = vsub.f32 %v13741_v21, %v6045_v53  ;;  %v13870_v19 = vsub.f32 %v13738_v42, %v6045_v53  ;;  %v13873_v50 = vsub.f32 %v13753_v58, %v6045_v53 }
 0x4df   :  { %v6124_v9 = vadd.f32 %v6123_v25, %v6122_v22  ;;  %v13876_v51 = vsub.f32 %v13748_v14, %v6045_v53  ;;  %v13879_v1 = vsub.f32 %v13763_v52, %v6045_v53  ;;  %v13882_v45 = vsub.f32 %v13758_v10, %v6045_v53 }
 0x4e0   :  { %v13885_v4 = vsub.f32 %v13773_v57, %v6045_v53  ;;  %v13888_v21 = vsub.f32 %v13768_v23, %v6045_v53  ;;  %v13890_v42 = vsub.f32 %v8890_v49, %v6045_v53  ;;  %v13892_v58 = vsub.f32 %v8889_v32, %v6045_v53 }
 0x4e1   :  { %v6125_v48 = vrot.slane %v6124_v9, 2  ;;  %v13894_v20 = vsub.f32 %v8892_v33, %v6045_v53  ;;  %v13896_v14 = vsub.f32 %v8891_v17, %v6045_v53  ;;  %v6085_v52 = vmul.f32 %v13864_v26, %v13864_v26 }
 0x4e2   :  { %v6086_v10 = vmul.f32 %v13867_v3, %v13867_v3  ;;  %v6087_v23 = vmul.f32 %v13870_v19, %v13870_v19  ;;  %v6088_v32 = vmul.f32 %v13873_v50, %v13873_v50  ;;  %v6089_v35 = vmul.f32 %v13876_v51, %v13876_v51 }
 0x4e3   :  { %v6126_v16 = vadd.f32 %v6125_v48, %v6124_v9  ;;  %v6129_v49 = vsel %vm5980_vm8, %v6085_v52, 0.0  ;;  %v6090_v28 = vmul.f32 %v13879_v1, %v13879_v1  ;;  %v6091_v40 = vmul.f32 %v13882_v45, %v13882_v45 }
 0x4e4   :  { %v6130_v33 = vsel %vm5980_vm8, %v6086_v10, 0.0  ;;  %v6132_v59 = vsel %vm5980_vm8, %v6087_v23, 0.0  ;;  %v6134_v18 = vsel %vm5980_vm8, %v6088_v32, 0.0  ;;  %v6136_v7 = vsel %vm5980_vm8, %v6089_v35, 0.0 }
 0x4e5   :  { %v6127_v13 = vrot.slane %v6126_v16, 1  ;;  %v6131_v17 = vadd.f32 %v6130_v33, %v6129_v49  ;;  %v6092_v63 = vmul.f32 %v13885_v4, %v13885_v4  ;;  %v6138_v62 = vsel %vm5980_vm8, %v6090_v28, 0.0 }
 0x4e6   :  { %v6093_v12 = vmul.f32 %v13888_v21, %v13888_v21  ;;  %v6094_v60 = vmul.f32 %v13890_v42, %v13890_v42  ;;  %v6140_v54 = vsel %vm5980_vm8, %v6091_v40, 0.0  ;;  %v6095_v38 = vmul.f32 %v13892_v58, %v13892_v58 }
 0x4e7   :  { %v6128_v57 = vadd.f32 %v6127_v13, %v6126_v16  ;;  %v6133_v47 = vadd.f32 %v6132_v59, %v6131_v17  ;;  %v6142_v55 = vsel %vm5980_vm8, %v6092_v63, 0.0  ;;  %v6096_v11 = vmul.f32 %v13894_v20, %v13894_v20 }
 0x4e8   :  { %v6097_v25 = vmul.f32 %v13896_v14, %v13896_v14  ;;  %v6144_v31 = vsel %vm5980_vm8, %v6093_v12, 0.0  ;;  %v6146_v9 = vsel %vm5980_vm8, %v6094_v60, 0.0 }
 0x4e9   :  { %v6160_v6 = vmul.f32 0.009615385, %v6128_v57  ;;  %v6135_v41 = vadd.f32 %v6134_v18, %v6133_v47 }
 0x4eb   :  { %v6162_v43 = vadd.f32 1e-05, %v6160_v6  ;;  %v6137_v8 = vadd.f32 %v6136_v7, %v6135_v41 }
 0x4ed   :  { %9118 = vrsqrt.f32 %v6162_v43  ;;  %v6139_v36 = vadd.f32 %v6138_v62, %v6137_v8 }
 0x4ef   :  { %v6141_v27 = vadd.f32 %v6140_v54, %v6139_v36 }
 0x4f1   :  { %v6143_v46 = vadd.f32 %v6142_v55, %v6141_v27 }
 0x4f3   :  { %v6145_v48 = vadd.f32 %v6144_v31, %v6143_v46  ;;  %v14012_v31 = vld [vmem:[%s14404_s5] ss:$0 sm:$0xff] }
 0x4f5   :  { %v6147_v6 = vadd.f32 %v6146_v9, %v6145_v48  ;;  %v9212_v9 = vmov 1934713408  }
 0x4f7   :  { %v9119_v22 = vpop.eup %9118 }
 0x4f8   :  { %v6178_v53 = vmul.f32 %v9119_v22, %v13810_v15  ;;  %v6166_v16 = vmul.f32 %v9119_v22, %v13776_v24  ;;  %v6167_v13 = vmul.f32 %v9119_v22, %v13779_v39  ;;  %v6168_v52 = vmul.f32 %v9119_v22, %v13782_v30 }
 0x4f9   :  { %v6169_v10 = vmul.f32 %v9119_v22, %v13785_v29  ;;  %v6170_v57 = vmul.f32 %v9119_v22, %v13788_v37  ;;  %v6171_v23 = vmul.f32 %v9119_v22, %v13791_v34  ;;  %v6172_v32 = vmul.f32 %v9119_v22, %v13794_v2 }
 0x4fa   :  { %8773 = vmatprep.mubr.msk.f32.mxu1 %vm5980_vm8, %v6166_v16  ;;  %v6173_v15 = vmul.f32 %v9119_v22, %v13797_v61  ;;  %v6174_v49 = vmul.f32 %v9119_v22, %v13800_v0  ;;  %v6148_v24 = vsel %vm5980_vm8, %v6095_v38, 0.0  ;;  %v6175_v39 = vmul.f32 %v9119_v22, %v13803_v56 }
 0x4fb   :  { %8774 = vmatmul.mubr.msk.f32.vlgmr.msra.gmra.mrb[26].mxu1 %vm5980_vm8, %v6167_v13  ;;  %v6176_v30 = vmul.f32 %v9119_v22, %v13805_v44  ;;  %v6177_v29 = vmul.f32 %v9119_v22, %v13808_v5  ;;  %v6149_v37 = vadd.f32 %v6148_v24, %v6147_v6  ;;  %v6150_v34 = vsel %vm5980_vm8, %v6096_v11, 0.0 }
 0x4fc   :  { %8776 = vmatprep.mubr.msk.f32.mxu1 %vm5980_vm8, %v6168_v52  ;;  %v6152_v61 = vsel %vm5980_vm8, %v6097_v25, 0.0  ;;  %v9211_v38 = vmov 1983009808   ;;  %v6478_v22 = vlaneseq }
 0x4fd   :  { %v6151_v2 = vadd.f32 %v6150_v34, %v6149_v37  ;;  %v6476_v46 = vunpack.c.l.s4 %v9211_v38 }
 0x4fe   :  { %v6479_v16 = vshrl.u32 %v6478_v22, 7 }
 0x4ff   :  { %8777 = vmatmul.mubr.msk.f32.gmra.mrb[28].mxu1 %vm5980_vm8, %v6169_v10  ;;  %v6153_v0 = vadd.f32 %v6152_v61, %v6151_v2  ;;  %v6477_v48 = vunpack.c.0.s8 %v6476_v46 }
 0x500   :  { %8779 = vmatprep.mubr.msk.f32.mxu1 %vm5980_vm8, %v6170_v57 }
 0x501   :  { %v6154_v33 = vrot.slane %v6153_v0, 4  ;;  %v14016_v57 = vsub.s32 %v6477_v48, %v6479_v16 }
 0x503   :  { %8780 = vmatmul.mubr.msk.f32.gmra.mrb[30].mxu1 %vm5980_vm8, %v6171_v23  ;;  %v6155_v56 = vadd.f32 %v6154_v33, %v6153_v0 }
 0x504   :  { %8782 = vmatprep.mubr.msk.f32.mxu1 %vm5980_vm8, %v6172_v32 }
 0x505   :  { %v6156_v44 = vrot.slane %v6155_v56, 2 }
 0x507   :  { %8783 = vmatmul.mubr.msk.f32.gmra.mrb[32].mxu1 %vm5980_vm8, %v6173_v15  ;;  %v6157_v5 = vadd.f32 %v6156_v44, %v6155_v56 }
 0x508   :  { %8785 = vmatprep.mubr.msk.f32.mxu1 %vm5980_vm8, %v6174_v49  ;;  %v9213_v49 = vmov 0.0  }
 0x509   :  { %v6158_v17 = vrot.slane %v6157_v5, 1 }
 0x50b   :  { %8786 = vmatmul.mubr.msk.f32.gmra.mrb[34].mxu1 %vm5980_vm8, %v6175_v39  ;;  %v6159_v43 = vadd.f32 %v6158_v17, %v6157_v5 }
 0x50c   :  { %8788 = vmatprep.mubr.msk.f32.mxu1 %vm5980_vm8, %v6176_v30 }
 0x50d   :  { %v6161_v35 = vmul.f32 0.009615385, %v6159_v43 }
 0x50f   :  { %8789 = vmatmul.mubr.msk.f32.gmra.mrb[36].mxu1 %vm5980_vm8, %v6177_v29  ;;  %v6163_v59 = vadd.f32 1e-05, %v6161_v35 }
 0x510   :  { %8791 = vmatprep.mubr.msk.f32.mxu1 %vm5980_vm8, %v6178_v53  ;;  %v6507_v53 = vunpack.c.l.s4 %v9212_v9 }
 0x511   :  { %9120 = vrsqrt.f32 %v6163_v59 }
 0x512   :  { %v6508_v10 = vunpack.c.0.s8 %v6507_v53 }
 0x514   :  { %v14026_v37 = vsub.s32 %v6508_v10, %v6479_v16 }
 0x51b   :  { %v9121_v47 = vpop.eup %9120 }
 0x51c   :  { %v6190_v28 = vmul.f32 %v9121_v47, %v13894_v20  ;;  %v6179_v18 = vmul.f32 %v9121_v47, %v13864_v26  ;;  %v6180_v41 = vmul.f32 %v9121_v47, %v13867_v3  ;;  %v6181_v40 = vmul.f32 %v9121_v47, %v13870_v19 }
 0x51d   :  { %v6182_v7 = vmul.f32 %v9121_v47, %v13873_v50  ;;  %v6183_v8 = vmul.f32 %v9121_v47, %v13876_v51  ;;  %v6184_v63 = vmul.f32 %v9121_v47, %v13879_v1  ;;  %v6185_v62 = vmul.f32 %v9121_v47, %v13882_v45  ;;  %v13992_v50 = vld [vmem:[%s14403_s4] sm:$0xff]  ;;  %v13997_v51 = vld [vmem:[%s14403_s4 + $0x8] sm:$0xff]  ;;  %v14002_v1 = vld [vmem:[%s14403_s4 + $0x10] sm:$0xff] }
 0x51e   :  { %8792 = vmatmul.mubr.msk.f32.gmra.mrb[38].mxu1 %vm5980_vm8, %v6179_v18  ;;  %v6186_v36 = vmul.f32 %v9121_v47, %v13885_v4  ;;  %v6187_v20 = vmul.f32 %v9121_v47, %v13888_v21  ;;  %v6188_v26 = vmul.f32 %v9121_v47, %v13890_v42  ;;  %v6189_v3 = vmul.f32 %v9121_v47, %v13892_v58  ;;  %v14007_v45 = vld [vmem:[%s14403_s4 + $0x18] sm:$0xff]  ;;  %s14339_s4 = smov 0  }
 0x51f   :  { %8794 = vmatprep.mubr.msk.f32.mxu1 %vm5980_vm8, %v6180_v41  ;;  %v6191_v19 = vmul.f32 %v9121_v47, %v13896_v14 }
 0x522   :  { %8795 = vmatmul.mubr.msk.f32.gmra.mrb[40].mxu1 %vm5980_vm8, %v6181_v40 }
 0x523   :  { %8797 = vmatprep.mubr.msk.f32.mxu1 %vm5980_vm8, %v6182_v7 }
 0x526   :  { %8798 = vmatmul.mubr.msk.f32.gmra.mrb[42].mxu1 %vm5980_vm8, %v6183_v8 }
 0x527   :  { %8800 = vmatprep.mubr.msk.f32.mxu1 %vm5980_vm8, %v6184_v63 }
 0x52a   :  { %8801 = vmatmul.mubr.msk.f32.gmra.mrb[44].mxu1 %vm5980_vm8, %v6185_v62 }
 0x52b   :  { %8803 = vmatprep.mubr.msk.f32.mxu1 %vm5980_vm8, %v6186_v36 }
 0x52e   :  { %8804 = vmatmul.mubr.msk.f32.gmra.mrb[46].mxu1 %vm5980_vm8, %v6187_v20 }
 0x52f   :  { %8806 = vmatprep.mubr.msk.f32.mxu1 %vm5980_vm8, %v6188_v26 }
 0x532   :  { %8807 = vmatmul.mubr.msk.f32.gmra.mrb[48].mxu1 %vm5980_vm8, %v6189_v3 }
 0x533   :  { %8809 = vmatprep.mubr.msk.f32.mxu1 %vm5980_vm8, %v6190_v28 }
 0x536   :  { %8810 = vmatmul.mubr.msk.f32.gmra.mrb[50].mxu1 %vm5980_vm8, %v6191_v19 }
 0x5ce   :  { %v8775_v4 = vpop.f32.mrb[26].mxu1 }
 0x5cf   :  { %v6345_v21 = vpop.f32.mrb[27].mxu1  ;;  %v6351_v13 = vadd.f32 %v8775_v4, %v14012_v31 }
 0x5d0   :  { %v6346_v52 = vadd.f32 %v14012_v31, %v6345_v21 }
 0x5d1   :  { %v6540_v24 = vcombine.high %v6351_v13, %v9213_v49  ;;  %v14029_v34 = vrot.slane %v6351_v13, %v14016_v57 }
 0x5d2   :  { %v8778_v42 = vpop.f32.mrb[28].mxu1  ;;  %v6474_v39 = vcombine.high %v6346_v52, %v9213_v49  ;;  %v6481_v2 = vrot.slane %v6346_v52, %v14016_v57 }
 0x5d3   :  { %v6355_v58 = vpop.f32.mrb[29].mxu1  ;;  %v6361_v23 = vadd.f32 %v8778_v42, %v14012_v31  ;;  %v14039_v17 = vrot.slane %v6540_v24, %v14016_v57 }
 0x5d4   :  { %v6356_v6 = vadd.f32 %v14012_v31, %v6355_v58  ;;  %v6488_v43 = vrot.slane %v6474_v39, %v14016_v57 }
 0x5d5   :  { %v6672_v61 = vcombine.high %v6361_v23, %v9213_v49  ;;  %v14043_v35 = vrot.slane %v6361_v23, %v14016_v57 }
 0x5d6   :  { %v8781_v14 = vpop.f32.mrb[30].mxu1  ;;  %v6606_v0 = vcombine.high %v6356_v6, %v9213_v49  ;;  %v6613_v47 = vrot.slane %v6356_v6, %v14016_v57 }
 0x5d7   :  { %v6365_v12 = vpop.f32.mrb[31].mxu1  ;;  %v6371_v32 = vadd.f32 %v8781_v14, %v14012_v31  ;;  %v14051_v40 = vrot.slane %v6672_v61, %v14016_v57 }
 0x5d8   :  { %v6366_v15 = vadd.f32 %v14012_v31, %v6365_v12  ;;  %v14054_v7 = vrot.slane %v6606_v0, %v14016_v57 }
 0x5d9   :  { %v6804_v33 = vcombine.high %v6371_v32, %v9213_v49  ;;  %v14057_v8 = vrot.slane %v6371_v32, %v14016_v57 }
 0x5da   :  { %v8784_v60 = vpop.f32.mrb[32].mxu1  ;;  %v6738_v56 = vcombine.high %v6366_v15, %v9213_v49  ;;  %v14060_v63 = vrot.slane %v6366_v15, %v14016_v57 }
 0x5db   :  { %v6375_v54 = vpop.f32.mrb[33].mxu1  ;;  %v6381_v30 = vadd.f32 %v8784_v60, %v14012_v31  ;;  %v14063_v62 = vrot.slane %v6804_v33, %v14016_v57 }
 0x5dc   :  { %v6376_v29 = vadd.f32 %v14012_v31, %v6375_v54  ;;  %v14066_v36 = vrot.slane %v6738_v56, %v14016_v57 }
 0x5dd   :  { %v6936_v59 = vcombine.high %v6381_v30, %v9213_v49  ;;  %v14071_v19 = vrot.slane %v6381_v30, %v14016_v57 }
 0x5de   :  { %v8787_v27 = vpop.f32.mrb[34].mxu1  ;;  %v6870_v28 = vcombine.high %v6376_v29, %v9213_v49  ;;  %v14077_v21 = vrot.slane %v6376_v29, %v14016_v57 }
 0x5df   :  { %v6385_v55 = vpop.f32.mrb[35].mxu1  ;;  %v6391_v44 = vadd.f32 %v8787_v27, %v14012_v31  ;;  %v14074_v4 = vrot.slane %v6936_v59, %v14016_v57 }
 0x5e0   :  { %v6386_v5 = vadd.f32 %v14012_v31, %v6385_v55  ;;  %v14081_v14 = vrot.slane %v6870_v28, %v14016_v57 }
 0x5e1   :  { %v7068_v20 = vcombine.high %v6391_v44, %v9213_v49  ;;  %v14089_v27 = vrot.slane %v6391_v44, %v14016_v57 }
 0x5e2   :  { %v8790_v11 = vpop.f32.mrb[36].mxu1  ;;  %v7002_v26 = vcombine.high %v6386_v5, %v9213_v49  ;;  %v14092_v55 = vrot.slane %v6386_v5, %v14016_v57 }
 0x5e3   :  { %v6395_v25 = vpop.f32.mrb[37].mxu1  ;;  %v6401_v18 = vadd.f32 %v8790_v11, %v14012_v31  ;;  %v14097_v22 = vrot.slane %v7068_v20, %v14016_v57 }
 0x5e4   :  { %v6396_v41 = vadd.f32 %v14012_v31, %v6395_v25  ;;  %v14100_v11 = vrot.slane %v7002_v26, %v14016_v57 }
 0x5e5   :  { %v7200_v12 = vcombine.high %v6401_v18, %v9213_v49  ;;  %v14103_v25 = vrot.slane %v6401_v18, %v14016_v57 }
 0x5e6   :  { %v7134_v60 = vcombine.high %v6396_v41, %v9213_v49  ;;  %v14106_v9 = vrot.slane %v6396_v41, %v14016_v57 }
 0x5e7   :  { %v14111_v23 = vrot.slane %v7200_v12, %v14016_v57 }
 0x5e8   :  { %v14114_v6 = vrot.slane %v7134_v60, %v14016_v57 }
 0x5f1   :  { %v8793_v3 = vpop.f32.mrb[38].mxu1 }
 0x5f2   :  { %v6411_v42 = vadd.f32 %v8793_v3, %v14012_v31  ;;  %v6405_v58 = vpop.f32.mrb[39].mxu1 }
 0x5f3   :  { %v14086_v54 = vadd.f32 %v14012_v31, %v6405_v58 }
 0x5f4   :  { %v6489_v38 = vcombine.high %v6411_v42, %v9213_v49  ;;  %v6496_v46 = vrot.slane %v6411_v42, %v14016_v57 }
 0x5f5   :  { %v8796_v53 = vpop.f32.mrb[40].mxu1  ;;  %v14118_v32 = vcombine.high %v14086_v54, %v9213_v49 }
 0x5f6   :  { %v6503_v48 = vrot.slane %v6489_v38, %v14016_v57  ;;  %v6504_v16 = vcombine.low %v6481_v2, %v6496_v46  ;;  %v6505_v13 = vcombine.high %v6481_v2, %v6496_v46  ;;  %v6421_v52 = vadd.f32 %v8796_v53, %v14012_v31  ;;  %v6415_v10 = vpop.f32.mrb[41].mxu1 }
 0x5f7   :  { %v6416_v15 = vadd.f32 %v14012_v31, %v6415_v10 }
 0x5f8   :  { %v6512_v24 = vrot.slane %v6504_v16, %v14026_v37  ;;  %v6519_v39 = vrot.slane %v6505_v13, %v14026_v37  ;;  %v6520_v30 = vcombine.low %v6488_v43, %v6503_v48  ;;  %v6521_v29 = vcombine.high %v6488_v43, %v6503_v48  ;;  %8055 = vst.sshfl [vmem:[#allocation2] sm:$0x11 pattern:$0x73516240] %v6504_v16 }
 0x5f9   :  { %8056 = vst.sshfl [vmem:[#allocation2 + $0x4] sm:$0x11 pattern:$0x73516240] %v6505_v13  ;;  %v6621_v2 = vcombine.high %v6421_v52, %v9213_v49  ;;  %v6628_v61 = vrot.slane %v6421_v52, %v14016_v57  ;;  %v6555_v0 = vcombine.high %v6416_v15, %v9213_v49  ;;  %v6562_v33 = vrot.slane %v6416_v15, %v14016_v57  ;;  %v8799_v56 = vpop.f32.mrb[42].mxu1 }
 0x5fa   :  { %v6528_v44 = vrot.slane %v6520_v30, %v14026_v37  ;;  %v6535_v5 = vrot.slane %v6521_v29, %v14026_v37  ;;  %v6536_v59 = vcombine.high %v6512_v24, %v9213_v49  ;;  %v6537_v28 = vcombine.high %v6519_v39, %v9213_v49  ;;  %8057 = vst.sshfl [vmem:[#allocation2 + $0x8] sm:$0x11 pattern:$0x73516240] %v6520_v30  ;;  %v6425_v43 = vpop.f32.mrb[43].mxu1 }
 0x5fb   :  { %8058 = vst.sshfl [vmem:[#allocation2 + $0xc] sm:$0x11 pattern:$0x73516240] %v6521_v29  ;;  %v6635_v18 = vrot.slane %v6621_v2, %v14016_v57  ;;  %v6636_v41 = vcombine.low %v6613_v47, %v6628_v61  ;;  %v6637_v20 = vcombine.high %v6613_v47, %v6628_v61  ;;  %v6569_v26 = vrot.slane %v6555_v0, %v14016_v57 }
 0x5fc   :  { %v6538_v3 = vcombine.high %v6528_v44, %v9213_v49  ;;  %v6539_v42 = vcombine.high %v6535_v5, %v9213_v49  ;;  %7333 = vst [vmem:[#allocation2 + $0x2] sm:$0x3] %v6536_v59  ;;  %7335 = vst [vmem:[#allocation2 + $0x6] sm:$0x3] %v6537_v28  ;;  %v6570_v58 = vcombine.low %v14029_v34, %v6562_v33 }
 0x5fd   :  { %v6571_v12 = vcombine.high %v14029_v34, %v6562_v33  ;;  %v6644_v60 = vrot.slane %v6636_v41, %v14026_v37  ;;  %v6651_v38 = vrot.slane %v6637_v20, %v14026_v37  ;;  %v6652_v46 = vcombine.low %v14054_v7, %v6635_v18  ;;  %8063 = vst.sshfl [vmem:[#allocation2 + $0x20] sm:$0x11 pattern:$0x73516240] %v6636_v41  ;;  %v8802_v53 = vpop.f32.mrb[44].mxu1 }
 0x5fe   :  { %v6653_v47 = vcombine.high %v14054_v7, %v6635_v18  ;;  %8064 = vst.sshfl [vmem:[#allocation2 + $0x24] sm:$0x11 pattern:$0x73516240] %v6637_v20  ;;  %7337 = vst [vmem:[#allocation2 + $0xa] sm:$0x3] %v6538_v3  ;;  %v6578_v48 = vrot.slane %v6570_v58, %v14026_v37  ;;  %v6586_v13 = vcombine.low %v14039_v17, %v6569_v26 }
 0x5ff   :  { %7339 = vst [vmem:[#allocation2 + $0xe] sm:$0x3] %v6539_v42  ;;  %v6585_v16 = vrot.slane %v6571_v12, %v14026_v37  ;;  %v6587_v34 = vcombine.high %v14039_v17, %v6569_v26  ;;  %8059 = vst.sshfl [vmem:[#allocation2 + $0x10] sm:$0x11 pattern:$0x73516240] %v6570_v58  ;;  %v6660_v10 = vrot.slane %v6652_v46, %v14026_v37 }
 0x600   :  { %8060 = vst.sshfl [vmem:[#allocation2 + $0x14] sm:$0x11 pattern:$0x73516240] %v6571_v12  ;;  %v6435_v52 = vpop.f32.mrb[45].mxu1  ;;  %v6667_v7 = vrot.slane %v6653_v47, %v14026_v37  ;;  %v6668_v15 = vcombine.high %v6644_v60, %v9213_v49  ;;  %v6669_v24 = vcombine.high %v6651_v38, %v9213_v49  ;;  %v6594_v39 = vrot.slane %v6586_v13, %v14026_v37 }
 0x601   :  { %8065 = vst.sshfl [vmem:[#allocation2 + $0x28] sm:$0x11 pattern:$0x73516240] %v6652_v46  ;;  %v6601_v30 = vrot.slane %v6587_v34, %v14026_v37  ;;  %v6602_v29 = vcombine.high %v6578_v48, %v9213_v49  ;;  %v6603_v17 = vcombine.high %v6585_v16, %v9213_v49  ;;  %v6670_v2 = vcombine.high %v6660_v10, %v9213_v49  ;;  %v14157_v44 = vpop.f32.mrb[46].mxu1 }
 0x602   :  { %8066 = vst.sshfl [vmem:[#allocation2 + $0x2c] sm:$0x11 pattern:$0x73516240] %v6653_v47  ;;  %v6671_v61 = vcombine.high %v6667_v7, %v9213_v49  ;;  %7349 = vst [vmem:[#allocation2 + $0x22] sm:$0x3] %v6668_v15  ;;  %v6431_v0 = vadd.f32 %v8799_v56, %v14012_v31  ;;  %v6426_v33 = vadd.f32 %v14012_v31, %v6425_v43 }
 0x603   :  { %8061 = vst.sshfl [vmem:[#allocation2 + $0x18] sm:$0x11 pattern:$0x73516240] %v6586_v13  ;;  %7351 = vst [vmem:[#allocation2 + $0x26] sm:$0x3] %v6669_v24  ;;  %v6604_v5 = vcombine.high %v6594_v39, %v9213_v49  ;;  %v6605_v59 = vcombine.high %v6601_v30, %v9213_v49  ;;  %v6441_v28 = vadd.f32 %v8802_v53, %v14012_v31 }
 0x604   :  { %8062 = vst.sshfl [vmem:[#allocation2 + $0x1c] sm:$0x11 pattern:$0x73516240] %v6587_v34  ;;  %7341 = vst [vmem:[#allocation2 + $0x12] sm:$0x3] %v6602_v29  ;;  %v6436_v18 = vadd.f32 %v14012_v31, %v6435_v52  ;;  %v6753_v56 = vcombine.high %v6431_v0, %v9213_v49  ;;  %v6760_v43 = vrot.slane %v6431_v0, %v14016_v57 }
 0x605   :  { %7343 = vst [vmem:[#allocation2 + $0x16] sm:$0x3] %v6603_v17  ;;  %v14163_v41 = vpop.f32.mrb[47].mxu1  ;;  %7353 = vst [vmem:[#allocation2 + $0x2a] sm:$0x3] %v6670_v2  ;;  %v6687_v20 = vcombine.high %v6426_v33, %v9213_v49  ;;  %v6694_v26 = vrot.slane %v6426_v33, %v14016_v57  ;;  %v6885_v3 = vcombine.high %v6441_v28, %v9213_v49 }
 0x606   :  { %7355 = vst [vmem:[#allocation2 + $0x2e] sm:$0x3] %v6671_v61  ;;  %7345 = vst [vmem:[#allocation2 + $0x1a] sm:$0x3] %v6604_v5  ;;  %v6892_v42 = vrot.slane %v6441_v28, %v14016_v57  ;;  %v6819_v58 = vcombine.high %v6436_v18, %v9213_v49  ;;  %v14173_v12 = vrot.slane %v6436_v18, %v14016_v57  ;;  %v14179_v53 = vpop.f32.mrb[48].mxu1 }
 0x607   :  { %7347 = vst [vmem:[#allocation2 + $0x1e] sm:$0x3] %v6605_v59  ;;  %v6767_v60 = vrot.slane %v6753_v56, %v14016_v57  ;;  %v6768_v38 = vcombine.low %v14060_v63, %v6760_v43  ;;  %v6769_v46 = vcombine.high %v14060_v63, %v6760_v43  ;;  %v6701_v47 = vrot.slane %v6687_v20, %v14016_v57  ;;  %v14185_v52 = vpop.f32.mrb[49].mxu1 }
 0x608   :  { %v6702_v48 = vcombine.low %v14043_v35, %v6694_v26  ;;  %v6703_v16 = vcombine.high %v14043_v35, %v6694_v26  ;;  %v6899_v13 = vrot.slane %v6885_v3, %v14016_v57  ;;  %v6900_v34 = vcombine.low %v14077_v21, %v6892_v42 }
 0x609   :  { %v6776_v10 = vrot.slane %v6768_v38, %v14026_v37  ;;  %v6783_v7 = vrot.slane %v6769_v46, %v14026_v37  ;;  %v6784_v63 = vcombine.low %v14066_v36, %v6767_v60  ;;  %v6785_v15 = vcombine.high %v14066_v36, %v6767_v60  ;;  %8071 = vst.sshfl [vmem:[#allocation2 + $0x40] sm:$0x11 pattern:$0x73516240] %v6768_v38  ;;  %v14199_v61 = vpop.f32.mrb[50].mxu1 }
 0x60a   :  { %8072 = vst.sshfl [vmem:[#allocation2 + $0x44] sm:$0x11 pattern:$0x73516240] %v6769_v46  ;;  %v6710_v24 = vrot.slane %v6702_v48, %v14026_v37  ;;  %v6717_v35 = vrot.slane %v6703_v16, %v14026_v37  ;;  %v6718_v39 = vcombine.low %v14051_v40, %v6701_v47  ;;  %v6719_v30 = vcombine.high %v14051_v40, %v6701_v47  ;;  %v14205_v59 = vpop.f32.mrb[51].mxu1 }
 0x60b   :  { %8067 = vst.sshfl [vmem:[#allocation2 + $0x30] sm:$0x11 pattern:$0x73516240] %v6702_v48  ;;  %v6792_v29 = vrot.slane %v6784_v63, %v14026_v37  ;;  %v6799_v17 = vrot.slane %v6785_v15, %v14026_v37  ;;  %v6800_v2 = vcombine.high %v6776_v10, %v9213_v49  ;;  %v6801_v36 = vcombine.high %v6783_v7, %v9213_v49 }
 0x60c   :  { %8068 = vst.sshfl [vmem:[#allocation2 + $0x34] sm:$0x11 pattern:$0x73516240] %v6703_v16  ;;  %v6726_v0 = vrot.slane %v6718_v39, %v14026_v37  ;;  %v6733_v33 = vrot.slane %v6719_v30, %v14026_v37  ;;  %v6734_v40 = vcombine.high %v6710_v24, %v9213_v49  ;;  %v6735_v5 = vcombine.high %v6717_v35, %v9213_v49 }
 0x60d   :  { %8079 = vst.sshfl [vmem:[#allocation2 + $0x60] sm:$0x11 pattern:$0x73516240] %v6900_v34  ;;  %v6802_v28 = vcombine.high %v6792_v29, %v9213_v49  ;;  %v6803_v18 = vcombine.high %v6799_v17, %v9213_v49  ;;  %7365 = vst [vmem:[#allocation2 + $0x42] sm:$0x3] %v6800_v2  ;;  %v6901_v56 = vcombine.high %v14077_v21, %v6892_v42 }
 0x60e   :  { %8073 = vst.sshfl [vmem:[#allocation2 + $0x48] sm:$0x11 pattern:$0x73516240] %v6784_v63  ;;  %7367 = vst [vmem:[#allocation2 + $0x46] sm:$0x3] %v6801_v36  ;;  %v6908_v43 = vrot.slane %v6900_v34, %v14026_v37  ;;  %v6736_v20 = vcombine.high %v6726_v0, %v9213_v49  ;;  %v6737_v26 = vcombine.high %v6733_v33, %v9213_v49 }
 0x60f   :  { %8074 = vst.sshfl [vmem:[#allocation2 + $0x4c] sm:$0x11 pattern:$0x73516240] %v6785_v15  ;;  %7357 = vst [vmem:[#allocation2 + $0x32] sm:$0x3] %v6734_v40  ;;  %v6916_v3 = vcombine.low %v14081_v14, %v6899_v13  ;;  %v6917_v60 = vcombine.high %v14081_v14, %v6899_v13  ;;  %v6915_v38 = vrot.slane %v6901_v56, %v14026_v37 }
 0x610   :  { %8069 = vst.sshfl [vmem:[#allocation2 + $0x38] sm:$0x11 pattern:$0x73516240] %v6718_v39  ;;  %7359 = vst [vmem:[#allocation2 + $0x36] sm:$0x3] %v6735_v5  ;;  %v6932_v46 = vcombine.high %v6908_v43, %v9213_v49  ;;  %v6833_v21 = vrot.slane %v6819_v58, %v14016_v57  ;;  %v6834_v42 = vcombine.low %v14057_v8, %v14173_v12 }
 0x611   :  { %8070 = vst.sshfl [vmem:[#allocation2 + $0x3c] sm:$0x11 pattern:$0x73516240] %v6719_v30  ;;  %7369 = vst [vmem:[#allocation2 + $0x4a] sm:$0x3] %v6802_v28  ;;  %v6924_v47 = vrot.slane %v6916_v3, %v14026_v37  ;;  %v6931_v48 = vrot.slane %v6917_v60, %v14026_v37  ;;  %v6835_v14 = vcombine.high %v14057_v8, %v14173_v12 }
 0x612   :  { %7371 = vst [vmem:[#allocation2 + $0x4e] sm:$0x3] %v6803_v18  ;;  %8080 = vst.sshfl [vmem:[#allocation2 + $0x64] sm:$0x11 pattern:$0x73516240] %v6901_v56  ;;  %v6451_v16 = vadd.f32 %v14157_v44, %v14012_v31  ;;  %v6933_v13 = vcombine.high %v6915_v38, %v9213_v49  ;;  %v6842_v58 = vrot.slane %v6834_v42, %v14026_v37 }
 0x613   :  { %7361 = vst [vmem:[#allocation2 + $0x3a] sm:$0x3] %v6736_v20  ;;  %7363 = vst [vmem:[#allocation2 + $0x3e] sm:$0x3] %v6737_v26  ;;  %v6850_v34 = vcombine.low %v14063_v62, %v6833_v21  ;;  %v6851_v10 = vcombine.high %v14063_v62, %v6833_v21  ;;  %v6934_v7 = vcombine.high %v6924_v47, %v9213_v49 }
 0x614   :  { %8081 = vst.sshfl [vmem:[#allocation2 + $0x68] sm:$0x11 pattern:$0x73516240] %v6916_v3  ;;  %7381 = vst [vmem:[#allocation2 + $0x62] sm:$0x3] %v6932_v46  ;;  %v6935_v63 = vcombine.high %v6931_v48, %v9213_v49  ;;  %v6849_v15 = vrot.slane %v6835_v14, %v14026_v37  ;;  %v7017_v8 = vcombine.high %v6451_v16, %v9213_v49 }
 0x615   :  { %8082 = vst.sshfl [vmem:[#allocation2 + $0x6c] sm:$0x11 pattern:$0x73516240] %v6917_v60  ;;  %7383 = vst [vmem:[#allocation2 + $0x66] sm:$0x3] %v6933_v13  ;;  %v6858_v44 = vrot.slane %v6850_v34, %v14026_v37  ;;  %v6865_v12 = vrot.slane %v6851_v10, %v14026_v37  ;;  %v6866_v24 = vcombine.high %v6842_v58, %v9213_v49 }
 0x616   :  { %8075 = vst.sshfl [vmem:[#allocation2 + $0x50] sm:$0x11 pattern:$0x73516240] %v6834_v42  ;;  %v7024_v62 = vrot.slane %v6451_v16, %v14016_v57  ;;  %7385 = vst [vmem:[#allocation2 + $0x6a] sm:$0x3] %v6934_v7  ;;  %v6867_v35 = vcombine.high %v6849_v15, %v9213_v49  ;;  %v7031_v39 = vrot.slane %v7017_v8, %v14016_v57 }
 0x617   :  { %8076 = vst.sshfl [vmem:[#allocation2 + $0x54] sm:$0x11 pattern:$0x73516240] %v6835_v14  ;;  %7387 = vst [vmem:[#allocation2 + $0x6e] sm:$0x3] %v6935_v63  ;;  %v6446_v30 = vadd.f32 %v14012_v31, %v14163_v41  ;;  %v6461_v29 = vadd.f32 %v14179_v53, %v14012_v31  ;;  %v6868_v17 = vcombine.high %v6858_v44, %v9213_v49 }
 0x618   :  { %8077 = vst.sshfl [vmem:[#allocation2 + $0x58] sm:$0x11 pattern:$0x73516240] %v6850_v34  ;;  %v6869_v2 = vcombine.high %v6865_v12, %v9213_v49  ;;  %7373 = vst [vmem:[#allocation2 + $0x52] sm:$0x3] %v6866_v24  ;;  %v7032_v36 = vcombine.low %v14092_v55, %v7024_v62  ;;  %v7033_v0 = vcombine.high %v14092_v55, %v7024_v62 }
 0x619   :  { %8078 = vst.sshfl [vmem:[#allocation2 + $0x5c] sm:$0x11 pattern:$0x73516240] %v6851_v10  ;;  %7375 = vst [vmem:[#allocation2 + $0x56] sm:$0x3] %v6867_v35  ;;  %v7048_v33 = vcombine.low %v14100_v11, %v7031_v39  ;;  %v7049_v40 = vcombine.high %v14100_v11, %v7031_v39  ;;  %v6951_v5 = vcombine.high %v6446_v30, %v9213_v49 }
 0x61a   :  { %v6958_v41 = vrot.slane %v6446_v30, %v14016_v57  ;;  %7377 = vst [vmem:[#allocation2 + $0x5a] sm:$0x3] %v6868_v17  ;;  %7379 = vst [vmem:[#allocation2 + $0x5e] sm:$0x3] %v6869_v2  ;;  %v7040_v53 = vrot.slane %v7032_v36, %v14026_v37  ;;  %v7047_v28 = vrot.slane %v7033_v0, %v14026_v37 }
 0x61b   :  { %8087 = vst.sshfl [vmem:[#allocation2 + $0x80] sm:$0x11 pattern:$0x73516240] %v7032_v36  ;;  %v7149_v18 = vcombine.high %v6461_v29, %v9213_v49  ;;  %v7156_v55 = vrot.slane %v6461_v29, %v14016_v57  ;;  %v7056_v56 = vrot.slane %v7048_v33, %v14026_v37  ;;  %v7063_v11 = vrot.slane %v7049_v40, %v14026_v37 }
 0x61c   :  { %8088 = vst.sshfl [vmem:[#allocation2 + $0x84] sm:$0x11 pattern:$0x73516240] %v7033_v0  ;;  %v6965_v43 = vrot.slane %v6951_v5, %v14016_v57  ;;  %v6966_v20 = vcombine.low %v14071_v19, %v6958_v41  ;;  %v7064_v26 = vcombine.high %v7040_v53, %v9213_v49  ;;  %v7065_v3 = vcombine.high %v7047_v28, %v9213_v49 }
 0x61d   :  { %8089 = vst.sshfl [vmem:[#allocation2 + $0x88] sm:$0x11 pattern:$0x73516240] %v7048_v33  ;;  %v6967_v60 = vcombine.high %v14071_v19, %v6958_v41  ;;  %v7163_v38 = vrot.slane %v7149_v18, %v14016_v57  ;;  %v7066_v46 = vcombine.high %v7056_v56, %v9213_v49  ;;  %v7067_v21 = vcombine.high %v7063_v11, %v9213_v49 }
 0x61e   :  { %8090 = vst.sshfl [vmem:[#allocation2 + $0x8c] sm:$0x11 pattern:$0x73516240] %v7049_v40  ;;  %v6974_v42 = vrot.slane %v6966_v20, %v14026_v37  ;;  %v6982_v47 = vcombine.low %v14074_v4, %v6965_v43  ;;  %7397 = vst [vmem:[#allocation2 + $0x82] sm:$0x3] %v7064_v26  ;;  %v6983_v14 = vcombine.high %v14074_v4, %v6965_v43 }
 0x61f   :  { %8083 = vst.sshfl [vmem:[#allocation2 + $0x70] sm:$0x11 pattern:$0x73516240] %v6966_v20  ;;  %7399 = vst [vmem:[#allocation2 + $0x86] sm:$0x3] %v7065_v3  ;;  %v6981_v48 = vrot.slane %v6967_v60, %v14026_v37  ;;  %v7164_v19 = vcombine.low %v14106_v9, %v7156_v55  ;;  %v7165_v16 = vcombine.high %v14106_v9, %v7156_v55 }
 0x620   :  { %8084 = vst.sshfl [vmem:[#allocation2 + $0x74] sm:$0x11 pattern:$0x73516240] %v6967_v60  ;;  %7401 = vst [vmem:[#allocation2 + $0x8a] sm:$0x3] %v7066_v46  ;;  %v6990_v13 = vrot.slane %v6982_v47, %v14026_v37  ;;  %v6998_v58 = vcombine.high %v6974_v42, %v9213_v49  ;;  %v7180_v34 = vcombine.low %v14114_v6, %v7163_v38 }
 0x621   :  { %7403 = vst [vmem:[#allocation2 + $0x8e] sm:$0x3] %v7067_v21  ;;  %8085 = vst.sshfl [vmem:[#allocation2 + $0x78] sm:$0x11 pattern:$0x73516240] %v6982_v47  ;;  %v7181_v10 = vcombine.high %v14114_v6, %v7163_v38  ;;  %v6997_v7 = vrot.slane %v6983_v14, %v14026_v37  ;;  %v6999_v4 = vcombine.high %v6981_v48, %v9213_v49 }
 0x622   :  { %8086 = vst.sshfl [vmem:[#allocation2 + $0x7c] sm:$0x11 pattern:$0x73516240] %v6983_v14  ;;  %v7172_v63 = vrot.slane %v7164_v19, %v14026_v37  ;;  %v7179_v9 = vrot.slane %v7165_v16, %v14026_v37  ;;  %v7000_v15 = vcombine.high %v6990_v13, %v9213_v49  ;;  %7389 = vst [vmem:[#allocation2 + $0x72] sm:$0x3] %v6998_v58 }
 0x623   :  { %8095 = vst.sshfl [vmem:[#allocation2 + $0xa0] sm:$0x11 pattern:$0x73516240] %v7164_v19  ;;  %v7188_v8 = vrot.slane %v7180_v34, %v14026_v37  ;;  %v7195_v44 = vrot.slane %v7181_v10, %v14026_v37  ;;  %v6456_v6 = vadd.f32 %v14012_v31, %v14185_v52  ;;  %v7001_v12 = vcombine.high %v6997_v7, %v9213_v49 }
 0x624   :  { %8096 = vst.sshfl [vmem:[#allocation2 + $0xa4] sm:$0x11 pattern:$0x73516240] %v7165_v16  ;;  %7391 = vst [vmem:[#allocation2 + $0x76] sm:$0x3] %v6999_v4  ;;  %v7196_v24 = vcombine.high %v7172_v63, %v9213_v49  ;;  %v7197_v62 = vcombine.high %v7179_v9, %v9213_v49  ;;  %v6471_v35 = vadd.f32 %v14199_v61, %v14012_v31 }
 0x625   :  { %8097 = vst.sshfl [vmem:[#allocation2 + $0xa8] sm:$0x11 pattern:$0x73516240] %v7180_v34  ;;  %7393 = vst [vmem:[#allocation2 + $0x7a] sm:$0x3] %v7000_v15  ;;  %v7198_v39 = vcombine.high %v7188_v8, %v9213_v49  ;;  %v7199_v30 = vcombine.high %v7195_v44, %v9213_v49  ;;  %v7083_v29 = vcombine.high %v6456_v6, %v9213_v49 }
 0x626   :  { %8098 = vst.sshfl [vmem:[#allocation2 + $0xac] sm:$0x11 pattern:$0x73516240] %v7181_v10  ;;  %v7090_v17 = vrot.slane %v6456_v6, %v14016_v57  ;;  %v7273_v52 = vrot.slane %v14086_v54, %v14016_v57  ;;  %7395 = vst [vmem:[#allocation2 + $0x7e] sm:$0x3] %v7001_v12  ;;  %v7281_v2 = vcombine.high %v6471_v35, %v9213_v49 }
 0x627   :  { %7413 = vst [vmem:[#allocation2 + $0xa2] sm:$0x3] %v7196_v24  ;;  %7415 = vst [vmem:[#allocation2 + $0xa6] sm:$0x3] %v7197_v62  ;;  %v7288_v36 = vrot.slane %v6471_v35, %v14016_v57  ;;  %v6466_v61 = vadd.f32 %v14012_v31, %v14205_v59  ;;  %v7280_v0 = vrot.slane %v14118_v32, %v14016_v57  ;;  %v9198_v15 = vmov 0.0  }
 0x628   :  { %7417 = vst [vmem:[#allocation2 + $0xaa] sm:$0x3] %v7198_v39  ;;  %7419 = vst [vmem:[#allocation2 + $0xae] sm:$0x3] %v7199_v30  ;;  %v7097_v33 = vrot.slane %v7083_v29, %v14016_v57  ;;  %v7098_v40 = vcombine.low %v14089_v27, %v7090_v17  ;;  %v7099_v54 = vcombine.high %v14089_v27, %v7090_v17  ;;  %v9202_v8 = vmov 0.0  }
 0x629   :  { %v7295_v5 = vrot.slane %v7281_v2, %v14016_v57  ;;  %v7296_v41 = vcombine.low %v7273_v52, %v7288_v36  ;;  %v7297_v53 = vcombine.high %v7273_v52, %v7288_v36  ;;  %v7215_v28 = vcombine.high %v6466_v61, %v9213_v49 }
 0x62a   :  { %v7106_v18 = vrot.slane %v7098_v40, %v14026_v37  ;;  %v7113_v31 = vrot.slane %v7099_v54, %v14026_v37  ;;  %v7114_v32 = vcombine.low %v14097_v22, %v7097_v33  ;;  %v7115_v59 = vcombine.high %v14097_v22, %v7097_v33  ;;  %8091 = vst.sshfl [vmem:[#allocation2 + $0x90] sm:$0x11 pattern:$0x73516240] %v7098_v40 }
 0x62b   :  { %8092 = vst.sshfl [vmem:[#allocation2 + $0x94] sm:$0x11 pattern:$0x73516240] %v7099_v54  ;;  %v7304_v55 = vrot.slane %v7296_v41, %v14026_v37  ;;  %v7311_v27 = vrot.slane %v7297_v53, %v14026_v37  ;;  %v7312_v56 = vcombine.low %v7280_v0, %v7295_v5  ;;  %v7313_v11 = vcombine.high %v7280_v0, %v7295_v5 }
 0x62c   :  { %8103 = vst.sshfl [vmem:[#allocation2 + $0xc0] sm:$0x11 pattern:$0x73516240] %v7296_v41  ;;  %v7122_v43 = vrot.slane %v7114_v32, %v14026_v37  ;;  %v7129_v20 = vrot.slane %v7115_v59, %v14026_v37  ;;  %v7130_v26 = vcombine.high %v7106_v18, %v9213_v49  ;;  %v7131_v3 = vcombine.high %v7113_v31, %v9213_v49 }
 0x62d   :  { %8104 = vst.sshfl [vmem:[#allocation2 + $0xc4] sm:$0x11 pattern:$0x73516240] %v7297_v53  ;;  %v7320_v22 = vrot.slane %v7312_v56, %v14026_v37  ;;  %v7327_v60 = vrot.slane %v7313_v11, %v14026_v37  ;;  %v7328_v38 = vcombine.high %v7304_v55, %v9213_v49  ;;  %v7329_v46 = vcombine.high %v7311_v27, %v9213_v49 }
 0x62e   :  { %8093 = vst.sshfl [vmem:[#allocation2 + $0x98] sm:$0x11 pattern:$0x73516240] %v7114_v32  ;;  %v7132_v21 = vcombine.high %v7122_v43, %v9213_v49  ;;  %v7133_v42 = vcombine.high %v7129_v20, %v9213_v49  ;;  %7405 = vst [vmem:[#allocation2 + $0x92] sm:$0x3] %v7130_v26  ;;  %v7222_v47 = vrot.slane %v6466_v61, %v14016_v57 }
 0x62f   :  { %8094 = vst.sshfl [vmem:[#allocation2 + $0x9c] sm:$0x11 pattern:$0x73516240] %v7115_v59  ;;  %7407 = vst [vmem:[#allocation2 + $0x96] sm:$0x3] %v7131_v3  ;;  %v7229_v48 = vrot.slane %v7215_v28, %v14016_v57  ;;  %v7330_v14 = vcombine.high %v7320_v22, %v9213_v49  ;;  %v7331_v19 = vcombine.high %v7327_v60, %v9213_v49 }
 0x630   :  { %8105 = vst.sshfl [vmem:[#allocation2 + $0xc8] sm:$0x11 pattern:$0x73516240] %v7312_v56  ;;  %7429 = vst [vmem:[#allocation2 + $0xc2] sm:$0x3] %v7328_v38  ;;  %v7230_v16 = vcombine.low %v14103_v25, %v7222_v47  ;;  %v7231_v13 = vcombine.high %v14103_v25, %v7222_v47 }
 0x631   :  { %8106 = vst.sshfl [vmem:[#allocation2 + $0xcc] sm:$0x11 pattern:$0x73516240] %v7313_v11  ;;  %7431 = vst [vmem:[#allocation2 + $0xc6] sm:$0x3] %v7329_v46  ;;  %v7246_v58 = vcombine.low %v14111_v23, %v7229_v48  ;;  %v7247_v34 = vcombine.high %v14111_v23, %v7229_v48 }
 0x632   :  { %7409 = vst [vmem:[#allocation2 + $0x9a] sm:$0x3] %v7132_v21  ;;  %7411 = vst [vmem:[#allocation2 + $0x9e] sm:$0x3] %v7133_v42  ;;  %v7238_v57 = vrot.slane %v7230_v16, %v14026_v37  ;;  %v7245_v10 = vrot.slane %v7231_v13, %v14026_v37 }
 0x633   :  { %7433 = vst [vmem:[#allocation2 + $0xca] sm:$0x3] %v7330_v14  ;;  %7435 = vst [vmem:[#allocation2 + $0xce] sm:$0x3] %v7331_v19  ;;  %v7254_v7 = vrot.slane %v7246_v58, %v14026_v37  ;;  %v7261_v4 = vrot.slane %v7247_v34, %v14026_v37 }
 0x634   :  { %8099 = vst.sshfl [vmem:[#allocation2 + $0xb0] sm:$0x11 pattern:$0x73516240] %v7230_v16  ;;  %v7262_v25 = vcombine.high %v7238_v57, %v9213_v49  ;;  %v7263_v63 = vcombine.high %v7245_v10, %v9213_v49 }
 0x635   :  { %8100 = vst.sshfl [vmem:[#allocation2 + $0xb4] sm:$0x11 pattern:$0x73516240] %v7231_v13  ;;  %v7264_v23 = vcombine.high %v7254_v7, %v9213_v49  ;;  %v7265_v9 = vcombine.high %v7261_v4, %v9213_v49 }
 0x636   :  { %8101 = vst.sshfl [vmem:[#allocation2 + $0xb8] sm:$0x11 pattern:$0x73516240] %v7246_v58  ;;  %7421 = vst [vmem:[#allocation2 + $0xb2] sm:$0x3] %v7262_v25 }
 0x637   :  { %8102 = vst.sshfl [vmem:[#allocation2 + $0xbc] sm:$0x11 pattern:$0x73516240] %v7247_v34  ;;  %7423 = vst [vmem:[#allocation2 + $0xb6] sm:$0x3] %v7263_v63 }
 0x638   :  { %7425 = vst [vmem:[#allocation2 + $0xba] sm:$0x3] %v7264_v23  ;;  %7427 = vst [vmem:[#allocation2 + $0xbe] sm:$0x3] %v7265_v9 }
 0x639 LB: > { %v8850_v37 = vpack.c.bf16 %v13997_v51, %v13992_v50  ;;  %v9214_v44 = vmov 0.0|0.0   ;;  %s9215_s5 = smov 32   ;;  %v8853_v6 = vpack.c.bf16 %v14007_v45, %v14002_v1  ;;  %vm9216_vm9 = vmmov 0   ;;  %s8107_s17 = sshll.u32 %s9208_s4, 1  ;;  %s9208_s4 = sphi %s14339_s4, %s7445_s4   ;;  %v9204_v8 = vphi %v9202_v8, %v9203_v8   ;;  %v9200_v15 = vphi %v9198_v15, %v7545_v15  }
 0x63a   : > { %8849 = vmatprep.subr.bf16.mxu0 %v9214_v44  ;;  %7452 = vrot.lane.b32.xlu0 %v9204_v8, %s9215_s5  ;;  %v9217_v12 = vmov 0.0   ;;  %vm7454_vm10 = vcmask 261120   ;;  %s7449_s18 = scalar_lea.vmem [#allocation2], %s8107_s17  ;;  %s9218_s19 = smov 64  }
 0x63b   : > { %8851 = vmatpush3.bf16.msra.mxu0 %v8850_v37  ;;  %8820 = vmatprep.mubr.msk.f32.mxu0 %vm9216_vm9, %v9217_v12  ;;  %s7445_s4 = sadd.s32 1, %s9208_s4  }
 0x63c   : > { %8852 = vmatprep.subr.bf16.mxu0 %v9214_v44  ;;  %p7442_p0 = scmp.ge.s32.totalorder %s7445_s4, 104  }
 0x63d   :  { %v7552_v53 = vld [vmem:[%s14405_s6] sm:$0xff] (%p7442_p0)  ;;  %v7553_v28 = vld [vmem:[%s14405_s6 + $0x8] sm:$0xff] (%p7442_p0)  ;;  %v7554_v18 = vld [vmem:[%s14405_s6 + $0x10] sm:$0xff] (%p7442_p0)  ;;  %s9219_s25 = smov (%p7442_p0), 32   ;;  %v9220_v31 = vmov (%p7442_p0), 0.0|0.0   ;;  %vm9221_vm11 = vmmov (%p7442_p0), 0  }
 0x63e   :  { %v8856_v32 = vpack.c.bf16 (%p7442_p0), %v7553_v28, %v7552_v53  ;;  %v7555_v50 = vld [vmem:[%s14405_s6 + $0x18] sm:$0xff] (%p7442_p0)  ;;  %v7640_v51 = vld [vmem:[%s14407_s8] sm:$0xff] (%p7442_p0)  ;;  %v7641_v1 = vld [vmem:[%s14407_s8 + $0x8] sm:$0xff] (%p7442_p0)  ;;  %8861 = vmatprep.subr.bf16.mxu1 (%p7442_p0), %v9220_v31  ;;  %8842 = vmatprep.mubr.msk.f32.mxu1 (%p7442_p0), %vm9221_vm11, %v9213_v49  ;;  %s9222_s16 = smov (%p7442_p0), [#allocation3]   ;;  %vm7724_vm12 = vcmask (%p7442_p0), 25600  }
 0x63f   : > { %8854 = vmatpush3.bf16.msra.mxu0 %v8853_v6  ;;  %v7450_v62 = vld [vmem:[%s7449_s18] sm:$0x3]  ;;  %v8862_v45 = vpack.c.bf16 (%p7442_p0), %v7641_v1, %v7640_v51  ;;  %v8859_v59 = vpack.c.bf16 (%p7442_p0), %v7555_v50, %v7554_v18  ;;  %v7642_v27 = vld [vmem:[%s14407_s8 + $0x10] sm:$0xff] (%p7442_p0)  ;;  %v7643_v56 = vld [vmem:[%s14407_s8 + $0x18] sm:$0xff] (%p7442_p0)  ;;  %s7732_s4 = sshll.u32 (%p7442_p0), %s9222_s16, 4  ;;  %s7733_s4 = int_to_ptr.vmem [resolvable:$true] %s7732_s4 }
 0x640   :  { %8855 = vmatprep.subr.bf16.mxu0 (%p7442_p0), %v9220_v31  ;;  %v8865_v11 = vpack.c.bf16 (%p7442_p0), %v7643_v56, %v7642_v27  ;;  %v8112_v22 = vld [vmem:[%s14408_s9] ss:$0 sm:$0xff] (%p7442_p0)  ;;  %s9162_s8 = scalar_lea.vmem (%p7442_p0), %s7733_s4, 32  ;;  %p9167_p2 = scmp.lt.s32.totalorder (%p7442_p0), %s7733_s4, %s7733_s4 }
 0x641   :  { %8863 = vmatpush3.bf16.msra.mxu1 (%p7442_p0), %v8862_v45  ;;  %p9163_p1 = scmp.ne.s32.totalorder (%p7442_p0), %s7733_s4, %s9162_s8  ;;  %p9168_p3 = scmp.lt.s32.totalorder (%p7442_p0), %s9162_s8, %s9162_s8 }
 0x642   :  { %8864 = vmatprep.subr.bf16.mxu1 (%p7442_p0), %v9220_v31 }
 0x643   :  { %p9169_p4 = por (%p7442_p0), %p9168_p3, %p9167_p2 }
 0x645   :  { %8866 = vmatpush3.bf16.msra.mxu1 (%p7442_p0), %v8865_v11  ;;  %p9170_p5 = pnand (%p7442_p0), %p9169_p4, %p9163_p1 }
 0x6ac   : > { %v7453_v24 = vpop.permute.xlu0 %7452 }
 0x6ad   : > { %8821 = vmatmul.mubr.msk.f32.vlgmr.msra.gmra.mrb[0].mxu0 %vm7454_vm10, %v7453_v24 }
 0x6ae   :  { %8831 = vmatprep.mubr.msk.f32.mxu0 (%p7442_p0), %vm9221_vm11, %v9213_v49  ;;  %8857 = vmatpush3.bf16.msra.mxu0 (%p7442_p0), %v8856_v32  ;;  %v8110_v49 = vld [vmem:[%s14406_s7] ss:$0 sm:$0xff] (%p7442_p0) }
 0x6af   :  { %8858 = vmatprep.subr.bf16.mxu0 (%p7442_p0), %v9220_v31 }
 0x6b2   :  { %8860 = vmatpush3.bf16.msra.mxu0 (%p7442_p0), %v8859_v59 }
 0x780   : > { %v7523_v35 = vpop.f32.mrb[0].mxu0 }
 0x781   : > { %v7527_v39 = vadd.f32 %v7523_v35, %v7450_v62  ;;  %v8822_v30 = vpop.f32.mrb[1].mxu0 }
 0x783   : > { %9154 = vtanh.f32 %v7527_v39  ;;  %v8109_v17 = vmul.f32 -1.442695, %v7527_v39 }
 0x785   : > { %9156 = vpow2.f32 %v8109_v17 }
 0x78d   : > { %v9155_v29 = vpop.eup %9154 }
 0x78e   : > { %7537 = vrot.lane.b32.xlu0 %v9155_v29, %s9218_s19 }
 0x78f   : > { %v9157_v52 = vpop.eup %9156 }
 0x790   : > { %v7531_v2 = vadd.f32 1.0, %v9157_v52 }
 0x792   : > { %9158 = vrcp.f32 %v7531_v2 }
 0x79c   : > { %v9159_v36 = vpop.eup %9158 }
 0x79d   : > { %v7535_v33 = vmul.f32 %v9200_v15, %v9159_v36 }
 0x800   : > { %v7538_v61 = vpop.permute.xlu0 %7537 }
 0x801   : > { %v7540_v0 = vmul.f32 %v9159_v36, %v7538_v61 }
 0x803   : > { %7542 = vrot.lane.b32.xlu1 %v7540_v0, %s9215_s5 }
 0x875   : > { %v7543_v40 = vpop.permute.xlu1 %7542 }
 0x876   : > { %v7545_v15 = vadd.f32 %v7543_v40, %v7535_v33  }
 0x878   : > { %9160 = vtanh.f32 %v7545_v15 }
 0x882   : > { %v9161_v54 = vpop.eup %9160 }
 0x883   : > { %7548 = vrot.lane.b32.xlu1 %v9161_v54, %s9218_s19 }
 0x8f2   :  { %7444 = sbr.rel (!%p7442_p0) target bundleno = 1593 (0x639), region = 92 }
 0x8f5   : > { %v7549_v5 = vpop.permute.xlu1 %7548 }
 0x8f6   : > { %v7551_v41 = vmul.f32 %v9159_v36, %v7549_v5  }
 0x8f8   : > { %v9203_v8 = vmov %v7551_v41   ;;  %7564 = vrot.lane.b32.xlu0 (%p7442_p0), %v7551_v41, %s9219_s25 }
 0x96a   :  { %v7565_v55 = vpop.permute.xlu0 %7564 }
 0x96b   :  { %8832 = vmatmul.mubr.msk.f32.vlgmr.msra.gmra.mrb[0].mxu0 %vm7454_vm10, %v7565_v55 }
 0xa3e   :  { %v7635_v43 = vpop.f32.mrb[0].mxu0 }
 0xa3f   :  { %v7636_v20 = vadd.f32 %v8110_v49, %v7635_v43  ;;  %v8833_v26 = vpop.f32.mrb[1].mxu0 }
 0xa41   :  { %v7639_v3 = vmax.f32 %v7636_v20, 0.0 }
 0xa43   :  { %8843 = vmatmul.mubr.msk.f32.vlgmr.msra.gmra.mrb[0].mxu1 %vm7454_vm10, %v7639_v3 }
 0xb16   :  { %v7720_v60 = vpop.f32.mrb[0].mxu1 }
 0xb17   :  { %v7721_v38 = vadd.f32 %v8112_v22, %v7720_v60  ;;  %v8844_v46 = vpop.f32.mrb[1].mxu1 }
 0xb19   :  { %7725 = vst.msk [vmem:[#allocation3] sm:$0x3] %vm7724_vm12, %v7721_v38 }
 0xb1a   :  { %9173 = shalt.err (!%p9170_p5)
}
 0xb1b   :  { %s9174_s17 = scalar_lea.hbm %s14409_s10, 32 }
 0xb1c   :  { %p9175_p6 = scmp.ne.s32.totalorder %s14409_s10, %s9174_s17  ;;  %p9178_p7 = scmp.lt.u32.totalorder %s9174_s17, %s14409_s10 }
 0xb1e   :  { %p9180_p8 = pnand %p9178_p7, %p9175_p6 }
 0xb20   :  { %9183 = shalt.err (!%p9180_p8)
}
 0xb21   :  { %7735 = dma.vmem_to_hbm [thread:$0]  %s7733_s4, 32, %s14409_s10, [#allocation4]  }
 0xb22   :  { %9196 = dma.done.wait [#allocation4], 32  }
 0xb23   :  { %9197 = vsyncadd [#allocation4], 4294967264 }
 0xb24   :  { %7739 = vsyncpa [#allocation4], 1 }

</bundles_post_ra>
